<compile_context>
chip_gen: v7x
topology: tpu7x:2x2x1
jax: 0.10.0
libtpu: 0.0.40
codegen_flags: <defaults>
</compile_context>

<pallas_src>
import functools

import jax
import jax.numpy as jnp
from jax.experimental import pallas as pl
from jax.experimental.pallas import tpu as pltpu


WOFF = 8  # column offset of the image interior inside the pad scratch (even)


# ----------------------------------------------------------------------------
# Fused Pallas kernel: full InceptionBlockA forward for one image per grid step
# ----------------------------------------------------------------------------
def _inception_a_kernel(
    x_ref,                 # (1, H, W, Cin) bf16
    wf_ref, sbf_ref,       # fused 1x1 heads: (Cin, 256) bf16, (2, 256) f32
    w12_ref, sb12_ref,     # branch1 3x3:  64 -> 96
    w13_ref, sb13_ref,     # branch1 3x3:  96 -> 128 (Cout zero-padded)
    w22_ref, sb22_ref,     # branch2 3x3:  64 -> 128 (Cout zero-padded)
    w31_ref, sb31_ref,     # branch3 3x3: Cin -> 128 (Cout zero-padded)
    o_ref,                 # (H*W, 512) f32, per-branch 128-lane slots
    pad_ref,               # (1, H+2, WOFF+W+2, PC) bf16 scratch, reused
    *, H, W, Cin,
):
    NB = x_ref.shape[0]
    M = NB * H * W
    PC = pad_ref.shape[-1]

    def fill_halo(val):
        # halo-only writes (rows 0 / H+1 and the two edge column pairs); all
        # column offsets/sizes are even so bf16 sublane-packed stores stay clean
        row = jnp.full((NB, 1, W + 4, PC), val, jnp.bfloat16)
        col = jnp.full((NB, H, 2, PC), val, jnp.bfloat16)
        pad_ref[:, 0:1, WOFF - 2:WOFF + W + 2, :] = row
        pad_ref[:, H + 1:H + 2, WOFF - 2:WOFF + W + 2, :] = row
        pad_ref[:, 1:H + 1, WOFF - 2:WOFF, :] = col
        pad_ref[:, 1:H + 1, WOFF + W:WOFF + W + 2, :] = col

    def store_interior(a4d):
        C = a4d.shape[-1]
        pad_ref[:, 1:H + 1, WOFF:WOFF + W, :C] = a4d

    def tap(dy, dx, C):
        # shifted (NB, H, W, C) window; only loads carry the +/-1 offsets
        return pad_ref[:, dy:dy + H, WOFF - 1 + dx:WOFF - 1 + dx + W, :C]

    def affine_relu(acc, sb_ref):
        # folded eval-mode BatchNorm (per-channel scale/bias) + ReLU, in f32
        return jnp.maximum(acc * sb_ref[0:1, :] + sb_ref[1:2, :], 0.0)

    def conv3x3(C, w_ref, sb_ref):
        # input already resident (bf16) in the scratch interior; halo is zero.
        # Nine per-tap MXU matmuls accumulate into one f32 accumulator.
        acc = None
        t = 0
        for dy in range(3):
            for dx in range(3):
                xt = tap(dy, dx, C).reshape(M, C)
                part = jnp.dot(xt, w_ref[t * C:(t + 1) * C, :],
                               preferred_element_type=jnp.float32)
                acc = part if acc is None else acc + part
                t += 1
        return affine_relu(acc, sb_ref)

    x4 = x_ref[...]                        # (NB, H, W, Cin) bf16
    x2 = x4.reshape(M, Cin)

    # --- branch3 pool: -inf halo, 3x3/s1/p1 max pool (matches PyTorch) ------
    fill_halo(-jnp.inf)
    store_interior(x4)
    pooled = tap(0, 0, Cin)
    for dy in range(3):
        for dx in range(3):
            if dy == 0 and dx == 0:
                continue
            pooled = jnp.maximum(pooled, tap(dy, dx, Cin))

    # zero halo, set once and reused by all four 3x3 convs below
    fill_halo(0.0)

    # --- branch3: pooled -> 3x3 (Cin -> 96, padded to 128) ------------------
    store_interior(pooled)
    b3 = conv3x3(Cin, w31_ref, sb31_ref)           # (M, 128); lanes 96:128 == 0

    # --- fused 1x1 heads (branch1[0], branch2[0], branch4) ------------------
    acc = jnp.dot(x2, wf_ref[...], preferred_element_type=jnp.float32)
    fused = affine_relu(acc, sbf_ref)              # (M, 256) f32
    b1pre = fused[:, 0:64].astype(jnp.bfloat16)    # cast once per activation
    b2pre = fused[:, 64:128].astype(jnp.bfloat16)
    b4 = fused[:, 128:256]                         # (M, 128); lanes 96:128 == 0

    # --- branch1: 1x1 -> 3x3 (64->96) -> 3x3 (96->96, padded to 128) --------
    store_interior(b1pre.reshape(NB, H, W, 64))
    mid = conv3x3(64, w12_ref, sb12_ref).astype(jnp.bfloat16)   # (M, 96) bf16
    store_interior(mid.reshape(NB, H, W, 96))
    b1 = conv3x3(96, w13_ref, sb13_ref)            # (M, 128)

    # --- branch2: 1x1 -> 3x3 (64->96, padded to 128) ------------------------
    store_interior(b2pre.reshape(NB, H, W, 64))
    b2 = conv3x3(64, w22_ref, sb22_ref)            # (M, 128)

    # --- concat: four unmasked 128-lane-aligned stores (no lane shuffles) ----
    o_ref[:, 0:128] = b1.astype(o_ref.dtype)
    o_ref[:, 128:256] = b2.astype(o_ref.dtype)
    o_ref[:, 256:384] = b3.astype(o_ref.dtype)
    o_ref[:, 384:512] = b4.astype(o_ref.dtype)


# ----------------------------------------------------------------------------
# Wrapper around pallas_call
# ----------------------------------------------------------------------------
def _const_spec(a):
    nd = a.ndim
    return pl.BlockSpec(a.shape, lambda n, _nd=nd: (0,) * _nd)


def inception_block_a(x_nchw, params):
    """x_nchw: (N, Cin, H, W) float32 -> (N, 384, H, W) float32 (eval mode)."""
    N, Cin, H, W = x_nchw.shape
    HW = H * W
    x = jnp.transpose(x_nchw, (0, 2, 3, 1)).astype(jnp.bfloat16)   # NHWC bf16

    def w2d(p):        # HWIO (k,k,cin,cout) -> (k*k*cin, cout)
        k, _, cin, cout = p["w"].shape
        return p["w"].reshape(k * k * cin, cout)

    def sb(p):         # (2, cout) f32 folded scale/bias
        return jnp.stack([p["scale"], p["bias"]]).astype(jnp.float32)

    def pad_out(w, s, to=128):
        cout = w.shape[1]
        return (jnp.pad(w, ((0, 0), (0, to - cout))),
                jnp.pad(s, ((0, 0), (0, to - cout))))

    b1p, b2p, b3p, b4p = (params["branch1"], params["branch2"],
                          params["branch3"], params["branch4"])

    # fused 1x1 heads: [branch1 1x1 (64) | branch2 1x1 (64) | branch4 (96->128)]
    w41p, sb41p = pad_out(w2d(b4p[0]), sb(b4p[0]))
    wf = jnp.concatenate([w2d(b1p[0]), w2d(b2p[0]), w41p],
                         axis=1).astype(jnp.bfloat16)              # (Cin, 256)
    sbf = jnp.concatenate([sb(b1p[0]), sb(b2p[0]), sb41p], axis=1)  # (2, 256)

    w12, sb12 = w2d(b1p[1]).astype(jnp.bfloat16), sb(b1p[1])        # 64 -> 96
    w13, sb13 = pad_out(w2d(b1p[2]), sb(b1p[2]))                    # 96 -> 128
    w22, sb22 = pad_out(w2d(b2p[1]), sb(b2p[1]))                    # 64 -> 128
    w31, sb31 = pad_out(w2d(b3p[0]), sb(b3p[0]))                    # Cin -> 128
    w13 = w13.astype(jnp.bfloat16)
    w22 = w22.astype(jnp.bfloat16)
    w31 = w31.astype(jnp.bfloat16)

    pad_c = ((max(96, Cin) + 127) // 128) * 128     # full-lane bf16 scratch
    flat = [x, wf, sbf, w12, sb12, w13, sb13, w22, sb22, w31, sb31]

    in_specs = [pl.BlockSpec((1, H, W, Cin), lambda n: (n, 0, 0, 0))]
    in_specs += [_const_spec(a) for a in flat[1:]]

    kernel = functools.partial(_inception_a_kernel, H=H, W=W, Cin=Cin)
    out2d = pl.pallas_call(
        kernel,
        out_shape=jax.ShapeDtypeStruct((N * HW, 4 * 128), jnp.float32),
        grid=(N,),
        in_specs=in_specs,
        out_specs=pl.BlockSpec((HW, 4 * 128), lambda n: (n, 0)),
        scratch_shapes=[
            pltpu.VMEM((1, H + 2, WOFF + W + 2, pad_c), jnp.bfloat16),
        ],
        compiler_params=pltpu.CompilerParams(
            dimension_semantics=("parallel",),
        ),
    )(*flat)

    # slice the 96 real channels out of each 128-lane branch slot, fused into
    # the NHWC -> NCHW transpose
    out = out2d.reshape(N, H, W, 4, 128)[..., :96]          # (N,H,W,4,96)
    out = jnp.transpose(out, (0, 3, 4, 1, 2)).reshape(N, 4 * 96, H, W)
    return out


# ----------------------------------------------------------------------------
# Pure-JAX reference (f32) for a loose numerical check
# ----------------------------------------------------------------------------
def inception_block_a_reference(x_nchw, params):
    x = jnp.transpose(x_nchw, (0, 2, 3, 1)).astype(jnp.float32)   # NHWC

    def convblock(y, p):
        k = p["ksize"]
        pad = (k - 1) // 2
        out = jax.lax.conv_general_dilated(
            y, p["w"], window_strides=(1, 1),
            padding=((pad, pad), (pad, pad)),
            dimension_numbers=("NHWC", "HWIO", "NHWC"))
        return jnp.maximum(out * p["scale"] + p["bias"], 0.0)

    def maxpool3(y):
        return jax.lax.reduce_window(
            y, -jnp.inf, jax.lax.max, (1, 3, 3, 1), (1, 1, 1, 1),
            ((0, 0), (1, 1), (1, 1), (0, 0)))

    b1 = x
    for p in params["branch1"]:
        b1 = convblock(b1, p)
    b2 = x
    for p in params["branch2"]:
        b2 = convblock(b2, p)
    b3 = convblock(maxpool3(x), params["branch3"][0])
    b4 = convblock(x, params["branch4"][0])
    out = jnp.concatenate([b1, b2, b3, b4], axis=-1)
    return jnp.transpose(out, (0, 3, 1, 2))


# ----------------------------------------------------------------------------
# Deterministic parameter initialization (synthetic; shapes from __init__)
# ----------------------------------------------------------------------------
def init_convblock(key, cin, cout, ksize):
    k1, k2, k3, k4, k5, k6 = jax.random.split(key, 6)
    w = 0.05 * jax.random.normal(k1, (ksize, ksize, cin, cout), jnp.float32)
    conv_b = 0.05 * jax.random.normal(k2, (cout,), jnp.float32)
    gamma = jax.random.uniform(k3, (cout,), jnp.float32, 0.5, 1.5)
    beta = 0.1 * jax.random.normal(k4, (cout,), jnp.float32)
    run_mean = 0.1 * jax.random.normal(k5, (cout,), jnp.float32)
    run_var = jax.random.uniform(k6, (cout,), jnp.float32, 0.5, 1.5)
    eps = 1e-5
    scale = gamma / jnp.sqrt(run_var + eps)          # BN folded into affine
    bias = beta + (conv_b - run_mean) * scale
    return dict(w=w, scale=scale, bias=bias, ksize=ksize)


def init_inception_a(key, channels):
    keys = jax.random.split(key, 7)
    return dict(
        branch1=[
            init_convblock(keys[0], channels, 64, 1),
            init_convblock(keys[1], 64, 96, 3),
            init_convblock(keys[2], 96, 96, 3),
        ],
        branch2=[
            init_convblock(keys[3], channels, 64, 1),
            init_convblock(keys[4], 64, 96, 3),
        ],
        branch3=[init_convblock(keys[5], channels, 96, 3)],
        branch4=[init_convblock(keys[6], channels, 96, 1)],
    )


if __name__ == "__main__":
    key = jax.random.PRNGKey(0)
    k_x, k_p = jax.random.split(key)

    N, C, H, W = 2, 32, 8, 8
    x = jax.random.normal(k_x, (N, C, H, W), jnp.float32)
    params = init_inception_a(k_p, C)

    out = inception_block_a(x, params)
    out = jax.block_until_ready(out)

    assert out.shape == (N, 96 * 4, H, W), out.shape
    assert out.dtype == jnp.float32
    assert bool(jnp.all(jnp.isfinite(out)))
    assert bool(jnp.all(out >= 0.0))  # ReLU at the end of every branch

    # loose tolerance: matmuls run in bf16 with f32 accumulation
    ref = jax.block_until_ready(inception_block_a_reference(x, params))
    assert bool(jnp.allclose(out, ref, rtol=0.05, atol=0.05)), (
        float(jnp.max(jnp.abs(out - ref))))

    print("KERNEL_OK")
</pallas_src>

<mosaic_0001>
module attributes {stable_mosaic.version = 11 : i64} {
  func.func @_inception_a_kernel(%arg0: i32, %arg1: memref<1x8x8x32xbf16, #tpu.memory_space<vmem>>, %arg2: memref<32x256xbf16, #tpu.memory_space<vmem>>, %arg3: memref<2x256xf32, #tpu.memory_space<vmem>>, %arg4: memref<576x96xbf16, #tpu.memory_space<vmem>>, %arg5: memref<2x96xf32, #tpu.memory_space<vmem>>, %arg6: memref<864x128xbf16, #tpu.memory_space<vmem>>, %arg7: memref<2x128xf32, #tpu.memory_space<vmem>>, %arg8: memref<576x128xbf16, #tpu.memory_space<vmem>>, %arg9: memref<2x128xf32, #tpu.memory_space<vmem>>, %arg10: memref<288x128xbf16, #tpu.memory_space<vmem>>, %arg11: memref<2x128xf32, #tpu.memory_space<vmem>>, %arg12: memref<64x512xf32, #tpu.memory_space<vmem>>, %arg13: memref<1x10x18x128xbf16, #tpu.memory_space<vmem>>) attributes {dimension_semantics = [#tpu.dimension_semantics<parallel>], iteration_bounds = array<i64: 2>, scalar_prefetch = 0 : i64, scratch_operands = 1 : i64, tpu.core_type = #tpu.core_type<tc>, window_params = [{transform_indices = @transform_0, window_bounds = array<i64: 1, 8, 8, 32>}, {pipeline_mode = #tpu.pipeline_mode<synchronous>, transform_indices = @transform_1, window_bounds = array<i64: 32, 256>}, {pipeline_mode = #tpu.pipeline_mode<synchronous>, transform_indices = @transform_2, window_bounds = array<i64: 2, 256>}, {pipeline_mode = #tpu.pipeline_mode<synchronous>, transform_indices = @transform_3, window_bounds = array<i64: 576, 96>}, {pipeline_mode = #tpu.pipeline_mode<synchronous>, transform_indices = @transform_4, window_bounds = array<i64: 2, 96>}, {pipeline_mode = #tpu.pipeline_mode<synchronous>, transform_indices = @transform_5, window_bounds = array<i64: 864, 128>}, {pipeline_mode = #tpu.pipeline_mode<synchronous>, transform_indices = @transform_6, window_bounds = array<i64: 2, 128>}, {pipeline_mode = #tpu.pipeline_mode<synchronous>, transform_indices = @transform_7, window_bounds = array<i64: 576, 128>}, {pipeline_mode = #tpu.pipeline_mode<synchronous>, transform_indices = @transform_8, window_bounds = array<i64: 2, 128>}, {pipeline_mode = #tpu.pipeline_mode<synchronous>, transform_indices = @transform_9, window_bounds = array<i64: 288, 128>}, {pipeline_mode = #tpu.pipeline_mode<synchronous>, transform_indices = @transform_10, window_bounds = array<i64: 2, 128>}, {transform_indices = @transform_11, window_bounds = array<i64: 64, 512>}]} {
    %c0 = arith.constant 0 : index
    %c0_0 = arith.constant 0 : index
    %c0_1 = arith.constant 0 : index
    %c0_2 = arith.constant 0 : index
    %0 = vector.load %arg1[%c0, %c0_0, %c0_1, %c0_2] : memref<1x8x8x32xbf16, #tpu.memory_space<vmem>>, vector<1x8x8x32xbf16>
    %1 = vector.shape_cast %0 : vector<1x8x8x32xbf16> to vector<64x32xbf16>
    %cst = arith.constant 0xFF80 : bf16
    %2 = vector.broadcast %cst : bf16 to vector<1x1x12x128xbf16>
    %cst_3 = arith.constant 0xFF80 : bf16
    %3 = vector.broadcast %cst_3 : bf16 to vector<1x8x2x128xbf16>
    %c0_4 = arith.constant 0 : index
    %c0_5 = arith.constant 0 : index
    %c6 = arith.constant 6 : index
    %c0_6 = arith.constant 0 : index
    %4 = vector.load %arg13[%c0_4, %c0_5, %c6, %c0_6] : memref<1x10x18x128xbf16, #tpu.memory_space<vmem>>, vector<1x1x12x128xbf16>
    tpu.vector_store %arg13[%c0_4, %c0_5, %c6, %c0_6], %2 {strides = array<i32>} : memref<1x10x18x128xbf16, #tpu.memory_space<vmem>>, vector<1x1x12x128xbf16>,
    %c0_7 = arith.constant 0 : index
    %c9 = arith.constant 9 : index
    %c6_8 = arith.constant 6 : index
    %c0_9 = arith.constant 0 : index
    %5 = vector.load %arg13[%c0_7, %c9, %c6_8, %c0_9] : memref<1x10x18x128xbf16, #tpu.memory_space<vmem>>, vector<1x1x12x128xbf16>
    tpu.vector_store %arg13[%c0_7, %c9, %c6_8, %c0_9], %2 {strides = array<i32>} : memref<1x10x18x128xbf16, #tpu.memory_space<vmem>>, vector<1x1x12x128xbf16>,
    %c0_10 = arith.constant 0 : index
    %c1 = arith.constant 1 : index
    %c6_11 = arith.constant 6 : index
    %c0_12 = arith.constant 0 : index
    %6 = vector.load %arg13[%c0_10, %c1, %c6_11, %c0_12] : memref<1x10x18x128xbf16, #tpu.memory_space<vmem>>, vector<1x8x2x128xbf16>
    tpu.vector_store %arg13[%c0_10, %c1, %c6_11, %c0_12], %3 {strides = array<i32>} : memref<1x10x18x128xbf16, #tpu.memory_space<vmem>>, vector<1x8x2x128xbf16>,
    %c0_13 = arith.constant 0 : index
    %c1_14 = arith.constant 1 : index
    %c16 = arith.constant 16 : index
    %c0_15 = arith.constant 0 : index
    %7 = vector.load %arg13[%c0_13, %c1_14, %c16, %c0_15] : memref<1x10x18x128xbf16, #tpu.memory_space<vmem>>, vector<1x8x2x128xbf16>
    tpu.vector_store %arg13[%c0_13, %c1_14, %c16, %c0_15], %3 {strides = array<i32>} : memref<1x10x18x128xbf16, #tpu.memory_space<vmem>>, vector<1x8x2x128xbf16>,
    %c0_16 = arith.constant 0 : index
    %c1_17 = arith.constant 1 : index
    %c8 = arith.constant 8 : index
    %c0_18 = arith.constant 0 : index
    %8 = vector.load %arg13[%c0_16, %c1_17, %c8, %c0_18] : memref<1x10x18x128xbf16, #tpu.memory_space<vmem>>, vector<1x8x8x32xbf16>
    tpu.vector_store %arg13[%c0_16, %c1_17, %c8, %c0_18], %0 {strides = array<i32>} : memref<1x10x18x128xbf16, #tpu.memory_space<vmem>>, vector<1x8x8x32xbf16>,
    %c0_19 = arith.constant 0 : index
    %c0_20 = arith.constant 0 : index
    %c7 = arith.constant 7 : index
    %c0_21 = arith.constant 0 : index
    %9 = vector.load %arg13[%c0_19, %c0_20, %c7, %c0_21] : memref<1x10x18x128xbf16, #tpu.memory_space<vmem>>, vector<1x8x8x32xbf16>
    %c0_22 = arith.constant 0 : index
    %c0_23 = arith.constant 0 : index
    %c8_24 = arith.constant 8 : index
    %c0_25 = arith.constant 0 : index
    %10 = vector.load %arg13[%c0_22, %c0_23, %c8_24, %c0_25] : memref<1x10x18x128xbf16, #tpu.memory_space<vmem>>, vector<1x8x8x32xbf16>
    %11 = arith.maximumf %9, %10 : vector<1x8x8x32xbf16>
    %c0_26 = arith.constant 0 : index
    %c0_27 = arith.constant 0 : index
    %c9_28 = arith.constant 9 : index
    %c0_29 = arith.constant 0 : index
    %12 = vector.load %arg13[%c0_26, %c0_27, %c9_28, %c0_29] : memref<1x10x18x128xbf16, #tpu.memory_space<vmem>>, vector<1x8x8x32xbf16>
    %13 = arith.maximumf %11, %12 : vector<1x8x8x32xbf16>
    %c0_30 = arith.constant 0 : index
    %c1_31 = arith.constant 1 : index
    %c7_32 = arith.constant 7 : index
    %c0_33 = arith.constant 0 : index
    %14 = vector.load %arg13[%c0_30, %c1_31, %c7_32, %c0_33] : memref<1x10x18x128xbf16, #tpu.memory_space<vmem>>, vector<1x8x8x32xbf16>
    %15 = arith.maximumf %13, %14 : vector<1x8x8x32xbf16>
    %c0_34 = arith.constant 0 : index
    %c1_35 = arith.constant 1 : index
    %c8_36 = arith.constant 8 : index
    %c0_37 = arith.constant 0 : index
    %16 = vector.load %arg13[%c0_34, %c1_35, %c8_36, %c0_37] : memref<1x10x18x128xbf16, #tpu.memory_space<vmem>>, vector<1x8x8x32xbf16>
    %17 = arith.maximumf %15, %16 : vector<1x8x8x32xbf16>
    %c0_38 = arith.constant 0 : index
    %c1_39 = arith.constant 1 : index
    %c9_40 = arith.constant 9 : index
    %c0_41 = arith.constant 0 : index
    %18 = vector.load %arg13[%c0_38, %c1_39, %c9_40, %c0_41] : memref<1x10x18x128xbf16, #tpu.memory_space<vmem>>, vector<1x8x8x32xbf16>
    %19 = arith.maximumf %17, %18 : vector<1x8x8x32xbf16>
    %c0_42 = arith.constant 0 : index
    %c2 = arith.constant 2 : index
    %c7_43 = arith.constant 7 : index
    %c0_44 = arith.constant 0 : index
    %20 = vector.load %arg13[%c0_42, %c2, %c7_43, %c0_44] : memref<1x10x18x128xbf16, #tpu.memory_space<vmem>>, vector<1x8x8x32xbf16>
    %21 = arith.maximumf %19, %20 : vector<1x8x8x32xbf16>
    %c0_45 = arith.constant 0 : index
    %c2_46 = arith.constant 2 : index
    %c8_47 = arith.constant 8 : index
    %c0_48 = arith.constant 0 : index
    %22 = vector.load %arg13[%c0_45, %c2_46, %c8_47, %c0_48] : memref<1x10x18x128xbf16, #tpu.memory_space<vmem>>, vector<1x8x8x32xbf16>
    %23 = arith.maximumf %21, %22 : vector<1x8x8x32xbf16>
    %c0_49 = arith.constant 0 : index
    %c2_50 = arith.constant 2 : index
    %c9_51 = arith.constant 9 : index
    %c0_52 = arith.constant 0 : index
    %24 = vector.load %arg13[%c0_49, %c2_50, %c9_51, %c0_52] : memref<1x10x18x128xbf16, #tpu.memory_space<vmem>>, vector<1x8x8x32xbf16>
    %25 = arith.maximumf %23, %24 : vector<1x8x8x32xbf16>
    %cst_53 = arith.constant 0.000000e+00 : bf16
    %26 = vector.broadcast %cst_53 : bf16 to vector<1x1x12x128xbf16>
    %cst_54 = arith.constant 0.000000e+00 : bf16
    %27 = vector.broadcast %cst_54 : bf16 to vector<1x8x2x128xbf16>
    %c0_55 = arith.constant 0 : index
    %c0_56 = arith.constant 0 : index
    %c6_57 = arith.constant 6 : index
    %c0_58 = arith.constant 0 : index
    %28 = vector.load %arg13[%c0_55, %c0_56, %c6_57, %c0_58] : memref<1x10x18x128xbf16, #tpu.memory_space<vmem>>, vector<1x1x12x128xbf16>
    tpu.vector_store %arg13[%c0_55, %c0_56, %c6_57, %c0_58], %26 {strides = array<i32>} : memref<1x10x18x128xbf16, #tpu.memory_space<vmem>>, vector<1x1x12x128xbf16>,
    %c0_59 = arith.constant 0 : index
    %c9_60 = arith.constant 9 : index
    %c6_61 = arith.constant 6 : index
    %c0_62 = arith.constant 0 : index
    %29 = vector.load %arg13[%c0_59, %c9_60, %c6_61, %c0_62] : memref<1x10x18x128xbf16, #tpu.memory_space<vmem>>, vector<1x1x12x128xbf16>
    tpu.vector_store %arg13[%c0_59, %c9_60, %c6_61, %c0_62], %26 {strides = array<i32>} : memref<1x10x18x128xbf16, #tpu.memory_space<vmem>>, vector<1x1x12x128xbf16>,
    %c0_63 = arith.constant 0 : index
    %c1_64 = arith.constant 1 : index
    %c6_65 = arith.constant 6 : index
    %c0_66 = arith.constant 0 : index
    %30 = vector.load %arg13[%c0_63, %c1_64, %c6_65, %c0_66] : memref<1x10x18x128xbf16, #tpu.memory_space<vmem>>, vector<1x8x2x128xbf16>
    tpu.vector_store %arg13[%c0_63, %c1_64, %c6_65, %c0_66], %27 {strides = array<i32>} : memref<1x10x18x128xbf16, #tpu.memory_space<vmem>>, vector<1x8x2x128xbf16>,
    %c0_67 = arith.constant 0 : index
    %c1_68 = arith.constant 1 : index
    %c16_69 = arith.constant 16 : index
    %c0_70 = arith.constant 0 : index
    %31 = vector.load %arg13[%c0_67, %c1_68, %c16_69, %c0_70] : memref<1x10x18x128xbf16, #tpu.memory_space<vmem>>, vector<1x8x2x128xbf16>
    tpu.vector_store %arg13[%c0_67, %c1_68, %c16_69, %c0_70], %27 {strides = array<i32>} : memref<1x10x18x128xbf16, #tpu.memory_space<vmem>>, vector<1x8x2x128xbf16>,
    %c0_71 = arith.constant 0 : index
    %c1_72 = arith.constant 1 : index
    %c8_73 = arith.constant 8 : index
    %c0_74 = arith.constant 0 : index
    %32 = vector.load %arg13[%c0_71, %c1_72, %c8_73, %c0_74] : memref<1x10x18x128xbf16, #tpu.memory_space<vmem>>, vector<1x8x8x32xbf16>
    tpu.vector_store %arg13[%c0_71, %c1_72, %c8_73, %c0_74], %25 {strides = array<i32>} : memref<1x10x18x128xbf16, #tpu.memory_space<vmem>>, vector<1x8x8x32xbf16>,
    %c0_75 = arith.constant 0 : index
    %c0_76 = arith.constant 0 : index
    %c7_77 = arith.constant 7 : index
    %c0_78 = arith.constant 0 : index
    %33 = vector.load %arg13[%c0_75, %c0_76, %c7_77, %c0_78] : memref<1x10x18x128xbf16, #tpu.memory_space<vmem>>, vector<1x8x8x32xbf16>
    %34 = vector.shape_cast %33 : vector<1x8x8x32xbf16> to vector<64x32xbf16>
    %c0_79 = arith.constant 0 : index
    %c0_80 = arith.constant 0 : index
    %35 = vector.load %arg10[%c0_79, %c0_80] : memref<288x128xbf16, #tpu.memory_space<vmem>>, vector<32x128xbf16>
    %cst_81 = arith.constant dense<0.000000e+00> : vector<64x128xf32>
    %36 = tpu.matmul %34, %35, %cst_81 {dimension_numbers = #tpu.dot_dimension_numbers<[1], [0], [0], [1], [0, 0, 1, 1], [], []>} : vector<64x32xbf16>, vector<32x128xbf16>, vector<64x128xf32> -> vector<64x128xf32>
    %c0_82 = arith.constant 0 : index
    %c0_83 = arith.constant 0 : index
    %c8_84 = arith.constant 8 : index
    %c0_85 = arith.constant 0 : index
    %37 = vector.load %arg13[%c0_82, %c0_83, %c8_84, %c0_85] : memref<1x10x18x128xbf16, #tpu.memory_space<vmem>>, vector<1x8x8x32xbf16>
    %38 = vector.shape_cast %37 : vector<1x8x8x32xbf16> to vector<64x32xbf16>
    %c32 = arith.constant 32 : index
    %c0_86 = arith.constant 0 : index
    %39 = vector.load %arg10[%c32, %c0_86] : memref<288x128xbf16, #tpu.memory_space<vmem>>, vector<32x128xbf16>
    %cst_87 = arith.constant dense<0.000000e+00> : vector<64x128xf32>
    %40 = tpu.matmul %38, %39, %cst_87 {dimension_numbers = #tpu.dot_dimension_numbers<[1], [0], [0], [1], [0, 0, 1, 1], [], []>} : vector<64x32xbf16>, vector<32x128xbf16>, vector<64x128xf32> -> vector<64x128xf32>
    %41 = arith.addf %36, %40 : vector<64x128xf32>
    %c0_88 = arith.constant 0 : index
    %c0_89 = arith.constant 0 : index
    %c9_90 = arith.constant 9 : index
    %c0_91 = arith.constant 0 : index
    %42 = vector.load %arg13[%c0_88, %c0_89, %c9_90, %c0_91] : memref<1x10x18x128xbf16, #tpu.memory_space<vmem>>, vector<1x8x8x32xbf16>
    %43 = vector.shape_cast %42 : vector<1x8x8x32xbf16> to vector<64x32xbf16>
    %c64 = arith.constant 64 : index
    %c0_92 = arith.constant 0 : index
    %44 = vector.load %arg10[%c64, %c0_92] : memref<288x128xbf16, #tpu.memory_space<vmem>>, vector<32x128xbf16>
    %cst_93 = arith.constant dense<0.000000e+00> : vector<64x128xf32>
    %45 = tpu.matmul %43, %44, %cst_93 {dimension_numbers = #tpu.dot_dimension_numbers<[1], [0], [0], [1], [0, 0, 1, 1], [], []>} : vector<64x32xbf16>, vector<32x128xbf16>, vector<64x128xf32> -> vector<64x128xf32>
    %46 = arith.addf %41, %45 : vector<64x128xf32>
    %c0_94 = arith.constant 0 : index
    %c1_95 = arith.constant 1 : index
    %c7_96 = arith.constant 7 : index
    %c0_97 = arith.constant 0 : index
    %47 = vector.load %arg13[%c0_94, %c1_95, %c7_96, %c0_97] : memref<1x10x18x128xbf16, #tpu.memory_space<vmem>>, vector<1x8x8x32xbf16>
    %48 = vector.shape_cast %47 : vector<1x8x8x32xbf16> to vector<64x32xbf16>
    %c96 = arith.constant 96 : index
    %c0_98 = arith.constant 0 : index
    %49 = vector.load %arg10[%c96, %c0_98] : memref<288x128xbf16, #tpu.memory_space<vmem>>, vector<32x128xbf16>
    %cst_99 = arith.constant dense<0.000000e+00> : vector<64x128xf32>
    %50 = tpu.matmul %48, %49, %cst_99 {dimension_numbers = #tpu.dot_dimension_numbers<[1], [0], [0], [1], [0, 0, 1, 1], [], []>} : vector<64x32xbf16>, vector<32x128xbf16>, vector<64x128xf32> -> vector<64x128xf32>
    %51 = arith.addf %46, %50 : vector<64x128xf32>
    %c0_100 = arith.constant 0 : index
    %c1_101 = arith.constant 1 : index
    %c8_102 = arith.constant 8 : index
    %c0_103 = arith.constant 0 : index
    %52 = vector.load %arg13[%c0_100, %c1_101, %c8_102, %c0_103] : memref<1x10x18x128xbf16, #tpu.memory_space<vmem>>, vector<1x8x8x32xbf16>
    %53 = vector.shape_cast %52 : vector<1x8x8x32xbf16> to vector<64x32xbf16>
    %c128 = arith.constant 128 : index
    %c0_104 = arith.constant 0 : index
    %54 = vector.load %arg10[%c128, %c0_104] : memref<288x128xbf16, #tpu.memory_space<vmem>>, vector<32x128xbf16>
    %cst_105 = arith.constant dense<0.000000e+00> : vector<64x128xf32>
    %55 = tpu.matmul %53, %54, %cst_105 {dimension_numbers = #tpu.dot_dimension_numbers<[1], [0], [0], [1], [0, 0, 1, 1], [], []>} : vector<64x32xbf16>, vector<32x128xbf16>, vector<64x128xf32> -> vector<64x128xf32>
    %56 = arith.addf %51, %55 : vector<64x128xf32>
    %c0_106 = arith.constant 0 : index
    %c1_107 = arith.constant 1 : index
    %c9_108 = arith.constant 9 : index
    %c0_109 = arith.constant 0 : index
    %57 = vector.load %arg13[%c0_106, %c1_107, %c9_108, %c0_109] : memref<1x10x18x128xbf16, #tpu.memory_space<vmem>>, vector<1x8x8x32xbf16>
    %58 = vector.shape_cast %57 : vector<1x8x8x32xbf16> to vector<64x32xbf16>
    %c160 = arith.constant 160 : index
    %c0_110 = arith.constant 0 : index
    %59 = vector.load %arg10[%c160, %c0_110] : memref<288x128xbf16, #tpu.memory_space<vmem>>, vector<32x128xbf16>
    %cst_111 = arith.constant dense<0.000000e+00> : vector<64x128xf32>
    %60 = tpu.matmul %58, %59, %cst_111 {dimension_numbers = #tpu.dot_dimension_numbers<[1], [0], [0], [1], [0, 0, 1, 1], [], []>} : vector<64x32xbf16>, vector<32x128xbf16>, vector<64x128xf32> -> vector<64x128xf32>
    %61 = arith.addf %56, %60 : vector<64x128xf32>
    %c0_112 = arith.constant 0 : index
    %c2_113 = arith.constant 2 : index
    %c7_114 = arith.constant 7 : index
    %c0_115 = arith.constant 0 : index
    %62 = vector.load %arg13[%c0_112, %c2_113, %c7_114, %c0_115] : memref<1x10x18x128xbf16, #tpu.memory_space<vmem>>, vector<1x8x8x32xbf16>
    %63 = vector.shape_cast %62 : vector<1x8x8x32xbf16> to vector<64x32xbf16>
    %c192 = arith.constant 192 : index
    %c0_116 = arith.constant 0 : index
    %64 = vector.load %arg10[%c192, %c0_116] : memref<288x128xbf16, #tpu.memory_space<vmem>>, vector<32x128xbf16>
    %cst_117 = arith.constant dense<0.000000e+00> : vector<64x128xf32>
    %65 = tpu.matmul %63, %64, %cst_117 {dimension_numbers = #tpu.dot_dimension_numbers<[1], [0], [0], [1], [0, 0, 1, 1], [], []>} : vector<64x32xbf16>, vector<32x128xbf16>, vector<64x128xf32> -> vector<64x128xf32>
    %66 = arith.addf %61, %65 : vector<64x128xf32>
    %c0_118 = arith.constant 0 : index
    %c2_119 = arith.constant 2 : index
    %c8_120 = arith.constant 8 : index
    %c0_121 = arith.constant 0 : index
    %67 = vector.load %arg13[%c0_118, %c2_119, %c8_120, %c0_121] : memref<1x10x18x128xbf16, #tpu.memory_space<vmem>>, vector<1x8x8x32xbf16>
    %68 = vector.shape_cast %67 : vector<1x8x8x32xbf16> to vector<64x32xbf16>
    %c224 = arith.constant 224 : index
    %c0_122 = arith.constant 0 : index
    %69 = vector.load %arg10[%c224, %c0_122] : memref<288x128xbf16, #tpu.memory_space<vmem>>, vector<32x128xbf16>
    %cst_123 = arith.constant dense<0.000000e+00> : vector<64x128xf32>
    %70 = tpu.matmul %68, %69, %cst_123 {dimension_numbers = #tpu.dot_dimension_numbers<[1], [0], [0], [1], [0, 0, 1, 1], [], []>} : vector<64x32xbf16>, vector<32x128xbf16>, vector<64x128xf32> -> vector<64x128xf32>
    %71 = arith.addf %66, %70 : vector<64x128xf32>
    %c0_124 = arith.constant 0 : index
    %c2_125 = arith.constant 2 : index
    %c9_126 = arith.constant 9 : index
    %c0_127 = arith.constant 0 : index
    %72 = vector.load %arg13[%c0_124, %c2_125, %c9_126, %c0_127] : memref<1x10x18x128xbf16, #tpu.memory_space<vmem>>, vector<1x8x8x32xbf16>
    %73 = vector.shape_cast %72 : vector<1x8x8x32xbf16> to vector<64x32xbf16>
    %c256 = arith.constant 256 : index
    %c0_128 = arith.constant 0 : index
    %74 = vector.load %arg10[%c256, %c0_128] : memref<288x128xbf16, #tpu.memory_space<vmem>>, vector<32x128xbf16>
    %cst_129 = arith.constant dense<0.000000e+00> : vector<64x128xf32>
    %75 = tpu.matmul %73, %74, %cst_129 {dimension_numbers = #tpu.dot_dimension_numbers<[1], [0], [0], [1], [0, 0, 1, 1], [], []>} : vector<64x32xbf16>, vector<32x128xbf16>, vector<64x128xf32> -> vector<64x128xf32>
    %76 = arith.addf %71, %75 : vector<64x128xf32>
    %c0_130 = arith.constant 0 : index
    %c0_131 = arith.constant 0 : index
    %77 = vector.load %arg11[%c0_130, %c0_131] : memref<2x128xf32, #tpu.memory_space<vmem>>, vector<1x128xf32>
    %78 = vector.broadcast %77 : vector<1x128xf32> to vector<64x128xf32>
    %79 = arith.mulf %76, %78 : vector<64x128xf32>
    %c1_132 = arith.constant 1 : index
    %c0_133 = arith.constant 0 : index
    %80 = vector.load %arg11[%c1_132, %c0_133] : memref<2x128xf32, #tpu.memory_space<vmem>>, vector<1x128xf32>
    %81 = vector.broadcast %80 : vector<1x128xf32> to vector<64x128xf32>
    %82 = arith.addf %79, %81 : vector<64x128xf32>
    %cst_134 = arith.constant 0.000000e+00 : f32
    %83 = vector.broadcast %cst_134 : f32 to vector<64x128xf32>
    %84 = arith.maximumf %82, %83 : vector<64x128xf32>
    %c0_135 = arith.constant 0 : index
    %c0_136 = arith.constant 0 : index
    %85 = vector.load %arg2[%c0_135, %c0_136] : memref<32x256xbf16, #tpu.memory_space<vmem>>, vector<32x256xbf16>
    %cst_137 = arith.constant dense<0.000000e+00> : vector<64x256xf32>
    %86 = tpu.matmul %1, %85, %cst_137 {dimension_numbers = #tpu.dot_dimension_numbers<[1], [0], [0], [1], [0, 0, 1, 1], [], []>} : vector<64x32xbf16>, vector<32x256xbf16>, vector<64x256xf32> -> vector<64x256xf32>
    %c0_138 = arith.constant 0 : index
    %c0_139 = arith.constant 0 : index
    %87 = vector.load %arg3[%c0_138, %c0_139] : memref<2x256xf32, #tpu.memory_space<vmem>>, vector<1x256xf32>
    %88 = vector.broadcast %87 : vector<1x256xf32> to vector<64x256xf32>
    %89 = arith.mulf %86, %88 : vector<64x256xf32>
    %c1_140 = arith.constant 1 : index
    %c0_141 = arith.constant 0 : index
    %90 = vector.load %arg3[%c1_140, %c0_141] : memref<2x256xf32, #tpu.memory_space<vmem>>, vector<1x256xf32>
    %91 = vector.broadcast %90 : vector<1x256xf32> to vector<64x256xf32>
    %92 = arith.addf %89, %91 : vector<64x256xf32>
    %cst_142 = arith.constant 0.000000e+00 : f32
    %93 = vector.broadcast %cst_142 : f32 to vector<64x256xf32>
    %94 = arith.maximumf %92, %93 : vector<64x256xf32>
    %95 = vector.extract_strided_slice %94 {offsets = [0, 0], sizes = [64, 64], strides = [1, 1]} : vector<64x256xf32> to vector<64x64xf32>
    %96 = arith.truncf %95 : vector<64x64xf32> to vector<64x64xbf16>
    %97 = vector.extract_strided_slice %94 {offsets = [0, 64], sizes = [64, 64], strides = [1, 1]} : vector<64x256xf32> to vector<64x64xf32>
    %98 = arith.truncf %97 : vector<64x64xf32> to vector<64x64xbf16>
    %99 = vector.extract_strided_slice %94 {offsets = [0, 128], sizes = [64, 128], strides = [1, 1]} : vector<64x256xf32> to vector<64x128xf32>
    %100 = vector.shape_cast %96 : vector<64x64xbf16> to vector<1x8x8x64xbf16>
    %c0_143 = arith.constant 0 : index
    %c1_144 = arith.constant 1 : index
    %c8_145 = arith.constant 8 : index
    %c0_146 = arith.constant 0 : index
    %101 = vector.load %arg13[%c0_143, %c1_144, %c8_145, %c0_146] : memref<1x10x18x128xbf16, #tpu.memory_space<vmem>>, vector<1x8x8x64xbf16>
    tpu.vector_store %arg13[%c0_143, %c1_144, %c8_145, %c0_146], %100 {strides = array<i32>} : memref<1x10x18x128xbf16, #tpu.memory_space<vmem>>, vector<1x8x8x64xbf16>,
    %c0_147 = arith.constant 0 : index
    %c0_148 = arith.constant 0 : index
    %c7_149 = arith.constant 7 : index
    %c0_150 = arith.constant 0 : index
    %102 = vector.load %arg13[%c0_147, %c0_148, %c7_149, %c0_150] : memref<1x10x18x128xbf16, #tpu.memory_space<vmem>>, vector<1x8x8x64xbf16>
    %103 = vector.shape_cast %102 : vector<1x8x8x64xbf16> to vector<64x64xbf16>
    %c0_151 = arith.constant 0 : index
    %c0_152 = arith.constant 0 : index
    %104 = vector.load %arg4[%c0_151, %c0_152] : memref<576x96xbf16, #tpu.memory_space<vmem>>, vector<64x96xbf16>
    %cst_153 = arith.constant dense<0.000000e+00> : vector<64x96xf32>
    %105 = tpu.matmul %103, %104, %cst_153 {dimension_numbers = #tpu.dot_dimension_numbers<[1], [0], [0], [1], [0, 0, 1, 1], [], []>} : vector<64x64xbf16>, vector<64x96xbf16>, vector<64x96xf32> -> vector<64x96xf32>
    %c0_154 = arith.constant 0 : index
    %c0_155 = arith.constant 0 : index
    %c8_156 = arith.constant 8 : index
    %c0_157 = arith.constant 0 : index
    %106 = vector.load %arg13[%c0_154, %c0_155, %c8_156, %c0_157] : memref<1x10x18x128xbf16, #tpu.memory_space<vmem>>, vector<1x8x8x64xbf16>
    %107 = vector.shape_cast %106 : vector<1x8x8x64xbf16> to vector<64x64xbf16>
    %c64_158 = arith.constant 64 : index
    %c0_159 = arith.constant 0 : index
    %108 = vector.load %arg4[%c64_158, %c0_159] : memref<576x96xbf16, #tpu.memory_space<vmem>>, vector<64x96xbf16>
    %cst_160 = arith.constant dense<0.000000e+00> : vector<64x96xf32>
    %109 = tpu.matmul %107, %108, %cst_160 {dimension_numbers = #tpu.dot_dimension_numbers<[1], [0], [0], [1], [0, 0, 1, 1], [], []>} : vector<64x64xbf16>, vector<64x96xbf16>, vector<64x96xf32> -> vector<64x96xf32>
    %110 = arith.addf %105, %109 : vector<64x96xf32>
    %c0_161 = arith.constant 0 : index
    %c0_162 = arith.constant 0 : index
    %c9_163 = arith.constant 9 : index
    %c0_164 = arith.constant 0 : index
    %111 = vector.load %arg13[%c0_161, %c0_162, %c9_163, %c0_164] : memref<1x10x18x128xbf16, #tpu.memory_space<vmem>>, vector<1x8x8x64xbf16>
    %112 = vector.shape_cast %111 : vector<1x8x8x64xbf16> to vector<64x64xbf16>
    %c128_165 = arith.constant 128 : index
    %c0_166 = arith.constant 0 : index
    %113 = vector.load %arg4[%c128_165, %c0_166] : memref<576x96xbf16, #tpu.memory_space<vmem>>, vector<64x96xbf16>
    %cst_167 = arith.constant dense<0.000000e+00> : vector<64x96xf32>
    %114 = tpu.matmul %112, %113, %cst_167 {dimension_numbers = #tpu.dot_dimension_numbers<[1], [0], [0], [1], [0, 0, 1, 1], [], []>} : vector<64x64xbf16>, vector<64x96xbf16>, vector<64x96xf32> -> vector<64x96xf32>
    %115 = arith.addf %110, %114 : vector<64x96xf32>
    %c0_168 = arith.constant 0 : index
    %c1_169 = arith.constant 1 : index
    %c7_170 = arith.constant 7 : index
    %c0_171 = arith.constant 0 : index
    %116 = vector.load %arg13[%c0_168, %c1_169, %c7_170, %c0_171] : memref<1x10x18x128xbf16, #tpu.memory_space<vmem>>, vector<1x8x8x64xbf16>
    %117 = vector.shape_cast %116 : vector<1x8x8x64xbf16> to vector<64x64xbf16>
    %c192_172 = arith.constant 192 : index
    %c0_173 = arith.constant 0 : index
    %118 = vector.load %arg4[%c192_172, %c0_173] : memref<576x96xbf16, #tpu.memory_space<vmem>>, vector<64x96xbf16>
    %cst_174 = arith.constant dense<0.000000e+00> : vector<64x96xf32>
    %119 = tpu.matmul %117, %118, %cst_174 {dimension_numbers = #tpu.dot_dimension_numbers<[1], [0], [0], [1], [0, 0, 1, 1], [], []>} : vector<64x64xbf16>, vector<64x96xbf16>, vector<64x96xf32> -> vector<64x96xf32>
    %120 = arith.addf %115, %119 : vector<64x96xf32>
    %c0_175 = arith.constant 0 : index
    %c1_176 = arith.constant 1 : index
    %c8_177 = arith.constant 8 : index
    %c0_178 = arith.constant 0 : index
    %121 = vector.load %arg13[%c0_175, %c1_176, %c8_177, %c0_178] : memref<1x10x18x128xbf16, #tpu.memory_space<vmem>>, vector<1x8x8x64xbf16>
    %122 = vector.shape_cast %121 : vector<1x8x8x64xbf16> to vector<64x64xbf16>
    %c256_179 = arith.constant 256 : index
    %c0_180 = arith.constant 0 : index
    %123 = vector.load %arg4[%c256_179, %c0_180] : memref<576x96xbf16, #tpu.memory_space<vmem>>, vector<64x96xbf16>
    %cst_181 = arith.constant dense<0.000000e+00> : vector<64x96xf32>
    %124 = tpu.matmul %122, %123, %cst_181 {dimension_numbers = #tpu.dot_dimension_numbers<[1], [0], [0], [1], [0, 0, 1, 1], [], []>} : vector<64x64xbf16>, vector<64x96xbf16>, vector<64x96xf32> -> vector<64x96xf32>
    %125 = arith.addf %120, %124 : vector<64x96xf32>
    %c0_182 = arith.constant 0 : index
    %c1_183 = arith.constant 1 : index
    %c9_184 = arith.constant 9 : index
    %c0_185 = arith.constant 0 : index
    %126 = vector.load %arg13[%c0_182, %c1_183, %c9_184, %c0_185] : memref<1x10x18x128xbf16, #tpu.memory_space<vmem>>, vector<1x8x8x64xbf16>
    %127 = vector.shape_cast %126 : vector<1x8x8x64xbf16> to vector<64x64xbf16>
    %c320 = arith.constant 320 : index
    %c0_186 = arith.constant 0 : index
    %128 = vector.load %arg4[%c320, %c0_186] : memref<576x96xbf16, #tpu.memory_space<vmem>>, vector<64x96xbf16>
    %cst_187 = arith.constant dense<0.000000e+00> : vector<64x96xf32>
    %129 = tpu.matmul %127, %128, %cst_187 {dimension_numbers = #tpu.dot_dimension_numbers<[1], [0], [0], [1], [0, 0, 1, 1], [], []>} : vector<64x64xbf16>, vector<64x96xbf16>, vector<64x96xf32> -> vector<64x96xf32>
    %130 = arith.addf %125, %129 : vector<64x96xf32>
    %c0_188 = arith.constant 0 : index
    %c2_189 = arith.constant 2 : index
    %c7_190 = arith.constant 7 : index
    %c0_191 = arith.constant 0 : index
    %131 = vector.load %arg13[%c0_188, %c2_189, %c7_190, %c0_191] : memref<1x10x18x128xbf16, #tpu.memory_space<vmem>>, vector<1x8x8x64xbf16>
    %132 = vector.shape_cast %131 : vector<1x8x8x64xbf16> to vector<64x64xbf16>
    %c384 = arith.constant 384 : index
    %c0_192 = arith.constant 0 : index
    %133 = vector.load %arg4[%c384, %c0_192] : memref<576x96xbf16, #tpu.memory_space<vmem>>, vector<64x96xbf16>
    %cst_193 = arith.constant dense<0.000000e+00> : vector<64x96xf32>
    %134 = tpu.matmul %132, %133, %cst_193 {dimension_numbers = #tpu.dot_dimension_numbers<[1], [0], [0], [1], [0, 0, 1, 1], [], []>} : vector<64x64xbf16>, vector<64x96xbf16>, vector<64x96xf32> -> vector<64x96xf32>
    %135 = arith.addf %130, %134 : vector<64x96xf32>
    %c0_194 = arith.constant 0 : index
    %c2_195 = arith.constant 2 : index
    %c8_196 = arith.constant 8 : index
    %c0_197 = arith.constant 0 : index
    %136 = vector.load %arg13[%c0_194, %c2_195, %c8_196, %c0_197] : memref<1x10x18x128xbf16, #tpu.memory_space<vmem>>, vector<1x8x8x64xbf16>
    %137 = vector.shape_cast %136 : vector<1x8x8x64xbf16> to vector<64x64xbf16>
    %c448 = arith.constant 448 : index
    %c0_198 = arith.constant 0 : index
    %138 = vector.load %arg4[%c448, %c0_198] : memref<576x96xbf16, #tpu.memory_space<vmem>>, vector<64x96xbf16>
    %cst_199 = arith.constant dense<0.000000e+00> : vector<64x96xf32>
    %139 = tpu.matmul %137, %138, %cst_199 {dimension_numbers = #tpu.dot_dimension_numbers<[1], [0], [0], [1], [0, 0, 1, 1], [], []>} : vector<64x64xbf16>, vector<64x96xbf16>, vector<64x96xf32> -> vector<64x96xf32>
    %140 = arith.addf %135, %139 : vector<64x96xf32>
    %c0_200 = arith.constant 0 : index
    %c2_201 = arith.constant 2 : index
    %c9_202 = arith.constant 9 : index
    %c0_203 = arith.constant 0 : index
    %141 = vector.load %arg13[%c0_200, %c2_201, %c9_202, %c0_203] : memref<1x10x18x128xbf16, #tpu.memory_space<vmem>>, vector<1x8x8x64xbf16>
    %142 = vector.shape_cast %141 : vector<1x8x8x64xbf16> to vector<64x64xbf16>
    %c512 = arith.constant 512 : index
    %c0_204 = arith.constant 0 : index
    %143 = vector.load %arg4[%c512, %c0_204] : memref<576x96xbf16, #tpu.memory_space<vmem>>, vector<64x96xbf16>
    %cst_205 = arith.constant dense<0.000000e+00> : vector<64x96xf32>
    %144 = tpu.matmul %142, %143, %cst_205 {dimension_numbers = #tpu.dot_dimension_numbers<[1], [0], [0], [1], [0, 0, 1, 1], [], []>} : vector<64x64xbf16>, vector<64x96xbf16>, vector<64x96xf32> -> vector<64x96xf32>
    %145 = arith.addf %140, %144 : vector<64x96xf32>
    %c0_206 = arith.constant 0 : index
    %c0_207 = arith.constant 0 : index
    %146 = vector.load %arg5[%c0_206, %c0_207] : memref<2x96xf32, #tpu.memory_space<vmem>>, vector<1x96xf32>
    %147 = vector.broadcast %146 : vector<1x96xf32> to vector<64x96xf32>
    %148 = arith.mulf %145, %147 : vector<64x96xf32>
    %c1_208 = arith.constant 1 : index
    %c0_209 = arith.constant 0 : index
    %149 = vector.load %arg5[%c1_208, %c0_209] : memref<2x96xf32, #tpu.memory_space<vmem>>, vector<1x96xf32>
    %150 = vector.broadcast %149 : vector<1x96xf32> to vector<64x96xf32>
    %151 = arith.addf %148, %150 : vector<64x96xf32>
    %cst_210 = arith.constant 0.000000e+00 : f32
    %152 = vector.broadcast %cst_210 : f32 to vector<64x96xf32>
    %153 = arith.maximumf %151, %152 : vector<64x96xf32>
    %154 = arith.truncf %153 : vector<64x96xf32> to vector<64x96xbf16>
    %155 = vector.shape_cast %154 : vector<64x96xbf16> to vector<1x8x8x96xbf16>
    %c0_211 = arith.constant 0 : index
    %c1_212 = arith.constant 1 : index
    %c8_213 = arith.constant 8 : index
    %c0_214 = arith.constant 0 : index
    %156 = vector.load %arg13[%c0_211, %c1_212, %c8_213, %c0_214] : memref<1x10x18x128xbf16, #tpu.memory_space<vmem>>, vector<1x8x8x96xbf16>
    tpu.vector_store %arg13[%c0_211, %c1_212, %c8_213, %c0_214], %155 {strides = array<i32>} : memref<1x10x18x128xbf16, #tpu.memory_space<vmem>>, vector<1x8x8x96xbf16>,
    %c0_215 = arith.constant 0 : index
    %c0_216 = arith.constant 0 : index
    %c7_217 = arith.constant 7 : index
    %c0_218 = arith.constant 0 : index
    %157 = vector.load %arg13[%c0_215, %c0_216, %c7_217, %c0_218] : memref<1x10x18x128xbf16, #tpu.memory_space<vmem>>, vector<1x8x8x96xbf16>
    %158 = vector.shape_cast %157 : vector<1x8x8x96xbf16> to vector<64x96xbf16>
    %c0_219 = arith.constant 0 : index
    %c0_220 = arith.constant 0 : index
    %159 = vector.load %arg6[%c0_219, %c0_220] : memref<864x128xbf16, #tpu.memory_space<vmem>>, vector<96x128xbf16>
    %cst_221 = arith.constant dense<0.000000e+00> : vector<64x128xf32>
    %160 = tpu.matmul %158, %159, %cst_221 {dimension_numbers = #tpu.dot_dimension_numbers<[1], [0], [0], [1], [0, 0, 1, 1], [], []>} : vector<64x96xbf16>, vector<96x128xbf16>, vector<64x128xf32> -> vector<64x128xf32>
    %c0_222 = arith.constant 0 : index
    %c0_223 = arith.constant 0 : index
    %c8_224 = arith.constant 8 : index
    %c0_225 = arith.constant 0 : index
    %161 = vector.load %arg13[%c0_222, %c0_223, %c8_224, %c0_225] : memref<1x10x18x128xbf16, #tpu.memory_space<vmem>>, vector<1x8x8x96xbf16>
    %162 = vector.shape_cast %161 : vector<1x8x8x96xbf16> to vector<64x96xbf16>
    %c96_226 = arith.constant 96 : index
    %c0_227 = arith.constant 0 : index
    %163 = vector.load %arg6[%c96_226, %c0_227] : memref<864x128xbf16, #tpu.memory_space<vmem>>, vector<96x128xbf16>
    %cst_228 = arith.constant dense<0.000000e+00> : vector<64x128xf32>
    %164 = tpu.matmul %162, %163, %cst_228 {dimension_numbers = #tpu.dot_dimension_numbers<[1], [0], [0], [1], [0, 0, 1, 1], [], []>} : vector<64x96xbf16>, vector<96x128xbf16>, vector<64x128xf32> -> vector<64x128xf32>
    %165 = arith.addf %160, %164 : vector<64x128xf32>
    %c0_229 = arith.constant 0 : index
    %c0_230 = arith.constant 0 : index
    %c9_231 = arith.constant 9 : index
    %c0_232 = arith.constant 0 : index
    %166 = vector.load %arg13[%c0_229, %c0_230, %c9_231, %c0_232] : memref<1x10x18x128xbf16, #tpu.memory_space<vmem>>, vector<1x8x8x96xbf16>
    %167 = vector.shape_cast %166 : vector<1x8x8x96xbf16> to vector<64x96xbf16>
    %c192_233 = arith.constant 192 : index
    %c0_234 = arith.constant 0 : index
    %168 = vector.load %arg6[%c192_233, %c0_234] : memref<864x128xbf16, #tpu.memory_space<vmem>>, vector<96x128xbf16>
    %cst_235 = arith.constant dense<0.000000e+00> : vector<64x128xf32>
    %169 = tpu.matmul %167, %168, %cst_235 {dimension_numbers = #tpu.dot_dimension_numbers<[1], [0], [0], [1], [0, 0, 1, 1], [], []>} : vector<64x96xbf16>, vector<96x128xbf16>, vector<64x128xf32> -> vector<64x128xf32>
    %170 = arith.addf %165, %169 : vector<64x128xf32>
    %c0_236 = arith.constant 0 : index
    %c1_237 = arith.constant 1 : index
    %c7_238 = arith.constant 7 : index
    %c0_239 = arith.constant 0 : index
    %171 = vector.load %arg13[%c0_236, %c1_237, %c7_238, %c0_239] : memref<1x10x18x128xbf16, #tpu.memory_space<vmem>>, vector<1x8x8x96xbf16>
    %172 = vector.shape_cast %171 : vector<1x8x8x96xbf16> to vector<64x96xbf16>
    %c288 = arith.constant 288 : index
    %c0_240 = arith.constant 0 : index
    %173 = vector.load %arg6[%c288, %c0_240] : memref<864x128xbf16, #tpu.memory_space<vmem>>, vector<96x128xbf16>
    %cst_241 = arith.constant dense<0.000000e+00> : vector<64x128xf32>
    %174 = tpu.matmul %172, %173, %cst_241 {dimension_numbers = #tpu.dot_dimension_numbers<[1], [0], [0], [1], [0, 0, 1, 1], [], []>} : vector<64x96xbf16>, vector<96x128xbf16>, vector<64x128xf32> -> vector<64x128xf32>
    %175 = arith.addf %170, %174 : vector<64x128xf32>
    %c0_242 = arith.constant 0 : index
    %c1_243 = arith.constant 1 : index
    %c8_244 = arith.constant 8 : index
    %c0_245 = arith.constant 0 : index
    %176 = vector.load %arg13[%c0_242, %c1_243, %c8_244, %c0_245] : memref<1x10x18x128xbf16, #tpu.memory_space<vmem>>, vector<1x8x8x96xbf16>
    %177 = vector.shape_cast %176 : vector<1x8x8x96xbf16> to vector<64x96xbf16>
    %c384_246 = arith.constant 384 : index
    %c0_247 = arith.constant 0 : index
    %178 = vector.load %arg6[%c384_246, %c0_247] : memref<864x128xbf16, #tpu.memory_space<vmem>>, vector<96x128xbf16>
    %cst_248 = arith.constant dense<0.000000e+00> : vector<64x128xf32>
    %179 = tpu.matmul %177, %178, %cst_248 {dimension_numbers = #tpu.dot_dimension_numbers<[1], [0], [0], [1], [0, 0, 1, 1], [], []>} : vector<64x96xbf16>, vector<96x128xbf16>, vector<64x128xf32> -> vector<64x128xf32>
    %180 = arith.addf %175, %179 : vector<64x128xf32>
    %c0_249 = arith.constant 0 : index
    %c1_250 = arith.constant 1 : index
    %c9_251 = arith.constant 9 : index
    %c0_252 = arith.constant 0 : index
    %181 = vector.load %arg13[%c0_249, %c1_250, %c9_251, %c0_252] : memref<1x10x18x128xbf16, #tpu.memory_space<vmem>>, vector<1x8x8x96xbf16>
    %182 = vector.shape_cast %181 : vector<1x8x8x96xbf16> to vector<64x96xbf16>
    %c480 = arith.constant 480 : index
    %c0_253 = arith.constant 0 : index
    %183 = vector.load %arg6[%c480, %c0_253] : memref<864x128xbf16, #tpu.memory_space<vmem>>, vector<96x128xbf16>
    %cst_254 = arith.constant dense<0.000000e+00> : vector<64x128xf32>
    %184 = tpu.matmul %182, %183, %cst_254 {dimension_numbers = #tpu.dot_dimension_numbers<[1], [0], [0], [1], [0, 0, 1, 1], [], []>} : vector<64x96xbf16>, vector<96x128xbf16>, vector<64x128xf32> -> vector<64x128xf32>
    %185 = arith.addf %180, %184 : vector<64x128xf32>
    %c0_255 = arith.constant 0 : index
    %c2_256 = arith.constant 2 : index
    %c7_257 = arith.constant 7 : index
    %c0_258 = arith.constant 0 : index
    %186 = vector.load %arg13[%c0_255, %c2_256, %c7_257, %c0_258] : memref<1x10x18x128xbf16, #tpu.memory_space<vmem>>, vector<1x8x8x96xbf16>
    %187 = vector.shape_cast %186 : vector<1x8x8x96xbf16> to vector<64x96xbf16>
    %c576 = arith.constant 576 : index
    %c0_259 = arith.constant 0 : index
    %188 = vector.load %arg6[%c576, %c0_259] : memref<864x128xbf16, #tpu.memory_space<vmem>>, vector<96x128xbf16>
    %cst_260 = arith.constant dense<0.000000e+00> : vector<64x128xf32>
    %189 = tpu.matmul %187, %188, %cst_260 {dimension_numbers = #tpu.dot_dimension_numbers<[1], [0], [0], [1], [0, 0, 1, 1], [], []>} : vector<64x96xbf16>, vector<96x128xbf16>, vector<64x128xf32> -> vector<64x128xf32>
    %190 = arith.addf %185, %189 : vector<64x128xf32>
    %c0_261 = arith.constant 0 : index
    %c2_262 = arith.constant 2 : index
    %c8_263 = arith.constant 8 : index
    %c0_264 = arith.constant 0 : index
    %191 = vector.load %arg13[%c0_261, %c2_262, %c8_263, %c0_264] : memref<1x10x18x128xbf16, #tpu.memory_space<vmem>>, vector<1x8x8x96xbf16>
    %192 = vector.shape_cast %191 : vector<1x8x8x96xbf16> to vector<64x96xbf16>
    %c672 = arith.constant 672 : index
    %c0_265 = arith.constant 0 : index
    %193 = vector.load %arg6[%c672, %c0_265] : memref<864x128xbf16, #tpu.memory_space<vmem>>, vector<96x128xbf16>
    %cst_266 = arith.constant dense<0.000000e+00> : vector<64x128xf32>
    %194 = tpu.matmul %192, %193, %cst_266 {dimension_numbers = #tpu.dot_dimension_numbers<[1], [0], [0], [1], [0, 0, 1, 1], [], []>} : vector<64x96xbf16>, vector<96x128xbf16>, vector<64x128xf32> -> vector<64x128xf32>
    %195 = arith.addf %190, %194 : vector<64x128xf32>
    %c0_267 = arith.constant 0 : index
    %c2_268 = arith.constant 2 : index
    %c9_269 = arith.constant 9 : index
    %c0_270 = arith.constant 0 : index
    %196 = vector.load %arg13[%c0_267, %c2_268, %c9_269, %c0_270] : memref<1x10x18x128xbf16, #tpu.memory_space<vmem>>, vector<1x8x8x96xbf16>
    %197 = vector.shape_cast %196 : vector<1x8x8x96xbf16> to vector<64x96xbf16>
    %c768 = arith.constant 768 : index
    %c0_271 = arith.constant 0 : index
    %198 = vector.load %arg6[%c768, %c0_271] : memref<864x128xbf16, #tpu.memory_space<vmem>>, vector<96x128xbf16>
    %cst_272 = arith.constant dense<0.000000e+00> : vector<64x128xf32>
    %199 = tpu.matmul %197, %198, %cst_272 {dimension_numbers = #tpu.dot_dimension_numbers<[1], [0], [0], [1], [0, 0, 1, 1], [], []>} : vector<64x96xbf16>, vector<96x128xbf16>, vector<64x128xf32> -> vector<64x128xf32>
    %200 = arith.addf %195, %199 : vector<64x128xf32>
    %c0_273 = arith.constant 0 : index
    %c0_274 = arith.constant 0 : index
    %201 = vector.load %arg7[%c0_273, %c0_274] : memref<2x128xf32, #tpu.memory_space<vmem>>, vector<1x128xf32>
    %202 = vector.broadcast %201 : vector<1x128xf32> to vector<64x128xf32>
    %203 = arith.mulf %200, %202 : vector<64x128xf32>
    %c1_275 = arith.constant 1 : index
    %c0_276 = arith.constant 0 : index
    %204 = vector.load %arg7[%c1_275, %c0_276] : memref<2x128xf32, #tpu.memory_space<vmem>>, vector<1x128xf32>
    %205 = vector.broadcast %204 : vector<1x128xf32> to vector<64x128xf32>
    %206 = arith.addf %203, %205 : vector<64x128xf32>
    %cst_277 = arith.constant 0.000000e+00 : f32
    %207 = vector.broadcast %cst_277 : f32 to vector<64x128xf32>
    %208 = arith.maximumf %206, %207 : vector<64x128xf32>
    %209 = vector.shape_cast %98 : vector<64x64xbf16> to vector<1x8x8x64xbf16>
    %c0_278 = arith.constant 0 : index
    %c1_279 = arith.constant 1 : index
    %c8_280 = arith.constant 8 : index
    %c0_281 = arith.constant 0 : index
    %210 = vector.load %arg13[%c0_278, %c1_279, %c8_280, %c0_281] : memref<1x10x18x128xbf16, #tpu.memory_space<vmem>>, vector<1x8x8x64xbf16>
    tpu.vector_store %arg13[%c0_278, %c1_279, %c8_280, %c0_281], %209 {strides = array<i32>} : memref<1x10x18x128xbf16, #tpu.memory_space<vmem>>, vector<1x8x8x64xbf16>,
    %c0_282 = arith.constant 0 : index
    %c0_283 = arith.constant 0 : index
    %c7_284 = arith.constant 7 : index
    %c0_285 = arith.constant 0 : index
    %211 = vector.load %arg13[%c0_282, %c0_283, %c7_284, %c0_285] : memref<1x10x18x128xbf16, #tpu.memory_space<vmem>>, vector<1x8x8x64xbf16>
    %212 = vector.shape_cast %211 : vector<1x8x8x64xbf16> to vector<64x64xbf16>
    %c0_286 = arith.constant 0 : index
    %c0_287 = arith.constant 0 : index
    %213 = vector.load %arg8[%c0_286, %c0_287] : memref<576x128xbf16, #tpu.memory_space<vmem>>, vector<64x128xbf16>
    %cst_288 = arith.constant dense<0.000000e+00> : vector<64x128xf32>
    %214 = tpu.matmul %212, %213, %cst_288 {dimension_numbers = #tpu.dot_dimension_numbers<[1], [0], [0], [1], [0, 0, 1, 1], [], []>} : vector<64x64xbf16>, vector<64x128xbf16>, vector<64x128xf32> -> vector<64x128xf32>
    %c0_289 = arith.constant 0 : index
    %c0_290 = arith.constant 0 : index
    %c8_291 = arith.constant 8 : index
    %c0_292 = arith.constant 0 : index
    %215 = vector.load %arg13[%c0_289, %c0_290, %c8_291, %c0_292] : memref<1x10x18x128xbf16, #tpu.memory_space<vmem>>, vector<1x8x8x64xbf16>
    %216 = vector.shape_cast %215 : vector<1x8x8x64xbf16> to vector<64x64xbf16>
    %c64_293 = arith.constant 64 : index
    %c0_294 = arith.constant 0 : index
    %217 = vector.load %arg8[%c64_293, %c0_294] : memref<576x128xbf16, #tpu.memory_space<vmem>>, vector<64x128xbf16>
    %cst_295 = arith.constant dense<0.000000e+00> : vector<64x128xf32>
    %218 = tpu.matmul %216, %217, %cst_295 {dimension_numbers = #tpu.dot_dimension_numbers<[1], [0], [0], [1], [0, 0, 1, 1], [], []>} : vector<64x64xbf16>, vector<64x128xbf16>, vector<64x128xf32> -> vector<64x128xf32>
    %219 = arith.addf %214, %218 : vector<64x128xf32>
    %c0_296 = arith.constant 0 : index
    %c0_297 = arith.constant 0 : index
    %c9_298 = arith.constant 9 : index
    %c0_299 = arith.constant 0 : index
    %220 = vector.load %arg13[%c0_296, %c0_297, %c9_298, %c0_299] : memref<1x10x18x128xbf16, #tpu.memory_space<vmem>>, vector<1x8x8x64xbf16>
    %221 = vector.shape_cast %220 : vector<1x8x8x64xbf16> to vector<64x64xbf16>
    %c128_300 = arith.constant 128 : index
    %c0_301 = arith.constant 0 : index
    %222 = vector.load %arg8[%c128_300, %c0_301] : memref<576x128xbf16, #tpu.memory_space<vmem>>, vector<64x128xbf16>
    %cst_302 = arith.constant dense<0.000000e+00> : vector<64x128xf32>
    %223 = tpu.matmul %221, %222, %cst_302 {dimension_numbers = #tpu.dot_dimension_numbers<[1], [0], [0], [1], [0, 0, 1, 1], [], []>} : vector<64x64xbf16>, vector<64x128xbf16>, vector<64x128xf32> -> vector<64x128xf32>
    %224 = arith.addf %219, %223 : vector<64x128xf32>
    %c0_303 = arith.constant 0 : index
    %c1_304 = arith.constant 1 : index
    %c7_305 = arith.constant 7 : index
    %c0_306 = arith.constant 0 : index
    %225 = vector.load %arg13[%c0_303, %c1_304, %c7_305, %c0_306] : memref<1x10x18x128xbf16, #tpu.memory_space<vmem>>, vector<1x8x8x64xbf16>
    %226 = vector.shape_cast %225 : vector<1x8x8x64xbf16> to vector<64x64xbf16>
    %c192_307 = arith.constant 192 : index
    %c0_308 = arith.constant 0 : index
    %227 = vector.load %arg8[%c192_307, %c0_308] : memref<576x128xbf16, #tpu.memory_space<vmem>>, vector<64x128xbf16>
    %cst_309 = arith.constant dense<0.000000e+00> : vector<64x128xf32>
    %228 = tpu.matmul %226, %227, %cst_309 {dimension_numbers = #tpu.dot_dimension_numbers<[1], [0], [0], [1], [0, 0, 1, 1], [], []>} : vector<64x64xbf16>, vector<64x128xbf16>, vector<64x128xf32> -> vector<64x128xf32>
    %229 = arith.addf %224, %228 : vector<64x128xf32>
    %c0_310 = arith.constant 0 : index
    %c1_311 = arith.constant 1 : index
    %c8_312 = arith.constant 8 : index
    %c0_313 = arith.constant 0 : index
    %230 = vector.load %arg13[%c0_310, %c1_311, %c8_312, %c0_313] : memref<1x10x18x128xbf16, #tpu.memory_space<vmem>>, vector<1x8x8x64xbf16>
    %231 = vector.shape_cast %230 : vector<1x8x8x64xbf16> to vector<64x64xbf16>
    %c256_314 = arith.constant 256 : index
    %c0_315 = arith.constant 0 : index
    %232 = vector.load %arg8[%c256_314, %c0_315] : memref<576x128xbf16, #tpu.memory_space<vmem>>, vector<64x128xbf16>
    %cst_316 = arith.constant dense<0.000000e+00> : vector<64x128xf32>
    %233 = tpu.matmul %231, %232, %cst_316 {dimension_numbers = #tpu.dot_dimension_numbers<[1], [0], [0], [1], [0, 0, 1, 1], [], []>} : vector<64x64xbf16>, vector<64x128xbf16>, vector<64x128xf32> -> vector<64x128xf32>
    %234 = arith.addf %229, %233 : vector<64x128xf32>
    %c0_317 = arith.constant 0 : index
    %c1_318 = arith.constant 1 : index
    %c9_319 = arith.constant 9 : index
    %c0_320 = arith.constant 0 : index
    %235 = vector.load %arg13[%c0_317, %c1_318, %c9_319, %c0_320] : memref<1x10x18x128xbf16, #tpu.memory_space<vmem>>, vector<1x8x8x64xbf16>
    %236 = vector.shape_cast %235 : vector<1x8x8x64xbf16> to vector<64x64xbf16>
    %c320_321 = arith.constant 320 : index
    %c0_322 = arith.constant 0 : index
    %237 = vector.load %arg8[%c320_321, %c0_322] : memref<576x128xbf16, #tpu.memory_space<vmem>>, vector<64x128xbf16>
    %cst_323 = arith.constant dense<0.000000e+00> : vector<64x128xf32>
    %238 = tpu.matmul %236, %237, %cst_323 {dimension_numbers = #tpu.dot_dimension_numbers<[1], [0], [0], [1], [0, 0, 1, 1], [], []>} : vector<64x64xbf16>, vector<64x128xbf16>, vector<64x128xf32> -> vector<64x128xf32>
    %239 = arith.addf %234, %238 : vector<64x128xf32>
    %c0_324 = arith.constant 0 : index
    %c2_325 = arith.constant 2 : index
    %c7_326 = arith.constant 7 : index
    %c0_327 = arith.constant 0 : index
    %240 = vector.load %arg13[%c0_324, %c2_325, %c7_326, %c0_327] : memref<1x10x18x128xbf16, #tpu.memory_space<vmem>>, vector<1x8x8x64xbf16>
    %241 = vector.shape_cast %240 : vector<1x8x8x64xbf16> to vector<64x64xbf16>
    %c384_328 = arith.constant 384 : index
    %c0_329 = arith.constant 0 : index
    %242 = vector.load %arg8[%c384_328, %c0_329] : memref<576x128xbf16, #tpu.memory_space<vmem>>, vector<64x128xbf16>
    %cst_330 = arith.constant dense<0.000000e+00> : vector<64x128xf32>
    %243 = tpu.matmul %241, %242, %cst_330 {dimension_numbers = #tpu.dot_dimension_numbers<[1], [0], [0], [1], [0, 0, 1, 1], [], []>} : vector<64x64xbf16>, vector<64x128xbf16>, vector<64x128xf32> -> vector<64x128xf32>
    %244 = arith.addf %239, %243 : vector<64x128xf32>
    %c0_331 = arith.constant 0 : index
    %c2_332 = arith.constant 2 : index
    %c8_333 = arith.constant 8 : index
    %c0_334 = arith.constant 0 : index
    %245 = vector.load %arg13[%c0_331, %c2_332, %c8_333, %c0_334] : memref<1x10x18x128xbf16, #tpu.memory_space<vmem>>, vector<1x8x8x64xbf16>
    %246 = vector.shape_cast %245 : vector<1x8x8x64xbf16> to vector<64x64xbf16>
    %c448_335 = arith.constant 448 : index
    %c0_336 = arith.constant 0 : index
    %247 = vector.load %arg8[%c448_335, %c0_336] : memref<576x128xbf16, #tpu.memory_space<vmem>>, vector<64x128xbf16>
    %cst_337 = arith.constant dense<0.000000e+00> : vector<64x128xf32>
    %248 = tpu.matmul %246, %247, %cst_337 {dimension_numbers = #tpu.dot_dimension_numbers<[1], [0], [0], [1], [0, 0, 1, 1], [], []>} : vector<64x64xbf16>, vector<64x128xbf16>, vector<64x128xf32> -> vector<64x128xf32>
    %249 = arith.addf %244, %248 : vector<64x128xf32>
    %c0_338 = arith.constant 0 : index
    %c2_339 = arith.constant 2 : index
    %c9_340 = arith.constant 9 : index
    %c0_341 = arith.constant 0 : index
    %250 = vector.load %arg13[%c0_338, %c2_339, %c9_340, %c0_341] : memref<1x10x18x128xbf16, #tpu.memory_space<vmem>>, vector<1x8x8x64xbf16>
    %251 = vector.shape_cast %250 : vector<1x8x8x64xbf16> to vector<64x64xbf16>
    %c512_342 = arith.constant 512 : index
    %c0_343 = arith.constant 0 : index
    %252 = vector.load %arg8[%c512_342, %c0_343] : memref<576x128xbf16, #tpu.memory_space<vmem>>, vector<64x128xbf16>
    %cst_344 = arith.constant dense<0.000000e+00> : vector<64x128xf32>
    %253 = tpu.matmul %251, %252, %cst_344 {dimension_numbers = #tpu.dot_dimension_numbers<[1], [0], [0], [1], [0, 0, 1, 1], [], []>} : vector<64x64xbf16>, vector<64x128xbf16>, vector<64x128xf32> -> vector<64x128xf32>
    %254 = arith.addf %249, %253 : vector<64x128xf32>
    %c0_345 = arith.constant 0 : index
    %c0_346 = arith.constant 0 : index
    %255 = vector.load %arg9[%c0_345, %c0_346] : memref<2x128xf32, #tpu.memory_space<vmem>>, vector<1x128xf32>
    %256 = vector.broadcast %255 : vector<1x128xf32> to vector<64x128xf32>
    %257 = arith.mulf %254, %256 : vector<64x128xf32>
    %c1_347 = arith.constant 1 : index
    %c0_348 = arith.constant 0 : index
    %258 = vector.load %arg9[%c1_347, %c0_348] : memref<2x128xf32, #tpu.memory_space<vmem>>, vector<1x128xf32>
    %259 = vector.broadcast %258 : vector<1x128xf32> to vector<64x128xf32>
    %260 = arith.addf %257, %259 : vector<64x128xf32>
    %cst_349 = arith.constant 0.000000e+00 : f32
    %261 = vector.broadcast %cst_349 : f32 to vector<64x128xf32>
    %262 = arith.maximumf %260, %261 : vector<64x128xf32>
    %c0_350 = arith.constant 0 : index
    %c0_351 = arith.constant 0 : index
    %263 = vector.load %arg12[%c0_350, %c0_351] : memref<64x512xf32, #tpu.memory_space<vmem>>, vector<64x128xf32>
    tpu.vector_store %arg12[%c0_350, %c0_351], %208 {strides = array<i32>} : memref<64x512xf32, #tpu.memory_space<vmem>>, vector<64x128xf32>,
    %c0_352 = arith.constant 0 : index
    %c128_353 = arith.constant 128 : index
    %264 = vector.load %arg12[%c0_352, %c128_353] : memref<64x512xf32, #tpu.memory_space<vmem>>, vector<64x128xf32>
    tpu.vector_store %arg12[%c0_352, %c128_353], %262 {strides = array<i32>} : memref<64x512xf32, #tpu.memory_space<vmem>>, vector<64x128xf32>,
    %c0_354 = arith.constant 0 : index
    %c256_355 = arith.constant 256 : index
    %265 = vector.load %arg12[%c0_354, %c256_355] : memref<64x512xf32, #tpu.memory_space<vmem>>, vector<64x128xf32>
    tpu.vector_store %arg12[%c0_354, %c256_355], %84 {strides = array<i32>} : memref<64x512xf32, #tpu.memory_space<vmem>>, vector<64x128xf32>,
    %c0_356 = arith.constant 0 : index
    %c384_357 = arith.constant 384 : index
    %266 = vector.load %arg12[%c0_356, %c384_357] : memref<64x512xf32, #tpu.memory_space<vmem>>, vector<64x128xf32>
    tpu.vector_store %arg12[%c0_356, %c384_357], %99 {strides = array<i32>} : memref<64x512xf32, #tpu.memory_space<vmem>>, vector<64x128xf32>,
    return
  }
  func.func @transform_0(%arg0: i32) -> (i32, i32, i32, i32) {
    %c0_i32 = arith.constant 0 : i32
    %c0_i32_0 = arith.constant 0 : i32
    %c0_i32_1 = arith.constant 0 : i32
    %c0_i32_2 = arith.constant 0 : i32
    return %arg0, %c0_i32, %c0_i32_0, %c0_i32_1 : i32, i32, i32, i32
  }
  func.func @transform_1(%arg0: i32) -> (i32, i32) {
    %c0_i32 = arith.constant 0 : i32
    %c0_i32_0 = arith.constant 0 : i32
    %c0_i32_1 = arith.constant 0 : i32
    return %c0_i32, %c0_i32_0 : i32, i32
  }
  func.func @transform_2(%arg0: i32) -> (i32, i32) {
    %c0_i32 = arith.constant 0 : i32
    %c0_i32_0 = arith.constant 0 : i32
    %c0_i32_1 = arith.constant 0 : i32
    return %c0_i32, %c0_i32_0 : i32, i32
  }
  func.func @transform_3(%arg0: i32) -> (i32, i32) {
    %c0_i32 = arith.constant 0 : i32
    %c0_i32_0 = arith.constant 0 : i32
    %c0_i32_1 = arith.constant 0 : i32
    return %c0_i32, %c0_i32_0 : i32, i32
  }
  func.func @transform_4(%arg0: i32) -> (i32, i32) {
    %c0_i32 = arith.constant 0 : i32
    %c0_i32_0 = arith.constant 0 : i32
    %c0_i32_1 = arith.constant 0 : i32
    return %c0_i32, %c0_i32_0 : i32, i32
  }
  func.func @transform_5(%arg0: i32) -> (i32, i32) {
    %c0_i32 = arith.constant 0 : i32
    %c0_i32_0 = arith.constant 0 : i32
    %c0_i32_1 = arith.constant 0 : i32
    return %c0_i32, %c0_i32_0 : i32, i32
  }
  func.func @transform_6(%arg0: i32) -> (i32, i32) {
    %c0_i32 = arith.constant 0 : i32
    %c0_i32_0 = arith.constant 0 : i32
    %c0_i32_1 = arith.constant 0 : i32
    return %c0_i32, %c0_i32_0 : i32, i32
  }
  func.func @transform_7(%arg0: i32) -> (i32, i32) {
    %c0_i32 = arith.constant 0 : i32
    %c0_i32_0 = arith.constant 0 : i32
    %c0_i32_1 = arith.constant 0 : i32
    return %c0_i32, %c0_i32_0 : i32, i32
  }
  func.func @transform_8(%arg0: i32) -> (i32, i32) {
    %c0_i32 = arith.constant 0 : i32
    %c0_i32_0 = arith.constant 0 : i32
    %c0_i32_1 = arith.constant 0 : i32
    return %c0_i32, %c0_i32_0 : i32, i32
  }
  func.func @transform_9(%arg0: i32) -> (i32, i32) {
    %c0_i32 = arith.constant 0 : i32
    %c0_i32_0 = arith.constant 0 : i32
    %c0_i32_1 = arith.constant 0 : i32
    return %c0_i32, %c0_i32_0 : i32, i32
  }
  func.func @transform_10(%arg0: i32) -> (i32, i32) {
    %c0_i32 = arith.constant 0 : i32
    %c0_i32_0 = arith.constant 0 : i32
    %c0_i32_1 = arith.constant 0 : i32
    return %c0_i32, %c0_i32_0 : i32, i32
  }
  func.func @transform_11(%arg0: i32) -> (i32, i32) {
    %c0_i32 = arith.constant 0 : i32
    %c0_i32_0 = arith.constant 0 : i32
    return %arg0, %c0_i32 : i32, i32
  }
}

</mosaic_0001>

<bundles_post_ra>
// kernel: tpu_custom_call.1
= control target key start
LH: loop header
LB: loop body
LE: loop exit
PB: predicated region body
PF: predicated region fallthrough
CT: control target
= control target key end

     0   :  { %16 = vsyncpa [#allocation4], 0  ;;  %s14325_s0 = inlined_call_operand.vmem [shape: bf16[2,8,8,32], index: 0, kind: input, shape index: {}]   ;;  %s14326_s1 = inlined_call_operand.vmem [shape: bf16[32,256], index: 1, kind: input, shape index: {}]   ;;  %s14327_s2 = inlined_call_operand.vmem [shape: f32[2,256], index: 2, kind: input, shape index: {}]   ;;  %s14328_s3 = inlined_call_operand.vmem [shape: bf16[576,96], index: 3, kind: input, shape index: {}]   ;;  %s14329_s4 = inlined_call_operand.vmem [shape: f32[2,96], index: 4, kind: input, shape index: {}]   ;;  %s14330_s5 = inlined_call_operand.vmem [shape: bf16[864,128], index: 5, kind: input, shape index: {}]   ;;  %s14331_s6 = inlined_call_operand.vmem [shape: f32[2,128], index: 6, kind: input, shape index: {}]   ;;  %s14332_s7 = inlined_call_operand.hbm [shape: bf16[576,128], index: 7, kind: input, shape index: {}]   ;;  %s14333_s8 = inlined_call_operand.vmem [shape: f32[2,128], index: 8, kind: input, shape index: {}]   ;;  %s14334_s9 = inlined_call_operand.hbm [shape: bf16[288,128], index: 9, kind: input, shape index: {}]   ;;  %s14335_s10 = inlined_call_operand.vmem [shape: f32[2,128], index: 10, kind: input, shape index: {}]   ;;  %s14336_s11 = inlined_call_operand.hbm [shape: f32[128,512], index: 11, kind: output, shape index: {}]  }
   0x1   :  { %17 = vsyncpa [#allocation7], 0 }
   0x2   :  { %18 = vsyncpa [#allocation5], 0 }
   0x3   :  { %20 = vsyncpa [#allocation5 + $0x1], 0  ;;  %s11684_s17 = smov 0   ;;  %s11686_s18 = smov 0  }
   0x4   :  { %s11688_s19 = smov 0   ;;  %s11690_s20 = smov 0  }
   0x5 LB: > { %14379 = sst [smem:[#allocation12_spill]] %s11600_s17  ;;  %s11705_s21 = sadd.s32 4294967295, %s11612_s20   ;;  %s11612_s20 = sphi %s11690_s20, %s14573_s20   ;;  %s11608_s19 = sphi %s11688_s19, %s14575_s19   ;;  %s11604_s18 = sphi %s11686_s18, %s14577_s18   ;;  %s11600_s17 = sphi %s11684_s17, %s14576_s17  }
   0x6   : > { %14380 = sst [smem:[#allocation13_spill]] %s11608_s19  ;;  %s9505_s22 = sadd.s32 4294967294, %s11612_s20  }
   0x7   : > { %s11709_s23 = sadd.s32 1, %s11612_s20   ;;  %s269_s24 = sadd.s32 1, %s11608_s19 }
   0x8   : > { %14381 = sst [smem:[#allocation14_spill]] %s11709_s23  ;;  %s266_s25 = ssub.s32 %s11612_s20, %s11709_s23 }
   0x9   : > { %p279_p0 = scmp.ne.s32.totalorder %s11608_s19, %s11604_s18  ;;  %p267_p1 = scmp.eq.s32.totalorder %s266_s25, 0 }
   0xa   : > { %p280_p2 = scmp.eq.s32.totalorder %s11705_s21, 1  ;;  %p285_p3 = scmp.ne.s32.totalorder %s11604_s18, %s11600_s17 }
   0xb   : > { %p286_p4 = scmp.eq.s32.totalorder %s9505_s22, 1  ;;  %p9506_p7 = scmp.ge.s32.totalorder %s11612_s20, 1 }
   0xc   : > { %s11720_s26 = scalar_select %p267_p1, %s11608_s19, %s269_s24  }
   0xd   : > { %p11722_p5 = por %p280_p2, %p279_p0  ;;  %p11726_p6 = por %p286_p4, %p285_p3 }
   0xe   : > { %14382 = sst [smem:[#allocation15_spill]] %s11720_s26  ;;  %p293_p8 = scmp.lt.s32.totalorder %s11612_s20, 3 }
   0xf   : > { %s14383_s27 = scalar_select %p11722_p5, 1, 0 }
  0x10   : > { %s14384_s28 = scalar_select %p11726_p6, 1, 0 }
  0x11   : > { %p14338_p9 = scmp.eq.s32.totalorder %s11705_s21, 0  ;;  %p11733_p10 = pnand %p9506_p7, %p293_p8 }
  0x12   : > { %14385 = sst [smem:[#allocation16_spill]] %s14384_s28  ;;  %s11614_s30 = smov [#allocation3]  }
  0x13   : > { %s14386_s29 = scalar_select %p11733_p10, 1, 0 }
  0x14   : > { %s323_s12 = sshll.u32 %s11614_s30, 4  ;;  %p11244_p11 = pneg %p11733_p10  ;;  %s324_s12 = int_to_ptr.vmem [resolvable:$true] %s323_s12 }
  0x15   : > { %s11615_s14 = smov [#allocation6]   ;;  %s11486_s24 = scalar_lea.hbm %s14332_s7, 4608 }
  0x16   : > { %p11741_p12 = pnand %p14338_p9, %p11244_p11  ;;  %s339_s15 = sshll.u32 %s11615_s14, 4  ;;  %s11745_s15 = int_to_ptr.vmem [resolvable:$true] %s339_s15 }
  0x17   : > { %p11487_p13 = scmp.ne.s32.totalorder %s14332_s7, %s11486_s24  ;;  %p11493_p3 = scmp.lt.u32.totalorder %s11486_s24, %s14332_s7 }
  0x18   : > { %p11488_p0 = pneg %p11741_p12 }
  0x1a   : > { %p11489_p1 = pnand %p11488_p0, %p11487_p13 }
  0x1c   : > { %p11490_p2 = pneg %p11489_p1 }
  0x1e   : > { %p11495_p4 = pnand %p11493_p3, %p11490_p2 }
  0x20   : > { %11498 = shalt.err (!%p11495_p4)
}
  0x21   : > { %s11499_s14 = scalar_lea.vmem %s324_s12, 4608  ;;  %p11507_p9 = scmp.lt.s32.totalorder %s324_s12, %s324_s12 }
  0x22   : > { %p11500_p7 = scmp.ne.s32.totalorder %s324_s12, %s11499_s14  ;;  %p11508_p6 = scmp.lt.s32.totalorder %s11499_s14, %s11499_s14 }
  0x24   : > { %p11502_p8 = pnand %p11500_p7, %p11488_p0  ;;  %p11509_p5 = por %p11508_p6, %p11507_p9 }
  0x26   : > { %p11503_p11 = pneg %p11502_p8 }
  0x28   : > { %p11510_p10 = pnand %p11509_p5, %p11503_p11 }
  0x2a   : > { %11513 = shalt.err (!%p11510_p10)
}
  0x2b   : > { %s11616_s16 = smov 64   ;;  %s11617_s22 = smov 4  }
  0x2c   : > { %11247 = dma.hbm_to_vmem [thread:$0]  (!%p11741_p12), %s14332_s7, 4608, %s324_s12, [#allocation4], %s11616_s16, %s11616_s16, %s11617_s22  }
  0x2d   : > { %s11514_s30 = scalar_lea.hbm %s14334_s9, 2304 }
  0x2e   : > { %p11515_p13 = scmp.ne.s32.totalorder %s14334_s9, %s11514_s30  ;;  %p11521_p9 = scmp.lt.u32.totalorder %s11514_s30, %s14334_s9 }
  0x30   : > { %p11517_p5 = pnand %p11515_p13, %p11488_p0 }
  0x32   : > { %p11518_p6 = pneg %p11517_p5 }
  0x34   : > { %p11523_p10 = pnand %p11521_p9, %p11518_p6 }
  0x36   : > { %11526 = shalt.err (!%p11523_p10)
}
  0x37   : > { %s11527_s12 = scalar_lea.vmem %s11745_s15, 2304  ;;  %p11535_p4 = scmp.lt.s32.totalorder %s11745_s15, %s11745_s15 }
  0x38   : > { %p11528_p1 = scmp.ne.s32.totalorder %s11745_s15, %s11527_s12  ;;  %p11536_p7 = scmp.lt.s32.totalorder %s11527_s12, %s11527_s12 }
  0x3a   : > { %p11530_p2 = pnand %p11528_p1, %p11488_p0  ;;  %p11537_p8 = por %p11536_p7, %p11535_p4 }
  0x3c   : > { %p11531_p3 = pneg %p11530_p2 }
  0x3e   : > { %p11538_p11 = pnand %p11537_p8, %p11531_p3 }
  0x40   : > { %11541 = shalt.err (!%p11538_p11)
}
  0x41   : > { %11250 = dma.hbm_to_vmem [thread:$0]  (!%p11741_p12), %s14334_s9, 2304, %s11745_s15, [#allocation7], %s11616_s16, %s11616_s16, %s11617_s22  }
  0x42   : > { %p14388_p13 = scmp.ne.s32.totalorder %s14386_s29, 0 }
  0x44   : > { %366 = sbr.rel (%p14388_p13) target bundleno = 1287 (0x507), region = 64 }
  0x4b   : > { %p14389_p5 = scmp.eq.s32.totalorder %s11705_s21, 0 }
  0x4d   : > { %11587 = dma.done.wait (%p14389_p5), [#allocation4], 4608   ;;  %p14390_p0 = pmov %p14389_p5 }
  0x4f   : > { %11589 = vsyncadd (%p14390_p0), [#allocation4], 4294962688  ;;  %p14391_p6 = pmov %p14390_p0 }
  0x50   : > { %p14392_p9 = pmov %p14390_p0 }
  0x51   : > { %11591 = dma.done.wait (%p14391_p6), [#allocation7], 2304  }
  0x52   : > { %11593 = vsyncadd (%p14392_p9), [#allocation7], 4294964992  ;;  %p410_p10 = scmp.lt.s32.totalorder %s11705_s21, 1  ;;  %v11618_v0 = vmov 4286644096   ;;  %vm450_vm0 = vcmask 257024  }
  0x53   : > { %426 = vst [vmem:[#allocation2] sm:$0x8] %v11618_v0  ;;  %427 = vst [vmem:[#allocation2 + $0x4] sm:$0xf] %v11618_v0  ;;  %vm603_vm1 = vcmask 1042432   ;;  %v11301_v1 = vld [vmem:[#allocation6 + $0x10] sm:$0xff]  }
  0x54   : > { %428 = vst [vmem:[#allocation2 + $0x8] sm:$0x1] %v11618_v0  ;;  %434 = vst [vmem:[#allocation2 + $0xc] sm:$0x8] %v11618_v0  ;;  %s411_s28 = scalar_select %p410_p10, %s11705_s21, 1  ;;  %vm604_vm2 = vcmask 1046532   ;;  %10402 = vmatprep.subr.bf16.mxu1 %v11301_v1 }
  0x55   : > { %435 = vst [vmem:[#allocation2 + $0x18] sm:$0x8] %v11618_v0  ;;  %442 = vst [vmem:[#allocation2 + $0x14] sm:$0x1] %v11618_v0  ;;  %v11302_v2 = vld [vmem:[#allocation6 + $0x18] sm:$0xff]   ;;  %10403 = vmatpush3.bf16.msra.mxu1 %v11301_v1  ;;  %v11619_v12 = vmov 0  }
  0x56   : > { %443 = vst [vmem:[#allocation2 + $0x20] sm:$0x1] %v11618_v0  ;;  %430 = vst [vmem:[#allocation2 + $0x6c] sm:$0x8] %v11618_v0  ;;  %s10095_s29 = sshll.u32 %s411_s28, 5  ;;  %10404 = vmatprep.subr.bf16.mxu1 %v11302_v2  ;;  %v11304_v20 = vld [vmem:[#allocation6] sm:$0xff]  }
  0x57   : > { %431 = vst [vmem:[#allocation2 + $0x70] sm:$0xf] %v11618_v0  ;;  %432 = vst [vmem:[#allocation2 + $0x74] sm:$0x1] %v11618_v0  ;;  %s11811_s16 = scalar_lea.vmem %s14325_s0, %s10095_s29  ;;  %10414 = vmatprep.subr.bf16.mxu0 %v11304_v20  ;;  %v11307_v39 = vld [vmem:[%s14326_s1 + $0x4] ss:$8 sps:$4 sm:$0xff]  }
  0x58   : > { %436 = vst [vmem:[#allocation2 + $0x24] sm:$0x8] %v11618_v0  ;;  %437 = vst [vmem:[#allocation2 + $0x30] sm:$0x8] %v11618_v0  ;;  %v11814_v3 = vld [vmem:[%s11811_s16] sm:$0xf]  ;;  %10415 = vmatpush3.bf16.msra.mxu0 %v11304_v20 }
  0x59   : > { %438 = vst [vmem:[#allocation2 + $0x3c] sm:$0x8] %v11618_v0  ;;  %439 = vst [vmem:[#allocation2 + $0x48] sm:$0x8] %v11618_v0  ;;  %v11817_v4 = vld [vmem:[%s11811_s16 + $0x4] sm:$0xf]  ;;  %10405 = vmatpush3.bf16.msra.mxu1 %v11302_v2 }
  0x5a   : > { %440 = vst [vmem:[#allocation2 + $0x54] sm:$0x8] %v11618_v0  ;;  %441 = vst [vmem:[#allocation2 + $0x60] sm:$0x8] %v11618_v0  ;;  %v11820_v5 = vld [vmem:[%s11811_s16 + $0xc] sm:$0xf]  ;;  %v9640_v21 = vcombine.low %v11814_v3, %v11817_v4  ;;  %3127 = vmatprep.subr.bf16.mxu1 %v11307_v39 }
  0x5b   : > { %444 = vst [vmem:[#allocation2 + $0x2c] sm:$0x1] %v11618_v0  ;;  %445 = vst [vmem:[#allocation2 + $0x38] sm:$0x1] %v11618_v0  ;;  %v11823_v6 = vld [vmem:[%s11811_s16 + $0x14] sm:$0xf] }
  0x5c   : > { %446 = vst [vmem:[#allocation2 + $0x44] sm:$0x1] %v11618_v0  ;;  %447 = vst [vmem:[#allocation2 + $0x50] sm:$0x1] %v11618_v0  ;;  %v11826_v7 = vld [vmem:[%s11811_s16 + $0x1c] sm:$0xf] }
  0x5d   : > { %448 = vst [vmem:[#allocation2 + $0x5c] sm:$0x1] %v11618_v0  ;;  %449 = vst [vmem:[#allocation2 + $0x68] sm:$0x1] %v11618_v0  ;;  %v459_v8 = vld [vmem:[#allocation2] sm:$0x8] }
  0x5e   : > { %451 = vst.msk [vmem:[#allocation2 + $0x10] sm:$0xf] %vm450_vm0, %v11814_v3  ;;  %452 = vst.msk [vmem:[#allocation2 + $0x1c] sm:$0xf] %vm450_vm0, %v11817_v4  ;;  %v460_v9 = vld [vmem:[#allocation2 + $0x4] sm:$0xf] }
  0x5f   : > { %454 = vst.msk [vmem:[#allocation2 + $0x34] sm:$0xf] %vm450_vm0, %v11820_v5  ;;  %456 = vst.msk [vmem:[#allocation2 + $0x4c] sm:$0xf] %vm450_vm0, %v11823_v6  ;;  %v11838_v10 = vld [vmem:[#allocation2 + $0xc] sm:$0x8] }
  0x60   : > { %458 = vst.msk [vmem:[#allocation2 + $0x64] sm:$0xf] %vm450_vm0, %v11826_v7  ;;  %v579_v11 = vld [vmem:[#allocation2 + $0x8] sm:$0x1]  ;;  %1119 = vst [vmem:[#allocation2] sm:$0x8] %v11619_v12 }
  0x61   : > { %v476_v13 = vshll.u32 %v460_v9, 16  ;;  %v479_v14 = vshrl.u32 %v460_v9, 16  ;;  %v580_v15 = vld [vmem:[#allocation2 + $0x14] sm:$0x1]  ;;  %v606_v16 = vrot.slane %v460_v9, 5  ;;  %v608_v17 = vrot.slane %v579_v11, 5  ;;  %vm11847_vm3 = vmor %vm603_vm1, %vm604_vm2 }
  0x62   : > { %1120 = vst [vmem:[#allocation2 + $0x4] sm:$0xf] %v11619_v12  ;;  %1121 = vst [vmem:[#allocation2 + $0x8] sm:$0x1] %v11619_v12  ;;  %v670_v18 = vld [vmem:[#allocation2 + $0xc] sm:$0x8] }
  0x63   : > { %v806_v19 = vld [vmem:[#allocation2 + $0x14] sm:$0x1]  ;;  %v478_v22 = vrot.slane %v476_v13, 5  ;;  %v481_v23 = vrot.slane %v479_v14, 4  ;;  %v607_v25 = vrot.slane %v606_v16, 4  ;;  %v612_v29 = vrot.slane %v580_v15, 5 }
  0x64   : > { %1125 = vst [vmem:[#allocation2 + $0xc] sm:$0x8] %v11619_v12  ;;  %1133 = vst [vmem:[#allocation2 + $0x14] sm:$0x1] %v11619_v12  ;;  %v11853_v26 = vld [vmem:[#allocation2 + $0x20] sm:$0x1] }
  0x65   : > { %v482_v27 = vor.u32 %v481_v23, %v478_v22  ;;  %v563_v28 = vmax.bf16 %v478_v22, %v459_v8  ;;  %v11855_v30 = vld [vmem:[#allocation2 + $0x10] sm:$0xf]  ;;  %v609_v31 = vsel %vm11847_vm3, %v607_v25, %v608_v17  ;;  %v832_v33 = vrot.slane %v806_v19, 5  ;;  %v11866_v44 = vld [vmem:[#allocation2 + $0x1c] sm:$0xf]  ;;  %v11309_v45 = vld [vmem:[#allocation6 + $0x8] sm:$0xff]  }
  0x66   : > { %v671_v32 = vld [vmem:[#allocation2 + $0x10] sm:$0xf]  ;;  %v1057_v34 = vrot.slane %v11853_v26, 5  ;;  %v485_v36 = vshll.u32 %v11855_v30, 16  ;;  %v488_v37 = vshrl.u32 %v11855_v30, 16  ;;  %v610_v38 = vrot.slane %v11855_v30, 5  ;;  %10416 = vmatprep.subr.bf16.mxu0 %v11309_v45 }
  0x67   : > { %v483_v35 = vrot.slane %v482_v27, 4  ;;  %v654_v40 = vmax.bf16 %v606_v16, %v563_v28  ;;  %v703_v41 = vshll.u32 %v671_v32, 16  ;;  %v706_v42 = vshrl.u32 %v671_v32, 16  ;;  %v11869_v50 = vld [vmem:[%s11811_s16 + $0x8] sm:$0xf]  ;;  %10417 = vmatpush3.bf16.msra.mxu0 %v11309_v45  ;;  %s407_s12 = sand.u32 1, %s11604_s18  }
  0x68   : > { %v830_v43 = vrot.slane %v671_v32, 5  ;;  %v487_v46 = vrot.slane %v485_v36, 5  ;;  %v490_v47 = vrot.slane %v488_v37, 4  ;;  %v611_v49 = vrot.slane %v610_v38, 4  ;;  %453 = vst.msk [vmem:[#allocation2 + $0x28] sm:$0xf] %vm450_vm0, %v11869_v50 }
  0x69   : > { %v564_v48 = vmax.bf16 %v483_v35, %v460_v9  ;;  %v686_v51 = vmax.bf16 %v670_v18, %v654_v40  ;;  %v705_v52 = vrot.slane %v703_v41, 5  ;;  %v708_v53 = vrot.slane %v706_v42, 4  ;;  %v895_v59 = vld [vmem:[#allocation2 + $0x18] sm:$0x8]  ;;  %v11881_v2 = vld [vmem:[#allocation2 + $0x4] sm:$0xf] }
  0x6a   : > { %v831_v54 = vrot.slane %v830_v43, 4  ;;  %v491_v55 = vor.u32 %v490_v47, %v487_v46  ;;  %v565_v56 = vmax.bf16 %v487_v46, %v11838_v10  ;;  %v613_v57 = vsel %vm11847_vm3, %v611_v49, %v612_v29  ;;  %v463_v60 = vld [vmem:[#allocation2 + $0x18] sm:$0x8]  ;;  %v11883_v8 = vld [vmem:[#allocation2 + $0x1c] sm:$0xf]  ;;  %s9513_s17 = sshll.u32 %s407_s12, 8 }
  0x6b   : > { %v655_v58 = vmax.bf16 %v609_v31, %v564_v48  ;;  %v11876_v61 = vld [vmem:[#allocation2 + $0x18] sm:$0x8]  ;;  %v709_v62 = vor.u32 %v708_v53, %v705_v52  ;;  %v790_v63 = vmax.bf16 %v705_v52, %v686_v51  ;;  %v928_v1 = vshll.u32 %v11866_v44, 16  ;;  %v581_v15 = vld [vmem:[#allocation2 + $0x20] sm:$0x1]  ;;  %s12654_s23 = scalar_lea.vmem [#allocation8], %s9513_s17 }
  0x6c   : > { %v833_v0 = vsel %vm11847_vm3, %v831_v54, %v832_v33  ;;  %1126 = vst [vmem:[#allocation2 + $0x18] sm:$0x8] %v11619_v12  ;;  %v11886_v9 = vld [vmem:[#allocation6 + $0x20] sm:$0xff]   ;;  %v492_v10 = vrot.slane %v491_v55, 4  ;;  %v11888_v11 = vmax.bf16 %v610_v38, %v565_v56  ;;  %v931_v14 = vshrl.u32 %v11866_v44, 16  ;;  %s11620_s28 = smov 64  }
  0x6d   : > { %v687_v13 = vmax.bf16 %v671_v32, %v655_v58  ;;  %v11891_v16 = vld [vmem:[#allocation2 + $0x20] sm:$0x1]  ;;  %v710_v17 = vrot.slane %v709_v62, 4  ;;  %v878_v18 = vmax.bf16 %v830_v43, %v790_v63  ;;  %v930_v19 = vrot.slane %v928_v1, 5  ;;  %10426 = vmatprep.subr.bf16.mxu0 %v11886_v9  ;;  %v11915_v26 = vld [vmem:[#allocation2 + $0x1c] sm:$0xf] }
  0x6e   : > { %v1055_v20 = vrot.slane %v11866_v44, 5  ;;  %1134 = vst [vmem:[#allocation2 + $0x20] sm:$0x1] %v11619_v12  ;;  %v566_v22 = vmax.bf16 %v492_v10, %v11855_v30  ;;  %v933_v23 = vrot.slane %v931_v14, 4  ;;  %v1286_v25 = vshrl.u32 %v11881_v2, 16  ;;  %s10113_s22 = sshll.u32 %s11705_s21, 12 }
  0x6f   : > { %v1289_v27 = vshll.u32 %v11881_v2, 16  ;;  %v791_v28 = vmax.bf16 %v710_v17, %v687_v13  ;;  %v911_v29 = vmax.bf16 %v895_v59, %v878_v18  ;;  %v494_v32 = vshll.u32 %v11883_v8, 16  ;;  %v11904_v37 = vld [vmem:[#allocation2 + $0x28] sm:$0xf]  ;;  %v674_v52 = vld [vmem:[#allocation2 + $0x24] sm:$0x8]  ;;  %s14275_s25 = scalar_lea.hbm %s14336_s11, %s10113_s22 }
  0x70   : > { %v1056_v31 = vrot.slane %v1055_v20, 4  ;;  %v11900_v33 = vmax.bf16 %v613_v57, %v566_v22  ;;  %v934_v35 = vor.u32 %v933_v23, %v930_v19  ;;  %v11902_v36 = vrot.slane %v1286_v25, 7  ;;  %v11919_v56 = vld [vmem:[#allocation2 + $0x24] sm:$0x8]  ;;  %v11924_v63 = vld [vmem:[%s11811_s16 + $0x10] sm:$0xf] }
  0x71   : > { %v497_v38 = vshrl.u32 %v11883_v8, 16  ;;  %v879_v30 = vmax.bf16 %v833_v0, %v791_v28  ;;  %v1015_v39 = vmax.bf16 %v930_v19, %v911_v29  ;;  %vm1141_vm4 = vsmask.f32 256  ;;  %v675_v10 = vld [vmem:[#allocation2 + $0x28] sm:$0xf]  ;;  %s9421_s19 = sshll.u32 %s12654_s23, 4  ;;  %s14277_s19 = int_to_ptr.vmem [resolvable:$true] %s9421_s19 }
  0x72   : > { %v1058_v40 = vsel %vm11847_vm3, %v1056_v31, %v1057_v34  ;;  %vm1142_vm5 = vsmask.f32 4368  ;;  %v496_v41 = vrot.slane %v494_v32, 5  ;;  %v935_v42 = vrot.slane %v934_v35, 4  ;;  %v11935_v17 = vld [vmem:[#allocation2 + $0x2c] sm:$0x1] }
  0x73   : > { %v499_v43 = vrot.slane %v497_v38, 4  ;;  %v503_v45 = vshll.u32 %v11904_v37, 16  ;;  %v506_v46 = vshrl.u32 %v11904_v37, 16  ;;  %v912_v47 = vmax.bf16 %v11866_v44, %v879_v30  ;;  %v11921_v44 = vld [vmem:[#allocation2 + $0x2c] sm:$0x1]  ;;  %vm11967_vm6 = vmor %vm1141_vm4, %vm1142_vm5  ;;  %s14284_s21 = scalar_lea.sflag [#allocation5], %s407_s12 }
  0x74   : > { %v1103_v48 = vmax.bf16 %v1055_v20, %v1015_v39  ;;  %v567_v49 = vmax.bf16 %v496_v41, %v463_v60  ;;  %v614_v51 = vrot.slane %v11883_v8, 5  ;;  %v616_v55 = vrot.slane %v581_v15, 5  ;;  %v11926_v60 = vld [vmem:[#allocation2 + $0x24] sm:$0x8]  ;;  %v11933_v15 = vld [vmem:[#allocation2 + $0x30] sm:$0x8] }
  0x75   : > { %v500_v34 = vor.u32 %v499_v43, %v496_v41  ;;  %v11917_v53 = vrot.slane %v503_v45, 5  ;;  %v508_v54 = vrot.slane %v506_v46, 4  ;;  %v1016_v57 = vmax.bf16 %v935_v42, %v912_v47  ;;  %455 = vst.msk [vmem:[#allocation2 + $0x40] sm:$0xf] %vm450_vm0, %v11924_v63  ;;  %1127 = vst [vmem:[#allocation2 + $0x24] sm:$0x8] %v11619_v12 }
  0x76   : > { %v1145_v58 = vshrl.u32 %v1103_v48, 16  ;;  %v615_v59 = vrot.slane %v614_v51, 4  ;;  %v658_v62 = vmax.bf16 %v614_v51, %v567_v49  ;;  %v688_v13 = vmax.bf16 %v11876_v61, %v11888_v11  ;;  %v11942_v23 = vld [vmem:[#allocation2 + $0x30] sm:$0x8]  ;;  %v11944_v61 = vld [vmem:[#allocation2 + $0x2c] sm:$0x1] }
  0x77   : > { %v501_v0 = vrot.slane %v500_v34, 4  ;;  %v509_v1 = vor.u32 %v508_v54, %v11917_v53  ;;  %v689_v14 = vmax.bf16 %v11915_v26, %v11900_v33  ;;  %v1104_v18 = vmax.bf16 %v1058_v40, %v1016_v57  ;;  %v11951_v31 = vld [vmem:[#allocation2 + $0x30] sm:$0x8]  ;;  %1135 = vst [vmem:[#allocation2 + $0x2c] sm:$0x1] %v11619_v12  ;;  %s11542_s30 = scalar_lea.vmem %s14277_s19, 4096 }
  0x78   : > { %v9516_v19 = vrot.slane %v1145_v58, 11  ;;  %v617_v20 = vsel %vm11847_vm3, %v615_v59, %v616_v55  ;;  %v690_v22 = vmax.bf16 %v674_v52, %v658_v62  ;;  %v712_v28 = vshll.u32 %v11915_v26, 16  ;;  %v11954_v30 = vld [vmem:[#allocation2 + $0x38] sm:$0x1]  ;;  %1128 = vst [vmem:[#allocation2 + $0x30] sm:$0x8] %v11619_v12  ;;  %p11543_p12 = scmp.ne.s32.totalorder %s14277_s19, %s11542_s30 }
  0x79   : > { %v11946_v11 = vrot.slane %v509_v1, 4  ;;  %v568_v25 = vmax.bf16 %v501_v0, %v11883_v8  ;;  %v715_v29 = vshrl.u32 %v11915_v26, 16  ;;  %v1150_v32 = vshrl.u32 %v1104_v18, 16  ;;  %v11959_v42 = vld [vmem:[#allocation2 + $0x38] sm:$0x1]  ;;  %v11477_v49 = vld [vmem:[%s14330_s5 + $0x170] sm:$0xff]  }
  0x7a   : > { %v1153_v33 = vshll.u32 %v1104_v18, 16  ;;  %v721_v35 = vshll.u32 %v675_v10, 16  ;;  %v724_v38 = vshrl.u32 %v675_v10, 16  ;;  %v714_v40 = vrot.slane %v712_v28, 5  ;;  %v11961_v43 = vld [vmem:[#allocation2 + $0x38] sm:$0x1] }
  0x7b   : > { %v570_v39 = vmax.bf16 %v11946_v11, %v11904_v37  ;;  %v659_v8 = vmax.bf16 %v617_v20, %v568_v25  ;;  %v717_v41 = vrot.slane %v715_v29, 4  ;;  %v1152_v45 = vrot.slane %v1150_v32, 7  ;;  %1136 = vst [vmem:[#allocation2 + $0x38] sm:$0x1] %v11619_v12  ;;  %v898_v55 = vld [vmem:[#allocation2 + $0x28] sm:$0xf] }
  0x7c   : > { %v723_v46 = vrot.slane %v721_v35, 5  ;;  %v726_v47 = vrot.slane %v724_v38, 4  ;;  %v834_v48 = vrot.slane %v11915_v26, 5  ;;  %v792_v34 = vmax.bf16 %v714_v40, %v688_v13  ;;  %v900_v20 = vld [vmem:[#allocation2 + $0x34] sm:$0xf]  ;;  %p14569_p1 = scmp.ne.s32.totalorder %s14383_s27, 0 }
  0x7d   : > { %v691_v51 = vmax.bf16 %v675_v10, %v659_v8  ;;  %v718_v52 = vor.u32 %v717_v41, %v714_v40  ;;  %v836_v54 = vrot.slane %v11891_v16, 5  ;;  %v1155_v57 = vor.u32 %v1153_v33, %v1152_v45  ;;  %v1264_v45 = vld [vmem:[#allocation2] sm:$0x8]  ;;  %s11621_s14 = smov [#allocation8]  }
  0x7e   : > { %v727_v58 = vor.u32 %v726_v47, %v723_v46  ;;  %v794_v59 = vmax.bf16 %v723_v46, %v690_v22  ;;  %v835_v62 = vrot.slane %v834_v48, 4  ;;  %v838_v26 = vrot.slane %v675_v10, 5  ;;  %v11982_v46 = vld [vmem:[#allocation2 + $0x3c] sm:$0x8]  ;;  %p11544_p2 = pnand %p11543_p12, %p14569_p1  ;;  %s11546_s17 = sshll.u32 %s11621_s14, 4  ;;  %s11547_s17 = int_to_ptr.vmem [resolvable:$false] %s11546_s17 }
  0x7f   : > { %v719_v0 = vrot.slane %v718_v52, 4  ;;  %v840_v1 = vrot.slane %v11921_v44, 5  ;;  %v880_v18 = vmax.bf16 %v834_v48, %v792_v34  ;;  %v1156_v25 = vsel %vm11967_vm6, %v9516_v19, %v1155_v57  ;;  %v11986_v52 = vld [vmem:[#allocation2 + $0x44] sm:$0x1]  ;;  %v11989_v34 = vld [vmem:[%s11811_s16 + $0x18] sm:$0xf]  ;;  %p11549_p4 = scmp.lt.s32.totalorder %s14277_s19, %s11547_s17 }
  0x80   : > { %vm1424_vm7 = vcmask 261120   ;;  %v728_v28 = vrot.slane %v727_v58, 4  ;;  %v837_v13 = vsel %vm11847_vm3, %v835_v62, %v836_v54  ;;  %v937_v16 = vshll.u32 %v898_v55, 16  ;;  %1256 = vst.msk [vmem:[#allocation2 + $0x10] sm:$0xf] %vm450_vm0, %v1156_v25  ;;  %p11545_p3 = pneg %p11544_p2 }
  0x81   : > { %v793_v29 = vmax.bf16 %v719_v0, %v689_v14  ;;  %v839_v22 = vrot.slane %v838_v26, 4  ;;  %v882_v32 = vmax.bf16 %v838_v26, %v794_v59  ;;  %v913_v10 = vmax.bf16 %v11919_v56, %v880_v18  ;;  %v11984_v14 = vld [vmem:[#allocation2 + $0x3c] sm:$0x8]  ;;  %v11994_v62 = vld [vmem:[#allocation2 + $0x48] sm:$0x8] }
  0x82   : > { %v795_v33 = vmax.bf16 %v728_v28, %v691_v51  ;;  %v939_v44 = vrot.slane %v937_v16, 5  ;;  %v940_v35 = vshrl.u32 %v898_v55, 16  ;;  %v946_v38 = vshll.u32 %v900_v20, 16  ;;  %v11991_v54 = vld [vmem:[#allocation2 + $0x3c] sm:$0x8] }
  0x83   : > { %v841_v19 = vsel %vm11847_vm3, %v839_v22, %v840_v1  ;;  %v881_v8 = vmax.bf16 %v837_v13, %v793_v29  ;;  %v915_v40 = vmax.bf16 %v11933_v15, %v882_v32  ;;  %v949_v41 = vshrl.u32 %v900_v20, 16  ;;  %457 = vst.msk [vmem:[#allocation2 + $0x58] sm:$0xf] %vm450_vm0, %v11989_v34  ;;  %1129 = vst [vmem:[#allocation2 + $0x3c] sm:$0x8] %v11619_v12 }
  0x84   : > { %v883_v47 = vmax.bf16 %v841_v19, %v795_v33  ;;  %v942_v48 = vrot.slane %v940_v35, 4  ;;  %v948_v56 = vrot.slane %v946_v38, 5  ;;  %v1017_v51 = vmax.bf16 %v939_v44, %v913_v10  ;;  %v1266_v25 = vld [vmem:[#allocation2 + $0xc] sm:$0x8]  ;;  %v11999_v28 = vld [vmem:[#allocation2 + $0x44] sm:$0x1] }
  0x85   : > { %v914_v57 = vmax.bf16 %v898_v55, %v881_v8  ;;  %v951_v58 = vrot.slane %v949_v41, 4  ;;  %v1059_v59 = vrot.slane %v898_v55, 5  ;;  %v1061_v15 = vrot.slane %v11935_v17, 5  ;;  %v12001_v13 = vld [vmem:[#allocation2 + $0x44] sm:$0x1] }
  0x86   : > { %v916_v0 = vmax.bf16 %v900_v20, %v883_v47  ;;  %v943_v26 = vor.u32 %v942_v48, %v939_v44  ;;  %v1019_v1 = vmax.bf16 %v948_v56, %v915_v40  ;;  %v1063_v18 = vrot.slane %v900_v20, 5  ;;  %v12004_v22 = vld [vmem:[#allocation2 + $0x48] sm:$0x8]  ;;  %1137 = vst [vmem:[#allocation2 + $0x44] sm:$0x1] %v11619_v12 }
  0x87   : > { %v952_v16 = vor.u32 %v951_v58, %v948_v56  ;;  %v1060_v55 = vrot.slane %v1059_v59, 4  ;;  %v1065_v17 = vrot.slane %v11954_v30, 5  ;;  %v1105_v29 = vmax.bf16 %v1059_v59, %v1017_v51  ;;  %v12006_v32 = vld [vmem:[#allocation2 + $0x48] sm:$0x8]  ;;  %v1267_v10 = vld [vmem:[#allocation2 + $0x10] sm:$0xf] }
  0x88   : > { %v944_v33 = vrot.slane %v943_v26, 4  ;;  %v1064_v44 = vrot.slane %v1063_v18, 4  ;;  %v1107_v20 = vmax.bf16 %v1063_v18, %v1019_v1  ;;  %v1281_v35 = vshrl.u32 %v1264_v45, 16  ;;  %1130 = vst [vmem:[#allocation2 + $0x48] sm:$0x8] %v11619_v12 }
  0x89   : > { %v9532_v38 = vcombine.low %v11881_v2, %v1267_v10  ;;  %v953_v19 = vrot.slane %v952_v16, 4  ;;  %v1062_v30 = vsel %vm11847_vm3, %v1060_v55, %v1061_v15  ;;  %v1158_v8 = vshrl.u32 %v1105_v29, 16  ;;  %v12013_v40 = vld [vmem:[#allocation2 + $0x34] sm:$0xf]  ;;  %v12015_v41 = vld [vmem:[#allocation2 + $0x50] sm:$0x1] }
  0x8a   : > { %v1018_v47 = vmax.bf16 %v944_v33, %v914_v57  ;;  %v1066_v48 = vsel %vm11847_vm3, %v1064_v44, %v1065_v17  ;;  %v1171_v56 = vshrl.u32 %v1107_v20, 16  ;;  %v9524_v51 = vrot.slane %v1281_v35, 11  ;;  %v12019_v45 = vld [vmem:[#allocation2 + $0x50] sm:$0x1]  ;;  %v12028_v17 = vld [vmem:[#allocation2 + $0x40] sm:$0xf] }
  0x8b   : > { %v12021_v58 = vld [vmem:[#allocation2 + $0x50] sm:$0x1]  ;;  %10406 = vmatprep.mubr.msk.bf16.mxu1 %vm1424_vm7, %v9532_v38  ;;  %v1020_v59 = vmax.bf16 %v953_v19, %v916_v0  ;;  %v9517_v26 = vrot.slane %v1158_v8, 11  ;;  %v1291_v15 = vor.u32 %v1289_v27, %v11902_v36  ;;  %v1294_v1 = vshrl.u32 %v1266_v25, 16 }
  0x8c   : > { %1138 = vst [vmem:[#allocation2 + $0x50] sm:$0x1] %v11619_v12  ;;  %v1106_v57 = vmax.bf16 %v1062_v30, %v1018_v47  ;;  %v9518_v18 = vrot.slane %v1171_v56, 11  ;;  %v1299_v16 = vshrl.u32 %v1267_v10, 16  ;;  %v1302_v55 = vshll.u32 %v1267_v10, 16 }
  0x8d   : > { %v1108_v29 = vmax.bf16 %v1066_v48, %v1020_v59  ;;  %v1292_v33 = vsel %vm11967_vm6, %v9524_v51, %v1291_v15  ;;  %v9525_v44 = vrot.slane %v1294_v1, 11  ;;  %v512_v0 = vshll.u32 %v12013_v40, 16  ;;  %v12041_v15 = vld [vmem:[#allocation2 + $0x54] sm:$0x8]  ;;  %v2201_v24 = vld [vmem:[#allocation2 + $0x10] sm:$0xf] }
  0x8e   : > { %v1163_v20 = vshrl.u32 %v1106_v57, 16  ;;  %v1166_v35 = vshll.u32 %v1106_v57, 16  ;;  %v1301_v2 = vrot.slane %v1299_v16, 7  ;;  %v515_v27 = vshrl.u32 %v12013_v40, 16 }
  0x8f   : > { %v1176_v36 = vshrl.u32 %v1108_v29, 16  ;;  %v1179_v25 = vshll.u32 %v1108_v29, 16  ;;  %v514_v38 = vrot.slane %v512_v0, 5  ;;  %v521_v19 = vshll.u32 %v12028_v17, 16  ;;  %v12047_v0 = vld [vmem:[#allocation2 + $0x54] sm:$0x8] }
  0x90   : > { %v1165_v10 = vrot.slane %v1163_v20, 7  ;;  %v1304_v30 = vor.u32 %v1302_v55, %v1301_v2  ;;  %v517_v8 = vrot.slane %v515_v27, 4  ;;  %v524_v47 = vshrl.u32 %v12028_v17, 16  ;;  %v12045_v55 = vld [vmem:[#allocation2 + $0x34] sm:$0xf] }
  0x91   : > { %v1178_v48 = vrot.slane %v1176_v36, 7  ;;  %v12036_v56 = vrot.slane %v521_v19, 5  ;;  %v569_v51 = vmax.bf16 %v11917_v53, %v11926_v60  ;;  %v571_v59 = vmax.bf16 %v514_v38, %v11942_v23  ;;  %v12049_v20 = vld [vmem:[#allocation2 + $0x54] sm:$0x8] }
  0x92   : > { %v1168_v1 = vor.u32 %v1166_v35, %v1165_v10  ;;  %v1305_v57 = vsel %vm11967_vm6, %v9525_v44, %v1304_v30  ;;  %v518_v16 = vor.u32 %v517_v8, %v514_v38  ;;  %v526_v29 = vrot.slane %v524_v47, 4  ;;  %1131 = vst [vmem:[#allocation2 + $0x54] sm:$0x8] %v11619_v12  ;;  %v679_v8 = vld [vmem:[#allocation2 + $0x40] sm:$0xf] }
  0x93   : > { %v1181_v2 = vor.u32 %v1179_v25, %v1178_v48  ;;  %v9542_v27 = vcombine.low %v1292_v33, %v1305_v57  ;;  %v618_v53 = vrot.slane %v11904_v37, 5  ;;  %v620_v60 = vrot.slane %v11944_v61, 5  ;;  %v12080_v57 = vld [vmem:[#allocation2 + $0x5c] sm:$0x1] }
  0x94   : > { %v1169_v23 = vsel %vm11967_vm6, %v9517_v26, %v1168_v1  ;;  %v519_v44 = vrot.slane %v518_v16, 4  ;;  %v527_v35 = vor.u32 %v526_v29, %v12036_v56  ;;  %v622_v36 = vrot.slane %v12013_v40, 5  ;;  %v12082_v16 = vld [vmem:[#allocation2 + $0x5c] sm:$0x1] }
  0x95   : > { %v1182_v38 = vsel %vm11967_vm6, %v9518_v18, %v1181_v2  ;;  %1257 = vst.msk [vmem:[#allocation2 + $0x1c] sm:$0xf] %vm450_vm0, %v1169_v23  ;;  %10418 = vmatprep.mubr.msk.bf16.mxu0 %vm1424_vm7, %v9542_v27  ;;  %v619_v33 = vrot.slane %v618_v53, 4  ;;  %v624_v61 = vrot.slane %v11959_v42, 5  ;;  %v660_v25 = vmax.bf16 %v618_v53, %v569_v51 }
  0x96   : > { %1258 = vst.msk [vmem:[#allocation2 + $0x28] sm:$0xf] %vm450_vm0, %v1182_v38  ;;  %v12064_v19 = vrot.slane %v527_v35, 4  ;;  %v572_v26 = vmax.bf16 %v519_v44, %v12013_v40  ;;  %v623_v10 = vrot.slane %v622_v36, 4  ;;  %v662_v30 = vmax.bf16 %v622_v36, %v571_v59 }
  0x97   : > { %v621_v18 = vsel %vm11847_vm3, %v619_v33, %v620_v60  ;;  %v692_v47 = vmax.bf16 %v11951_v31, %v660_v25  ;;  %v730_v48 = vshll.u32 %v12045_v55, 16  ;;  %v733_v1 = vshrl.u32 %v12045_v55, 16  ;;  %v12084_v31 = vld [vmem:[#allocation2 + $0x5c] sm:$0x1] }
  0x98   : > { %v574_v42 = vmax.bf16 %v12064_v19, %v12028_v17  ;;  %v625_v51 = vsel %vm11847_vm3, %v623_v10, %v624_v61  ;;  %v661_v40 = vmax.bf16 %v621_v18, %v570_v39  ;;  %v694_v59 = vmax.bf16 %v11982_v46, %v662_v30  ;;  %1139 = vst [vmem:[#allocation2 + $0x5c] sm:$0x1] %v11619_v12  ;;  %v902_v39 = vld [vmem:[#allocation2 + $0x40] sm:$0xf] }
  0x99   : > { %v663_v29 = vmax.bf16 %v625_v51, %v572_v26  ;;  %v732_v2 = vrot.slane %v730_v48, 5  ;;  %v735_v27 = vrot.slane %v733_v1, 4  ;;  %v739_v53 = vshll.u32 %v679_v8, 16  ;;  %v11305_v46 = vld [vmem:[%s14326_s1] ss:$8 sps:$4 sm:$0xff]  }
  0x9a   : > { %v693_v60 = vmax.bf16 %v12045_v55, %v661_v40  ;;  %v742_v23 = vshrl.u32 %v679_v8, 16  ;;  %v842_v37 = vrot.slane %v12045_v55, 5  ;;  %v844_v11 = vrot.slane %v11961_v43, 5  ;;  %v904_v48 = vld [vmem:[#allocation2 + $0x4c] sm:$0xf] }
  0x9b   : > { %v695_v44 = vmax.bf16 %v679_v8, %v663_v29  ;;  %v736_v35 = vor.u32 %v735_v27, %v732_v2  ;;  %v741_v36 = vrot.slane %v739_v53, 5  ;;  %v796_v38 = vmax.bf16 %v732_v2, %v692_v47 }
  0x9c   : > { %v12093_v33 = vld [vmem:[#allocation2 + $0x1c] sm:$0xf]  ;;  %v744_v61 = vrot.slane %v742_v23, 4  ;;  %v843_v25 = vrot.slane %v842_v37, 4  ;;  %v846_v26 = vrot.slane %v679_v8, 5  ;;  %v848_v10 = vrot.slane %v11986_v52, 5 }
  0x9d   : > { %v12096_v30 = vld [vmem:[#allocation2 + $0x28] sm:$0xf]  ;;  %v737_v55 = vrot.slane %v736_v35, 4  ;;  %v798_v43 = vmax.bf16 %v741_v36, %v694_v59  ;;  %v884_v18 = vmax.bf16 %v842_v37, %v796_v38  ;;  %v955_v1 = vshll.u32 %v902_v39, 16  ;;  %v11313_v8 = vld [vmem:[%s14326_s1 + $0x14] ss:$8 sps:$4 sm:$0xff]  }
  0x9e   : > { %v9533_v51 = vcombine.low %v12093_v33, %v12096_v30  ;;  %v745_v40 = vor.u32 %v744_v61, %v741_v36  ;;  %v845_v47 = vsel %vm11847_vm3, %v843_v25, %v844_v11  ;;  %v847_v29 = vrot.slane %v846_v26, 4 }
  0x9f   : > { %v797_v52 = vmax.bf16 %v737_v55, %v693_v60  ;;  %v886_v2 = vmax.bf16 %v846_v26, %v798_v43  ;;  %v917_v27 = vmax.bf16 %v11984_v14, %v884_v18  ;;  %v957_v59 = vrot.slane %v955_v1, 5  ;;  %v11311_v60 = vld [vmem:[%s14326_s1 + $0x10] ss:$8 sps:$4 sm:$0xff]  }
  0xa0   : > { %10407 = vmatmul.mubr.msk.bf16.vlgmr.msra.gmra.mrb[0].mxu1 %vm1424_vm7, %v9533_v51  ;;  %v746_v53 = vrot.slane %v745_v40, 4  ;;  %v849_v23 = vsel %vm11847_vm3, %v847_v29, %v848_v10  ;;  %v958_v37 = vshrl.u32 %v902_v39, 16  ;;  %v964_v35 = vshll.u32 %v904_v48, 16 }
  0xa1   : > { %3128 = vmatpush1.bf16.msra.mxu1 %v11305_v46  ;;  %v885_v11 = vmax.bf16 %v845_v47, %v797_v52  ;;  %v919_v36 = vmax.bf16 %v11994_v62, %v886_v2  ;;  %v967_v38 = vshrl.u32 %v904_v48, 16  ;;  %v1021_v61 = vmax.bf16 %v957_v59, %v917_v27  ;;  %v1268_v47 = vld [vmem:[#allocation2 + $0x18] sm:$0x8] }
  0xa2   : > { %v799_v14 = vmax.bf16 %v746_v53, %v695_v44  ;;  %v960_v25 = vrot.slane %v958_v37, 4  ;;  %v966_v26 = vrot.slane %v964_v35, 5  ;;  %v1067_v55 = vrot.slane %v902_v39, 5  ;;  %3129 = vmatprep.subr.bf16.mxu1 %v11313_v8  ;;  %v1270_v44 = vld [vmem:[#allocation2 + $0x24] sm:$0x8] }
  0xa3   : > { %v918_v43 = vmax.bf16 %v902_v39, %v885_v11  ;;  %v969_v18 = vrot.slane %v967_v38, 4  ;;  %v1069_v10 = vrot.slane %v11999_v28, 5  ;;  %v1071_v1 = vrot.slane %v904_v48, 5  ;;  %v12115_v53 = vld [vmem:[#allocation2 + $0x60] sm:$0x8] }
  0xa4   : > { %v887_v46 = vmax.bf16 %v849_v23, %v799_v14  ;;  %v961_v51 = vor.u32 %v960_v25, %v957_v59  ;;  %v1023_v40 = vmax.bf16 %v966_v26, %v919_v36  ;;  %v1068_v62 = vrot.slane %v1067_v55, 4  ;;  %v12119_v23 = vld [vmem:[#allocation2 + $0x4c] sm:$0xf]  ;;  %v12121_v59 = vld [vmem:[#allocation2 + $0x68] sm:$0x1] }
  0xa5   : > { %v970_v29 = vor.u32 %v969_v18, %v966_v26  ;;  %v1072_v52 = vrot.slane %v1071_v1, 4  ;;  %v1073_v2 = vrot.slane %v12015_v41, 5  ;;  %v1109_v27 = vmax.bf16 %v1067_v55, %v1021_v61  ;;  %3130 = vmatpush1.bf16.msra.mxu1 %v11311_v60  ;;  %v12123_v35 = vld [vmem:[#allocation2 + $0x60] sm:$0x8]  ;;  %v12127_v61 = vld [vmem:[#allocation2 + $0x68] sm:$0x1] }
  0xa6   : > { %v920_v8 = vmax.bf16 %v904_v48, %v887_v46  ;;  %v962_v39 = vrot.slane %v961_v51, 4  ;;  %v1070_v28 = vsel %vm11847_vm3, %v1068_v62, %v1069_v10  ;;  %v1111_v37 = vmax.bf16 %v1071_v1, %v1023_v40  ;;  %1132 = vst [vmem:[#allocation2 + $0x60] sm:$0x8] %v11619_v12  ;;  %v12132_v26 = vld [vmem:[#allocation2 + $0x6c] sm:$0x8] }
  0xa7   : > { %v971_v11 = vrot.slane %v970_v29, 4  ;;  %v1074_v41 = vsel %vm11847_vm3, %v1072_v52, %v1073_v2  ;;  %v1184_v36 = vshrl.u32 %v1109_v27, 16  ;;  %v1307_v38 = vshrl.u32 %v1268_v47, 16  ;;  %1140 = vst [vmem:[#allocation2 + $0x68] sm:$0x1] %v11619_v12 }
  0xa8   : > { %v1022_v48 = vmax.bf16 %v962_v39, %v918_v43  ;;  %v1197_v60 = vshrl.u32 %v1111_v37, 16  ;;  %v1312_v14 = vshrl.u32 %v12093_v33, 16  ;;  %v1315_v25 = vshll.u32 %v12093_v33, 16  ;;  %v12135_v46 = vld [vmem:[#allocation2 + $0x70] sm:$0xf] }
  0xa9   : > { %v1024_v55 = vmax.bf16 %v971_v11, %v920_v8  ;;  %v9519_v18 = vrot.slane %v1184_v36, 11  ;;  %v9526_v10 = vrot.slane %v1307_v38, 11  ;;  %v1320_v1 = vshrl.u32 %v1270_v44, 16  ;;  %1122 = vst [vmem:[#allocation2 + $0x6c] sm:$0x8] %v11619_v12 }
  0xaa   : > { %v1110_v51 = vmax.bf16 %v1070_v28, %v1022_v48  ;;  %v9520_v40 = vrot.slane %v1197_v60, 11  ;;  %v1314_v43 = vrot.slane %v1312_v14, 7  ;;  %v1325_v62 = vshrl.u32 %v12096_v30, 16  ;;  %v12139_v47 = vld [vmem:[#allocation2 + $0x74] sm:$0x1] }
  0xab   : > { %1123 = vst [vmem:[#allocation2 + $0x70] sm:$0xf] %v11619_v12  ;;  %v1112_v33 = vmax.bf16 %v1074_v41, %v1024_v55  ;;  %v9527_v29 = vrot.slane %v1320_v1, 11  ;;  %v1328_v52 = vshll.u32 %v12096_v30, 16  ;;  %v530_v2 = vshll.u32 %v12119_v23, 16 }
  0xac   : > { %1124 = vst [vmem:[#allocation2 + $0x74] sm:$0x1] %v11619_v12  ;;  %v1189_v27 = vshrl.u32 %v1110_v51, 16  ;;  %v1192_v44 = vshll.u32 %v1110_v51, 16  ;;  %v1317_v8 = vor.u32 %v1315_v25, %v1314_v43  ;;  %v1327_v39 = vrot.slane %v1325_v62, 7 }
  0xad   : > { %v1202_v28 = vshrl.u32 %v1112_v33, 16  ;;  %v1205_v37 = vshll.u32 %v1112_v33, 16  ;;  %v532_v11 = vrot.slane %v530_v2, 5  ;;  %v533_v36 = vshrl.u32 %v12119_v23, 16  ;;  %v12152_v1 = vld [vmem:[#allocation2 + $0x4c] sm:$0xf] }
  0xae   : > { %v1191_v38 = vrot.slane %v1189_v27, 7  ;;  %v1318_v41 = vsel %vm11967_vm6, %v9526_v10, %v1317_v8  ;;  %v1330_v48 = vor.u32 %v1328_v52, %v1327_v39  ;;  %v573_v30 = vmax.bf16 %v12036_v56, %v11991_v54  ;;  %v11316_v56 = vld [vmem:[#allocation6 + $0x28] sm:$0xff]  }
  0xaf   : > { %v1204_v60 = vrot.slane %v1202_v28, 7  ;;  %v535_v14 = vrot.slane %v533_v36, 4  ;;  %v575_v55 = vmax.bf16 %v532_v11, %v12004_v22  ;;  %v626_v25 = vrot.slane %v12028_v17, 5 }
  0xb0   : > { %v1194_v51 = vor.u32 %v1192_v44, %v1191_v38  ;;  %v1331_v43 = vsel %vm11967_vm6, %v9527_v29, %v1330_v48  ;;  %v628_v62 = vrot.slane %v12001_v13, 5  ;;  %v630_v10 = vrot.slane %v12119_v23, 5  ;;  %v683_v44 = vld [vmem:[#allocation2 + $0x58] sm:$0xf] }
  0xb1   : > { %v1207_v33 = vor.u32 %v1205_v37, %v1204_v60  ;;  %v9543_v52 = vcombine.low %v1318_v41, %v1331_v43  ;;  %v536_v2 = vor.u32 %v535_v14, %v532_v11  ;;  %v627_v54 = vrot.slane %v626_v25, 4  ;;  %v906_v43 = vld [vmem:[#allocation2 + $0x58] sm:$0xf] }
  0xb2   : > { %v1195_v22 = vsel %vm11967_vm6, %v9519_v18, %v1194_v51  ;;  %v631_v27 = vrot.slane %v630_v10, 4  ;;  %v632_v8 = vrot.slane %v12019_v45, 5  ;;  %v664_v39 = vmax.bf16 %v626_v25, %v573_v30  ;;  %v12179_v30 = vld [vmem:[#allocation6 + $0x30] sm:$0xff]  }
  0xb3   : > { %v1208_v29 = vsel %vm11967_vm6, %v9520_v40, %v1207_v33  ;;  %1259 = vst.msk [vmem:[#allocation2 + $0x34] sm:$0xf] %vm450_vm0, %v1195_v22  ;;  %10419 = vmatmul.mubr.msk.bf16.vlgmr.msra.gmra.mrb[0].mxu0 %vm1424_vm7, %v9543_v52  ;;  %v537_v13 = vrot.slane %v536_v2, 4  ;;  %v629_v28 = vsel %vm11847_vm3, %v627_v54, %v628_v62  ;;  %v666_v37 = vmax.bf16 %v630_v10, %v575_v55 }
  0xb4   : > { %1260 = vst.msk [vmem:[#allocation2 + $0x40] sm:$0xf] %vm450_vm0, %v1208_v29  ;;  %v633_v18 = vsel %vm11847_vm3, %v631_v27, %v632_v8  ;;  %v665_v45 = vmax.bf16 %v629_v28, %v574_v42  ;;  %v696_v40 = vmax.bf16 %v12006_v32, %v664_v39  ;;  %v748_v11 = vshll.u32 %v12152_v1, 16  ;;  %10427 = vmatpush3.bf16.msra.mxu0 %v11886_v9  ;;  %v908_v27 = vld [vmem:[#allocation2 + $0x64] sm:$0xf] }
  0xb5   : > { %v576_v36 = vmax.bf16 %v537_v13, %v12119_v23  ;;  %v698_v38 = vmax.bf16 %v12041_v15, %v666_v37  ;;  %v751_v41 = vshrl.u32 %v12152_v1, 16  ;;  %v757_v48 = vshll.u32 %v683_v44, 16  ;;  %10428 = vmatprep.subr.bf16.mxu0 %v11316_v56 }
  0xb6   : > { %v697_v60 = vmax.bf16 %v12152_v1, %v665_v45  ;;  %v750_v17 = vrot.slane %v748_v11, 5  ;;  %v760_v19 = vshrl.u32 %v683_v44, 16  ;;  %v850_v32 = vrot.slane %v12152_v1, 5 }
  0xb7   : > { %v667_v42 = vmax.bf16 %v633_v18, %v576_v36  ;;  %v753_v14 = vrot.slane %v751_v41, 4  ;;  %v759_v55 = vrot.slane %v757_v48, 5  ;;  %v852_v9 = vrot.slane %v12021_v58, 5 }
  0xb8   : > { %v762_v23 = vrot.slane %v760_v19, 4  ;;  %v800_v25 = vmax.bf16 %v750_v17, %v696_v40  ;;  %v851_v15 = vrot.slane %v850_v32, 4  ;;  %v854_v51 = vrot.slane %v683_v44, 5  ;;  %10429 = vmatpush3.bf16.msra.mxu0 %v11316_v56 }
  0xb9   : > { %v699_v62 = vmax.bf16 %v683_v44, %v667_v42  ;;  %v754_v10 = vor.u32 %v753_v14, %v750_v17  ;;  %v802_v33 = vmax.bf16 %v759_v55, %v698_v38  ;;  %v856_v52 = vrot.slane %v12080_v57, 5  ;;  %10438 = vmatprep.subr.bf16.mxu0 %v12179_v30 }
  0xba   : > { %v12186_v2 = vld [vmem:[#allocation2 + $0x34] sm:$0xf]  ;;  %v763_v1 = vor.u32 %v762_v23, %v759_v55  ;;  %v853_v54 = vsel %vm11847_vm3, %v851_v15, %v852_v9  ;;  %v855_v58 = vrot.slane %v854_v51, 4  ;;  %v888_v22 = vmax.bf16 %v850_v32, %v800_v25 }
  0xbb   : > { %v12190_v8 = vld [vmem:[#allocation2 + $0x40] sm:$0xf]  ;;  %v755_v39 = vrot.slane %v754_v10, 4  ;;  %v890_v56 = vmax.bf16 %v854_v51, %v802_v33  ;;  %v973_v44 = vshll.u32 %v906_v43, 16  ;;  %v976_v29 = vshrl.u32 %v906_v43, 16 }
  0xbc   : > { %v9534_v57 = vcombine.low %v12186_v2, %v12190_v8  ;;  %v764_v13 = vrot.slane %v763_v1, 4  ;;  %v857_v28 = vsel %vm11847_vm3, %v855_v58, %v856_v52  ;;  %v921_v37 = vmax.bf16 %v12047_v0, %v888_v22 }
  0xbd   : > { %v801_v18 = vmax.bf16 %v755_v39, %v697_v60  ;;  %v923_v45 = vmax.bf16 %v12115_v53, %v890_v56  ;;  %v975_v40 = vrot.slane %v973_v44, 5  ;;  %v978_v11 = vrot.slane %v976_v29, 4  ;;  %v1272_v60 = vld [vmem:[#allocation2 + $0x30] sm:$0x8]  ;;  %v12207_v29 = vld [vmem:[#allocation2 + $0x58] sm:$0xf] }
  0xbe   : > { %10410 = vmatprep.mubr.msk.bf16.mxu1 %vm1424_vm7, %v9534_v57  ;;  %v803_v36 = vmax.bf16 %v764_v13, %v699_v62  ;;  %v982_v38 = vshll.u32 %v908_v27, 16  ;;  %v985_v41 = vshrl.u32 %v908_v27, 16  ;;  %v1075_v48 = vrot.slane %v906_v43, 5 }
  0xbf   : > { %v889_v17 = vmax.bf16 %v853_v54, %v801_v18  ;;  %v979_v19 = vor.u32 %v978_v11, %v975_v40  ;;  %v1025_v32 = vmax.bf16 %v975_v40, %v921_v37  ;;  %v1077_v42 = vrot.slane %v12082_v16, 5  ;;  %v1274_v16 = vld [vmem:[#allocation2 + $0x3c] sm:$0x8] }
  0xc0   : > { %v891_v14 = vmax.bf16 %v857_v28, %v803_v36  ;;  %v984_v55 = vrot.slane %v982_v38, 5  ;;  %v987_v9 = vrot.slane %v985_v41, 4  ;;  %v1076_v0 = vrot.slane %v1075_v48, 4  ;;  %v1276_v36 = vld [vmem:[#allocation2 + $0x48] sm:$0x8] }
  0xc1   : > { %v922_v23 = vmax.bf16 %v906_v43, %v889_v17  ;;  %v980_v53 = vrot.slane %v979_v19, 4  ;;  %v1079_v25 = vrot.slane %v908_v27, 5  ;;  %v1081_v15 = vrot.slane %v12121_v59, 5  ;;  %v1278_v17 = vld [vmem:[#allocation2 + $0x54] sm:$0x8] }
  0xc2   : > { %v924_v51 = vmax.bf16 %v908_v27, %v891_v14  ;;  %v988_v62 = vor.u32 %v987_v9, %v984_v55  ;;  %v1027_v10 = vmax.bf16 %v984_v55, %v923_v45  ;;  %v1078_v33 = vsel %vm11847_vm3, %v1076_v0, %v1077_v42 }
  0xc3   : > { %v1026_v52 = vmax.bf16 %v980_v53, %v922_v23  ;;  %v1080_v1 = vrot.slane %v1079_v25, 4  ;;  %v1113_v54 = vmax.bf16 %v1075_v48, %v1025_v32  ;;  %v1333_v58 = vshrl.u32 %v1272_v60, 16  ;;  %v1603_v23 = vld [vmem:[#allocation2 + $0x4] sm:$0xf]  ;;  %v1604_v53 = vld [vmem:[#allocation2 + $0x8] sm:$0x1] }
  0xc4   : > { %v989_v22 = vrot.slane %v988_v62, 4  ;;  %v1115_v39 = vmax.bf16 %v1079_v25, %v1027_v10  ;;  %v1338_v56 = vshrl.u32 %v12186_v2, 16  ;;  %v1341_v43 = vshll.u32 %v12186_v2, 16  ;;  %v1605_v10 = vld [vmem:[#allocation2 + $0x10] sm:$0xf] }
  0xc5   : > { %v1082_v59 = vsel %vm11847_vm3, %v1080_v1, %v1081_v15  ;;  %v1114_v27 = vmax.bf16 %v1078_v33, %v1026_v52  ;;  %v1210_v44 = vshrl.u32 %v1113_v54, 16  ;;  %v9528_v13 = vrot.slane %v1333_v58, 11  ;;  %v1606_v54 = vld [vmem:[#allocation2 + $0x14] sm:$0x1] }
  0xc6   : > { %v1028_v57 = vmax.bf16 %v989_v22, %v924_v51  ;;  %v1340_v28 = vrot.slane %v1338_v56, 7  ;;  %v1346_v37 = vshrl.u32 %v1274_v16, 16  ;;  %v1223_v40 = vshrl.u32 %v1115_v39, 16  ;;  %v1607_v22 = vld [vmem:[#allocation2 + $0x1c] sm:$0xf] }
  0xc7   : > { %v1215_v18 = vshrl.u32 %v1114_v27, 16  ;;  %v1218_v45 = vshll.u32 %v1114_v27, 16  ;;  %v1351_v11 = vshrl.u32 %v12190_v8, 16  ;;  %v9521_v41 = vrot.slane %v1210_v44, 11  ;;  %v1608_v27 = vld [vmem:[#allocation2 + $0x20] sm:$0x1] }
  0xc8   : > { %v1116_v38 = vmax.bf16 %v1082_v59, %v1028_v57  ;;  %v1343_v2 = vor.u32 %v1341_v43, %v1340_v28  ;;  %v9529_v48 = vrot.slane %v1346_v37, 11  ;;  %v1354_v42 = vshll.u32 %v12190_v8, 16  ;;  %v1609_v37 = vld [vmem:[#allocation2 + $0x28] sm:$0xf] }
  0xc9   : > { %v1217_v19 = vrot.slane %v1215_v18, 7  ;;  %v1353_v32 = vrot.slane %v1351_v11, 7  ;;  %v539_v14 = vshll.u32 %v12207_v29, 16  ;;  %v542_v60 = vshrl.u32 %v12207_v29, 16  ;;  %v1610_v11 = vld [vmem:[#allocation2 + $0x2c] sm:$0x1] }
  0xca   : > { %v1228_v55 = vshrl.u32 %v1116_v38, 16  ;;  %v1231_v9 = vshll.u32 %v1116_v38, 16  ;;  %v1344_v0 = vsel %vm11967_vm6, %v9528_v13, %v1343_v2  ;;  %v1359_v62 = vshrl.u32 %v1276_v36, 16 }
  0xcb   : > { %v1220_v25 = vor.u32 %v1218_v45, %v1217_v19  ;;  %v1356_v15 = vor.u32 %v1354_v42, %v1353_v32  ;;  %v12215_v51 = vrot.slane %v539_v14, 5  ;;  %v9522_v33 = vrot.slane %v1223_v40, 11 }
  0xcc   : > { %v1230_v52 = vrot.slane %v1228_v55, 7  ;;  %v544_v8 = vrot.slane %v542_v60, 4  ;;  %v1372_v1 = vshrl.u32 %v1278_v17, 16  ;;  %vm1619_vm8 = vsmask.f32 3328 }
  0xcd   : > { %v1221_v16 = vsel %vm11967_vm6, %v9521_v41, %v1220_v25  ;;  %v1357_v58 = vsel %vm11967_vm6, %v9529_v48, %v1356_v15  ;;  %v577_v43 = vmax.bf16 %v12215_v51, %v12049_v20  ;;  %v12224_v59 = vrot.slane %v1359_v62, 11 }
  0xce   : > { %v1233_v39 = vor.u32 %v1231_v9, %v1230_v52  ;;  %1261 = vst.msk [vmem:[#allocation2 + $0x4c] sm:$0xf] %vm450_vm0, %v1221_v16  ;;  %v9544_v56 = vcombine.low %v1344_v0, %v1357_v58  ;;  %v545_v44 = vor.u32 %v544_v8, %v12215_v51  ;;  %v1623_v57 = vshrl.u32 %v1603_v23, 16  ;;  %v1611_v0 = vld [vmem:[#allocation2 + $0x34] sm:$0xf] }
  0xcf   : > { %v1626_v13 = vshll.u32 %v1603_v23, 16  ;;  %v1632_v28 = vshll.u32 %v1604_v53, 16  ;;  %vm1620_vm9 = vsmask.f32 7440  ;;  %v1637_v45 = vshrl.u32 %v1605_v10, 16 }
  0xd0   : > { %v1234_v18 = vsel %vm11967_vm6, %v9522_v33, %v1233_v39  ;;  %10422 = vmatprep.mubr.msk.bf16.mxu0 %vm1424_vm7, %v9544_v56  ;;  %v1640_v40 = vshll.u32 %v1605_v10, 16  ;;  %v12231_v36 = vrot.slane %v1372_v1, 11  ;;  %v1625_v38 = vrot.slane %v1623_v57, 4  ;;  %vm12235_vm10 = vmor %vm1619_vm8, %vm1620_vm9  ;;  %v1612_v57 = vld [vmem:[#allocation2 + $0x38] sm:$0x1] }
  0xd1   : > { %1262 = vst.msk [vmem:[#allocation2 + $0x58] sm:$0xf] %vm450_vm0, %v1234_v18  ;;  %v1628_v41 = vrot.slane %v1626_v13, 5  ;;  %v1646_v2 = vshll.u32 %v1606_v54, 16  ;;  %v1634_v48 = vrot.slane %v1632_v28, 5  ;;  %v1639_v17 = vrot.slane %v1637_v45, 4 }
  0xd2   : > { %v1642_v19 = vrot.slane %v1640_v40, 5  ;;  %v1651_v32 = vshrl.u32 %v1607_v22, 16  ;;  %v1654_v55 = vshll.u32 %v1607_v22, 16  ;;  %v1660_v9 = vshll.u32 %v1608_v27, 16  ;;  %v1613_v13 = vld [vmem:[#allocation2 + $0x40] sm:$0xf] }
  0xd3   : > { %v1629_v42 = vor.u32 %v1628_v41, %v1625_v38  ;;  %v1648_v14 = vrot.slane %v1646_v2, 5  ;;  %v1665_v25 = vshrl.u32 %v1609_v37, 16  ;;  %v1668_v15 = vshll.u32 %v1609_v37, 16 }
  0xd4   : > { %v1643_v23 = vor.u32 %v1642_v19, %v1639_v17  ;;  %v1653_v53 = vrot.slane %v1651_v32, 4  ;;  %v12239_v10 = vrot.slane %v545_v44, 4  ;;  %v1656_v52 = vrot.slane %v1654_v55, 5 }
  0xd5   : > { %v1277_v62 = vld [vmem:[#allocation2 + $0x4c] sm:$0xf]  ;;  %v1630_v33 = vrot.slane %v1629_v42, 4  ;;  %v1674_v8 = vshll.u32 %v1610_v11, 16  ;;  %v1667_v58 = vrot.slane %v1665_v25, 4  ;;  %v1662_v56 = vrot.slane %v1660_v9, 5 }
  0xd6   : > { %v1364_v1 = vshrl.u32 %v1277_v62, 16  ;;  %v1367_v54 = vshll.u32 %v1277_v62, 16  ;;  %v1644_v16 = vrot.slane %v1643_v23, 4  ;;  %v1657_v39 = vor.u32 %v1656_v52, %v1653_v53  ;;  %v1614_v42 = vld [vmem:[#allocation2 + $0x44] sm:$0x1] }
  0xd7   : > { %v1635_v22 = vsel %vm12235_vm10, %v1630_v33, %v1634_v48  ;;  %v1670_v27 = vrot.slane %v1668_v15, 5  ;;  %v1676_v18 = vrot.slane %v1674_v8, 5  ;;  %v1679_v45 = vshrl.u32 %v1611_v0, 16 }
  0xd8   : > { %v1279_v28 = vld [vmem:[#allocation2 + $0x58] sm:$0xf]  ;;  %v1366_v37 = vrot.slane %v1364_v1, 7  ;;  %v1649_v44 = vsel %vm12235_vm10, %v1644_v16, %v1648_v14  ;;  %v9641_v41 = vcombine.low %v11869_v50, %v11820_v5  ;;  %v1658_v48 = vrot.slane %v1657_v39, 4 }
  0xd9   : > { %v9535_v40 = vcombine.low %v1277_v62, %v1279_v28  ;;  %v1377_v11 = vshrl.u32 %v1279_v28, 16  ;;  %v1380_v38 = vshll.u32 %v1279_v28, 16  ;;  %v1671_v17 = vor.u32 %v1670_v27, %v1667_v58  ;;  %v1615_v62 = vld [vmem:[#allocation2 + $0x4c] sm:$0xf] }
  0xda   : > { %v1369_v2 = vor.u32 %v1367_v54, %v1366_v37  ;;  %v1681_v19 = vrot.slane %v1679_v45, 4  ;;  %v1682_v55 = vshll.u32 %v1611_v0, 16  ;;  %v1688_v9 = vshll.u32 %v1612_v57, 16  ;;  %v1616_v54 = vld [vmem:[#allocation2 + $0x50] sm:$0x1] }
  0xdb   : > { %10411 = vmatmul.mubr.msk.bf16.gmra.mrb[4].mxu1 %vm1424_vm7, %v9535_v40  ;;  %v1379_v32 = vrot.slane %v1377_v11, 7  ;;  %v1693_v23 = vshrl.u32 %v1613_v13, 16  ;;  %v9552_v53 = vcombine.low %v1635_v22, %v1649_v44  ;;  %v1672_v25 = vrot.slane %v1671_v17, 4 }
  0xdc   : > { %v1370_v14 = vsel %vm11967_vm6, %v12224_v59, %v1369_v2  ;;  %3159 = vmatprep.mubr.bf16.mxu1 %v11619_v12  ;;  %v1696_v15 = vshll.u32 %v1613_v13, 16  ;;  %v1663_v52 = vsel %vm12235_vm10, %v1658_v48, %v1662_v56  ;;  %v1684_v8 = vrot.slane %v1682_v55, 5  ;;  %v1617_v59 = vld [vmem:[#allocation2 + $0x58] sm:$0xf]  ;;  %v1618_v13 = vld [vmem:[#allocation2 + $0x5c] sm:$0x1] }
  0xdd   : > { %v1382_v33 = vor.u32 %v1380_v38, %v1379_v32  ;;  %v1695_v1 = vrot.slane %v1693_v23, 4  ;;  %v1677_v0 = vsel %vm12235_vm10, %v1672_v25, %v1676_v18  ;;  %v1690_v16 = vrot.slane %v1688_v9, 5  ;;  %v1847_v2 = vld [vmem:[#allocation2 + $0xc] sm:$0x8]  ;;  %v12270_v25 = vld [vmem:[#allocation2 + $0x1c] sm:$0xf] }
  0xde   : > { %v1698_v58 = vrot.slane %v1696_v15, 5  ;;  %v1702_v39 = vshll.u32 %v1614_v42, 16  ;;  %v1685_v27 = vor.u32 %v1684_v8, %v1681_v19  ;;  %v636_v57 = vrot.slane %v12084_v31, 5  ;;  %v12261_v19 = vld [vmem:[#allocation2 + $0x10] sm:$0xf] }
  0xdf   : > { %v1383_v22 = vsel %vm11967_vm6, %v12231_v36, %v1382_v33  ;;  %v1707_v28 = vshrl.u32 %v1615_v62, 16  ;;  %v1710_v45 = vshll.u32 %v1615_v62, 16  ;;  %v1716_v18 = vshll.u32 %v1616_v54, 16  ;;  %v12275_v33 = vld [vmem:[#allocation2 + $0x28] sm:$0xf] }
  0xe0   : > { %v9545_v56 = vcombine.low %v1370_v14, %v1383_v22  ;;  %v1699_v37 = vor.u32 %v1698_v58, %v1695_v1  ;;  %v1704_v44 = vrot.slane %v1702_v39, 5  ;;  %v1686_v40 = vrot.slane %v1685_v27, 4  ;;  %v1849_v14 = vld [vmem:[#allocation2 + $0x18] sm:$0x8]  ;;  %v1853_v54 = vld [vmem:[#allocation2 + $0x30] sm:$0x8] }
  0xe1   : > { %v1709_v11 = vrot.slane %v1707_v28, 4  ;;  %v1721_v38 = vshrl.u32 %v1617_v59, 16  ;;  %v1712_v17 = vrot.slane %v1710_v45, 5  ;;  %v1724_v32 = vshll.u32 %v1617_v59, 16 }
  0xe2   : > { %10423 = vmatmul.mubr.msk.bf16.gmra.mrb[4].mxu0 %vm1424_vm7, %v9545_v56  ;;  %v1700_v48 = vrot.slane %v1699_v37, 4  ;;  %v1730_v36 = vshll.u32 %v1618_v13, 16  ;;  %v9553_v42 = vcombine.low %v1663_v52, %v1677_v0  ;;  %v1691_v55 = vsel %vm12235_vm10, %v1686_v40, %v1690_v16  ;;  %v12279_v0 = vld [vmem:[#allocation2 + $0x34] sm:$0xf]  ;;  %v1855_v40 = vld [vmem:[#allocation2 + $0x3c] sm:$0x8] }
  0xe3   : > { %9648 = vmatmul.mubr.msk.bf16.vlgmr.msra.gmra.mrb[8].mxu1 %vm1424_vm7, %v9640_v21  ;;  %10430 = vmatprep.mubr.msk.bf16.mxu0 %vm1424_vm7, %v9552_v53  ;;  %v1718_v9 = vrot.slane %v1716_v18, 5  ;;  %v1723_v23 = vrot.slane %v1721_v38, 4  ;;  %v1713_v62 = vor.u32 %v1712_v17, %v1709_v11  ;;  %v1726_v3 = vrot.slane %v1724_v32, 5  ;;  %v1851_v21 = vld [vmem:[#allocation2 + $0x24] sm:$0x8]  ;;  %v11318_v18 = vld [vmem:[#allocation6 + $0x38] sm:$0xff]  }
  0xe4   : > { %3169 = vmatprep.mubr.bf16.mxu1 %v11619_v12  ;;  %v1705_v15 = vsel %vm12235_vm10, %v1700_v48, %v1704_v44  ;;  %v1732_v4 = vrot.slane %v1730_v36, 5  ;;  %v1864_v52 = vshrl.u32 %v1847_v2, 16  ;;  %v1869_v8 = vshrl.u32 %v12261_v19, 16  ;;  %v12285_v11 = vld [vmem:[#allocation2 + $0x40] sm:$0xf] }
  0xe5   : > { %v9554_v53 = vcombine.low %v1691_v55, %v1705_v15  ;;  %v1872_v1 = vshll.u32 %v12261_v19, 16  ;;  %v1714_v16 = vrot.slane %v1713_v62, 4  ;;  %v1727_v58 = vor.u32 %v1726_v3, %v1723_v23  ;;  %v1857_v32 = vld [vmem:[#allocation2 + $0x48] sm:$0x8]  ;;  %v12291_v36 = vld [vmem:[#allocation2 + $0x4c] sm:$0xf] }
  0xe6   : > { %v1877_v39 = vshrl.u32 %v1849_v14, 16  ;;  %v1882_v59 = vshrl.u32 %v12270_v25, 16  ;;  %v9562_v22 = vrot.slane %v1864_v52, 11  ;;  %v1871_v27 = vrot.slane %v1869_v8, 7 }
  0xe7   : > { %v1885_v13 = vshll.u32 %v12270_v25, 16  ;;  %v1890_v28 = vshrl.u32 %v1851_v21, 16  ;;  %v1719_v56 = vsel %vm12235_vm10, %v1714_v16, %v1718_v9  ;;  %v1728_v37 = vrot.slane %v1727_v58, 4  ;;  %v685_v21 = vld [vmem:[#allocation2 + $0x64] sm:$0xf] }
  0xe8   : > { %v9563_v44 = vrot.slane %v1877_v39, 11  ;;  %v1884_v45 = vrot.slane %v1882_v59, 7  ;;  %v1874_v38 = vor.u32 %v1872_v1, %v1871_v27  ;;  %v1895_v48 = vshrl.u32 %v12275_v33, 16 }
  0xe9   : > { %v12287_v2 = vrot.slane %v1890_v28, 11  ;;  %v1898_v17 = vshll.u32 %v12275_v33, 16  ;;  %v1733_v55 = vsel %vm12235_vm10, %v1728_v37, %v1732_v4  ;;  %v1903_v23 = vshrl.u32 %v1853_v54, 16  ;;  %v12307_v4 = vld [vmem:[#allocation6 + $0x40] sm:$0xff]  }
  0xea   : > { %10431 = vmatmul.mubr.msk.bf16.vlgmr.msra.gmra.mrb[0].mxu0 %vm1424_vm7, %v9553_v42  ;;  %v1887_v9 = vor.u32 %v1885_v13, %v1884_v45  ;;  %v1908_v14 = vshrl.u32 %v12279_v0, 16  ;;  %v578_v15 = vmax.bf16 %v12239_v10, %v12207_v29  ;;  %v9642_v42 = vcombine.low %v11924_v63, %v11823_v6 }
  0xeb   : > { %9649 = vmatmul.mubr.msk.bf16.gmra.mrb[12].mxu1 %vm1424_vm7, %v9641_v41  ;;  %10434 = vmatprep.mubr.msk.bf16.mxu0 %vm1424_vm7, %v9554_v53  ;;  %v1897_v62 = vrot.slane %v1895_v48, 7  ;;  %v1911_v3 = vshll.u32 %v12279_v0, 16  ;;  %v1875_v10 = vsel %vm11967_vm6, %v9562_v22, %v1874_v38  ;;  %v9565_v50 = vrot.slane %v1903_v23, 11 }
  0xec   : > { %3179 = vmatprep.mubr.bf16.mxu1 %v11619_v12  ;;  %10439 = vmatpush3.bf16.msra.mxu0 %v12179_v30  ;;  %v1888_v5 = vsel %vm11967_vm6, %v9563_v44, %v1887_v9  ;;  %v1910_v41 = vrot.slane %v1908_v14, 7  ;;  %v9555_v53 = vcombine.low %v1719_v56, %v1733_v55  ;;  %v1916_v63 = vshrl.u32 %v1855_v40, 16 }
  0xed   : > { %10440 = vmatprep.subr.bf16.mxu0 %v11318_v18  ;;  %v1900_v6 = vor.u32 %v1898_v17, %v1897_v62  ;;  %v1921_v52 = vshrl.u32 %v12285_v11, 16  ;;  %v1924_v1 = vshll.u32 %v12285_v11, 16  ;;  %v1929_v54 = vshrl.u32 %v1857_v32, 16 }
  0xee   : > { %v1913_v8 = vor.u32 %v1911_v3, %v1910_v41  ;;  %v1934_v30 = vshrl.u32 %v12291_v36, 16  ;;  %v9570_v16 = vcombine.low %v1875_v10, %v1888_v5  ;;  %v9566_v58 = vrot.slane %v1916_v63, 11 }
  0xef   : > { %v1923_v39 = vrot.slane %v1921_v52, 7  ;;  %v1937_v59 = vshll.u32 %v12291_v36, 16  ;;  %v1901_v22 = vsel %vm11967_vm6, %v12287_v2, %v1900_v6  ;;  %v9567_v27 = vrot.slane %v1929_v54, 11  ;;  %v12357_v54 = vld [vmem:[#allocation6 + $0x50] sm:$0xff]  }
  0xf0   : > { %10441 = vmatpush3.bf16.msra.mxu0 %v11318_v18  ;;  %v1936_v13 = vrot.slane %v1934_v30, 7  ;;  %v634_v28 = vrot.slane %v12207_v29, 5  ;;  %v1914_v56 = vsel %vm11967_vm6, %v9565_v50, %v1913_v8  ;;  %v766_v44 = vshll.u32 %v685_v21, 16 }
  0xf1   : > { %v1926_v37 = vor.u32 %v1924_v1, %v1923_v39  ;;  %v769_v45 = vshrl.u32 %v685_v21, 16  ;;  %10450 = vmatprep.subr.bf16.mxu0 %v12307_v4  ;;  %v858_v2 = vrot.slane %v685_v21, 5  ;;  %v860_v32 = vrot.slane %v12127_v61, 5 }
  0xf2   : > { %10435 = vmatmul.mubr.msk.bf16.gmra.mrb[4].mxu0 %vm1424_vm7, %v9555_v53  ;;  %v1939_v40 = vor.u32 %v1937_v59, %v1936_v13  ;;  %v635_v18 = vrot.slane %v634_v28, 4  ;;  %v668_v38 = vmax.bf16 %v634_v28, %v577_v43  ;;  %v768_v48 = vrot.slane %v766_v44, 5  ;;  %v2203_v44 = vld [vmem:[#allocation2 + $0x1c] sm:$0xf] }
  0xf3   : > { %9650 = vmatmul.mubr.msk.bf16.gmra.mrb[16].mxu1 %vm1424_vm7, %v9642_v42  ;;  %10442 = vmatprep.mubr.msk.bf16.mxu0 %vm1424_vm7, %v9570_v16  ;;  %v1927_v29 = vsel %vm11967_vm6, %v9566_v58, %v1926_v37  ;;  %v771_v17 = vrot.slane %v769_v45, 4  ;;  %v859_v43 = vrot.slane %v858_v2, 4  ;;  %v9643_v9 = vcombine.low %v11989_v34, %v11826_v7  ;;  %v11320_v34 = vld [vmem:[#allocation6 + $0x48] sm:$0xff]  }
  0xf4   : > { %3189 = vmatprep.mubr.bf16.mxu1 %v11619_v12  ;;  %v1940_v55 = vsel %vm11967_vm6, %v9567_v27, %v1939_v40  ;;  %v637_v20 = vsel %vm11847_vm3, %v635_v18, %v636_v57  ;;  %v700_v51 = vmax.bf16 %v12123_v35, %v668_v38  ;;  %v991_v61 = vshll.u32 %v12135_v46, 16  ;;  %v2202_v40 = vld [vmem:[#allocation2 + $0x14] sm:$0x1] }
  0xf5   : > { %v669_v23 = vmax.bf16 %v637_v20, %v578_v15  ;;  %v772_v14 = vor.u32 %v771_v17, %v768_v48  ;;  %v9571_v42 = vcombine.low %v1901_v22, %v1914_v56  ;;  %v994_v62 = vshrl.u32 %v12135_v46, 16  ;;  %v12362_v22 = vld [vmem:[#allocation2 + $0x58] sm:$0xf]  ;;  %v1861_v56 = vld [vmem:[#allocation2 + $0x60] sm:$0x8] }
  0xf6   : > { %v804_v12 = vmax.bf16 %v768_v48, %v700_v51  ;;  %v1083_v3 = vrot.slane %v12135_v46, 5  ;;  %v9572_v31 = vcombine.low %v1927_v29, %v1940_v55  ;;  %v993_v57 = vrot.slane %v991_v61, 5  ;;  %v2207_v55 = vld [vmem:[#allocation2 + $0x34] sm:$0xf]  ;;  %v2209_v51 = vld [vmem:[#allocation2 + $0x40] sm:$0xf] }
  0xf7   : > { %v701_v10 = vmax.bf16 %v685_v21, %v669_v23  ;;  %v773_v5 = vrot.slane %v772_v14, 4  ;;  %v861_v35 = vsel %vm11847_vm3, %v859_v43, %v860_v32  ;;  %v996_v41 = vrot.slane %v994_v62, 4  ;;  %v2205_v32 = vld [vmem:[#allocation2 + $0x28] sm:$0xf]  ;;  %v2204_v61 = vld [vmem:[#allocation2 + $0x20] sm:$0x1] }
  0xf8   : > { %v892_v50 = vmax.bf16 %v858_v2, %v804_v12  ;;  %v1084_v6 = vrot.slane %v1083_v3, 4  ;;  %v1085_v63 = vrot.slane %v12139_v47, 5  ;;  %v1947_v28 = vshrl.u32 %v12362_v22, 16 }
  0xf9   : > { %v805_v7 = vmax.bf16 %v773_v5, %v701_v10  ;;  %v997_v53 = vor.u32 %v996_v41, %v993_v57  ;;  %v1950_v38 = vshll.u32 %v12362_v22, 16  ;;  %v1955_v2 = vshrl.u32 %v1861_v56, 16 }
  0xfa   : > { %10443 = vmatmul.mubr.msk.bf16.vlgmr.msra.gmra.mrb[0].mxu0 %vm1424_vm7, %v9571_v42  ;;  %v925_v15 = vmax.bf16 %v12132_v26, %v892_v50  ;;  %v1086_v26 = vsel %vm11847_vm3, %v1084_v6, %v1085_v63  ;;  %v1949_v18 = vrot.slane %v1947_v28, 7  ;;  %v2218_v29 = vshrl.u32 %v2201_v24, 16 }
  0xfb   : > { %9651 = vmatmul.mubr.msk.bf16.gmra.mrb[20].mxu1 %vm1424_vm7, %v9643_v9  ;;  %10446 = vmatprep.mubr.msk.bf16.mxu0 %vm1424_vm7, %v9572_v31  ;;  %v893_v21 = vmax.bf16 %v861_v35, %v805_v7  ;;  %v998_v52 = vrot.slane %v997_v53, 4  ;;  %v2221_v48 = vshll.u32 %v2201_v24, 16  ;;  %v2232_v17 = vshrl.u32 %v2203_v44, 16  ;;  %v2211_v9 = vld [vmem:[#allocation2 + $0x4c] sm:$0xf] }
  0xfc   : > { %v1029_v8 = vmax.bf16 %v993_v57, %v925_v15  ;;  %10451 = vmatpush3.bf16.msra.mxu0 %v12307_v4  ;;  %v2235_v20 = vshll.u32 %v2203_v44, 16  ;;  %v1952_v23 = vor.u32 %v1950_v38, %v1949_v18  ;;  %v9569_v14 = vrot.slane %v1955_v2, 11  ;;  %v2206_v31 = vld [vmem:[#allocation2 + $0x2c] sm:$0x1]  ;;  %v2213_v53 = vld [vmem:[#allocation2 + $0x58] sm:$0xf] }
  0xfd   : > { %v926_v1 = vmax.bf16 %v12135_v46, %v893_v21  ;;  %10452 = vmatprep.subr.bf16.mxu0 %v11320_v34  ;;  %v1859_v46 = vld [vmem:[#allocation2 + $0x54] sm:$0x8]  ;;  %v2220_v42 = vrot.slane %v2218_v29, 4  ;;  %v2227_v12 = vshll.u32 %v2202_v40, 16  ;;  %v2223_v62 = vrot.slane %v2221_v48, 5 }
  0xfe   : > { %v1117_v30 = vmax.bf16 %v1083_v3, %v1029_v8  ;;  %v1942_v45 = vshrl.u32 %v1859_v46, 16  ;;  %v2234_v3 = vrot.slane %v2232_v17, 4  ;;  %v2237_v5 = vrot.slane %v2235_v20, 5 }
  0xff   : > { %v1030_v16 = vmax.bf16 %v998_v52, %v926_v1  ;;  %v2246_v57 = vshrl.u32 %v2205_v32, 16  ;;  %v2249_v35 = vshll.u32 %v2205_v32, 16  ;;  %v2260_v50 = vshrl.u32 %v2207_v55, 16 }
 0x100   : > { %10453 = vmatpush3.bf16.msra.mxu0 %v11320_v34  ;;  %v1236_v58 = vshrl.u32 %v1117_v30, 16  ;;  %v9568_v43 = vrot.slane %v1942_v45, 11  ;;  %v2263_v34 = vshll.u32 %v2207_v55, 16  ;;  %v2274_v15 = vshrl.u32 %v2209_v51, 16  ;;  %v12385_v55 = vld [vmem:[#allocation2 + $0x1c] sm:$0xf] }
 0x101   : > { %v1118_v47 = vmax.bf16 %v1086_v26, %v1030_v16  ;;  %10462 = vmatprep.subr.bf16.mxu0 %v12357_v54  ;;  %v2277_v63 = vshll.u32 %v2209_v51, 16  ;;  %v2288_v21 = vshrl.u32 %v2211_v9, 16  ;;  %v2291_v52 = vshll.u32 %v2211_v9, 16  ;;  %v2208_v16 = vld [vmem:[#allocation2 + $0x38] sm:$0x1] }
 0x102   : > { %v9523_v4 = vrot.slane %v1236_v58, 11  ;;  %v1953_v6 = vsel %vm11967_vm6, %v9568_v43, %v1952_v23  ;;  %v2224_v1 = vor.u32 %v2223_v62, %v2220_v42  ;;  %v12375_v26 = vrot.slane %v2227_v12, 5  ;;  %v2214_v9 = vld [vmem:[#allocation2 + $0x5c] sm:$0x1] }
 0x103   : > { %v1241_v39 = vshrl.u32 %v1118_v47, 16  ;;  %v1244_v59 = vshll.u32 %v1118_v47, 16  ;;  %v2241_v30 = vshll.u32 %v2204_v61, 16  ;;  %v2248_v47 = vrot.slane %v2246_v57, 4  ;;  %v2442_v61 = vld [vmem:[#allocation2 + $0x18] sm:$0x8] }
 0x104   : > { %v2251_v58 = vrot.slane %v2249_v35, 5  ;;  %v2265_v28 = vrot.slane %v2263_v34, 5  ;;  %v2276_v56 = vrot.slane %v2274_v15, 4  ;;  %v2279_v24 = vrot.slane %v2277_v63, 5  ;;  %v2216_v35 = vld [vmem:[#allocation2 + $0x68] sm:$0x1] }
 0x105   : > { %v1243_v27 = vrot.slane %v1241_v39, 7  ;;  %v2255_v39 = vshll.u32 %v2206_v31, 16  ;;  %v2293_v44 = vrot.slane %v2291_v52, 5  ;;  %v2302_v45 = vshrl.u32 %v2213_v53, 16  ;;  %v2444_v52 = vld [vmem:[#allocation2 + $0x24] sm:$0x8] }
 0x106   : > { %v9580_v18 = vcombine.low %v12261_v19, %v12270_v25  ;;  %v12381_v38 = vrot.slane %v2224_v1, 4  ;;  %v2305_v2 = vshll.u32 %v2213_v53, 16  ;;  %v12383_v48 = vrot.slane %v2241_v30, 5 }
 0x107   : > { %v1246_v13 = vor.u32 %v1244_v59, %v1243_v27  ;;  %v2262_v59 = vrot.slane %v2260_v50, 4  ;;  %v2212_v27 = vld [vmem:[#allocation2 + $0x50] sm:$0x1]  ;;  %v2252_v17 = vor.u32 %v2251_v58, %v2248_v47  ;;  %v2269_v32 = vshll.u32 %v2208_v16, 16  ;;  %v2446_v16 = vld [vmem:[#allocation2 + $0x30] sm:$0x8] }
 0x108   : > { %v2297_v43 = vshll.u32 %v2212_v27, 16  ;;  %v2280_v19 = vor.u32 %v2279_v24, %v2276_v56  ;;  %v2304_v42 = vrot.slane %v2302_v45, 4  ;;  %v9581_v12 = vcombine.low %v12275_v33, %v12279_v0  ;;  %v11323_v47 = vld [vmem:[#allocation6 + $0x58] sm:$0xff]  }
 0x109   : > { %v1247_v37 = vsel %vm11967_vm6, %v9523_v4, %v1246_v13  ;;  %v2210_v4 = vld [vmem:[#allocation2 + $0x44] sm:$0x1]  ;;  %v2238_v13 = vor.u32 %v2237_v5, %v2234_v3  ;;  %v2266_v20 = vor.u32 %v2265_v28, %v2262_v59  ;;  %v2307_v62 = vrot.slane %v2305_v2, 5  ;;  %v12391_v3 = vld [vmem:[#allocation2 + $0x28] sm:$0xf] }
 0x10a   : > { %1263 = vst.msk [vmem:[#allocation2 + $0x64] sm:$0xf] %vm450_vm0, %v1247_v37  ;;  %v2290_v37 = vrot.slane %v2288_v21, 4  ;;  %v2283_v51 = vshll.u32 %v2210_v4, 16  ;;  %v2464_v31 = vshrl.u32 %v12385_v55, 16  ;;  %v2253_v5 = vrot.slane %v2252_v17, 4 }
 0x10b   : > { %v2257_v57 = vrot.slane %v2255_v39, 5  ;;  %v2271_v34 = vrot.slane %v2269_v32, 5  ;;  %v2299_v53 = vrot.slane %v2297_v43, 5  ;;  %v2311_v21 = vshll.u32 %v2214_v9, 16  ;;  %v12402_v27 = vld [vmem:[#allocation2 + $0x34] sm:$0xf] }
 0x10c   : > { %v2294_v25 = vor.u32 %v2293_v44, %v2290_v37  ;;  %v2285_v15 = vrot.slane %v2283_v51, 5  ;;  %v9582_v33 = vcombine.low %v12285_v11, %v12291_v36  ;;  %v2308_v0 = vor.u32 %v2307_v62, %v2304_v42  ;;  %v2454_v62 = vld [vmem:[#allocation2 + $0x60] sm:$0x8] }
 0x10d   : > { %v2466_v1 = vrot.slane %v2464_v31, 7  ;;  %v2467_v30 = vshll.u32 %v12385_v55, 16  ;;  %v2230_v58 = vsel %vm12235_vm10, %v12381_v38, %v12375_v26  ;;  %v2477_v4 = vshrl.u32 %v12391_v3, 16  ;;  %v2798_v31 = vld [vmem:[#allocation2 + $0x28] sm:$0xf] }
 0x10e   : > { %v2295_v63 = vrot.slane %v2294_v25, 4  ;;  %v2258_v36 = vsel %vm12235_vm10, %v2253_v5, %v2257_v57  ;;  %v2325_v26 = vshll.u32 %v2216_v35, 16  ;;  %v12418_v37 = vrot.slane %v2311_v21, 5  ;;  %v2800_v35 = vld [vmem:[#allocation2 + $0x34] sm:$0xf] }
 0x10f   : > { %v12424_v45 = vrot.slane %v2308_v0, 4  ;;  %v2472_v38 = vshrl.u32 %v2444_v52, 16  ;;  %v2480_v2 = vshll.u32 %v12391_v3, 16  ;;  %v2479_v17 = vrot.slane %v2477_v4, 7  ;;  %v12473_v4 = vld [vmem:[#allocation2 + $0x70] sm:$0xf] }
 0x110   : > { %v2300_v24 = vsel %vm12235_vm10, %v2295_v63, %v2299_v53  ;;  %v2485_v32 = vshrl.u32 %v2446_v16, 16  ;;  %v2490_v43 = vshrl.u32 %v12402_v27, 16  ;;  %v12441_v42 = vrot.slane %v2325_v26, 5 }
 0x111   : > { %v12369_v10 = vld [vmem:[#allocation2 + $0x64] sm:$0xf]  ;;  %v2314_v5 = vsel %vm12235_vm10, %v12424_v45, %v12418_v37  ;;  %v2493_v57 = vshll.u32 %v12402_v27, 16  ;;  %v2537_v16 = vshrl.u32 %v2454_v62, 16  ;;  %vm3305_vm11 = vcmask 519168  }
 0x112   : > { %v1960_v41 = vshrl.u32 %v12369_v10, 16  ;;  %v1963_v7 = vshll.u32 %v12369_v10, 16  ;;  %v2215_v23 = vld [vmem:[#allocation2 + $0x64] sm:$0xf]  ;;  %v2492_v53 = vrot.slane %v2490_v43, 7  ;;  %vm3494_vm12 = vcmask 523264  }
 0x113   : > { %v2316_v50 = vshrl.u32 %v2215_v23, 16  ;;  %vm5294_vm13 = vcmask 781312   ;;  %vm5503_vm14 = vcmask 785408  }
 0x114   : > { %v1962_v8 = vrot.slane %v1960_v41, 7  ;;  %v2319_v41 = vshll.u32 %v2215_v23, 16  ;;  %v2452_v23 = vld [vmem:[#allocation2 + $0x54] sm:$0x8] }
 0x115   : > { %v2318_v39 = vrot.slane %v2316_v50, 4 }
 0x116   : > { %v1965_v46 = vor.u32 %v1963_v7, %v1962_v8  ;;  %v2267_v7 = vrot.slane %v2266_v20, 4  ;;  %v2459_v8 = vshrl.u32 %v2442_v61, 16  ;;  %v2321_v59 = vrot.slane %v2319_v41, 5  ;;  %v12431_v20 = vld [vmem:[#allocation2 + $0x4c] sm:$0xf] }
 0x117   : > { %v2796_v61 = vld [vmem:[#allocation2 + $0x1c] sm:$0xf]  ;;  %v2482_v41 = vor.u32 %v2480_v2, %v2479_v17  ;;  %v2516_v21 = vshrl.u32 %v12431_v20, 16 }
 0x118   : > { %v1966_v40 = vsel %vm11967_vm6, %v9569_v14, %v1965_v46  ;;  %v2239_v14 = vrot.slane %v2238_v13, 4  ;;  %v2448_v46 = vld [vmem:[#allocation2 + $0x3c] sm:$0x8]  ;;  %v12404_v13 = vld [vmem:[#allocation2 + $0x40] sm:$0xf]  ;;  %v2272_v28 = vsel %vm12235_vm10, %v2267_v7, %v2271_v34  ;;  %v12420_v44 = vrot.slane %v2459_v8, 11 }
 0x119   : > { %v9573_v29 = vcombine.low %v1953_v6, %v1966_v40  ;;  %v2281_v6 = vrot.slane %v2280_v19, 4  ;;  %v12426_v40 = vld [vmem:[#allocation6 + $0x60] sm:$0xff]   ;;  %v2503_v9 = vshrl.u32 %v12404_v13, 16  ;;  %v12437_v19 = vcombine.low %v2258_v36, %v2272_v28 }
 0x11a   : > { %v2244_v11 = vsel %vm12235_vm10, %v2239_v14, %v12383_v48  ;;  %v2322_v48 = vor.u32 %v2321_v59, %v2318_v39  ;;  %v9583_v14 = vcombine.low %v12362_v22, %v12369_v10  ;;  %v9601_v10 = vrot.slane %v2472_v38, 11  ;;  %v11325_v38 = vld [vmem:[#allocation6 + $0x68] sm:$0xff]  }
 0x11b   : > { %10447 = vmatmul.mubr.msk.bf16.gmra.mrb[4].mxu0 %vm1424_vm7, %v9573_v29  ;;  %v2286_v56 = vsel %vm12235_vm10, %v2281_v6, %v2285_v15  ;;  %v2450_v29 = vld [vmem:[#allocation2 + $0x48] sm:$0x8]  ;;  %v9590_v51 = vcombine.low %v2230_v58, %v2244_v11  ;;  %v12457_v7 = vrot.slane %v2485_v32, 11  ;;  %v12459_v15 = vld [vmem:[#allocation2 + $0x64] sm:$0xf]  ;;  %v12463_v63 = vrot.slane %v2503_v9, 7 }
 0x11c   : > { %10454 = vmatprep.mubr.msk.bf16.mxu0 %vm1424_vm7, %v9580_v18  ;;  %v12428_v18 = vor.u32 %v2467_v30, %v2466_v1  ;;  %v12439_v25 = vcombine.low %v2286_v56, %v2300_v24  ;;  %v12454_v50 = vrot.slane %v2322_v48, 4  ;;  %v2511_v34 = vshrl.u32 %v2450_v29, 16  ;;  %v2456_v30 = vld [vmem:[#allocation2 + $0x6c] sm:$0x8]  ;;  %v2799_v11 = vld [vmem:[#allocation2 + $0x2c] sm:$0x1] }
 0x11d   : > { %v2506_v52 = vshll.u32 %v12404_v13, 16  ;;  %v2524_v8 = vshrl.u32 %v2452_v23, 16  ;;  %v2816_v0 = vshll.u32 %v2796_v61, 16  ;;  %v2830_v58 = vshll.u32 %v2798_v31, 16  ;;  %v2802_v32 = vld [vmem:[#allocation2 + $0x40] sm:$0xf] }
 0x11e   : > { %v2470_v22 = vsel %vm11967_vm6, %v12420_v44, %v12428_v18  ;;  %v12470_v39 = vrot.slane %v2511_v34, 11  ;;  %v2519_v59 = vshll.u32 %v12431_v20, 16  ;;  %v2841_v36 = vshrl.u32 %v2800_v35, 16  ;;  %v2801_v18 = vld [vmem:[#allocation2 + $0x38] sm:$0x1] }
 0x11f   : > { %v2844_v28 = vshll.u32 %v2800_v35, 16  ;;  %v2328_v26 = vsel %vm12235_vm10, %v12454_v50, %v12441_v42  ;;  %v2483_v56 = vsel %vm11967_vm6, %v9601_v10, %v2482_v41  ;;  %v2518_v24 = vrot.slane %v2516_v21, 7 }
 0x120   : > { %v2542_v44 = vshrl.u32 %v12459_v15, 16  ;;  %v12482_v2 = vrot.slane %v2524_v8, 11  ;;  %v2818_v17 = vrot.slane %v2816_v0, 5  ;;  %v2832_v23 = vrot.slane %v2830_v58, 5  ;;  %v11326_v0 = vld [vmem:[#allocation6 + $0x70] sm:$0xff]  }
 0x121   : > { %v2550_v42 = vshrl.u32 %v2456_v30, 16  ;;  %v2843_v62 = vrot.slane %v2841_v36, 4  ;;  %v2555_v35 = vshrl.u32 %v12473_v4, 16  ;;  %v2836_v41 = vshll.u32 %v2799_v11, 16 }
 0x122   : > { %v2544_v10 = vrot.slane %v2542_v44, 7  ;;  %v9608_v34 = vcombine.low %v2470_v22, %v2483_v56  ;;  %v2558_v21 = vshll.u32 %v12473_v4, 16  ;;  %v2855_v30 = vshrl.u32 %v2802_v32, 16 }
 0x123   : > { %10455 = vmatmul.mubr.msk.bf16.vlgmr.msra.gmra.mrb[0].mxu0 %vm1424_vm7, %v9581_v12  ;;  %v12443_v12 = vld [vmem:[#allocation2 + $0x58] sm:$0xf]  ;;  %v2495_v58 = vor.u32 %v2493_v57, %v2492_v53  ;;  %v2557_v36 = vrot.slane %v2555_v35, 7  ;;  %v9593_v44 = vcombine.low %v2314_v5, %v2328_v26  ;;  %v2508_v57 = vor.u32 %v2506_v52, %v12463_v63  ;;  %v2807_v63 = vld [vmem:[#allocation2 + $0x5c] sm:$0x1] }
 0x124   : > { %10458 = vmatprep.mubr.msk.bf16.mxu0 %vm1424_vm7, %v9582_v33  ;;  %10463 = vmatpush3.bf16.msra.mxu0 %v12357_v54  ;;  %v2498_v54 = vshrl.u32 %v2448_v46, 16  ;;  %v2813_v33 = vshrl.u32 %v2796_v61, 16  ;;  %v2529_v1 = vshrl.u32 %v12443_v12, 16  ;;  %v2797_v46 = vld [vmem:[#allocation2 + $0x20] sm:$0x1]  ;;  %v2532_v29 = vshll.u32 %v12443_v12, 16 }
 0x125   : > { %10464 = vmatprep.subr.bf16.mxu0 %v11323_v47  ;;  %v2804_v61 = vld [vmem:[#allocation2 + $0x4c] sm:$0xf]  ;;  %v2822_v50 = vshll.u32 %v2797_v46, 16  ;;  %v12497_v46 = vld [vmem:[#allocation2 + $0x50] sm:$0x1]  ;;  %v2892_v35 = vshll.u32 %v2807_v63, 16 }
 0x126   : > { %v12461_v6 = vrot.slane %v2498_v54, 11  ;;  %v2815_v48 = vrot.slane %v2813_v33, 4  ;;  %v2531_v43 = vrot.slane %v2529_v1, 7  ;;  %v12485_v54 = vrot.slane %v2537_v16, 11 }
 0x127   : > { %v2850_v33 = vshll.u32 %v2801_v18, 16  ;;  %v2858_v16 = vshll.u32 %v2802_v32, 16  ;;  %v2869_v11 = vshrl.u32 %v2804_v61, 16  ;;  %v2872_v56 = vshll.u32 %v2804_v61, 16  ;;  %v2808_v61 = vld [vmem:[#allocation2 + $0x64] sm:$0xf] }
 0x128   : > { %10465 = vmatpush3.bf16.msra.mxu0 %v11323_v47  ;;  %v2827_v47 = vshrl.u32 %v2798_v31, 16  ;;  %v2846_v31 = vrot.slane %v2844_v28, 5  ;;  %v2819_v8 = vor.u32 %v2818_v17, %v2815_v48  ;;  %v12499_v28 = vrot.slane %v2822_v50, 5 }
 0x129   : > { %10474 = vmatprep.subr.bf16.mxu0 %v12426_v40  ;;  %v12515_v18 = vrot.slane %v2850_v33, 5  ;;  %v2857_v17 = vrot.slane %v2855_v30, 4  ;;  %v2860_v32 = vrot.slane %v2858_v16, 5  ;;  %v2534_v37 = vor.u32 %v2532_v29, %v2531_v43  ;;  %v11335_v33 = vld [vmem:[%s14328_s3 + $0x28] sm:$0xff]   ;;  %v11333_v16 = vld [vmem:[#allocation6 + $0x88] sm:$0xff]  }
 0x12a   : > { %v2829_v9 = vrot.slane %v2827_v47, 4  ;;  %v2847_v22 = vor.u32 %v2846_v31, %v2843_v62  ;;  %v12513_v53 = vrot.slane %v2819_v8, 4  ;;  %v12525_v5 = vrot.slane %v2869_v11, 4  ;;  %v11327_v31 = vld [vmem:[#allocation6 + $0x78] sm:$0xff]  }
 0x12b   : > { %10459 = vmatmul.mubr.msk.bf16.gmra.mrb[4].mxu0 %vm1424_vm7, %v9583_v14  ;;  %v2545_v14 = vshll.u32 %v12459_v15, 16  ;;  %v12527_v52 = vrot.slane %v2872_v56, 5  ;;  %v2878_v26 = vshll.u32 %v12497_v46, 16  ;;  %v2535_v43 = vsel %vm11967_vm6, %v12482_v2, %v2534_v37  ;;  %v2810_v8 = vld [vmem:[#allocation2 + $0x70] sm:$0xf] }
 0x12c   : > { %10466 = vmatprep.mubr.msk.bf16.mxu0 %vm1424_vm7, %v9590_v51  ;;  %v2803_v51 = vld [vmem:[#allocation2 + $0x44] sm:$0x1]  ;;  %v2833_v1 = vor.u32 %v2832_v23, %v2829_v9  ;;  %v2521_v9 = vor.u32 %v2519_v59, %v2518_v24  ;;  %v12523_v45 = vrot.slane %v2847_v22, 4  ;;  %v2496_v59 = vsel %vm11967_vm6, %v12457_v7, %v2495_v58 }
 0x12d   : > { %v2864_v47 = vshll.u32 %v2803_v51, 16  ;;  %v2509_v24 = vsel %vm11967_vm6, %v12461_v6, %v2508_v57  ;;  %v2547_v62 = vor.u32 %v2545_v14, %v2544_v10  ;;  %v11334_v7 = vld [vmem:[%s14328_s3 + $0x20] sm:$0xff]   ;;  %v2900_v6 = vshll.u32 %v2808_v61, 16 }
 0x12e   : > { %v12517_v48 = vrot.slane %v2833_v1, 4  ;;  %v2522_v29 = vsel %vm11967_vm6, %v12470_v39, %v2521_v9  ;;  %10510 = vmatprep.subr.bf16.mxu1 %v11334_v7  ;;  %v11332_v39 = vld [vmem:[#allocation6 + $0x80] sm:$0xff]   ;;  %v9618_v1 = vcombine.low %v12385_v55, %v12391_v3  ;;  %v9620_v30 = vcombine.low %v12431_v20, %v12443_v12  ;;  %v11336_v55 = vld [vmem:[%s14328_s3 + $0x30] sm:$0xff]   ;;  %v2809_v12 = vld [vmem:[#allocation2 + $0x68] sm:$0x1] }
 0x12f   : > { %v12519_v51 = vrot.slane %v2864_v47, 5  ;;  %v9610_v50 = vcombine.low %v2522_v29, %v2535_v43  ;;  %10511 = vmatpush3.bf16.msra.mxu1 %v11334_v7  ;;  %v2548_v2 = vsel %vm11967_vm6, %v12485_v54, %v2547_v62  ;;  %v2861_v54 = vor.u32 %v2860_v32, %v2857_v17 }
 0x130   : > { %10512 = vmatprep.subr.bf16.mxu1 %v11335_v33  ;;  %v2914_v47 = vshll.u32 %v2810_v8, 16  ;;  %v2880_v58 = vrot.slane %v2878_v26, 5  ;;  %v2894_v46 = vrot.slane %v2892_v35, 5  ;;  %v2825_v56 = vsel %vm12235_vm10, %v12513_v53, %v12499_v28  ;;  %v12590_v28 = vld [vmem:[%s14328_s3] sm:$0xff]  }
 0x131   : > { %v2862_v3 = vrot.slane %v2861_v54, 4  ;;  %v2875_v57 = vor.u32 %v12527_v52, %v12525_v5  ;;  %v9621_v32 = vcombine.low %v12459_v15, %v12473_v4  ;;  %v2906_v26 = vshll.u32 %v2809_v12, 16 }
 0x132   : > { %v2916_v20 = vrot.slane %v2914_v47, 5  ;;  %v2853_v15 = vsel %vm12235_vm10, %v12523_v45, %v12515_v18  ;;  %v3202_v35 = vlaneseq }
 0x133   : > { %10467 = vmatmul.mubr.msk.bf16.vlgmr.msra.gmra.mrb[0].mxu0 %vm1424_vm7, %v12437_v19  ;;  %v9607_v19 = vrot.slane %v2550_v42, 11  ;;  %v9609_v42 = vcombine.low %v2496_v59, %v2509_v24  ;;  %10513 = vmatpush3.bf16.msra.mxu1 %v11335_v33  ;;  %v2876_v37 = vrot.slane %v2875_v57, 4  ;;  %v2867_v4 = vsel %vm12235_vm10, %v2862_v3, %v12519_v51 }
 0x134   : > { %10470 = vmatprep.mubr.msk.bf16.mxu0 %vm1424_vm7, %v12439_v25  ;;  %10475 = vmatpush3.bf16.msra.mxu0 %v12426_v40  ;;  %v12501_v25 = vrot.slane %v2836_v41, 5  ;;  %v12503_v40 = vld [vmem:[#allocation2 + $0x58] sm:$0xf]  ;;  %v2560_v41 = vor.u32 %v2558_v21, %v2557_v36  ;;  %v2911_v21 = vshrl.u32 %v2810_v8, 16  ;;  %v2902_v36 = vrot.slane %v2900_v6, 5 }
 0x135   : > { %10476 = vmatprep.subr.bf16.mxu0 %v11325_v38  ;;  %v2886_v23 = vshll.u32 %v12503_v40, 16  ;;  %10514 = vmatprep.subr.bf16.mxu1 %v11336_v55  ;;  %v9629_v52 = vcombine.low %v2853_v15, %v2867_v4  ;;  %v3203_v7 = vshrl.u32 %v3202_v35, 7  ;;  %v3200_v8 = vld [vmem:[%s14327_s2] ss:$2 sm:$0x3] }
 0x136   : > { %v2561_v14 = vsel %vm11967_vm6, %v9607_v19, %v2560_v41 }
 0x137   : > { %v9611_v10 = vcombine.low %v2548_v2, %v2561_v14  ;;  %v2888_v22 = vrot.slane %v2886_v23, 5  ;;  %10515 = vmatpush3.bf16.msra.mxu1 %v11336_v55  ;;  %v2908_v23 = vrot.slane %v2906_v26, 5  ;;  %v9652_v14 = vld [vmem:[%s14327_s2 + $0x1] ss:$2 sm:$0x3] }
 0x138   : > { %10477 = vmatpush3.bf16.msra.mxu0 %v11325_v38  ;;  %v2883_v38 = vshrl.u32 %v12503_v40, 16  ;;  %v2811_v40 = vld [vmem:[#allocation2 + $0x74] sm:$0x1] }
 0x139   : > { %10486 = vmatprep.subr.bf16.mxu0 %v11326_v0 }
 0x13a   : > { %v2885_v19 = vrot.slane %v2883_v38, 4  ;;  %v2920_v38 = vshll.u32 %v2811_v40, 16 }
 0x13b   : > { %10471 = vmatmul.mubr.msk.bf16.gmra.mrb[4].mxu0 %vm1424_vm7, %v9593_v44  ;;  %v2839_v44 = vsel %vm12235_vm10, %v12517_v48, %v12501_v25  ;;  %v2881_v48 = vsel %vm12235_vm10, %v2876_v37, %v2880_v58 }
 0x13c   : > { %10478 = vmatprep.mubr.msk.bf16.mxu0 %vm1424_vm7, %v9608_v34  ;;  %v2897_v34 = vshrl.u32 %v2808_v61, 16  ;;  %v2889_v17 = vor.u32 %v2888_v22, %v2885_v19  ;;  %v9628_v9 = vcombine.low %v2825_v56, %v2839_v44  ;;  %v2922_v61 = vrot.slane %v2920_v38, 5 }
 0x13e   : > { %v2899_v11 = vrot.slane %v2897_v34, 4  ;;  %v2890_v63 = vrot.slane %v2889_v17, 4  ;;  %v3204_v34 = vsub.s32 0, %v3203_v7 }
 0x140   : > { %v2903_v25 = vor.u32 %v2902_v36, %v2899_v11  ;;  %v2895_v5 = vsel %vm12235_vm10, %v2890_v63, %v2894_v46  ;;  %v12640_v33 = vrot.slane %v9652_v14, %v3204_v34 }
 0x141   : > { %v9630_v59 = vcombine.low %v2881_v48, %v2895_v5  ;;  %v12670_v48 = vld [vmem:[#allocation2 + $0x4] sm:$0xf] }
 0x142   : > { %v2904_v24 = vrot.slane %v2903_v25, 4 }
 0x143   : > { %10479 = vmatmul.mubr.msk.bf16.vlgmr.msra.gmra.mrb[0].mxu0 %vm1424_vm7, %v9609_v42 }
 0x144   : > { %10482 = vmatprep.mubr.msk.bf16.mxu0 %vm1424_vm7, %v9610_v50  ;;  %10487 = vmatpush3.bf16.msra.mxu0 %v11326_v0  ;;  %v9619_v0 = vcombine.low %v12402_v27, %v12404_v13  ;;  %v11338_v27 = vld [vmem:[%s14328_s3 + $0x38] sm:$0xff]   ;;  %v2913_v13 = vrot.slane %v2911_v21, 4  ;;  %v2909_v18 = vsel %vm12235_vm10, %v2904_v24, %v2908_v23 }
 0x145   : > { %10488 = vmatprep.subr.bf16.mxu0 %v11327_v31  ;;  %10516 = vmatprep.subr.bf16.mxu1 %v11338_v27 }
 0x146   : > { %10517 = vmatpush3.bf16.msra.mxu1 %v11338_v27  ;;  %v2917_v53 = vor.u32 %v2916_v20, %v2913_v13 }
 0x147   : > { %10526 = vmatprep.subr.bf16.mxu1 %v12590_v28 }
 0x148   : > { %10489 = vmatpush3.bf16.msra.mxu0 %v11327_v31  ;;  %v2918_v29 = vrot.slane %v2917_v53, 4 }
 0x149   : > { %10498 = vmatprep.subr.bf16.mxu0 %v11332_v39 }
 0x14a   : > { %v2923_v51 = vsel %vm12235_vm10, %v2918_v29, %v2922_v61 }
 0x14b   : > { %10483 = vmatmul.mubr.msk.bf16.gmra.mrb[4].mxu0 %vm1424_vm7, %v9611_v10  ;;  %v9631_v45 = vcombine.low %v2909_v18, %v2923_v51  ;;  %v12635_v10 = vrot.slane %v3200_v8, %v3204_v34 }
 0x14c   : > { %10490 = vmatprep.mubr.msk.bf16.mxu0 %vm1424_vm7, %v9618_v1 }
 0x153   : > { %10491 = vmatmul.mubr.msk.bf16.vlgmr.msra.gmra.mrb[0].mxu0 %vm1424_vm7, %v9619_v0 }
 0x154   : > { %10494 = vmatprep.mubr.msk.bf16.mxu0 %vm1424_vm7, %v9620_v30  ;;  %10499 = vmatpush3.bf16.msra.mxu0 %v11332_v39  ;;  %v3208_v39 = vsub.s32 1, %v3203_v7 }
 0x155   : > { %10500 = vmatprep.subr.bf16.mxu0 %v11333_v16 }
 0x156   : > { %v12637_v21 = vrot.slane %v3200_v8, %v3208_v39  ;;  %v12642_v54 = vrot.slane %v9652_v14, %v3208_v39 }
 0x158   : > { %10501 = vmatpush3.bf16.msra.mxu0 %v11333_v16 }
 0x15b   : > { %10495 = vmatmul.mubr.msk.bf16.gmra.mrb[4].mxu0 %vm1424_vm7, %v9621_v32 }
 0x15c   : > { %10502 = vmatprep.mubr.msk.bf16.mxu0 %vm1424_vm7, %v9628_v9 }
 0x163   : > { %10503 = vmatmul.mubr.msk.bf16.vlgmr.msra.gmra.mrb[0].mxu0 %vm1424_vm7, %v9629_v52 }
 0x164   : > { %10506 = vmatprep.mubr.msk.bf16.mxu0 %vm1424_vm7, %v9630_v59 }
 0x16b   : > { %10507 = vmatmul.mubr.msk.bf16.gmra.mrb[4].mxu0 %vm1424_vm7, %v9631_v45 }
 0x173   : > { %v12613_v43 = vpop.f32.mrb[0].mxu1 }
 0x174   : > { %v12615_v42 = vpop.f32.mrb[1].mxu1 }
 0x175   : > { %v12617_v62 = vpop.f32.mrb[2].mxu1 }
 0x176   : > { %v12619_v31 = vpop.f32.mrb[3].mxu1 }
 0x1ae   : > { %v12621_v50 = vpop.f32.mrb[4].mxu1 }
 0x1af   : > { %v12623_v41 = vpop.f32.mrb[5].mxu1 }
 0x1b0   : > { %v12625_v6 = vpop.f32.mrb[6].mxu1 }
 0x1b1   : > { %v12630_v2 = vpop.f32.mrb[7].mxu1 }
 0x1b6   : > { %v3161_v1 = vpop.f32.mrb[8].mxu1 }
 0x1b7   : > { %v3212_v0 = vmul.f32 %v12635_v10, %v3161_v1  ;;  %v3163_v30 = vpop.f32.mrb[9].mxu1 }
 0x1b8   : > { %v3213_v16 = vmul.f32 %v12637_v21, %v3163_v30  ;;  %v3165_v47 = vpop.f32.mrb[10].mxu1 }
 0x1b9   : > { %v3214_v55 = vmul.f32 %v12635_v10, %v3165_v47  ;;  %v3167_v3 = vpop.f32.mrb[11].mxu1  ;;  %v3241_v58 = vadd.f32 %v12640_v33, %v3212_v0  ;;  %v12691_v47 = vld [vmem:[#allocation2 + $0x4] sm:$0xf] }
 0x1ba   : > { %v3242_v19 = vadd.f32 %v12642_v54, %v3213_v16  ;;  %v3215_v22 = vmul.f32 %v12637_v21, %v3167_v3 }
 0x1bb   : > { %v3243_v46 = vadd.f32 %v12640_v33, %v3214_v55  ;;  %v3257_v11 = vmax.f32 %v3241_v58, 0.0  ;;  %v3336_v58 = vshrl.u32 %v12670_v48, 16 }
 0x1bc   : > { %v3258_v36 = vmax.f32 %v3242_v19, 0.0  ;;  %v3244_v27 = vadd.f32 %v12642_v54, %v3215_v22  ;;  %v3314_v19 = vld [vmem:[#allocation2] sm:$0x8] }
 0x1bd   : > { %v3259_v13 = vmax.f32 %v3243_v46, 0.0  ;;  %v10096_v20 = vpack.c.bf16 %v3257_v11, %v3257_v11 }
 0x1be   : > { %9398 = vst [vmem:[%s12654_s23 + $0x18] sm:$0xff] %v3258_v36  ;;  %v3260_v12 = vmax.f32 %v3244_v27, 0.0  ;;  %v3171_v40 = vpop.f32.mrb[12].mxu1 }
 0x1bf   : > { %v10097_v56 = vpack.c.bf16 %v3259_v13, %v3259_v13  ;;  %v3216_v44 = vmul.f32 %v12635_v10, %v3171_v40  ;;  %7395 = vrot.lane.b32.xlu0 %v10096_v20, %s11620_s28  ;;  %v3173_v57 = vpop.f32.mrb[13].mxu1  ;;  %3306 = vst.msk [vmem:[#allocation2 + $0x10] sm:$0xf] %vm3305_vm11, %v10096_v20  ;;  %v11342_v40 = vld [vmem:[%s14328_s3 + $0x8] sm:$0xff]  }
 0x1c0   : > { %9399 = vst [vmem:[%s12654_s23 + $0x38] sm:$0xff] %v3260_v12  ;;  %v3217_v17 = vmul.f32 %v12637_v21, %v3173_v57  ;;  %v3175_v32 = vpop.f32.mrb[14].mxu1 }
 0x1c1   : > { %v3218_v9 = vmul.f32 %v12635_v10, %v3175_v32  ;;  %v3177_v37 = vpop.f32.mrb[15].mxu1  ;;  %v3245_v63 = vadd.f32 %v12640_v33, %v3216_v44  ;;  %3307 = vst.msk [vmem:[#allocation2 + $0x1c] sm:$0xf] %vm3305_vm11, %v10097_v56  ;;  %v3331_v32 = vshrl.u32 %v3314_v19, 16 }
 0x1c2   : > { %v3246_v26 = vadd.f32 %v12642_v54, %v3217_v17  ;;  %v3219_v38 = vmul.f32 %v12637_v21, %v3177_v37  ;;  %v3316_v17 = vld [vmem:[#allocation2 + $0xc] sm:$0x8]  ;;  %v3339_v37 = vshll.u32 %v12670_v48, 16 }
 0x1c3   : > { %v3247_v15 = vadd.f32 %v12640_v33, %v3218_v9  ;;  %7397 = vrot.lane.b32.xlu0 %v10097_v56, %s11620_s28  ;;  %v3261_v4 = vmax.f32 %v3245_v63, 0.0  ;;  %v3702_v56 = vshrl.u32 %v12691_v47, 16  ;;  %v3318_v9 = vld [vmem:[#allocation2 + $0x18] sm:$0x8] }
 0x1c4   : > { %v3262_v25 = vmax.f32 %v3246_v26, 0.0  ;;  %v3248_v53 = vadd.f32 %v12642_v54, %v3219_v38 }
 0x1c5   : > { %v3263_v5 = vmax.f32 %v3247_v15, 0.0  ;;  %v10098_v52 = vpack.c.bf16 %v3261_v4, %v3261_v4  ;;  %v3338_v4 = vrot.slane %v3336_v58, 7  ;;  %v3322_v58 = vld [vmem:[#allocation2 + $0x30] sm:$0x8] }
 0x1c6   : > { %9400 = vst [vmem:[%s12654_s23 + $0x58] sm:$0xff] %v3262_v25  ;;  %v3264_v23 = vmax.f32 %v3248_v53, 0.0  ;;  %v3181_v61 = vpop.f32.mrb[16].mxu1  ;;  %v12673_v59 = vld [vmem:[#allocation2 + $0x10] sm:$0xf] }
 0x1c7   : > { %v10099_v24 = vpack.c.bf16 %v3263_v5, %v3263_v5  ;;  %v3220_v29 = vmul.f32 %v12635_v10, %v3181_v61  ;;  %7399 = vrot.lane.b32.xlu1 %v10098_v52, %s11620_s28  ;;  %v3183_v18 = vpop.f32.mrb[17].mxu1  ;;  %v9669_v51 = vcombine.low %v12670_v48, %v12673_v59  ;;  %3308 = vst.msk [vmem:[#allocation2 + $0x28] sm:$0xf] %vm3305_vm11, %v10098_v52  ;;  %v3349_v15 = vshrl.u32 %v12673_v59, 16  ;;  %v3320_v48 = vld [vmem:[#allocation2 + $0x24] sm:$0x8] }
 0x1c8   : > { %9401 = vst [vmem:[%s12654_s23 + $0x78] sm:$0xff] %v3264_v23  ;;  %v3221_v45 = vmul.f32 %v12637_v21, %v3183_v18  ;;  %v3185_v35 = vpop.f32.mrb[18].mxu1  ;;  %v12695_v11 = vld [vmem:[#allocation2 + $0x1c] sm:$0xf]  ;;  %v3705_v5 = vshll.u32 %v12691_v47, 16  ;;  %v11343_v23 = vld [vmem:[%s14328_s3 + $0x10] sm:$0xff]  }
 0x1c9   : > { %v3249_v7 = vadd.f32 %v12640_v33, %v3220_v29  ;;  %v3222_v34 = vmul.f32 %v12635_v10, %v3185_v35  ;;  %v3187_v8 = vpop.f32.mrb[19].mxu1  ;;  %10518 = vmatprep.mubr.msk.bf16.mxu1 %vm3494_vm12, %v9669_v51  ;;  %3309 = vst.msk [vmem:[#allocation2 + $0x34] sm:$0xf] %vm3305_vm11, %v10099_v24  ;;  %v3344_v61 = vshrl.u32 %v3316_v17, 16  ;;  %v3686_v29 = vld [vmem:[#allocation2 + $0x8] sm:$0x1] }
 0x1ca   : > { %v3250_v39 = vadd.f32 %v12642_v54, %v3221_v45  ;;  %v3223_v14 = vmul.f32 %v12637_v21, %v3187_v8  ;;  %v12726_v51 = vrot.slane %v3331_v32, 11  ;;  %v12745_v19 = vrot.slane %v3705_v5, 5 }
 0x1cb   : > { %v3265_v1 = vmax.f32 %v3249_v7, 0.0  ;;  %v3251_v0 = vadd.f32 %v12640_v33, %v3222_v34  ;;  %7401 = vrot.lane.b32.xlu1 %v10099_v24, %s11620_s28  ;;  %v3357_v24 = vshrl.u32 %v3318_v9, 16  ;;  %v3351_v7 = vrot.slane %v3349_v15, 7  ;;  %v3328_v9 = vld [vmem:[#allocation2 + $0x54] sm:$0x8] }
 0x1cc   : > { %v3266_v30 = vmax.f32 %v3250_v39, 0.0  ;;  %v3252_v16 = vadd.f32 %v12642_v54, %v3223_v14  ;;  %v3370_v34 = vshrl.u32 %v3320_v48, 16  ;;  %v3341_v14 = vor.u32 %v3339_v37, %v3338_v4 }
 0x1cd   : > { %v10100_v55 = vpack.c.bf16 %v3265_v1, %v3265_v1  ;;  %v3267_v3 = vmax.f32 %v3251_v0, 0.0  ;;  %v3711_v1 = vshll.u32 %v3686_v29, 16 }
 0x1ce   : > { %9402 = vst [vmem:[%s12654_s23 + $0x98] sm:$0xff] %v3266_v30  ;;  %v3268_v22 = vmax.f32 %v3252_v16, 0.0  ;;  %v3191_v46 = vpop.f32.mrb[20].mxu1  ;;  %v12697_v36 = vld [vmem:[#allocation2 + $0x28] sm:$0xf]  ;;  %v3352_v30 = vshll.u32 %v12673_v59, 16 }
 0x1cf   : > { %v10101_v27 = vpack.c.bf16 %v3267_v3, %v3267_v3  ;;  %3310 = vst.msk [vmem:[#allocation2 + $0x40] sm:$0xf] %vm3305_vm11, %v10100_v55  ;;  %v3224_v13 = vmul.f32 %v12635_v10, %v3191_v46  ;;  %7403 = vrot.lane.b32.xlu0 %v10100_v55, %s11620_s28  ;;  %v3193_v20 = vpop.f32.mrb[21].mxu1  ;;  %v9670_v12 = vcombine.low %v12695_v11, %v12697_v36  ;;  %v11345_v16 = vld [vmem:[%s14328_s3 + $0x18] sm:$0xff]   ;;  %v3375_v47 = vshrl.u32 %v12697_v36, 16 }
 0x1d0   : > { %9403 = vst [vmem:[%s12654_s23 + $0xb8] sm:$0xff] %v3268_v22  ;;  %v3225_v44 = vmul.f32 %v12637_v21, %v3193_v20  ;;  %v3195_v57 = vpop.f32.mrb[22].mxu1  ;;  %v12731_v8 = vld [vmem:[#allocation2 + $0x34] sm:$0xf]  ;;  %v9662_v3 = vrot.slane %v3344_v61, 11  ;;  %v3354_v59 = vor.u32 %v3352_v30, %v3351_v7  ;;  %v3362_v46 = vshrl.u32 %v12695_v11, 16 }
 0x1d1   : > { %3311 = vst.msk [vmem:[#allocation2 + $0x4c] sm:$0xf] %vm3305_vm11, %v10101_v27  ;;  %v3253_v63 = vadd.f32 %v12640_v33, %v3224_v13  ;;  %v3226_v26 = vmul.f32 %v12635_v10, %v3195_v57  ;;  %10519 = vmatmul.mubr.msk.bf16.vlgmr.msra.gmra.mrb[24].mxu1 %vm3494_vm12, %v9670_v12  ;;  %7405 = vrot.lane.b32.xlu1 %v10101_v27, %s11620_s28  ;;  %v3197_v38 = vpop.f32.mrb[23].mxu1  ;;  %v3688_v55 = vld [vmem:[#allocation2 + $0x14] sm:$0x1]  ;;  %v3377_v17 = vrot.slane %v3375_v47, 7 }
 0x1d2   : > { %v3254_v25 = vadd.f32 %v12642_v54, %v3225_v44  ;;  %v3227_v53 = vmul.f32 %v12637_v21, %v3197_v38  ;;  %10527 = vmatpush3.bf16.msra.mxu1 %v12590_v28  ;;  %v12728_v28 = vrot.slane %v3702_v56, 4  ;;  %v12747_v22 = vld [vmem:[#allocation2 + $0x20] sm:$0x1]  ;;  %v3324_v27 = vld [vmem:[#allocation2 + $0x3c] sm:$0x8]  ;;  %v3342_v12 = vsel %vm11967_vm6, %v12726_v51, %v3341_v14 }
 0x1d3   : > { %v3269_v52 = vmax.f32 %v3253_v63, 0.0  ;;  %v3255_v10 = vadd.f32 %v12640_v33, %v3226_v26  ;;  %10528 = vmatprep.subr.bf16.mxu1 %v11342_v40  ;;  %v3687_v20 = vld [vmem:[#allocation2 + $0x10] sm:$0xf]  ;;  %v12762_v56 = vrot.slane %v3357_v24, 11  ;;  %v9664_v44 = vrot.slane %v3370_v34, 11 }
 0x1d4   : > { %v3270_v18 = vmax.f32 %v3254_v25, 0.0  ;;  %v3256_v21 = vadd.f32 %v12642_v54, %v3227_v53  ;;  %v3725_v57 = vshll.u32 %v3688_v55, 16  ;;  %v3388_v32 = vshrl.u32 %v12731_v8, 16 }
 0x1d5   : > { %v10102_v45 = vpack.c.bf16 %v3269_v52, %v3269_v52  ;;  %v3271_v35 = vmax.f32 %v3255_v10, 0.0  ;;  %v12765_v37 = vrot.slane %v3711_v1, 5  ;;  %v3739_v63 = vshll.u32 %v12747_v22, 16 }
 0x1d6   : > { %9404 = vst [vmem:[%s12654_s23 + $0xd8] sm:$0xff] %v3270_v18  ;;  %v3272_v33 = vmax.f32 %v3256_v21, 0.0  ;;  %v12733_v39 = vld [vmem:[#allocation2 + $0x40] sm:$0xf]  ;;  %10529 = vmatpush3.bf16.msra.mxu1 %v11342_v40  ;;  %v3383_v26 = vshrl.u32 %v3322_v58, 16  ;;  %v3396_v38 = vshrl.u32 %v3324_v27, 16  ;;  %v3355_v25 = vsel %vm11967_vm6, %v9662_v3, %v3354_v59 }
 0x1d7   : > { %3312 = vst.msk [vmem:[#allocation2 + $0x58] sm:$0xf] %vm3305_vm11, %v10102_v45  ;;  %v10103_v54 = vpack.c.bf16 %v3271_v35, %v3271_v35  ;;  %7407 = vrot.lane.b32.xlu0 %v10102_v45, %s11620_s28  ;;  %v9671_v0 = vcombine.low %v12731_v8, %v12733_v39  ;;  %10530 = vmatprep.subr.bf16.mxu1 %v11343_v23  ;;  %v3401_v13 = vshrl.u32 %v12733_v39, 16  ;;  %v12760_v40 = vld [vmem:[%s14328_s3 + $0x40] sm:$0xff]   ;;  %v3716_v15 = vshrl.u32 %v3687_v20, 16 }
 0x1d8   : > { %9405 = vst [vmem:[%s12654_s23 + $0xf8] sm:$0xff] %v3272_v33  ;;  %v3719_v4 = vshll.u32 %v3687_v20, 16  ;;  %v3364_v53 = vrot.slane %v3362_v46, 7  ;;  %v3378_v48 = vshll.u32 %v12697_v36, 16  ;;  %v12771_v52 = vld [vmem:[#allocation2 + $0x4c] sm:$0xf]  ;;  %v3708_v24 = vor.u32 %v12745_v19, %v12728_v28 }
 0x1d9   : > { %3313 = vst.msk [vmem:[#allocation2 + $0x64] sm:$0xf] %vm3305_vm11, %v10103_v54  ;;  %10522 = vmatprep.mubr.msk.bf16.mxu1 %vm3494_vm12, %v9671_v0  ;;  %7409 = vrot.lane.b32.xlu1 %v10103_v54, %s11620_s28  ;;  %v3403_v5 = vrot.slane %v3401_v13, 7  ;;  %v3422_v61 = vshrl.u32 %v3328_v9, 16  ;;  %v3390_v21 = vrot.slane %v3388_v32, 7  ;;  %v3404_v51 = vshll.u32 %v12733_v39, 16 }
 0x1da   : > { %10531 = vmatpush3.bf16.msra.mxu1 %v11343_v23  ;;  %v3365_v23 = vshll.u32 %v12695_v11, 16  ;;  %v3380_v18 = vor.u32 %v3378_v48, %v3377_v17  ;;  %v3326_v36 = vld [vmem:[#allocation2 + $0x48] sm:$0x8]  ;;  %v9681_v45 = vcombine.low %v3342_v12, %v3355_v25  ;;  %v3718_v7 = vrot.slane %v3716_v15, 4  ;;  %v3689_v54 = vld [vmem:[#allocation2 + $0x1c] sm:$0xf] }
 0x1db   : > { %10532 = vmatprep.subr.bf16.mxu1 %v11345_v16  ;;  %v3721_v34 = vrot.slane %v3719_v4, 5  ;;  %v3691_v33 = vld [vmem:[#allocation2 + $0x28] sm:$0xf]  ;;  %v3391_v14 = vshll.u32 %v12731_v8, 16  ;;  %v9666_v28 = vrot.slane %v3396_v38, 11  ;;  %v3406_v1 = vor.u32 %v3404_v51, %v3403_v5  ;;  %v11382_v0 = vld [vmem:[%s14330_s5 + $0x30] sm:$0xff]  }
 0x1dc   : > { %v3367_v11 = vor.u32 %v3365_v23, %v3364_v53  ;;  %v9665_v39 = vrot.slane %v3383_v26, 11  ;;  %v3409_v30 = vshrl.u32 %v3326_v36, 16  ;;  %v12786_v47 = vrot.slane %v3725_v57, 5  ;;  %v3695_v55 = vld [vmem:[#allocation2 + $0x40] sm:$0xf]  ;;  %10654 = vmatprep.subr.bf16.mxu0 %v11382_v0  ;;  %v11347_v4 = vld [vmem:[%s14328_s3 + $0x48] sm:$0xff]  }
 0x1dd   : > { %v3381_v3 = vsel %vm11967_vm6, %v9664_v44, %v3380_v18  ;;  %v3393_v8 = vor.u32 %v3391_v14, %v3390_v21  ;;  %v12790_v58 = vrot.slane %v3422_v61, 11  ;;  %v3744_v19 = vshrl.u32 %v3691_v33, 16  ;;  %v3693_v20 = vld [vmem:[#allocation2 + $0x34] sm:$0xf]  ;;  %10655 = vmatpush3.bf16.msra.mxu0 %v11382_v0  ;;  %v3692_v61 = vld [vmem:[#allocation2 + $0x2c] sm:$0x1] }
 0x1de   : > { %v3329_v10 = vld [vmem:[#allocation2 + $0x58] sm:$0xf]  ;;  %10533 = vmatpush3.bf16.msra.mxu1 %v11345_v16  ;;  %v3414_v16 = vshrl.u32 %v12771_v52, 16  ;;  %v3722_v46 = vor.u32 %v3721_v34, %v3718_v7  ;;  %v3730_v27 = vshrl.u32 %v3689_v54, 16  ;;  %v3747_v13 = vshll.u32 %v3691_v33, 16  ;;  %s11548_s28 = scalar_lea.vmem %s11547_s17, 8192 }
 0x1df   : > { %v9672_v29 = vcombine.low %v12771_v52, %v3329_v10  ;;  %10542 = vmatprep.subr.bf16.mxu1 %v12760_v40  ;;  %v3427_v35 = vshrl.u32 %v3329_v10, 16  ;;  %v3368_v12 = vsel %vm11967_vm6, %v12762_v56, %v3367_v11  ;;  %v3407_v57 = vsel %vm11967_vm6, %v9666_v28, %v3406_v1  ;;  %v3699_v36 = vld [vmem:[#allocation2 + $0x58] sm:$0xf]  ;;  %v3696_v33 = vld [vmem:[#allocation2 + $0x44] sm:$0x1]  ;;  %p11550_p7 = scmp.lt.s32.totalorder %s11548_s28, %s11542_s30 }
 0x1e0   : > { %v3772_v17 = vshrl.u32 %v3695_v55, 16  ;;  %v3775_v44 = vshll.u32 %v3695_v55, 16  ;;  %v9682_v32 = vcombine.low %v3368_v12, %v3381_v3  ;;  %v3416_v9 = vrot.slane %v3414_v16, 7  ;;  %v3697_v28 = vld [vmem:[#allocation2 + $0x4c] sm:$0xf] }
 0x1e1   : > { %10523 = vmatmul.mubr.msk.bf16.gmra.mrb[28].mxu1 %vm3494_vm12, %v9672_v29  ;;  %v3429_v59 = vrot.slane %v3427_v35, 7  ;;  %v3430_v26 = vshll.u32 %v3329_v10, 16  ;;  %v3733_v38 = vshll.u32 %v3689_v54, 16  ;;  %v3394_v15 = vsel %vm11967_vm6, %v9665_v39, %v3393_v8  ;;  %v3694_v54 = vld [vmem:[#allocation2 + $0x38] sm:$0x1]  ;;  %p11551_p8 = por %p11550_p7, %p11549_p4 }
 0x1e2   : > { %10534 = vmatprep.mubr.msk.bf16.mxu1 %vm3494_vm12, %v9681_v45  ;;  %v3746_v25 = vrot.slane %v3744_v19, 4  ;;  %v3758_v53 = vshrl.u32 %v3693_v20, 16  ;;  %v3761_v48 = vshll.u32 %v3693_v20, 16  ;;  %v9683_v56 = vcombine.low %v3394_v15, %v3407_v57  ;;  %v3700_v15 = vld [vmem:[#allocation2 + $0x5c] sm:$0x1] }
 0x1e3   : > { %v3417_v5 = vshll.u32 %v12771_v52, 16  ;;  %v3432_v23 = vor.u32 %v3430_v26, %v3429_v59  ;;  %v3749_v29 = vrot.slane %v3747_v13, 5  ;;  %v3709_v10 = vrot.slane %v3708_v24, 4  ;;  %v11348_v52 = vld [vmem:[%s14328_s3 + $0x50] sm:$0xff]   ;;  %p11552_p11 = pnand %p11551_p8, %p11545_p3 }
 0x1e4   : > { %v3723_v18 = vrot.slane %v3722_v46, 4  ;;  %v3774_v21 = vrot.slane %v3772_v17, 4  ;;  %v3777_v51 = vrot.slane %v3775_v44, 5  ;;  %v9667_v45 = vrot.slane %v3409_v30, 11  ;;  %v3944_v46 = vld [vmem:[#allocation2 + $0x18] sm:$0x8] }
 0x1e5   : > { %v3419_v35 = vor.u32 %v3417_v5, %v3416_v9  ;;  %v3732_v7 = vrot.slane %v3730_v27, 4  ;;  %v3735_v34 = vrot.slane %v3733_v38, 5  ;;  %v3753_v11 = vshll.u32 %v3692_v61, 16  ;;  %v12820_v27 = vld [vmem:[#allocation2 + $0x1c] sm:$0xf]  ;;  %v11350_v61 = vld [vmem:[%s14328_s3 + $0x60] sm:$0xff]  }
 0x1e6   : > { %v3760_v24 = vrot.slane %v3758_v53, 4  ;;  %v3763_v14 = vrot.slane %v3761_v48, 5  ;;  %v3750_v1 = vor.u32 %v3749_v29, %v3746_v25  ;;  %v3800_v0 = vshrl.u32 %v3699_v36, 16  ;;  %v12825_v9 = vld [vmem:[#allocation2 + $0x10] sm:$0xf] }
 0x1e7   : > { %v3803_v39 = vshll.u32 %v3699_v36, 16  ;;  %v3714_v30 = vsel %vm12235_vm10, %v3709_v10, %v12765_v37  ;;  %v3728_v16 = vsel %vm12235_vm10, %v3723_v18, %v12786_v47  ;;  %v3778_v55 = vor.u32 %v3777_v51, %v3774_v21  ;;  %v11349_v37 = vld [vmem:[%s14328_s3 + $0x58] sm:$0xff]   ;;  %v3698_v18 = vld [vmem:[#allocation2 + $0x50] sm:$0x1] }
 0x1e8   : > { %v3781_v3 = vshll.u32 %v3696_v33, 16  ;;  %v3420_v8 = vsel %vm11967_vm6, %v9667_v45, %v3419_v35  ;;  %v3736_v19 = vor.u32 %v3735_v34, %v3732_v7  ;;  %v3789_v59 = vshll.u32 %v3697_v28, 16  ;;  %v12840_v7 = vld [vmem:[#allocation2 + $0x34] sm:$0xf] }
 0x1e9   : > { %10535 = vmatmul.mubr.msk.bf16.vlgmr.msra.gmra.mrb[24].mxu1 %vm3494_vm12, %v9682_v32  ;;  %v3755_v20 = vrot.slane %v3753_v11, 5  ;;  %v3764_v47 = vor.u32 %v3763_v14, %v3760_v24  ;;  %v3767_v12 = vshll.u32 %v3694_v54, 16  ;;  %v9693_v57 = vcombine.low %v3714_v30, %v3728_v16  ;;  %v3948_v24 = vld [vmem:[#allocation2 + $0x30] sm:$0x8]  ;;  %v12844_v14 = vld [vmem:[#allocation2 + $0x4c] sm:$0xf] }
 0x1ea   : > { %10543 = vmatpush3.bf16.msra.mxu1 %v12760_v40  ;;  %10538 = vmatprep.mubr.msk.bf16.mxu1 %vm3494_vm12, %v9683_v56  ;;  %v3433_v40 = vsel %vm11967_vm6, %v12790_v58, %v3432_v23  ;;  %v3786_v58 = vshrl.u32 %v3697_v28, 16  ;;  %v3751_v17 = vrot.slane %v3750_v1, 4  ;;  %v3802_v44 = vrot.slane %v3800_v0, 4  ;;  %v3942_v23 = vld [vmem:[#allocation2 + $0xc] sm:$0x8] }
 0x1eb   : > { %10544 = vmatprep.subr.bf16.mxu1 %v11347_v4  ;;  %v9684_v13 = vcombine.low %v3420_v8, %v3433_v40  ;;  %v3805_v32 = vrot.slane %v3803_v39, 5  ;;  %v3779_v26 = vrot.slane %v3778_v55, 4  ;;  %v3783_v38 = vrot.slane %v3781_v3, 5  ;;  %v11351_v1 = vld [vmem:[%s14328_s3 + $0x68] sm:$0xff]   ;;  %v12855_v8 = vld [vmem:[#allocation2 + $0x40] sm:$0xf] }
 0x1ec   : > { %v3977_v25 = vshrl.u32 %v12820_v27, 16  ;;  %v3737_v53 = vrot.slane %v3736_v19, 4  ;;  %v3741_v48 = vrot.slane %v3739_v63, 5  ;;  %v3788_v56 = vrot.slane %v3786_v58, 4  ;;  %v12852_v39 = vld [vmem:[#allocation2 + $0x28] sm:$0xf] }
 0x1ed   : > { %v3791_v5 = vrot.slane %v3789_v59, 5  ;;  %v3765_v29 = vrot.slane %v3764_v47, 4  ;;  %v3769_v10 = vrot.slane %v3767_v12, 5  ;;  %v3964_v21 = vshrl.u32 %v12825_v9, 16  ;;  %v3946_v59 = vld [vmem:[#allocation2 + $0x24] sm:$0x8] }
 0x1ee   : > { %10545 = vmatpush3.bf16.msra.mxu1 %v11347_v4  ;;  %v3972_v4 = vshrl.u32 %v3944_v46, 16  ;;  %v3756_v51 = vsel %vm12235_vm10, %v3751_v17, %v3755_v20  ;;  %v3806_v36 = vor.u32 %v3805_v32, %v3802_v44  ;;  %v3809_v45 = vshll.u32 %v3700_v15, 16  ;;  %v3952_v12 = vld [vmem:[#allocation2 + $0x48] sm:$0x8]  ;;  %v3950_v32 = vld [vmem:[#allocation2 + $0x3c] sm:$0x8] }
 0x1ef   : > { %10546 = vmatprep.subr.bf16.mxu1 %v11348_v52  ;;  %v3784_v22 = vsel %vm12235_vm10, %v3779_v26, %v3783_v38  ;;  %v3959_v63 = vshrl.u32 %v3942_v23, 16  ;;  %v3979_v35 = vrot.slane %v3977_v25, 7  ;;  %v3742_v34 = vsel %vm12235_vm10, %v3737_v53, %v3741_v48 }
 0x1f0   : > { %v3792_v33 = vor.u32 %v3791_v5, %v3788_v56  ;;  %v9706_v11 = vrot.slane %v3972_v4, 11  ;;  %v9694_v28 = vcombine.low %v3742_v34, %v3756_v51  ;;  %v3770_v40 = vsel %vm12235_vm10, %v3765_v29, %v3769_v10  ;;  %v12870_v5 = vld [vmem:[#allocation2 + $0x64] sm:$0xf]  ;;  %v11353_v51 = vld [vmem:[%s14328_s3 + $0x78] sm:$0xff]  }
 0x1f1   : > { %10539 = vmatmul.mubr.msk.bf16.gmra.mrb[28].mxu1 %vm3494_vm12, %v9684_v13  ;;  %v3966_v54 = vrot.slane %v3964_v21, 7  ;;  %v3980_v0 = vshll.u32 %v12820_v27, 16  ;;  %v9695_v30 = vcombine.low %v3770_v40, %v3784_v22  ;;  %v3807_v16 = vrot.slane %v3806_v36, 4  ;;  %v12881_v22 = vld [vmem:[#allocation2 + $0x58] sm:$0xf] }
 0x1f2   : > { %10547 = vmatpush3.bf16.msra.mxu1 %v11348_v52  ;;  %10550 = vmatprep.mubr.msk.bf16.mxu1 %vm3494_vm12, %v9693_v57  ;;  %v3795_v52 = vshll.u32 %v3698_v18, 16  ;;  %v3811_v55 = vrot.slane %v3809_v45, 5  ;;  %v4003_v3 = vshrl.u32 %v12840_v7, 16  ;;  %v3967_v19 = vshll.u32 %v12825_v9, 16  ;;  %v11352_v57 = vld [vmem:[%s14328_s3 + $0x70] sm:$0xff]  }
 0x1f3   : > { %10548 = vmatprep.subr.bf16.mxu1 %v11349_v37  ;;  %v3982_v58 = vor.u32 %v3980_v0, %v3979_v35  ;;  %v3998_v46 = vshrl.u32 %v3948_v24, 16  ;;  %v4029_v13 = vshrl.u32 %v12844_v14, 16  ;;  %v3990_v47 = vshrl.u32 %v12852_v39, 16  ;;  %v11354_v0 = vld [vmem:[%s14328_s3 + $0x80] sm:$0xff]  }
 0x1f4   : > { %v3797_v20 = vrot.slane %v3795_v52, 5  ;;  %v9705_v17 = vrot.slane %v3959_v63, 11  ;;  %v3969_v44 = vor.u32 %v3967_v19, %v3966_v54  ;;  %v4016_v26 = vshrl.u32 %v12855_v8, 16 }
 0x1f5   : > { %v3812_v38 = vsel %vm12235_vm10, %v3807_v16, %v3811_v55  ;;  %v3985_v15 = vshrl.u32 %v3946_v59, 16  ;;  %v4005_v4 = vrot.slane %v4003_v3, 7  ;;  %v3983_v25 = vsel %vm11967_vm6, %v9706_v11, %v3982_v58  ;;  %v3954_v55 = vld [vmem:[#allocation2 + $0x54] sm:$0x8] }
 0x1f6   : > { %10549 = vmatpush3.bf16.msra.mxu1 %v11349_v37  ;;  %v3793_v37 = vrot.slane %v3792_v33, 4  ;;  %v9708_v53 = vrot.slane %v3998_v46, 11  ;;  %v4024_v48 = vshrl.u32 %v3952_v12, 16  ;;  %v4031_v56 = vrot.slane %v4029_v13, 7 }
 0x1f7   : > { %10558 = vmatprep.subr.bf16.mxu1 %v11350_v61  ;;  %v4006_v29 = vshll.u32 %v12840_v7, 16  ;;  %v4011_v10 = vshrl.u32 %v3950_v32, 16  ;;  %v3970_v21 = vsel %vm11967_vm6, %v9705_v17, %v3969_v44  ;;  %v4018_v36 = vrot.slane %v4016_v26, 7 }
 0x1f8   : > { %v3798_v23 = vsel %vm12235_vm10, %v3793_v37, %v3797_v20  ;;  %v4032_v45 = vshll.u32 %v12844_v14, 16  ;;  %v9713_v63 = vcombine.low %v3970_v21, %v3983_v25  ;;  %v3993_v35 = vshll.u32 %v12852_v39, 16  ;;  %v11356_v25 = vld [vmem:[%s14328_s3 + $0x90] sm:$0xff]  }
 0x1f9   : > { %10551 = vmatmul.mubr.msk.bf16.vlgmr.msra.gmra.mrb[24].mxu1 %vm3494_vm12, %v9694_v28  ;;  %v9696_v18 = vcombine.low %v3798_v23, %v3812_v38  ;;  %v4008_v34 = vor.u32 %v4006_v29, %v4005_v4  ;;  %v4055_v33 = vshrl.u32 %v12870_v5, 16  ;;  %v4019_v52 = vshll.u32 %v12855_v8, 16  ;;  %v3956_v28 = vld [vmem:[#allocation2 + $0x60] sm:$0x8]  ;;  %v4330_v4 = vld [vmem:[#allocation2 + $0x1c] sm:$0xf] }
 0x1fa   : > { %10559 = vmatpush3.bf16.msra.mxu1 %v11350_v61  ;;  %10554 = vmatprep.mubr.msk.bf16.mxu1 %vm3494_vm12, %v9695_v30  ;;  %v3992_v61 = vrot.slane %v3990_v47, 7  ;;  %v9710_v11 = vrot.slane %v4024_v48, 11  ;;  %v4034_v24 = vor.u32 %v4032_v45, %v4031_v56  ;;  %v9707_v40 = vrot.slane %v3985_v15, 11  ;;  %v4328_v48 = vld [vmem:[#allocation2 + $0x10] sm:$0xf] }
 0x1fb   : > { %10560 = vmatprep.subr.bf16.mxu1 %v11351_v1  ;;  %v4042_v54 = vshrl.u32 %v12881_v22, 16  ;;  %v9709_v30 = vrot.slane %v4011_v10, 11  ;;  %v4021_v16 = vor.u32 %v4019_v52, %v4018_v36  ;;  %v4009_v3 = vsel %vm11967_vm6, %v9708_v53, %v4008_v34  ;;  %v11358_v10 = vld [vmem:[%s14328_s3 + $0x98] sm:$0xff]   ;;  %v4331_v34 = vld [vmem:[#allocation2 + $0x20] sm:$0x1] }
 0x1fc   : > { %v4050_v19 = vshrl.u32 %v3956_v28, 16  ;;  %v4057_v58 = vrot.slane %v4055_v33, 7  ;;  %v4035_v59 = vsel %vm11967_vm6, %v9710_v11, %v4034_v24  ;;  %v4037_v13 = vshrl.u32 %v3954_v55, 16  ;;  %v4338_v33 = vld [vmem:[#allocation2 + $0x4c] sm:$0xf]  ;;  %v11359_v52 = vld [vmem:[%s14328_s3 + $0xa0] sm:$0xff]  }
 0x1fd   : > { %v4044_v37 = vrot.slane %v4042_v54, 7  ;;  %v4058_v20 = vshll.u32 %v12870_v5, 16  ;;  %v4022_v12 = vsel %vm11967_vm6, %v9709_v30, %v4021_v16  ;;  %v4045_v44 = vshll.u32 %v12881_v22, 16  ;;  %v4332_v28 = vld [vmem:[#allocation2 + $0x28] sm:$0xf] }
 0x1fe   : > { %10561 = vmatpush3.bf16.msra.mxu1 %v11351_v1  ;;  %v3995_v1 = vor.u32 %v3993_v35, %v3992_v61  ;;  %v9715_v17 = vcombine.low %v4022_v12, %v4035_v59  ;;  %v9712_v32 = vrot.slane %v4050_v19, 11  ;;  %v9711_v38 = vrot.slane %v4037_v13, 11  ;;  %v4329_v35 = vld [vmem:[#allocation2 + $0x14] sm:$0x1] }
 0x1ff   : > { %10562 = vmatprep.subr.bf16.mxu1 %v11352_v57  ;;  %v4060_v26 = vor.u32 %v4058_v20, %v4057_v58  ;;  %v4047_v15 = vor.u32 %v4045_v44, %v4044_v37  ;;  %v4359_v56 = vshrl.u32 %v4330_v4, 16  ;;  %v4362_v23 = vshll.u32 %v4330_v4, 16  ;;  %v11362_v58 = vld [vmem:[%s14328_s3 + $0xa8] sm:$0xff]  }
 0x200   : > { %v3996_v46 = vsel %vm11967_vm6, %v9707_v40, %v3995_v1  ;;  %v4348_v21 = vshll.u32 %v4328_v48, 16  ;;  %v4336_v40 = vld [vmem:[#allocation2 + $0x40] sm:$0xf]  ;;  %v4368_v54 = vshll.u32 %v4331_v34, 16  ;;  %v4418_v30 = vshll.u32 %v4338_v33, 16 }
 0x201   : > { %10555 = vmatmul.mubr.msk.bf16.gmra.mrb[28].mxu1 %vm3494_vm12, %v9696_v18  ;;  %v9714_v47 = vcombine.low %v3996_v46, %v4009_v3  ;;  %v4061_v53 = vsel %vm11967_vm6, %v9712_v32, %v4060_v26  ;;  %v4048_v61 = vsel %vm11967_vm6, %v9711_v38, %v4047_v15  ;;  %v4345_v18 = vshrl.u32 %v4328_v48, 16  ;;  %v4335_v46 = vld [vmem:[#allocation2 + $0x38] sm:$0x1] }
 0x202   : > { %10563 = vmatpush3.bf16.msra.mxu1 %v11352_v57  ;;  %10566 = vmatprep.mubr.msk.bf16.mxu1 %vm3494_vm12, %v9713_v63  ;;  %v11355_v57 = vld [vmem:[%s14328_s3 + $0x88] sm:$0xff]   ;;  %v9716_v29 = vcombine.low %v4048_v61, %v4061_v53  ;;  %v4361_v36 = vrot.slane %v4359_v56, 4  ;;  %v4364_v45 = vrot.slane %v4362_v23, 5  ;;  %v4334_v63 = vld [vmem:[#allocation2 + $0x34] sm:$0xf]  ;;  %v4350_v24 = vrot.slane %v4348_v21, 5 }
 0x203   : > { %10564 = vmatprep.subr.bf16.mxu1 %v11353_v51  ;;  %v4347_v11 = vrot.slane %v4345_v18, 4  ;;  %v4354_v16 = vshll.u32 %v4329_v35, 16  ;;  %v4373_v55 = vshrl.u32 %v4332_v28, 16  ;;  %v4376_v3 = vshll.u32 %v4332_v28, 16  ;;  %v4340_v56 = vld [vmem:[#allocation2 + $0x58] sm:$0xf] }
 0x204   : > { %v4365_v1 = vor.u32 %v4364_v45, %v4361_v36  ;;  %v9726_v19 = vcombine.low %v12852_v39, %v12840_v7  ;;  %v4401_v13 = vshrl.u32 %v4336_v40, 16  ;;  %v4404_v37 = vshll.u32 %v4336_v40, 16  ;;  %v4342_v39 = vld [vmem:[#allocation2 + $0x64] sm:$0xf] }
 0x205   : > { %v4351_v59 = vor.u32 %v4350_v24, %v4347_v11  ;;  %v9727_v20 = vcombine.low %v12855_v8, %v12844_v14  ;;  %v4370_v44 = vrot.slane %v4368_v54, 5  ;;  %v4420_v7 = vrot.slane %v4418_v30, 5  ;;  %v11363_v14 = vld [vmem:[%s14328_s3 + $0xb0] sm:$0xff]   ;;  %v4337_v61 = vld [vmem:[#allocation2 + $0x44] sm:$0x1]  ;;  %v11365_v24 = vld [vmem:[%s14328_s3 + $0xb8] sm:$0xff]  }
 0x206   : > { %10565 = vmatpush3.bf16.msra.mxu1 %v11353_v51  ;;  %v9725_v51 = vcombine.low %v12825_v9, %v12820_v27  ;;  %v4387_v27 = vshrl.u32 %v4334_v63, 16  ;;  %v4390_v9 = vshll.u32 %v4334_v63, 16  ;;  %v4356_v26 = vrot.slane %v4354_v16, 5  ;;  %v4585_v30 = vld [vmem:[#allocation2 + $0x18] sm:$0x8] }
 0x207   : > { %10574 = vmatprep.subr.bf16.mxu1 %v11354_v0  ;;  %v4375_v38 = vrot.slane %v4373_v55, 4  ;;  %v4378_v15 = vrot.slane %v4376_v3, 5  ;;  %v4396_v4 = vshll.u32 %v4335_v46, 16  ;;  %v4352_v8 = vrot.slane %v4351_v59, 4  ;;  %v12947_v16 = vld [vmem:[#allocation2 + $0x1c] sm:$0xf] }
 0x208   : > { %v4389_v12 = vrot.slane %v4387_v27, 4  ;;  %v4403_v53 = vrot.slane %v4401_v13, 4  ;;  %v4406_v48 = vrot.slane %v4404_v37, 5  ;;  %v4429_v35 = vshrl.u32 %v4340_v56, 16  ;;  %v4343_v3 = vld [vmem:[#allocation2 + $0x68] sm:$0x1] }
 0x209   : > { %10567 = vmatmul.mubr.msk.bf16.vlgmr.msra.gmra.mrb[24].mxu1 %vm3494_vm12, %v9714_v47  ;;  %v4333_v47 = vld [vmem:[#allocation2 + $0x2c] sm:$0x1]  ;;  %v4379_v45 = vor.u32 %v4378_v15, %v4375_v38  ;;  %v4398_v63 = vrot.slane %v4396_v4, 5  ;;  %v4432_v34 = vshll.u32 %v4340_v56, 16  ;;  %v4357_v11 = vsel %vm12235_vm10, %v4352_v8, %v4356_v26  ;;  %v4341_v59 = vld [vmem:[#allocation2 + $0x5c] sm:$0x1] }
 0x20a   : > { %10575 = vmatpush3.bf16.msra.mxu1 %v11354_v0  ;;  %10570 = vmatprep.mubr.msk.bf16.mxu1 %vm3494_vm12, %v9715_v17  ;;  %v4415_v0 = vshrl.u32 %v4338_v33, 16  ;;  %v4366_v17 = vrot.slane %v4365_v1, 4  ;;  %v4382_v21 = vshll.u32 %v4333_v47, 16  ;;  %v12938_v33 = vld [vmem:[#allocation2 + $0x28] sm:$0xf]  ;;  %v4407_v28 = vor.u32 %v4406_v48, %v4403_v53 }
 0x20b   : > { %10576 = vmatprep.subr.bf16.mxu1 %v11355_v57  ;;  %v4410_v27 = vshll.u32 %v4337_v61, 16  ;;  %v4431_v46 = vrot.slane %v4429_v35, 4  ;;  %v4434_v13 = vrot.slane %v4432_v34, 5  ;;  %v4438_v26 = vshll.u32 %v4341_v59, 16  ;;  %v12960_v4 = vld [vmem:[#allocation2 + $0x40] sm:$0xf] }
 0x20c   : > { %v4417_v32 = vrot.slane %v4415_v0, 4  ;;  %v4371_v18 = vsel %vm12235_vm10, %v4366_v17, %v4370_v44  ;;  %v4408_v47 = vrot.slane %v4407_v28, 4  ;;  %v4591_v17 = vld [vmem:[#allocation2 + $0x3c] sm:$0x8]  ;;  %v4602_v38 = vshrl.u32 %v4585_v30, 16  ;;  %v11367_v61 = vld [vmem:[%s14328_s3 + $0xc8] sm:$0xff]  }
 0x20d   : > { %v9737_v40 = vcombine.low %v4357_v11, %v4371_v18  ;;  %v4641_v53 = vshrl.u32 %v4591_v17, 16  ;;  %v12964_v48 = vld [vmem:[#allocation2 + $0x58] sm:$0xf]  ;;  %v12972_v18 = vld [vmem:[#allocation2 + $0x34] sm:$0xf]  ;;  %v4440_v35 = vrot.slane %v4438_v26, 5 }
 0x20e   : > { %10577 = vmatpush3.bf16.msra.mxu1 %v11355_v57  ;;  %v4392_v57 = vrot.slane %v4390_v9, 5  ;;  %v4587_v9 = vld [vmem:[#allocation2 + $0x24] sm:$0x8]  ;;  %v4610_v34 = vshll.u32 %v12947_v16, 16  ;;  %v4589_v11 = vld [vmem:[#allocation2 + $0x30] sm:$0x8] }
 0x20f   : > { %10578 = vmatprep.subr.bf16.mxu1 %v11356_v25  ;;  %v4615_v37 = vshrl.u32 %v4587_v9, 16  ;;  %v4593_v9 = vld [vmem:[#allocation2 + $0x48] sm:$0x8]  ;;  %v4599_v26 = vld [vmem:[#allocation2 + $0x6c] sm:$0x8] }
 0x210   : > { %v4393_v23 = vor.u32 %v4392_v57, %v4389_v12  ;;  %v4412_v12 = vrot.slane %v4410_v27, 5  ;;  %v4607_v57 = vshrl.u32 %v12947_v16, 16  ;;  %v4633_v27 = vshrl.u32 %v12972_v18, 16 }
 0x211   : > { %10571 = vmatmul.mubr.msk.bf16.gmra.mrb[28].mxu1 %vm3494_vm12, %v9716_v29  ;;  %v4443_v29 = vshrl.u32 %v4342_v39, 16  ;;  %v9750_v8 = vrot.slane %v4615_v37, 11  ;;  %v4654_v59 = vshrl.u32 %v4593_v9, 16  ;;  %v12992_v37 = vld [vmem:[#allocation2 + $0x64] sm:$0xf] }
 0x212   : > { %10579 = vmatpush3.bf16.msra.mxu1 %v11356_v25  ;;  %10582 = vmatprep.mubr.msk.bf16.mxu1 %vm3494_vm12, %v9725_v51  ;;  %v4339_v25 = vld [vmem:[#allocation2 + $0x50] sm:$0x1]  ;;  %v4421_v51 = vor.u32 %v4420_v7, %v4417_v32  ;;  %v4394_v1 = vrot.slane %v4393_v23, 4  ;;  %v4452_v7 = vshll.u32 %v4343_v3, 16  ;;  %v4413_v23 = vsel %vm12235_vm10, %v4408_v47, %v4412_v12 }
 0x213   : > { %10580 = vmatprep.subr.bf16.mxu1 %v11358_v10  ;;  %v4424_v36 = vshll.u32 %v4339_v25, 16  ;;  %v4445_v54 = vrot.slane %v4443_v29, 4  ;;  %v4609_v29 = vrot.slane %v4607_v57, 7  ;;  %v9752_v3 = vrot.slane %v4641_v53, 11 }
 0x214   : > { %v4399_v44 = vsel %vm12235_vm10, %v4394_v1, %v4398_v63  ;;  %v12975_v63 = vld [vmem:[#allocation2 + $0x4c] sm:$0xf]  ;;  %v11368_v1 = vld [vmem:[%s14328_s3 + $0xd0] sm:$0xff]   ;;  %v4635_v47 = vrot.slane %v4633_v27, 7  ;;  %v4649_v12 = vshll.u32 %v12960_v4, 16 }
 0x215   : > { %v4426_v55 = vrot.slane %v4424_v36, 5  ;;  %v4454_v36 = vrot.slane %v4452_v7, 5  ;;  %v4659_v30 = vshrl.u32 %v12975_v63, 16  ;;  %v13020_v27 = vld [vmem:[%s14335_s10] ss:$0 sm:$0xff] }
 0x216   : > { %10581 = vmatpush3.bf16.msra.mxu1 %v11358_v10  ;;  %v4446_v10 = vshll.u32 %v4342_v39, 16 }
 0x217   : > { %10590 = vmatprep.subr.bf16.mxu1 %v11359_v52  ;;  %v4661_v7 = vrot.slane %v4659_v30, 7 }
 0x218   : > { %v4448_v0 = vrot.slane %v4446_v10, 5  ;;  %v4623_v10 = vshll.u32 %v12938_v33, 16 }
 0x219   : > { %10583 = vmatmul.mubr.msk.bf16.vlgmr.msra.gmra.mrb[24].mxu1 %vm3494_vm12, %v9726_v19  ;;  %v4620_v19 = vshrl.u32 %v12938_v33, 16 }
 0x21a   : > { %10591 = vmatpush3.bf16.msra.mxu1 %v11359_v52  ;;  %10586 = vmatprep.mubr.msk.bf16.mxu1 %vm3494_vm12, %v9727_v20  ;;  %v9728_v52 = vcombine.low %v12881_v22, %v12870_v5  ;;  %v4384_v5 = vrot.slane %v4382_v21, 5  ;;  %v4422_v22 = vrot.slane %v4421_v51, 4  ;;  %v11366_v20 = vld [vmem:[%s14328_s3 + $0xc0] sm:$0xff]   ;;  %v4449_v32 = vor.u32 %v4448_v0, %v4445_v54 }
 0x21b   : > { %10592 = vmatprep.subr.bf16.mxu1 %v11362_v58  ;;  %v4622_v15 = vrot.slane %v4620_v19, 7  ;;  %v9749_v54 = vrot.slane %v4602_v38, 11  ;;  %v4612_v0 = vor.u32 %v4610_v34, %v4609_v29 }
 0x21c   : > { %v4427_v39 = vsel %vm12235_vm10, %v4422_v22, %v4426_v55  ;;  %v4450_v51 = vrot.slane %v4449_v32, 4  ;;  %v4628_v55 = vshrl.u32 %v4589_v11, 16  ;;  %v11369_v32 = vld [vmem:[%s14328_s3 + $0xd8] sm:$0xff]  }
 0x21d   : > { %v9739_v21 = vcombine.low %v4413_v23, %v4427_v39  ;;  %v4675_v39 = vshll.u32 %v12964_v48, 16  ;;  %v4597_v23 = vld [vmem:[#allocation2 + $0x60] sm:$0x8] }
 0x21e   : > { %10593 = vmatpush3.bf16.msra.mxu1 %v11362_v58  ;;  %v4380_v58 = vrot.slane %v4379_v45, 4  ;;  %v4646_v45 = vshrl.u32 %v12960_v4, 16  ;;  %v4455_v22 = vsel %vm12235_vm10, %v4450_v51, %v4454_v36  ;;  %v9753_v51 = vrot.slane %v4654_v59, 11 }
 0x21f   : > { %10594 = vmatprep.subr.bf16.mxu1 %v11363_v14 }
 0x220   : > { %v4385_v25 = vsel %vm12235_vm10, %v4380_v58, %v4384_v5  ;;  %v12986_v5 = vld [vmem:[#allocation2 + $0x70] sm:$0xf]  ;;  %v4648_v19 = vrot.slane %v4646_v45, 7 }
 0x221   : > { %10587 = vmatmul.mubr.msk.bf16.gmra.mrb[28].mxu1 %vm3494_vm12, %v9728_v52  ;;  %v9738_v56 = vcombine.low %v4385_v25, %v4399_v44  ;;  %v4625_v52 = vor.u32 %v4623_v10, %v4622_v15  ;;  %v4698_v57 = vshrl.u32 %v12986_v5, 16  ;;  %v4613_v44 = vsel %vm11967_vm6, %v9749_v54, %v4612_v0 }
 0x222   : > { %10595 = vmatpush3.bf16.msra.mxu1 %v11363_v14  ;;  %10598 = vmatprep.mubr.msk.bf16.mxu1 %vm3494_vm12, %v9737_v40  ;;  %v4435_v14 = vor.u32 %v4434_v13, %v4431_v46  ;;  %v4595_v40 = vld [vmem:[#allocation2 + $0x54] sm:$0x8]  ;;  %v4636_v15 = vshll.u32 %v12972_v18, 16  ;;  %v4651_v25 = vor.u32 %v4649_v12, %v4648_v19  ;;  %v4693_v10 = vshrl.u32 %v4599_v26, 16  ;;  %v13034_v19 = vld [vmem:[%s14335_s10 + $0x1] ss:$0 sm:$0xff] }
 0x223   : > { %10596 = vmatprep.subr.bf16.mxu1 %v11365_v24  ;;  %v4626_v58 = vsel %vm11967_vm6, %v9750_v8, %v4625_v52  ;;  %v4667_v46 = vshrl.u32 %v4595_v40, 16  ;;  %v4662_v8 = vshll.u32 %v12975_v63, 16  ;;  %v4700_v45 = vrot.slane %v4698_v57, 7  ;;  %v4971_v26 = vld [vmem:[#allocation2 + $0x1c] sm:$0xf] }
 0x224   : > { %v4436_v28 = vrot.slane %v4435_v14, 4  ;;  %v9757_v38 = vcombine.low %v4613_v44, %v4626_v58  ;;  %v4685_v14 = vshrl.u32 %v12992_v37, 16  ;;  %v4638_v29 = vor.u32 %v4636_v15, %v4635_v47 }
 0x225   : > { %v9754_v53 = vrot.slane %v4667_v46, 11  ;;  %v4664_v36 = vor.u32 %v4662_v8, %v4661_v7  ;;  %v4652_v34 = vsel %vm11967_vm6, %v9752_v3, %v4651_v25  ;;  %v4680_v52 = vshrl.u32 %v4597_v23, 16 }
 0x226   : > { %10597 = vmatpush3.bf16.msra.mxu1 %v11365_v24  ;;  %v4672_v24 = vshrl.u32 %v12964_v48, 16  ;;  %v4687_v11 = vrot.slane %v4685_v14, 7  ;;  %v4688_v40 = vshll.u32 %v12992_v37, 16 }
 0x227   : > { %10606 = vmatprep.subr.bf16.mxu1 %v11366_v20  ;;  %v9755_v46 = vrot.slane %v4680_v52, 11  ;;  %v11374_v52 = vld [vmem:[%s14328_s3 + $0xf8] sm:$0xff]  }
 0x228   : > { %v4674_v13 = vrot.slane %v4672_v24, 7 }
 0x229   : > { %10599 = vmatmul.mubr.msk.bf16.vlgmr.msra.gmra.mrb[24].mxu1 %vm3494_vm12, %v9738_v56 }
 0x22a   : > { %10607 = vmatpush3.bf16.msra.mxu1 %v11366_v20  ;;  %10602 = vmatprep.mubr.msk.bf16.mxu1 %vm3494_vm12, %v9739_v21  ;;  %v4441_v20 = vsel %vm12235_vm10, %v4436_v28, %v4440_v35  ;;  %v4677_v56 = vor.u32 %v4675_v39, %v4674_v13  ;;  %v11370_v21 = vld [vmem:[%s14328_s3 + $0xe0] sm:$0xff]   ;;  %v4701_v35 = vshll.u32 %v12986_v5, 16  ;;  %v4690_v13 = vor.u32 %v4688_v40, %v4687_v11 }
 0x22b   : > { %10608 = vmatprep.subr.bf16.mxu1 %v11367_v61  ;;  %v9740_v17 = vcombine.low %v4441_v20, %v4455_v22  ;;  %v4665_v22 = vsel %vm11967_vm6, %v9753_v51, %v4664_v36  ;;  %v4973_v20 = vld [vmem:[#allocation2 + $0x28] sm:$0xf]  ;;  %v4988_v51 = vshrl.u32 %v4971_v26, 16  ;;  %v4991_v11 = vshll.u32 %v4971_v26, 16  ;;  %v4977_v40 = vld [vmem:[#allocation2 + $0x40] sm:$0xf] }
 0x22c   : > { %v4678_v24 = vsel %vm11967_vm6, %v9754_v53, %v4677_v56  ;;  %v4703_v3 = vor.u32 %v4701_v35, %v4700_v45  ;;  %v4691_v25 = vsel %vm11967_vm6, %v9755_v46, %v4690_v13  ;;  %v5005_v14 = vshll.u32 %v4973_v20, 16  ;;  %v4975_v13 = vld [vmem:[#allocation2 + $0x34] sm:$0xf] }
 0x22d   : > { %v4993_v46 = vrot.slane %v4991_v11, 5  ;;  %v5019_v26 = vshll.u32 %v4975_v13, 16 }
 0x22e   : > { %10609 = vmatpush3.bf16.msra.mxu1 %v11367_v61  ;;  %v9751_v61 = vrot.slane %v4628_v55, 11  ;;  %v11371_v55 = vld [vmem:[%s14328_s3 + $0xe8] sm:$0xff]  }
 0x22f   : > { %10610 = vmatprep.subr.bf16.mxu1 %v11368_v1 }
 0x230   : > { %v4639_v9 = vsel %vm11967_vm6, %v9751_v61, %v4638_v29 }
 0x231   : > { %10603 = vmatmul.mubr.msk.bf16.gmra.mrb[28].mxu1 %vm3494_vm12, %v9740_v17  ;;  %v9758_v30 = vcombine.low %v4639_v9, %v4652_v34  ;;  %v5007_v9 = vrot.slane %v5005_v14, 5  ;;  %v4985_v14 = vld [vmem:[#allocation2 + $0x70] sm:$0xf] }
 0x232   : > { %10611 = vmatpush3.bf16.msra.mxu1 %v11368_v1  ;;  %10614 = vmatprep.mubr.msk.bf16.mxu1 %vm3494_vm12, %v9757_v38  ;;  %v9756_v1 = vrot.slane %v4693_v10, 11  ;;  %v5002_v38 = vshrl.u32 %v4973_v20, 16  ;;  %v9769_v10 = vcombine.low %v12947_v16, %v12938_v33 }
 0x233   : > { %10612 = vmatprep.subr.bf16.mxu1 %v11369_v32 }
 0x234   : > { %v4704_v39 = vsel %vm11967_vm6, %v9756_v1, %v4703_v3  ;;  %v4990_v3 = vrot.slane %v4988_v51, 4 }
 0x235   : > { %v9760_v34 = vcombine.low %v4691_v25, %v4704_v39  ;;  %v5016_v39 = vshrl.u32 %v4975_v13, 16 }
 0x236   : > { %v10504_v28 = vpop.f32.mrb[0].mxu0  ;;  %10613 = vmatpush3.bf16.msra.mxu1 %v11369_v32 }
 0x237   : > { %v10978_v54 = vadd.f32 %v10504_v28, %v12613_v43  ;;  %v2998_v0 = vpop.f32.mrb[1].mxu0  ;;  %10622 = vmatprep.subr.bf16.mxu1 %v11370_v21  ;;  %v9759_v43 = vcombine.low %v4665_v22, %v4678_v24  ;;  %v5004_v28 = vrot.slane %v5002_v38, 4 }
 0x238   : > { %v10979_v58 = vadd.f32 %v2998_v0, %v12615_v42  ;;  %v10505_v59 = vpop.f32.mrb[2].mxu0  ;;  %v4972_v42 = vld [vmem:[#allocation2 + $0x20] sm:$0x1] }
 0x239   : > { %v3044_v47 = vmul.f32 %v10978_v54, %v13020_v27  ;;  %v10980_v12 = vadd.f32 %v10505_v59, %v12617_v62  ;;  %v3001_v57 = vpop.f32.mrb[3].mxu0  ;;  %10615 = vmatmul.mubr.msk.bf16.vlgmr.msra.gmra.mrb[24].mxu1 %vm3494_vm12, %v9758_v30  ;;  %v11372_v62 = vld [vmem:[%s14328_s3 + $0xf0] sm:$0xff]   ;;  %v4997_v56 = vshll.u32 %v4972_v42, 16 }
 0x23a   : > { %v3042_v17 = vmul.f32 %v10979_v58, %v13020_v27  ;;  %v10981_v44 = vadd.f32 %v3001_v57, %v12619_v31  ;;  %10623 = vmatpush3.bf16.msra.mxu1 %v11370_v21  ;;  %10618 = vmatprep.mubr.msk.bf16.mxu1 %vm3494_vm12, %v9759_v43  ;;  %v13058_v21 = vld [vmem:[#allocation2 + $0x2c] sm:$0x1]  ;;  %v11375_v43 = vld [vmem:[%s14328_s3 + $0x100] sm:$0xff]  }
 0x23b   : > { %v3057_v32 = vadd.f32 %v13034_v19, %v3044_v47  ;;  %v3045_v7 = vmul.f32 %v10980_v12, %v13020_v27  ;;  %10624 = vmatprep.subr.bf16.mxu1 %v11371_v55  ;;  %v13071_v0 = vrot.slane %v4997_v56, 5  ;;  %v5011_v30 = vshll.u32 %v13058_v21, 16  ;;  %v4979_v12 = vld [vmem:[#allocation2 + $0x4c] sm:$0xf] }
 0x23c   : > { %v3055_v31 = vadd.f32 %v13034_v19, %v3042_v17  ;;  %v3043_v15 = vmul.f32 %v10981_v44, %v13020_v27  ;;  %v5047_v25 = vshll.u32 %v4979_v12, 16 }
 0x23d   : > { %v3065_v8 = vmax.f32 %v3057_v32, 0.0  ;;  %v3058_v53 = vadd.f32 %v13034_v19, %v3045_v7 }
 0x23e   : > { %v3063_v23 = vmax.f32 %v3055_v31, 0.0  ;;  %v3056_v61 = vadd.f32 %v13034_v19, %v3043_v15  ;;  %v10508_v29 = vpop.f32.mrb[4].mxu0  ;;  %10625 = vmatpush3.bf16.msra.mxu1 %v11371_v55  ;;  %v9770_v55 = vcombine.low %v12972_v18, %v12960_v4  ;;  %v5008_v4 = vor.u32 %v5007_v9, %v5004_v28 }
 0x23f   : > { %9392 = vst [vmem:[%s12654_s23 + $0x50] sm:$0xff] %v3065_v8  ;;  %v3066_v36 = vmax.f32 %v3058_v53, 0.0  ;;  %v10982_v45 = vadd.f32 %v10508_v29, %v12621_v50  ;;  %v3014_v35 = vpop.f32.mrb[5].mxu0  ;;  %10626 = vmatprep.subr.bf16.mxu1 %v11372_v62  ;;  %v5033_v18 = vshll.u32 %v4977_v40, 16  ;;  %v4994_v31 = vor.u32 %v4993_v46, %v4990_v3  ;;  %v4976_v53 = vld [vmem:[#allocation2 + $0x38] sm:$0x1] }
 0x240   : > { %9390 = vst [vmem:[%s12654_s23 + $0x10] sm:$0xff] %v3063_v23  ;;  %v3064_v24 = vmax.f32 %v3056_v61, 0.0  ;;  %v10983_v33 = vadd.f32 %v3014_v35, %v12623_v41  ;;  %v10509_v16 = vpop.f32.mrb[6].mxu0  ;;  %v5044_v15 = vshrl.u32 %v4979_v12, 16  ;;  %v5009_v61 = vrot.slane %v5008_v4, 4 }
 0x241   : > { %9393 = vst [vmem:[%s12654_s23 + $0x70] sm:$0xff] %v3066_v36  ;;  %v3048_v50 = vmul.f32 %v10982_v45, %v13020_v27  ;;  %v10984_v1 = vadd.f32 %v10509_v16, %v12625_v6  ;;  %v3017_v54 = vpop.f32.mrb[7].mxu0  ;;  %10619 = vmatmul.mubr.msk.bf16.gmra.mrb[28].mxu1 %vm3494_vm12, %v9760_v34  ;;  %v4981_v6 = vld [vmem:[#allocation2 + $0x58] sm:$0xf]  ;;  %v5035_v23 = vrot.slane %v5033_v18, 5  ;;  %v5013_v29 = vrot.slane %v5011_v30, 5 }
 0x242   : > { %9391 = vst [vmem:[%s12654_s23 + $0x30] sm:$0xff] %v3064_v24  ;;  %v3046_v22 = vmul.f32 %v10983_v33, %v13020_v27  ;;  %v10985_v41 = vadd.f32 %v3017_v54, %v12630_v2  ;;  %10627 = vmatpush3.bf16.msra.mxu1 %v11372_v62  ;;  %10630 = vmatprep.mubr.msk.bf16.mxu1 %vm3494_vm12, %v9769_v10  ;;  %v5030_v2 = vshrl.u32 %v4977_v40, 16  ;;  %v5058_v44 = vshrl.u32 %v4981_v6, 16  ;;  %v4978_v62 = vld [vmem:[#allocation2 + $0x44] sm:$0x1] }
 0x243   : > { %v3061_v58 = vadd.f32 %v13034_v19, %v3048_v50  ;;  %v3049_v59 = vmul.f32 %v10984_v1, %v13020_v27  ;;  %10628 = vmatprep.subr.bf16.mxu1 %v11374_v52  ;;  %v5061_v42 = vshll.u32 %v4981_v6, 16  ;;  %v4980_v10 = vld [vmem:[#allocation2 + $0x50] sm:$0x1]  ;;  %v4983_v36 = vld [vmem:[#allocation2 + $0x64] sm:$0xf]  ;;  %v5018_v45 = vrot.slane %v5016_v39, 4 }
 0x244   : > { %v3059_v20 = vadd.f32 %v13034_v19, %v3046_v22  ;;  %v3047_v47 = vmul.f32 %v10985_v41, %v13020_v27  ;;  %v11378_v27 = vld [vmem:[%s14328_s3 + $0x108] sm:$0xff]   ;;  %v5032_v56 = vrot.slane %v5030_v2, 4  ;;  %v5060_v21 = vrot.slane %v5058_v44, 4 }
 0x245   : > { %v3069_v57 = vmax.f32 %v3061_v58, 0.0  ;;  %v3062_v17 = vadd.f32 %v13034_v19, %v3049_v59  ;;  %v5063_v51 = vrot.slane %v5061_v42, 5  ;;  %v5021_v35 = vrot.slane %v5019_v26, 5  ;;  %v11381_v59 = vld [vmem:[%s14328_s3 + $0x118] sm:$0xff]  }
 0x246   : > { %v3067_v32 = vmax.f32 %v3059_v20, 0.0  ;;  %v3060_v7 = vadd.f32 %v13034_v19, %v3047_v47  ;;  %10629 = vmatpush3.bf16.msra.mxu1 %v11374_v52  ;;  %v9771_v19 = vcombine.low %v12975_v63, %v12964_v48  ;;  %v5039_v34 = vshll.u32 %v4978_v62, 16  ;;  %v4982_v48 = vld [vmem:[#allocation2 + $0x5c] sm:$0x1]  ;;  %v11379_v52 = vld [vmem:[%s14328_s3 + $0x110] sm:$0xff]  }
 0x247   : > { %9396 = vst [vmem:[%s12654_s23 + $0xd0] sm:$0xff] %v3069_v57  ;;  %v3070_v38 = vmax.f32 %v3062_v17, 0.0  ;;  %10638 = vmatprep.subr.bf16.mxu1 %v11375_v43  ;;  %v5086_v63 = vshrl.u32 %v4985_v14, 16  ;;  %v4995_v11 = vrot.slane %v4994_v31, 4  ;;  %v5046_v24 = vrot.slane %v5044_v15, 4 }
 0x248   : > { %9394 = vst [vmem:[%s12654_s23 + $0x90] sm:$0xff] %v3067_v32  ;;  %v3068_v8 = vmax.f32 %v3060_v7, 0.0  ;;  %v5049_v33 = vrot.slane %v5047_v25, 5  ;;  %v5089_v16 = vshll.u32 %v4985_v14, 16  ;;  %v5036_v28 = vor.u32 %v5035_v23, %v5032_v56  ;;  %v4984_v20 = vld [vmem:[#allocation2 + $0x68] sm:$0x1] }
 0x249   : > { %9397 = vst [vmem:[%s12654_s23 + $0xf0] sm:$0xff] %v3070_v38  ;;  %10631 = vmatmul.mubr.msk.bf16.vlgmr.msra.gmra.mrb[24].mxu1 %vm3494_vm12, %v9770_v55  ;;  %v5072_v9 = vshrl.u32 %v4983_v36, 16  ;;  %v5075_v40 = vshll.u32 %v4983_v36, 16  ;;  %v5014_v50 = vsel %vm12235_vm10, %v5009_v61, %v5013_v29  ;;  %v5025_v1 = vshll.u32 %v4976_v53, 16  ;;  %v11383_v23 = vld [vmem:[%s14330_s5 + $0x38] sm:$0xff]   ;;  %v11384_v61 = vld [vmem:[%s14330_s5 + $0x40] sm:$0xff]  }
 0x24a   : > { %9395 = vst [vmem:[%s12654_s23 + $0xb0] sm:$0xff] %v3068_v8  ;;  %10639 = vmatpush3.bf16.msra.mxu1 %v11375_v43  ;;  %10634 = vmatprep.mubr.msk.bf16.mxu1 %vm3494_vm12, %v9771_v19  ;;  %v5064_v54 = vor.u32 %v5063_v51, %v5060_v21  ;;  %v5067_v30 = vshll.u32 %v4982_v48, 16  ;;  %v5022_v22 = vor.u32 %v5021_v35, %v5018_v45  ;;  %v5041_v41 = vrot.slane %v5039_v34, 5  ;;  %v11385_v29 = vld [vmem:[%s14330_s5 + $0x48] sm:$0xff]   ;;  %v11387_v21 = vld [vmem:[#allocation3 + $0x20] sm:$0xff]   ;;  %v11389_v51 = vld [vmem:[#allocation3 + $0x28] sm:$0xff]  }
 0x24b   : > { %10640 = vmatprep.subr.bf16.mxu1 %v11378_v27  ;;  %v5053_v55 = vshll.u32 %v4980_v10, 16  ;;  %v5088_v3 = vrot.slane %v5086_v63, 4  ;;  %v9772_v6 = vcombine.low %v12992_v37, %v12986_v5  ;;  %v5000_v58 = vsel %vm12235_vm10, %v4995_v11, %v13071_v0  ;;  %v4986_v5 = vld [vmem:[#allocation2 + $0x74] sm:$0x1]  ;;  %10656 = vmatprep.subr.bf16.mxu0 %v11383_v23  ;;  %v11388_v36 = vld [vmem:[%s14330_s5 + $0x58] sm:$0xff]   ;;  %v11393_v45 = vld [vmem:[#allocation3 + $0x30] sm:$0xff]  }
 0x24c   : > { %v5050_v43 = vor.u32 %v5049_v33, %v5046_v24  ;;  %v5091_v46 = vrot.slane %v5089_v16, 5  ;;  %v9781_v13 = vcombine.low %v5000_v58, %v5014_v50  ;;  %v5037_v2 = vrot.slane %v5036_v28, 4  ;;  %10657 = vmatpush3.bf16.msra.mxu0 %v11383_v23  ;;  %v11386_v10 = vld [vmem:[%s14330_s5 + $0x50] sm:$0xff]   ;;  %v13148_v35 = vld [vmem:[%s14330_s5] sm:$0xff]   ;;  %v13151_v48 = vld [vmem:[#allocation3] sm:$0xff]  }
 0x24d   : > { %v5074_v47 = vrot.slane %v5072_v9, 4  ;;  %v5077_v4 = vrot.slane %v5075_v40, 5  ;;  %v5065_v18 = vrot.slane %v5064_v54, 4  ;;  %v5069_v12 = vrot.slane %v5067_v30, 5  ;;  %10658 = vmatprep.subr.bf16.mxu0 %v11384_v61  ;;  %v11395_v34 = vld [vmem:[#allocation3 + $0x38] sm:$0xff]  }
 0x24e   : > { %10641 = vmatpush3.bf16.msra.mxu1 %v11378_v27  ;;  %v5023_v37 = vrot.slane %v5022_v22, 4  ;;  %v5027_v0 = vrot.slane %v5025_v1, 5  ;;  %v5051_v57 = vrot.slane %v5050_v43, 4  ;;  %v5055_v17 = vrot.slane %v5053_v55, 5  ;;  %v13154_v63 = vld [vmem:[#allocation2 + $0x4] sm:$0xf] }
 0x24f   : > { %10642 = vmatprep.subr.bf16.mxu1 %v11379_v52  ;;  %v5081_v44 = vshll.u32 %v4984_v20, 16  ;;  %v5042_v42 = vsel %vm12235_vm10, %v5037_v2, %v5041_v41  ;;  %v5078_v32 = vor.u32 %v5077_v4, %v5074_v47  ;;  %v5092_v7 = vor.u32 %v5091_v46, %v5088_v3  ;;  %v5303_v11 = vld [vmem:[#allocation2] sm:$0x8]  ;;  %v5305_v24 = vld [vmem:[#allocation2 + $0xc] sm:$0x8] }
 0x250   : > { %v5095_v62 = vshll.u32 %v4986_v5, 16  ;;  %v5070_v39 = vsel %vm12235_vm10, %v5065_v18, %v5069_v12  ;;  %v5028_v26 = vsel %vm12235_vm10, %v5023_v37, %v5027_v0  ;;  %v5056_v27 = vsel %vm12235_vm10, %v5051_v57, %v5055_v17  ;;  %10659 = vmatpush3.bf16.msra.mxu0 %v11384_v61  ;;  %v7427_v33 = vld [vmem:[#allocation2] sm:$0x8]  ;;  %v7429_v16 = vld [vmem:[#allocation2 + $0xc] sm:$0x8] }
 0x251   : > { %10635 = vmatmul.mubr.msk.bf16.gmra.mrb[28].mxu1 %vm3494_vm12, %v9772_v6  ;;  %v9782_v38 = vcombine.low %v5028_v26, %v5042_v42  ;;  %v5083_v31 = vrot.slane %v5081_v44, 5  ;;  %v9783_v15 = vcombine.low %v5056_v27, %v5070_v39  ;;  %v5079_v25 = vrot.slane %v5078_v32, 4  ;;  %10660 = vmatprep.subr.bf16.mxu0 %v11385_v29  ;;  %v5307_v28 = vld [vmem:[#allocation2 + $0x18] sm:$0x8]  ;;  %v5309_v54 = vld [vmem:[#allocation2 + $0x24] sm:$0x8] }
 0x252   : > { %10643 = vmatpush3.bf16.msra.mxu1 %v11379_v52  ;;  %10646 = vmatprep.mubr.msk.bf16.mxu1 %vm3494_vm12, %v9781_v13  ;;  %v5093_v14 = vrot.slane %v5092_v7, 4  ;;  %v5097_v8 = vrot.slane %v5095_v62, 5  ;;  %v13156_v52 = vld [vmem:[#allocation2 + $0x4] sm:$0xf]  ;;  %v5325_v9 = vshrl.u32 %v13154_v63, 16  ;;  %v5320_v50 = vshrl.u32 %v5303_v11, 16 }
 0x253   : > { %10644 = vmatprep.subr.bf16.mxu1 %v11381_v59  ;;  %v5084_v19 = vsel %vm12235_vm10, %v5079_v25, %v5083_v31  ;;  %v7449_v40 = vshrl.u32 %v13156_v52, 16  ;;  %v5333_v1 = vshrl.u32 %v5305_v24, 16  ;;  %v5311_v30 = vld [vmem:[#allocation2 + $0x30] sm:$0x8]  ;;  %v7444_v22 = vshrl.u32 %v7427_v33, 16 }
 0x254   : > { %v5098_v53 = vsel %vm12235_vm10, %v5093_v14, %v5097_v8  ;;  %10661 = vmatpush3.bf16.msra.mxu0 %v11385_v29  ;;  %v7457_v41 = vshrl.u32 %v7429_v16, 16  ;;  %v5346_v55 = vshrl.u32 %v5307_v28, 16  ;;  %v5313_v3 = vld [vmem:[#allocation2 + $0x3c] sm:$0x8]  ;;  %v7431_v6 = vld [vmem:[#allocation2 + $0x18] sm:$0x8] }
 0x255   : > { %v9784_v56 = vcombine.low %v5084_v19, %v5098_v53  ;;  %10662 = vmatprep.subr.bf16.mxu0 %v11386_v10  ;;  %v7433_v58 = vld [vmem:[#allocation2 + $0x24] sm:$0x8]  ;;  %v13160_v43 = vrot.slane %v5325_v9, 7  ;;  %v5359_v13 = vshrl.u32 %v5309_v54, 16  ;;  %v5372_v2 = vshrl.u32 %v5311_v30, 16 }
 0x256   : > { %10645 = vmatpush3.bf16.msra.mxu1 %v11381_v59  ;;  %v7435_v59 = vld [vmem:[#allocation2 + $0x30] sm:$0x8]  ;;  %v7437_v20 = vld [vmem:[#allocation2 + $0x3c] sm:$0x8]  ;;  %v13163_v47 = vrot.slane %v7449_v40, 7  ;;  %v13166_v18 = vrot.slane %v5320_v50, 11 }
 0x257   : > { %10834 = vmatprep.subr.bf16.mxu1 %v11387_v21  ;;  %v13168_v12 = vrot.slane %v5333_v1, 11  ;;  %v5706_v5 = vld [vmem:[#allocation2 + $0x4] sm:$0xf]  ;;  %v5385_v37 = vshrl.u32 %v5313_v3, 16  ;;  %v7470_v0 = vshrl.u32 %v7431_v6, 16  ;;  %v7483_v57 = vshrl.u32 %v7433_v58, 16 }
 0x258   : > { %10663 = vmatpush3.bf16.msra.mxu0 %v11386_v10  ;;  %v7496_v17 = vshrl.u32 %v7435_v59, 16  ;;  %v7797_v44 = vld [vmem:[#allocation2 + $0x4] sm:$0xf]  ;;  %v13170_v42 = vrot.slane %v7444_v22, 11  ;;  %v13172_v32 = vrot.slane %v7457_v41, 11  ;;  %v13174_v7 = vrot.slane %v5346_v55, 11 }
 0x259   : > { %10647 = vmatmul.mubr.msk.bf16.vlgmr.msra.gmra.mrb[24].mxu1 %vm3494_vm12, %v9782_v38  ;;  %10664 = vmatprep.subr.bf16.mxu0 %v11388_v36  ;;  %v7509_v62 = vshrl.u32 %v7437_v20, 16  ;;  %v13176_v39 = vrot.slane %v5359_v13, 11  ;;  %v13178_v26 = vrot.slane %v5372_v2, 11  ;;  %v5315_v38 = vld [vmem:[#allocation2 + $0x48] sm:$0x8]  ;;  %v5723_v27 = vshrl.u32 %v5706_v5, 16 }
 0x25a   : > { %10650 = vmatprep.mubr.msk.bf16.mxu1 %vm3494_vm12, %v9783_v15  ;;  %10835 = vmatpush3.bf16.msra.mxu1 %v11387_v21  ;;  %v5726_v31 = vshll.u32 %v5706_v5, 16  ;;  %v5317_v15 = vld [vmem:[#allocation2 + $0x54] sm:$0x8]  ;;  %v5707_v25 = vld [vmem:[#allocation2 + $0x8] sm:$0x1]  ;;  %v7814_v14 = vshrl.u32 %v7797_v44, 16 }
 0x25b   : > { %10836 = vmatprep.subr.bf16.mxu1 %v11389_v51  ;;  %v7817_v8 = vshll.u32 %v7797_v44, 16  ;;  %v13180_v19 = vrot.slane %v5385_v37, 11  ;;  %v13182_v53 = vrot.slane %v7470_v0, 11  ;;  %v13186_v23 = vrot.slane %v7496_v17, 11  ;;  %v5709_v10 = vld [vmem:[#allocation2 + $0x14] sm:$0x1] }
 0x25c   : > { %10665 = vmatpush3.bf16.msra.mxu0 %v11388_v36  ;;  %v13188_v61 = vrot.slane %v7509_v62, 11  ;;  %v5398_v29 = vshrl.u32 %v5315_v38, 16  ;;  %v7439_v21 = vld [vmem:[#allocation2 + $0x48] sm:$0x8]  ;;  %v5725_v36 = vrot.slane %v5723_v27, 4  ;;  %v7816_v16 = vrot.slane %v7814_v14, 4 }
 0x25d   : > { %10674 = vmatprep.subr.bf16.mxu0 %v13148_v35  ;;  %v7441_v11 = vld [vmem:[#allocation2 + $0x54] sm:$0x8]  ;;  %v7798_v24 = vld [vmem:[#allocation2 + $0x8] sm:$0x1]  ;;  %v7800_v33 = vld [vmem:[#allocation2 + $0x14] sm:$0x1] }
 0x25e   : > { %10837 = vmatpush3.bf16.msra.mxu1 %v11389_v51  ;;  %v5411_v51 = vshrl.u32 %v5317_v15, 16  ;;  %v7819_v28 = vrot.slane %v7817_v8, 5  ;;  %v5746_v9 = vshll.u32 %v5709_v10, 16  ;;  %v7522_v40 = vshrl.u32 %v7439_v21, 16  ;;  %v7802_v50 = vld [vmem:[#allocation2 + $0x20] sm:$0x1] }
 0x25f   : > { %10838 = vmatprep.subr.bf16.mxu1 %v11393_v45  ;;  %v7804_v1 = vld [vmem:[#allocation2 + $0x2c] sm:$0x1]  ;;  %v7806_v54 = vld [vmem:[#allocation2 + $0x38] sm:$0x1]  ;;  %v7808_v30 = vld [vmem:[#allocation2 + $0x44] sm:$0x1] }
 0x260   : > { %v5711_v22 = vld [vmem:[#allocation2 + $0x20] sm:$0x1]  ;;  %v7535_v55 = vshrl.u32 %v7441_v11, 16  ;;  %v7823_v3 = vshll.u32 %v7798_v24, 16  ;;  %v7837_v6 = vshll.u32 %v7800_v33, 16  ;;  %v13190_v59 = vrot.slane %v5398_v29, 11 }
 0x261   : > { %10651 = vmatmul.mubr.msk.bf16.gmra.mrb[28].mxu1 %vm3494_vm12, %v9784_v56  ;;  %v13184_v56 = vrot.slane %v7483_v57, 11  ;;  %v5713_v58 = vld [vmem:[#allocation2 + $0x2c] sm:$0x1]  ;;  %v7820_v13 = vor.u32 %v7819_v28, %v7816_v16  ;;  %v7851_v2 = vshll.u32 %v7802_v50, 16  ;;  %v7865_v20 = vshll.u32 %v7804_v1, 16 }
 0x262   : > { %10839 = vmatpush3.bf16.msra.mxu1 %v11393_v45  ;;  %v5728_v45 = vrot.slane %v5726_v31, 5  ;;  %v13192_v5 = vrot.slane %v5411_v51, 11  ;;  %v7879_v37 = vshll.u32 %v7806_v54, 16  ;;  %v7893_v0 = vshll.u32 %v7808_v30, 16  ;;  %v5715_v17 = vld [vmem:[#allocation2 + $0x38] sm:$0x1] }
 0x263   : > { %10840 = vmatprep.subr.bf16.mxu1 %v11395_v34  ;;  %v5760_v57 = vshll.u32 %v5711_v22, 16  ;;  %v13196_v62 = vrot.slane %v5746_v9, 5  ;;  %v13198_v38 = vrot.slane %v7522_v40, 11  ;;  %v5774_v27 = vshll.u32 %v5713_v58, 16  ;;  %v5717_v31 = vld [vmem:[#allocation2 + $0x44] sm:$0x1] }
 0x264   : > { %v5729_v41 = vor.u32 %v5728_v45, %v5725_v36  ;;  %v13204_v14 = vrot.slane %v7823_v3, 5  ;;  %v13206_v8 = vrot.slane %v7837_v6, 5  ;;  %v7810_v29 = vld [vmem:[#allocation2 + $0x50] sm:$0x1]  ;;  %v13208_v10 = vrot.slane %v7820_v13, 4 }
 0x265   : > { %v13210_v21 = vrot.slane %v7851_v2, 5  ;;  %v13212_v51 = vrot.slane %v7865_v20, 5  ;;  %v5788_v36 = vshll.u32 %v5715_v17, 16  ;;  %v13214_v45 = vrot.slane %v7879_v37, 5  ;;  %v7812_v33 = vld [vmem:[#allocation2 + $0x5c] sm:$0x1] }
 0x266   : > { %10841 = vmatpush3.bf16.msra.mxu1 %v11395_v34  ;;  %v5732_v34 = vshll.u32 %v5707_v25, 16  ;;  %v13200_v15 = vrot.slane %v5729_v41, 4  ;;  %v13202_v25 = vrot.slane %v7535_v55, 11  ;;  %v13218_v11 = vrot.slane %v5760_v57, 5  ;;  %v8054_v9 = vld [vmem:[#allocation2 + $0xc] sm:$0x8] }
 0x267   : > { %10850 = vmatprep.subr.bf16.mxu1 %v13151_v48  ;;  %14399 = vst [vmem:[#allocation17_spill] sm:$0xff] %v13214_v45  ;;  %v5802_v24 = vshll.u32 %v5717_v31, 16  ;;  %v13220_v16 = vrot.slane %v5774_v27, 5  ;;  %v7907_v28 = vshll.u32 %v7810_v29, 16  ;;  %v8056_v40 = vld [vmem:[#allocation2 + $0x18] sm:$0x8] }
 0x268   : > { %v13194_v44 = vrot.slane %v5732_v34, 5  ;;  %v13216_v34 = vrot.slane %v7893_v0, 5  ;;  %14401 = vst [vmem:[#allocation19_spill] sm:$0xff] %v13218_v11  ;;  %v5719_v50 = vld [vmem:[#allocation2 + $0x50] sm:$0x1]  ;;  %v13222_v30 = vrot.slane %v5788_v36, 5 }
 0x269   : > { %14402 = vst [vmem:[#allocation20_spill] sm:$0xff] %v13220_v16  ;;  %v5721_v1 = vld [vmem:[#allocation2 + $0x5c] sm:$0x1]  ;;  %v5979_v54 = vld [vmem:[#allocation2 + $0xc] sm:$0x8]  ;;  %v7921_v22 = vshll.u32 %v7812_v33, 16 }
 0x26a   : > { %14400 = vst [vmem:[#allocation18_spill] sm:$0xff] %v13216_v34  ;;  %14403 = vst [vmem:[#allocation21_spill] sm:$0xff] %v13222_v30  ;;  %v5981_v41 = vld [vmem:[#allocation2 + $0x18] sm:$0x8]  ;;  %v8058_v55 = vld [vmem:[#allocation2 + $0x24] sm:$0x8] }
 0x26b   : > { %v8071_v3 = vshrl.u32 %v8054_v9, 16  ;;  %v8084_v6 = vshrl.u32 %v8056_v40, 16  ;;  %v8060_v58 = vld [vmem:[#allocation2 + $0x30] sm:$0x8]  ;;  %v8062_v13 = vld [vmem:[#allocation2 + $0x3c] sm:$0x8] }
 0x26c   : > { %v13224_v2 = vrot.slane %v5802_v24, 5  ;;  %v5816_v20 = vshll.u32 %v5719_v50, 16  ;;  %v5830_v37 = vshll.u32 %v5721_v1, 16  ;;  %v5996_v0 = vshrl.u32 %v5979_v54, 16  ;;  %v8064_v27 = vld [vmem:[#allocation2 + $0x48] sm:$0x8] }
 0x26d   : > { %v6009_v57 = vshrl.u32 %v5981_v41, 16  ;;  %v8097_v17 = vshrl.u32 %v8058_v55, 16  ;;  %v5983_v31 = vld [vmem:[#allocation2 + $0x24] sm:$0x8]  ;;  %v8110_v29 = vshrl.u32 %v8060_v58, 16  ;;  %v8123_v4 = vshrl.u32 %v8062_v13, 16 }
 0x26e   : > { %14404 = vst [vmem:[#allocation22_spill] sm:$0xff] %v13224_v2  ;;  %v8066_v36 = vld [vmem:[#allocation2 + $0x54] sm:$0x8]  ;;  %v5985_v46 = vld [vmem:[#allocation2 + $0x30] sm:$0x8]  ;;  %v13226_v33 = vrot.slane %v7907_v28, 5 }
 0x26f   : > { %v13228_v30 = vrot.slane %v7921_v22, 5  ;;  %v13230_v9 = vrot.slane %v8071_v3, 11  ;;  %v13232_v40 = vrot.slane %v8084_v6, 11  ;;  %v8068_v24 = vld [vmem:[#allocation2 + $0x60] sm:$0x8]  ;;  %v13234_v50 = vrot.slane %v5816_v20, 5 }
 0x270   : > { %14405 = vst [vmem:[#allocation23_spill] sm:$0xff] %v13226_v33  ;;  %v13236_v1 = vrot.slane %v5830_v37, 5  ;;  %v8136_v54 = vshrl.u32 %v8064_v27, 16  ;;  %v6022_v41 = vshrl.u32 %v5983_v31, 16  ;;  %v13238_v55 = vrot.slane %v5996_v0, 11 }
 0x271   : > { %14406 = vst [vmem:[#allocation24_spill] sm:$0xff] %v13228_v30  ;;  %14407 = vst [vmem:[#allocation25_spill] sm:$0xff] %v13230_v9  ;;  %v13240_v58 = vrot.slane %v6009_v57, 11  ;;  %v8149_v13 = vshrl.u32 %v8066_v36, 16  ;;  %v6035_v28 = vshrl.u32 %v5985_v46, 16  ;;  %v13242_v33 = vrot.slane %v8097_v17, 11 }
 0x272   : > { %14408 = vst [vmem:[#allocation26_spill] sm:$0xff] %v13232_v40  ;;  %14409 = vst [vmem:[#allocation27_spill] sm:$0xff] %v13234_v50  ;;  %v13244_v22 = vrot.slane %v8110_v29, 11  ;;  %v13246_v3 = vrot.slane %v8123_v4, 11  ;;  %v8162_v6 = vshrl.u32 %v8068_v24, 16  ;;  %v13248_v37 = vrot.slane %v8136_v54, 11 }
 0x273   : > { %14410 = vst [vmem:[#allocation28_spill] sm:$0xff] %v13236_v1  ;;  %14411 = vst [vmem:[#allocation29_spill] sm:$0xff] %v13238_v55  ;;  %v5987_v40 = vld [vmem:[#allocation2 + $0x3c] sm:$0x8]  ;;  %v5991_v20 = vld [vmem:[#allocation2 + $0x54] sm:$0x8] }
 0x274   : > { %14412 = vst [vmem:[#allocation30_spill] sm:$0xff] %v13240_v58  ;;  %14413 = vst [vmem:[#allocation31_spill] sm:$0xff] %v13242_v33  ;;  %v5993_v50 = vld [vmem:[#allocation2 + $0x60] sm:$0x8]  ;;  %v13250_v27 = vrot.slane %v6022_v41, 11  ;;  %v13252_v57 = vrot.slane %v8149_v13, 11 }
 0x275   : > { %14414 = vst [vmem:[#allocation32_spill] sm:$0xff] %v13244_v22  ;;  %14415 = vst [vmem:[#allocation33_spill] sm:$0xff] %v13246_v3  ;;  %v5989_v0 = vld [vmem:[#allocation2 + $0x48] sm:$0x8]  ;;  %v8441_v31 = vld [vmem:[#allocation2 + $0x14] sm:$0x1] }
 0x276   : > { %14416 = vst [vmem:[#allocation34_spill] sm:$0xff] %v13248_v37  ;;  %14417 = vst [vmem:[#allocation35_spill] sm:$0xff] %v13250_v27  ;;  %v13254_v36 = vrot.slane %v6035_v28, 11  ;;  %v8443_v46 = vld [vmem:[#allocation2 + $0x20] sm:$0x1]  ;;  %v13256_v29 = vrot.slane %v8162_v6, 11 }
 0x277   : > { %14418 = vst [vmem:[#allocation36_spill] sm:$0xff] %v13252_v57  ;;  %v8445_v17 = vld [vmem:[#allocation2 + $0x2c] sm:$0x1]  ;;  %v6048_v4 = vshrl.u32 %v5987_v40, 16  ;;  %v6074_v3 = vshrl.u32 %v5991_v20, 16  ;;  %v6087_v24 = vshrl.u32 %v5993_v50, 16 }
 0x278   : > { %14419 = vst [vmem:[#allocation37_spill] sm:$0xff] %v13254_v36  ;;  %14420 = vst [vmem:[#allocation38_spill] sm:$0xff] %v13256_v29  ;;  %v6061_v22 = vshrl.u32 %v5989_v0, 16  ;;  %v8466_v33 = vshll.u32 %v8441_v31, 16  ;;  %v8447_v58 = vld [vmem:[#allocation2 + $0x38] sm:$0x1] }
 0x279   : > { %v8697_v54 = vld [vmem:[#allocation2 + $0x18] sm:$0x8]  ;;  %v8480_v37 = vshll.u32 %v8443_v46, 16  ;;  %v8494_v41 = vshll.u32 %v8445_v17, 16  ;;  %v8453_v27 = vld [vmem:[#allocation2 + $0x5c] sm:$0x1] }
 0x27a   : > { %v8699_v1 = vld [vmem:[#allocation2 + $0x24] sm:$0x8]  ;;  %v8449_v55 = vld [vmem:[#allocation2 + $0x44] sm:$0x1]  ;;  %v8451_v13 = vld [vmem:[#allocation2 + $0x50] sm:$0x1] }
 0x27b   : > { %v8455_v57 = vld [vmem:[#allocation2 + $0x68] sm:$0x1]  ;;  %v13258_v28 = vrot.slane %v6048_v4, 11  ;;  %v13260_v36 = vrot.slane %v6074_v3, 11  ;;  %v8508_v6 = vshll.u32 %v8447_v58, 16  ;;  %v8714_v29 = vshrl.u32 %v8697_v54, 16 }
 0x27c   : > { %v8550_v40 = vshll.u32 %v8453_v27, 16  ;;  %v8727_v20 = vshrl.u32 %v8699_v1, 16  ;;  %v6398_v50 = vld [vmem:[#allocation2 + $0x14] sm:$0x1]  ;;  %v6400_v0 = vld [vmem:[#allocation2 + $0x20] sm:$0x1] }
 0x27d   : > { %14421 = vst [vmem:[#allocation39_spill] sm:$0xff] %v13258_v28  ;;  %14422 = vst [vmem:[#allocation40_spill] sm:$0xff] %v13260_v36  ;;  %v13265_v31 = vld [vmem:[%s14329_s4] ss:$0 sm:$0xff]  ;;  %v13267_v46 = vrot.slane %v6087_v24, 11  ;;  %v8522_v17 = vshll.u32 %v8449_v55, 16 }
 0x27e   : > { %v8536_v30 = vshll.u32 %v8451_v13, 16  ;;  %v8564_v4 = vshll.u32 %v8455_v57, 16  ;;  %v13272_v58 = vld [vmem:[%s14329_s4 + $0x1] ss:$0 sm:$0xff]  ;;  %v13274_v3 = vrot.slane %v6061_v22, 11  ;;  %v13276_v1 = vrot.slane %v8466_v33, 5 }
 0x27f   : > { %14423 = vst [vmem:[#allocation41_spill] sm:$0xff] %v13267_v46  ;;  %v13278_v27 = vrot.slane %v8480_v37, 5  ;;  %v13280_v54 = vrot.slane %v8494_v41, 5  ;;  %v13282_v28 = vrot.slane %v8714_v29, 11  ;;  %v6423_v24 = vshll.u32 %v6398_v50, 16 }
 0x280   : > { %14424 = vst [vmem:[#allocation42_spill] sm:$0xff] %v13274_v3  ;;  %14425 = vst [vmem:[#allocation43_spill] sm:$0xff] %v13276_v1  ;;  %v6437_v55 = vshll.u32 %v6400_v0, 16  ;;  %v8701_v13 = vld [vmem:[#allocation2 + $0x30] sm:$0x8]  ;;  %v13285_v9 = vrot.slane %v8508_v6, 5 }
 0x281   : > { %14426 = vst [vmem:[#allocation44_spill] sm:$0xff] %v13278_v27  ;;  %14427 = vst [vmem:[#allocation45_spill] sm:$0xff] %v13280_v54  ;;  %v13287_v2 = vrot.slane %v8550_v40, 5  ;;  %v13289_v22 = vrot.slane %v8727_v20, 11  ;;  %v13292_v41 = vrot.slane %v8522_v17, 5  ;;  %v13294_v54 = vrot.slane %v8536_v30, 5 }
 0x282   : > { %14428 = vst [vmem:[#allocation46_spill] sm:$0xff] %v13282_v28  ;;  %14429 = vst [vmem:[#allocation47_spill] sm:$0xff] %v13285_v9  ;;  %v13296_v29 = vrot.slane %v8564_v4, 5  ;;  %v8707_v50 = vld [vmem:[#allocation2 + $0x54] sm:$0x8]  ;;  %v8740_v40 = vshrl.u32 %v8701_v13, 16 }
 0x283   : > { %14430 = vst [vmem:[#allocation48_spill] sm:$0xff] %v13287_v2  ;;  %14431 = vst [vmem:[#allocation49_spill] sm:$0xff] %v13289_v22  ;;  %v8703_v28 = vld [vmem:[#allocation2 + $0x3c] sm:$0x8]  ;;  %v8709_v2 = vld [vmem:[#allocation2 + $0x60] sm:$0x8] }
 0x284   : > { %14432 = vst [vmem:[#allocation50_spill] sm:$0xff] %v13292_v41  ;;  %14433 = vst [vmem:[#allocation51_spill] sm:$0xff] %v13294_v54  ;;  %v13302_v22 = vrot.slane %v6423_v24, 5  ;;  %v13304_v17 = vrot.slane %v6437_v55, 5  ;;  %v6402_v30 = vld [vmem:[#allocation2 + $0x2c] sm:$0x1] }
 0x285   : > { %14434 = vst [vmem:[#allocation52_spill] sm:$0xff] %v13296_v29  ;;  %v8705_v54 = vld [vmem:[#allocation2 + $0x48] sm:$0x8]  ;;  %v13307_v41 = vld [vmem:[#allocation2 + $0x70] sm:$0xf]  ;;  %v8753_v9 = vshrl.u32 %v8703_v28, 16 }
 0x286   : > { %14435 = vst [vmem:[#allocation53_spill] sm:$0xff] %v13302_v22  ;;  %14436 = vst [vmem:[#allocation54_spill] sm:$0xff] %v13304_v17  ;;  %v8711_v27 = vld [vmem:[#allocation2 + $0x6c] sm:$0x8]  ;;  %v13310_v24 = vrot.slane %v8740_v40, 11  ;;  %v6451_v55 = vshll.u32 %v6402_v30, 16 }
 0x287   : > { %v8766_v3 = vshrl.u32 %v8705_v54, 16  ;;  %v8805_v28 = vshrl.u32 %v8711_v27, 16  ;;  %v13319_v54 = vrot.slane %v8753_v9, 11 }
 0x288   : > { %14437 = vst [vmem:[#allocation55_spill] sm:$0xff] %v13310_v24 }
 0x289   : > { %14439 = vst [vmem:[#allocation57_spill] sm:$0xff] %v13319_v54  ;;  %v13329_v9 = vrot.slane %v8766_v3, 11 }
 0x28b   : > { %14441 = vst [vmem:[#allocation59_spill] sm:$0xff] %v13329_v9 }
 0x32c   : > { %v10648_v36 = vpop.f32.mrb[24].mxu1 }
 0x32d   : > { %v5235_v57 = vmul.f32 %v10648_v36, %v13265_v31  ;;  %v5189_v46 = vpop.f32.mrb[25].mxu1 }
 0x32e   : > { %v5233_v33 = vmul.f32 %v13265_v31, %v5189_v46  ;;  %v10649_v37 = vpop.f32.mrb[26].mxu1 }
 0x32f   : > { %v5248_v0 = vadd.f32 %v13272_v58, %v5235_v57  ;;  %v5236_v36 = vmul.f32 %v10649_v37, %v13265_v31  ;;  %v5192_v6 = vpop.f32.mrb[27].mxu1  ;;  %v8779_v57 = vshrl.u32 %v8707_v50, 16  ;;  %v6404_v50 = vld [vmem:[#allocation2 + $0x38] sm:$0x1] }
 0x330   : > { %v5246_v20 = vadd.f32 %v13272_v58, %v5233_v33  ;;  %v5234_v46 = vmul.f32 %v13265_v31, %v5192_v6  ;;  %v8792_v33 = vshrl.u32 %v8709_v2, 16  ;;  %v6465_v27 = vshll.u32 %v6404_v50, 16 }
 0x331   : > { %v5256_v4 = vmax.f32 %v5248_v0, 0.0  ;;  %v5249_v29 = vadd.f32 %v13272_v58, %v5236_v36  ;;  %v8810_v36 = vshrl.u32 %v13307_v41, 16  ;;  %v13315_v2 = vrot.slane %v8779_v57, 11 }
 0x332   : > { %v5254_v37 = vmax.f32 %v5246_v20, 0.0  ;;  %v5247_v13 = vadd.f32 %v13272_v58, %v5234_v46 }
 0x333   : > { %v10106_v1 = vpack.c.bf16 %v5256_v4, %v5256_v4  ;;  %v5257_v6 = vmax.f32 %v5249_v29, 0.0  ;;  %14438 = vst [vmem:[#allocation56_spill] sm:$0xff] %v13315_v2  ;;  %v6406_v29 = vld [vmem:[#allocation2 + $0x44] sm:$0x1]  ;;  %v13321_v4 = vrot.slane %v8792_v33, 11 }
 0x334   : > { %v10104_v17 = vpack.c.bf16 %v5254_v37, %v5254_v37  ;;  %v5255_v22 = vmax.f32 %v5247_v13, 0.0  ;;  %v10652_v0 = vpop.f32.mrb[28].mxu1  ;;  %v6410_v37 = vld [vmem:[#allocation2 + $0x5c] sm:$0x1]  ;;  %v6479_v57 = vshll.u32 %v6406_v29, 16 }
 0x335   : > { %v10107_v16 = vpack.c.bf16 %v5257_v6, %v5257_v6  ;;  %v5239_v20 = vmul.f32 %v10652_v0, %v13265_v31  ;;  %v5205_v11 = vpop.f32.mrb[29].mxu1  ;;  %5297 = vst.msk [vmem:[#allocation2 + $0x28] sm:$0xf] %vm5294_vm13, %v10106_v1  ;;  %14440 = vst [vmem:[#allocation58_spill] sm:$0xff] %v13321_v4  ;;  %v13336_v4 = vld [vmem:[#allocation2 + $0x50] sm:$0x1] }
 0x336   : > { %v10105_v40 = vpack.c.bf16 %v5255_v22, %v5255_v22  ;;  %v5237_v46 = vmul.f32 %v13265_v31, %v5205_v11  ;;  %v10653_v30 = vpop.f32.mrb[30].mxu1  ;;  %5295 = vst.msk [vmem:[#allocation2 + $0x10] sm:$0xf] %vm5294_vm13, %v10104_v17  ;;  %v6507_v17 = vshll.u32 %v6410_v37, 16  ;;  %v13342_v37 = vrot.slane %v6465_v27, 5 }
 0x337   : > { %v5252_v13 = vadd.f32 %v13272_v58, %v5239_v20  ;;  %v5240_v6 = vmul.f32 %v10653_v30, %v13265_v31  ;;  %v5208_v1 = vpop.f32.mrb[31].mxu1  ;;  %5298 = vst.msk [vmem:[#allocation2 + $0x34] sm:$0xf] %vm5294_vm13, %v10107_v16  ;;  %v13332_v20 = vrot.slane %v8805_v28, 11  ;;  %v13334_v30 = vrot.slane %v8810_v36, 7 }
 0x338   : > { %v5250_v22 = vadd.f32 %v13272_v58, %v5237_v46  ;;  %v5238_v11 = vmul.f32 %v13265_v31, %v5208_v1  ;;  %5296 = vst.msk [vmem:[#allocation2 + $0x1c] sm:$0xf] %vm5294_vm13, %v10105_v40  ;;  %v13340_v31 = vrot.slane %v6451_v55, 5  ;;  %v7396_v40 = vpop.permute.xlu0 %7395  ;;  %14443 = vst [vmem:[#allocation61_spill] sm:$0xff] %v13342_v37  ;;  %v13347_v1 = vrot.slane %v6507_v17, 5  ;;  %v11394_v17 = vld [vmem:[%s14330_s5 + $0x8] sm:$0xff]  }
 0x339   : > { %v5260_v33 = vmax.f32 %v5252_v13, 0.0  ;;  %v5253_v0 = vadd.f32 %v13272_v58, %v5240_v6  ;;  %v13344_v13 = vrot.slane %v6479_v57, 5  ;;  %v13356_v27 = vld [vmem:[#allocation2 + $0x68] sm:$0x1]  ;;  %v13379_v29 = vld [vmem:[#allocation2 + $0x18] sm:$0x8] }
 0x33a   : > { %v5258_v16 = vmax.f32 %v5250_v22, 0.0  ;;  %v5251_v50 = vadd.f32 %v13272_v58, %v5238_v11  ;;  %14442 = vst [vmem:[#allocation60_spill] sm:$0xff] %v13340_v31  ;;  %14445 = vst [vmem:[#allocation63_spill] sm:$0xff] %v13347_v1  ;;  %v7400_v22 = vpop.permute.xlu1 %7399 }
 0x33b   : > { %v10110_v3 = vpack.c.bf16 %v5260_v33, %v5260_v33  ;;  %v5261_v46 = vmax.f32 %v5253_v0, 0.0  ;;  %14444 = vst [vmem:[#allocation62_spill] sm:$0xff] %v13344_v13  ;;  %14447 = vst [vmem:[#allocation65_spill] sm:$0xff] %v13356_v27 }
 0x33c   : > { %v10108_v28 = vpack.c.bf16 %v5258_v16, %v5258_v16  ;;  %v5259_v6 = vmax.f32 %v5251_v50, 0.0  ;;  %v13350_v55 = vld [vmem:[#allocation2 + $0x28] sm:$0xf]  ;;  %14450 = vst [vmem:[#allocation68_spill] sm:$0xff] %v13379_v29  ;;  %v7398_v31 = vpop.permute.xlu0 %7397 }
 0x33d   : > { %v10111_v2 = vpack.c.bf16 %v5261_v46, %v5261_v46  ;;  %v5306_v58 = vld [vmem:[#allocation2 + $0x10] sm:$0xf]  ;;  %5301 = vst.msk [vmem:[#allocation2 + $0x58] sm:$0xf] %vm5294_vm13, %v10110_v3  ;;  %v13365_v50 = vld [vmem:[#allocation2 + $0x28] sm:$0xf] }
 0x33e   : > { %v13352_v11 = vld [vmem:[#allocation2 + $0x10] sm:$0xf]  ;;  %v10109_v57 = vpack.c.bf16 %v5259_v6, %v5259_v6  ;;  %v9811_v0 = vcombine.low %v13154_v63, %v5306_v58  ;;  %5299 = vst.msk [vmem:[#allocation2 + $0x40] sm:$0xf] %vm5294_vm13, %v10108_v28  ;;  %v13367_v3 = vld [vmem:[#allocation2 + $0x28] sm:$0xf] }
 0x33f   : > { %v13354_v33 = vld [vmem:[#allocation2 + $0x10] sm:$0xf]  ;;  %5302 = vst.msk [vmem:[#allocation2 + $0x64] sm:$0xf] %vm5294_vm13, %v10111_v2  ;;  %v13370_v46 = vld [vmem:[#allocation2 + $0x1c] sm:$0xf] }
 0x340   : > { %14446 = vst [vmem:[#allocation64_spill] sm:$0xff] %v13354_v33  ;;  %v13363_v16 = vld [vmem:[#allocation2 + $0x10] sm:$0xf]  ;;  %v13372_v36 = vld [vmem:[#allocation2 + $0x34] sm:$0xf]  ;;  %10666 = vmatprep.mubr.msk.bf16.mxu0 %vm5503_vm14, %v9811_v0  ;;  %v9812_v1 = vcombine.low %v13370_v46, %v13350_v55 }
 0x341   : > { %14448 = vst [vmem:[#allocation66_spill] sm:$0xff] %v13363_v16  ;;  %7419 = vst.msk [vmem:[#allocation2 + $0x10] sm:$0xf] %vm3305_vm11, %v7396_v40  ;;  %v13375_v6 = vld [vmem:[#allocation2 + $0x1c] sm:$0xf]  ;;  %v13411_v40 = vld [vmem:[%s14330_s5 + $0x10] sm:$0xff]  }
 0x342   : > { %v13377_v28 = vld [vmem:[#allocation2 + $0x1c] sm:$0xf]  ;;  %5300 = vst.msk [vmem:[#allocation2 + $0x4c] sm:$0xf] %vm5294_vm13, %v10109_v57  ;;  %v13387_v13 = vld [vmem:[#allocation2 + $0x28] sm:$0xf]  ;;  %10667 = vmatmul.mubr.msk.bf16.vlgmr.msra.gmra.mrb[8].mxu0 %vm5503_vm14, %v9812_v1 }
 0x343   : > { %14449 = vst [vmem:[#allocation67_spill] sm:$0xff] %v13377_v28  ;;  %v13385_v2 = vld [vmem:[#allocation2 + $0x1c] sm:$0xf]  ;;  %14452 = vst [vmem:[#allocation70_spill] sm:$0xff] %v13387_v13  ;;  %v13393_v9 = vld [vmem:[#allocation2 + $0x28] sm:$0xf]  ;;  %10675 = vmatpush3.bf16.msra.mxu0 %v13148_v35 }
 0x344   : > { %14451 = vst [vmem:[#allocation69_spill] sm:$0xff] %v13385_v2  ;;  %v13389_v37 = vld [vmem:[#allocation2 + $0x1c] sm:$0xf]  ;;  %14454 = vst [vmem:[#allocation72_spill] sm:$0xff] %v13393_v9  ;;  %v13397_v0 = vld [vmem:[#allocation2 + $0x28] sm:$0xf]  ;;  %10676 = vmatprep.subr.bf16.mxu0 %v11394_v17 }
 0x345   : > { %14453 = vst [vmem:[#allocation71_spill] sm:$0xff] %v13389_v37  ;;  %v13395_v54 = vld [vmem:[#allocation2 + $0x1c] sm:$0xf]  ;;  %14456 = vst [vmem:[#allocation74_spill] sm:$0xff] %v13397_v0  ;;  %v14457_v57 = vshll.u32 %v13154_v63, 16  ;;  %v14458_v2 = vshll.u32 %v13156_v52, 16 }
 0x346   : > { %14455 = vst [vmem:[#allocation73_spill] sm:$0xff] %v13395_v54  ;;  %7420 = vst.msk [vmem:[#allocation2 + $0x1c] sm:$0xf] %vm3305_vm11, %v7398_v31  ;;  %v5338_v0 = vshrl.u32 %v5306_v58, 16  ;;  %v13415_v54 = vld [vmem:[#allocation2 + $0x34] sm:$0xf] }
 0x347   : > { %v5330_v24 = vor.u32 %v14457_v57, %v13160_v43  ;;  %v13405_v13 = vor.u32 %v14458_v2, %v13163_v47  ;;  %7421 = vst.msk [vmem:[#allocation2 + $0x28] sm:$0xf] %vm3305_vm11, %v7400_v22  ;;  %v13417_v63 = vld [vmem:[#allocation2 + $0x34] sm:$0xf]  ;;  %v7402_v47 = vpop.permute.xlu1 %7401  ;;  %v5341_v9 = vshll.u32 %v5306_v58, 16  ;;  %v5351_v22 = vshrl.u32 %v13370_v46, 16  ;;  %v7404_v58 = vpop.permute.xlu0 %7403  ;;  %10677 = vmatpush3.bf16.msra.mxu0 %v11394_v17 }
 0x348   : > { %v13421_v1 = vld [vmem:[#allocation2 + $0x34] sm:$0xf]  ;;  %v5340_v31 = vrot.slane %v5338_v0, 7  ;;  %v13429_v37 = vld [vmem:[#allocation2 + $0x24] sm:$0x8]  ;;  %10678 = vmatprep.subr.bf16.mxu0 %v13411_v40 }
 0x349   : > { %14459 = vst [vmem:[#allocation75_spill] sm:$0xff] %v13421_v1  ;;  %v13423_v2 = vld [vmem:[#allocation2 + $0x34] sm:$0xf]  ;;  %14462 = vst [vmem:[#allocation78_spill] sm:$0xff] %v13429_v37  ;;  %v13432_v27 = vld [vmem:[#allocation2 + $0x40] sm:$0xf] }
 0x34a   : > { %14460 = vst [vmem:[#allocation76_spill] sm:$0xff] %v13423_v2  ;;  %v13425_v57 = vld [vmem:[#allocation2 + $0x34] sm:$0xf]  ;;  %v13434_v35 = vld [vmem:[#allocation2 + $0x58] sm:$0xf]  ;;  %v5331_v2 = vsel %vm11967_vm6, %v13166_v18, %v5330_v24  ;;  %v5343_v29 = vor.u32 %v5341_v9, %v5340_v31  ;;  %v14469_v18 = vshll.u32 %v13336_v4, 16 }
 0x34b   : > { %14461 = vst [vmem:[#allocation77_spill] sm:$0xff] %v13425_v57  ;;  %7422 = vst.msk [vmem:[#allocation2 + $0x34] sm:$0xf] %vm3305_vm11, %v7402_v47  ;;  %v13439_v57 = vld [vmem:[#allocation2 + $0x40] sm:$0xf]  ;;  %v9813_v47 = vcombine.low %v13372_v36, %v13432_v27  ;;  %10679 = vmatpush3.bf16.msra.mxu0 %v13411_v40 }
 0x34c   : > { %14463 = vst [vmem:[#allocation79_spill] sm:$0xff] %v13439_v57  ;;  %v13441_v0 = vld [vmem:[#allocation2 + $0x40] sm:$0xf]  ;;  %v7430_v43 = vld [vmem:[#allocation2 + $0x10] sm:$0xf]  ;;  %v13473_v34 = vrot.slane %v14469_v18, 5  ;;  %v5344_v17 = vsel %vm11967_vm6, %v13168_v12, %v5343_v29 }
 0x34d   : > { %14464 = vst [vmem:[#allocation80_spill] sm:$0xff] %v13441_v0  ;;  %v13449_v1 = vld [vmem:[#allocation2 + $0x40] sm:$0xf]  ;;  %v7462_v28 = vshrl.u32 %v7430_v43, 16  ;;  %v9963_v33 = vcombine.low %v13156_v52, %v7430_v43  ;;  %v13462_v9 = vld [vmem:[#allocation2 + $0x4c] sm:$0xf]  ;;  %10670 = vmatprep.mubr.msk.bf16.mxu0 %vm5503_vm14, %v9813_v47  ;;  %v9825_v18 = vcombine.low %v5331_v2, %v5344_v17 }
 0x34e   : > { %14465 = vst [vmem:[#allocation81_spill] sm:$0xff] %v13449_v1  ;;  %v13451_v16 = vld [vmem:[#allocation2 + $0x40] sm:$0xf]  ;;  %14470 = vst [vmem:[#allocation84_spill] sm:$0xff] %v13473_v34  ;;  %v7465_v24 = vshll.u32 %v7430_v43, 16  ;;  %v9814_v52 = vcombine.low %v13462_v9, %v13434_v35 }
 0x34f   : > { %14466 = vst [vmem:[#allocation82_spill] sm:$0xff] %v13451_v16  ;;  %v13464_v31 = vld [vmem:[#allocation2 + $0x40] sm:$0xf]  ;;  %v14468_v16 = vshll.u32 %v13307_v41, 16  ;;  %v11402_v41 = vld [vmem:[%s14330_s5 + $0x18] sm:$0xff]   ;;  %10842 = vmatprep.mubr.msk.bf16.mxu1 %vm3494_vm12, %v9963_v33 }
 0x350   : > { %14467 = vst [vmem:[#allocation83_spill] sm:$0xff] %v13464_v31  ;;  %7423 = vst.msk [vmem:[#allocation2 + $0x40] sm:$0xf] %vm3305_vm11, %v7404_v58  ;;  %v13486_v4 = vld [vmem:[#allocation2 + $0x4c] sm:$0xf]  ;;  %v11403_v31 = vld [vmem:[#allocation3 + $0x8] sm:$0xff]   ;;  %10671 = vmatmul.mubr.msk.bf16.gmra.mrb[12].mxu0 %vm5503_vm14, %v9814_v52  ;;  %10680 = vmatprep.subr.bf16.mxu0 %v11402_v41 }
 0x351   : > { %v13469_v1 = vor.u32 %v14468_v16, %v13334_v30  ;;  %14471 = vst [vmem:[#allocation85_spill] sm:$0xff] %v13486_v4  ;;  %v7464_v16 = vrot.slane %v7462_v28, 7  ;;  %v13490_v43 = vld [vmem:[#allocation2 + $0x1c] sm:$0xf]  ;;  %v13492_v47 = vld [vmem:[#allocation2 + $0x28] sm:$0xf]  ;;  %10686 = vmatprep.mubr.msk.bf16.mxu0 %vm5503_vm14, %v9825_v18  ;;  %10681 = vmatpush3.bf16.msra.mxu0 %v11402_v41 }
 0x352   : > { %v13494_v12 = vld [vmem:[#allocation2 + $0x4c] sm:$0xf]  ;;  %v13496_v29 = vld [vmem:[#allocation2 + $0x58] sm:$0xf]  ;;  %v5353_v58 = vrot.slane %v5351_v22, 7  ;;  %v7475_v33 = vshrl.u32 %v13490_v43, 16  ;;  %v9964_v22 = vcombine.low %v13490_v43, %v13492_v47 }
 0x353   : > { %14472 = vst [vmem:[#allocation86_spill] sm:$0xff] %v13494_v12  ;;  %14473 = vst [vmem:[#allocation87_spill] sm:$0xff] %v13496_v29  ;;  %v13498_v34 = vld [vmem:[#allocation2 + $0x58] sm:$0xf]  ;;  %v7478_v28 = vshll.u32 %v13490_v43, 16  ;;  %v7488_v30 = vshrl.u32 %v13492_v47, 16  ;;  %v7467_v4 = vor.u32 %v7465_v24, %v7464_v16  ;;  %v7406_v43 = vpop.permute.xlu1 %7405 }
 0x354   : > { %14474 = vst [vmem:[#allocation88_spill] sm:$0xff] %v13498_v34  ;;  %v7491_v2 = vshll.u32 %v13492_v47, 16  ;;  %v11405_v17 = vld [vmem:[%s14330_s5 + $0x20] sm:$0xff]   ;;  %v13510_v37 = vld [vmem:[#allocation2 + $0x4c] sm:$0xf]  ;;  %v7477_v29 = vrot.slane %v7475_v33, 7  ;;  %v7408_v47 = vpop.permute.xlu0 %7407  ;;  %10843 = vmatmul.mubr.msk.bf16.vlgmr.msra.gmra.mrb[32].mxu1 %vm3494_vm12, %v9964_v22  ;;  %v14481_v22 = vsel %vm11967_vm6, %v13170_v42, %v13405_v13 }
 0x355   : > { %14475 = vst [vmem:[#allocation89_spill] sm:$0xff] %v13510_v37  ;;  %v7436_v52 = vld [vmem:[#allocation2 + $0x34] sm:$0xf]  ;;  %v13516_v57 = vld [vmem:[#allocation2 + $0x58] sm:$0xf]  ;;  %v7490_v37 = vrot.slane %v7488_v30, 7  ;;  %v7468_v24 = vsel %vm11967_vm6, %v13172_v32, %v7467_v4  ;;  %10851 = vmatpush3.bf16.msra.mxu1 %v13151_v48  ;;  %10682 = vmatprep.subr.bf16.mxu0 %v11405_v17 }
 0x356   : > { %14476 = vst [vmem:[#allocation90_spill] sm:$0xff] %v13516_v57  ;;  %v13518_v34 = vld [vmem:[#allocation2 + $0x4c] sm:$0xf]  ;;  %v7501_v40 = vshrl.u32 %v7436_v52, 16  ;;  %v7504_v12 = vshll.u32 %v7436_v52, 16  ;;  %v5354_v16 = vshll.u32 %v13370_v46, 16  ;;  %v13546_v32 = vcombine.low %v14481_v22, %v7468_v24  ;;  %10852 = vmatprep.subr.bf16.mxu1 %v11403_v31  ;;  %10683 = vmatpush3.bf16.msra.mxu0 %v11405_v17 }
 0x357   : > { %14477 = vst [vmem:[#allocation91_spill] sm:$0xff] %v13518_v34  ;;  %v13524_v45 = vld [vmem:[#allocation2 + $0x58] sm:$0xf]  ;;  %v13527_v18 = vld [vmem:[#allocation2 + $0x4c] sm:$0xf]  ;;  %v5364_v30 = vshrl.u32 %v13350_v55, 16 }
 0x358   : > { %14478 = vst [vmem:[#allocation92_spill] sm:$0xff] %v13524_v45  ;;  %14479 = vst [vmem:[#allocation93_spill] sm:$0xff] %v13527_v18  ;;  %v13529_v34 = vld [vmem:[#allocation2 + $0x58] sm:$0xf]  ;;  %v7503_v0 = vrot.slane %v7501_v40, 7  ;;  %v5367_v46 = vshll.u32 %v13350_v55, 16  ;;  %v5356_v40 = vor.u32 %v5354_v16, %v5353_v58 }
 0x359   : > { %14480 = vst [vmem:[#allocation94_spill] sm:$0xff] %v13529_v34  ;;  %7424 = vst.msk [vmem:[#allocation2 + $0x4c] sm:$0xf] %vm3305_vm11, %v7406_v43  ;;  %v5377_v4 = vshrl.u32 %v13372_v36, 16  ;;  %v7438_v33 = vld [vmem:[#allocation2 + $0x40] sm:$0xf]  ;;  %10853 = vmatpush3.bf16.msra.mxu1 %v11403_v31 }
 0x35a   : > { %7425 = vst.msk [vmem:[#allocation2 + $0x58] sm:$0xf] %vm3305_vm11, %v7408_v47  ;;  %v11407_v48 = vld [vmem:[#allocation3 + $0x10] sm:$0xff]   ;;  %v5366_v34 = vrot.slane %v5364_v30, 7  ;;  %v5380_v43 = vshll.u32 %v13372_v36, 16  ;;  %v5390_v47 = vshrl.u32 %v13432_v27, 16  ;;  %v9965_v57 = vcombine.low %v7436_v52, %v7438_v33 }
 0x35b   : > { %v7514_v18 = vshrl.u32 %v7438_v33, 16  ;;  %v7517_v45 = vshll.u32 %v7438_v33, 16  ;;  %v11408_v42 = vld [vmem:[%s14330_s5 + $0x28] sm:$0xff]   ;;  %v5379_v13 = vrot.slane %v5377_v4, 7  ;;  %v5357_v55 = vsel %vm11967_vm6, %v13174_v7, %v5356_v40  ;;  %10854 = vmatprep.subr.bf16.mxu1 %v11407_v48  ;;  %v11409_v33 = vld [vmem:[#allocation3 + $0x18] sm:$0xff]  }
 0x35c   : > { %v5369_v41 = vor.u32 %v5367_v46, %v5366_v34  ;;  %v5392_v58 = vrot.slane %v5390_v47, 7  ;;  %v5393_v24 = vshll.u32 %v13432_v27, 16  ;;  %10846 = vmatprep.mubr.msk.bf16.mxu1 %vm3494_vm12, %v9965_v57  ;;  %v7480_v52 = vor.u32 %v7478_v28, %v7477_v29  ;;  %10684 = vmatprep.subr.bf16.mxu0 %v11408_v42  ;;  %v11410_v57 = vld [vmem:[%s14330_s5 + $0x60] sm:$0xff]   ;;  %v7799_v40 = vld [vmem:[#allocation2 + $0x10] sm:$0xf]  ;;  %v13584_v47 = vld [vmem:[#allocation3 + $0x40] sm:$0xff]  }
 0x35d   : > { %v7516_v36 = vrot.slane %v7514_v18, 7  ;;  %v5382_v16 = vor.u32 %v5380_v43, %v5379_v13  ;;  %v7493_v30 = vor.u32 %v7491_v2, %v7490_v37  ;;  %v7506_v7 = vor.u32 %v7504_v12, %v7503_v0  ;;  %10855 = vmatpush3.bf16.msra.mxu1 %v11407_v48  ;;  %10685 = vmatpush3.bf16.msra.mxu0 %v11408_v42  ;;  %v11412_v42 = vld [vmem:[%s14330_s5 + $0x68] sm:$0xff]  }
 0x35e   : > { %v5370_v22 = vsel %vm11967_vm6, %v13176_v39, %v5369_v41  ;;  %v5395_v4 = vor.u32 %v5393_v24, %v5392_v58  ;;  %v5403_v34 = vshrl.u32 %v13462_v9, 16  ;;  %v7481_v31 = vsel %vm11967_vm6, %v13182_v53, %v7480_v52  ;;  %10856 = vmatprep.subr.bf16.mxu1 %v11409_v33  ;;  %10694 = vmatprep.subr.bf16.mxu0 %v11410_v57  ;;  %v13597_v24 = vld [vmem:[#allocation2 + $0x64] sm:$0xf] }
 0x35f   : > { %v9826_v27 = vcombine.low %v5357_v55, %v5370_v22  ;;  %v5383_v37 = vsel %vm11967_vm6, %v13178_v26, %v5382_v16  ;;  %v7494_v39 = vsel %vm11967_vm6, %v13184_v56, %v7493_v30  ;;  %v7507_v26 = vsel %vm11967_vm6, %v13186_v23, %v7506_v7  ;;  %v13589_v55 = vld [vmem:[#allocation2 + $0x64] sm:$0xf] }
 0x360   : > { %v7440_v0 = vld [vmem:[#allocation2 + $0x4c] sm:$0xf]  ;;  %v5396_v29 = vsel %vm11967_vm6, %v13180_v19, %v5395_v4  ;;  %v13579_v28 = vcombine.low %v7481_v31, %v7494_v39  ;;  %v7519_v2 = vor.u32 %v7517_v45, %v7516_v36  ;;  %v5405_v13 = vrot.slane %v5403_v34, 7  ;;  %v13591_v23 = vld [vmem:[#allocation2 + $0x64] sm:$0xf]  ;;  %v7410_v36 = vpop.permute.xlu1 %7409 }
 0x361   : > { %v7442_v12 = vld [vmem:[#allocation2 + $0x58] sm:$0xf]  ;;  %v7527_v17 = vshrl.u32 %v7440_v0, 16  ;;  %v7530_v18 = vshll.u32 %v7440_v0, 16  ;;  %v9827_v43 = vcombine.low %v5383_v37, %v5396_v29  ;;  %v5406_v58 = vshll.u32 %v13462_v9, 16  ;;  %10857 = vmatpush3.bf16.msra.mxu1 %v11409_v33  ;;  %10687 = vmatmul.mubr.msk.bf16.vlgmr.msra.gmra.mrb[8].mxu0 %vm5503_vm14, %v9826_v27 }
 0x362   : > { %v7540_v53 = vshrl.u32 %v7442_v12, 16  ;;  %v7543_v46 = vshll.u32 %v7442_v12, 16  ;;  %v9966_v56 = vcombine.low %v7440_v0, %v7442_v12  ;;  %v7520_v19 = vsel %vm11967_vm6, %v13188_v61, %v7519_v2  ;;  %v13604_v22 = vld [vmem:[#allocation2 + $0x64] sm:$0xf]  ;;  %v7801_v37 = vld [vmem:[#allocation2 + $0x1c] sm:$0xf]  ;;  %10866 = vmatprep.subr.bf16.mxu1 %v13584_v47  ;;  %10695 = vmatpush3.bf16.msra.mxu0 %v11410_v57 }
 0x363   : > { %v7529_v45 = vrot.slane %v7527_v17, 7  ;;  %v9977_v48 = vcombine.low %v7507_v26, %v7520_v19  ;;  %v5416_v61 = vshrl.u32 %v13434_v35, 16  ;;  %v5419_v16 = vshll.u32 %v13434_v35, 16  ;;  %7426 = vst.msk [vmem:[#allocation2 + $0x64] sm:$0xf] %vm3305_vm11, %v7410_v36  ;;  %10690 = vmatprep.mubr.msk.bf16.mxu0 %vm5503_vm14, %v9827_v43  ;;  %10696 = vmatprep.subr.bf16.mxu0 %v11412_v42  ;;  %v11414_v57 = vld [vmem:[%s14330_s5 + $0x70] sm:$0xff]  }
 0x364   : > { %v7542_v41 = vrot.slane %v7540_v53, 7  ;;  %10847 = vmatmul.mubr.msk.bf16.gmra.mrb[36].mxu1 %vm3494_vm12, %v9966_v56  ;;  %v5737_v52 = vshrl.u32 %v13352_v11, 16  ;;  %v5740_v30 = vshll.u32 %v13352_v11, 16  ;;  %v5408_v9 = vor.u32 %v5406_v58, %v5405_v13  ;;  %v7803_v0 = vld [vmem:[#allocation2 + $0x28] sm:$0xf] }
 0x365   : > { %10858 = vmatprep.mubr.msk.bf16.mxu1 %vm3494_vm12, %v13546_v32  ;;  %v7532_v4 = vor.u32 %v7530_v18, %v7529_v45  ;;  %v7828_v34 = vshrl.u32 %v7799_v40, 16  ;;  %v5418_v35 = vrot.slane %v5416_v61, 7  ;;  %v7831_v39 = vshll.u32 %v7799_v40, 16  ;;  %v7805_v29 = vld [vmem:[#allocation2 + $0x34] sm:$0xf]  ;;  %v11413_v40 = vld [vmem:[#allocation3 + $0x48] sm:$0xff]  }
 0x366   : > { %v7545_v7 = vor.u32 %v7543_v46, %v7542_v41  ;;  %v5739_v31 = vrot.slane %v5737_v52, 4  ;;  %v5742_v11 = vrot.slane %v5740_v30, 5  ;;  %v5409_v32 = vsel %vm11967_vm6, %v13190_v59, %v5408_v9  ;;  %v7807_v19 = vld [vmem:[#allocation2 + $0x40] sm:$0xf]  ;;  %10697 = vmatpush3.bf16.msra.mxu0 %v11412_v42 }
 0x367   : > { %v7533_v33 = vsel %vm11967_vm6, %v13198_v38, %v7532_v4  ;;  %v7830_v12 = vrot.slane %v7828_v34, 4  ;;  %v5421_v26 = vor.u32 %v5419_v16, %v5418_v35  ;;  %v7833_v59 = vrot.slane %v7831_v39, 5  ;;  %10698 = vmatprep.subr.bf16.mxu0 %v11414_v57 }
 0x368   : > { %v7546_v27 = vsel %vm11967_vm6, %v13202_v25, %v7545_v7  ;;  %v5743_v2 = vor.u32 %v5742_v11, %v5739_v31  ;;  %v7842_v18 = vshrl.u32 %v7801_v37, 16  ;;  %v7845_v53 = vshll.u32 %v7801_v37, 16  ;;  %v11415_v7 = vld [vmem:[#allocation3 + $0x50] sm:$0xff]  }
 0x369   : > { %v13624_v17 = vcombine.low %v7533_v33, %v7546_v27  ;;  %v7856_v46 = vshrl.u32 %v7803_v0, 16  ;;  %v7859_v38 = vshll.u32 %v7803_v0, 16  ;;  %v5422_v25 = vsel %vm11967_vm6, %v13192_v5, %v5421_v26  ;;  %v11416_v5 = vld [vmem:[%s14330_s5 + $0x78] sm:$0xff]  }
 0x36a   : > { %v5744_v56 = vrot.slane %v5743_v2, 4  ;;  %v7834_v43 = vor.u32 %v7833_v59, %v7830_v12  ;;  %v7870_v13 = vshrl.u32 %v7805_v29, 16  ;;  %v9828_v45 = vcombine.low %v5409_v32, %v5422_v25  ;;  %10699 = vmatpush3.bf16.msra.mxu0 %v11414_v57 }
 0x36b   : > { %v7844_v41 = vrot.slane %v7842_v18, 4  ;;  %v7847_v58 = vrot.slane %v7845_v53, 5  ;;  %v7858_v36 = vrot.slane %v7856_v46, 4  ;;  %v7861_v52 = vrot.slane %v7859_v38, 5  ;;  %10700 = vmatprep.subr.bf16.mxu0 %v11416_v5  ;;  %v7809_v46 = vld [vmem:[#allocation2 + $0x4c] sm:$0xf] }
 0x36c   : > { %10859 = vmatmul.mubr.msk.bf16.vlgmr.msra.gmra.mrb[32].mxu1 %vm3494_vm12, %v13579_v28  ;;  %v5749_v61 = vsel %vm12235_vm10, %v5744_v56, %v13196_v62  ;;  %v7835_v16 = vrot.slane %v7834_v43, 4  ;;  %v7872_v30 = vrot.slane %v7870_v13, 4  ;;  %v14482_v28 = vsel %vm12235_vm10, %v13200_v15, %v13194_v44  ;;  %10691 = vmatmul.mubr.msk.bf16.gmra.mrb[12].mxu0 %vm5503_vm14, %v9828_v45  ;;  %v11420_v38 = vld [vmem:[%s14330_s5 + $0x88] sm:$0xff]   ;;  %v14485_v13 = vld [vmem:[#allocation79_spill] sm:$0xff] }
 0x36d   : > { %10862 = vmatprep.mubr.msk.bf16.mxu1 %vm3494_vm12, %v9977_v48  ;;  %10867 = vmatpush3.bf16.msra.mxu1 %v13584_v47  ;;  %v9839_v42 = vcombine.low %v14482_v28, %v5749_v61  ;;  %v7848_v9 = vor.u32 %v7847_v58, %v7844_v41  ;;  %v7873_v4 = vshll.u32 %v7805_v29, 16  ;;  %v7884_v62 = vshrl.u32 %v7807_v19, 16  ;;  %v11417_v29 = vld [vmem:[#allocation3 + $0x58] sm:$0xff]   ;;  %v14484_v56 = vld [vmem:[#allocation17_spill] sm:$0xff]  ;;  %v11419_v41 = vld [vmem:[#allocation3 + $0x60] sm:$0xff]  }
 0x36e   : > { %10868 = vmatprep.subr.bf16.mxu1 %v11413_v40  ;;  %v7840_v34 = vsel %vm12235_vm10, %v7835_v16, %v13206_v8  ;;  %v7862_v48 = vor.u32 %v7861_v52, %v7858_v36  ;;  %v7887_v37 = vshll.u32 %v7807_v19, 16  ;;  %v5751_v47 = vshrl.u32 %v13375_v6, 16  ;;  %v11418_v8 = vld [vmem:[%s14330_s5 + $0x80] sm:$0xff]   ;;  %10701 = vmatpush3.bf16.msra.mxu0 %v11416_v5  ;;  %v14486_v58 = vld [vmem:[#allocation18_spill] sm:$0xff]  ;;  %v7811_v16 = vld [vmem:[#allocation2 + $0x58] sm:$0xf] }
 0x36f   : > { %10706 = vmatprep.mubr.msk.bf16.mxu0 %vm5503_vm14, %v9839_v42  ;;  %v14483_v44 = vsel %vm12235_vm10, %v13208_v10, %v13204_v14  ;;  %v7849_v35 = vrot.slane %v7848_v9, 4  ;;  %v7875_v31 = vrot.slane %v7873_v4, 5  ;;  %v7886_v11 = vrot.slane %v7884_v62, 4  ;;  %10702 = vmatprep.subr.bf16.mxu0 %v11418_v8  ;;  %v13683_v9 = vld [vmem:[#allocation2 + $0x10] sm:$0xf]  ;;  %v14487_v4 = vld [vmem:[#allocation19_spill] sm:$0xff] }
 0x370   : > { %v9987_v15 = vcombine.low %v14483_v44, %v7840_v34  ;;  %v7863_v39 = vrot.slane %v7862_v48, 4  ;;  %v7889_v0 = vrot.slane %v7887_v37, 5  ;;  %v5753_v32 = vrot.slane %v5751_v47, 4  ;;  %v14488_v47 = vld [vmem:[#allocation20_spill] sm:$0xff] }
 0x371   : > { %v5754_v33 = vshll.u32 %v13375_v6, 16  ;;  %10869 = vmatpush3.bf16.msra.mxu1 %v11413_v40  ;;  %v7854_v27 = vsel %vm12235_vm10, %v7849_v35, %v13210_v21  ;;  %v7876_v14 = vor.u32 %v7875_v31, %v7872_v30  ;;  %v5765_v10 = vshrl.u32 %v13365_v50, 16 }
 0x372   : > { %v5768_v12 = vshll.u32 %v13365_v50, 16  ;;  %10870 = vmatprep.subr.bf16.mxu1 %v11415_v7  ;;  %v7868_v26 = vsel %vm12235_vm10, %v7863_v39, %v13212_v51  ;;  %v7890_v57 = vor.u32 %v7889_v0, %v7886_v11  ;;  %v5779_v6 = vshrl.u32 %v13415_v54, 16  ;;  %10703 = vmatpush3.bf16.msra.mxu0 %v11418_v8  ;;  %v13694_v11 = vld [vmem:[#allocation2 + $0x1c] sm:$0xf]  ;;  %v11421_v8 = vld [vmem:[#allocation3 + $0x68] sm:$0xff]  }
 0x373   : > { %v5756_v2 = vrot.slane %v5754_v33, 5  ;;  %v9988_v59 = vcombine.low %v7854_v27, %v7868_v26  ;;  %v7877_v18 = vrot.slane %v7876_v14, 4  ;;  %v5767_v53 = vrot.slane %v5765_v10, 4  ;;  %10704 = vmatprep.subr.bf16.mxu0 %v11420_v38 }
 0x374   : > { %v5770_v21 = vrot.slane %v5768_v12, 5  ;;  %10863 = vmatmul.mubr.msk.bf16.gmra.mrb[36].mxu1 %vm3494_vm12, %v13624_v17  ;;  %v7891_v50 = vrot.slane %v7890_v57, 4  ;;  %v5781_v40 = vrot.slane %v5779_v6, 4  ;;  %v5782_v25 = vshll.u32 %v13415_v54, 16 }
 0x375   : > { %v5757_v51 = vor.u32 %v5756_v2, %v5753_v32  ;;  %10871 = vmatpush3.bf16.msra.mxu1 %v11415_v7  ;;  %10874 = vmatprep.mubr.msk.bf16.mxu1 %vm3494_vm12, %v9987_v15  ;;  %v7882_v43 = vsel %vm12235_vm10, %v7877_v18, %v14484_v56  ;;  %v5793_v17 = vshrl.u32 %v14485_v13, 16  ;;  %v5796_v45 = vshll.u32 %v14485_v13, 16  ;;  %v11422_v7 = vld [vmem:[%s14330_s5 + $0x90] sm:$0xff]   ;;  %v11424_v18 = vld [vmem:[%s14330_s5 + $0x98] sm:$0xff]  }
 0x376   : > { %v5771_v19 = vor.u32 %v5770_v21, %v5767_v53  ;;  %10872 = vmatprep.subr.bf16.mxu1 %v11417_v29  ;;  %v7896_v36 = vsel %vm12235_vm10, %v7891_v50, %v14486_v58  ;;  %v5784_v54 = vrot.slane %v5782_v25, 5  ;;  %v7898_v5 = vshrl.u32 %v7809_v46, 16  ;;  %10705 = vmatpush3.bf16.msra.mxu0 %v11420_v38  ;;  %v14490_v53 = vld [vmem:[#allocation22_spill] sm:$0xff]  ;;  %v11423_v25 = vld [vmem:[#allocation3 + $0x70] sm:$0xff]   ;;  %v14493_v58 = vld [vmem:[#allocation23_spill] sm:$0xff] }
 0x377   : > { %v5758_v61 = vrot.slane %v5757_v51, 4  ;;  %v9989_v52 = vcombine.low %v7882_v43, %v7896_v36  ;;  %v5795_v28 = vrot.slane %v5793_v17, 4  ;;  %v5798_v42 = vrot.slane %v5796_v45, 5  ;;  %10714 = vmatprep.subr.bf16.mxu0 %v11422_v7  ;;  %v14491_v50 = vld [vmem:[#allocation86_spill] sm:$0xff]  ;;  %v14492_v45 = vld [vmem:[#allocation87_spill] sm:$0xff] }
 0x378   : > { %v5772_v30 = vrot.slane %v5771_v19, 4  ;;  %v5785_v34 = vor.u32 %v5784_v54, %v5781_v40  ;;  %v7900_v48 = vrot.slane %v7898_v5, 4  ;;  %v7901_v37 = vshll.u32 %v7809_v46, 16 }
 0x379   : > { %v5763_v62 = vsel %vm12235_vm10, %v5758_v61, %v14487_v4  ;;  %10873 = vmatpush3.bf16.msra.mxu1 %v11417_v29  ;;  %v5799_v15 = vor.u32 %v5798_v42, %v5795_v28  ;;  %v7912_v35 = vshrl.u32 %v7811_v16, 16  ;;  %v7915_v31 = vshll.u32 %v7811_v16, 16  ;;  %v14489_v29 = vld [vmem:[#allocation21_spill] sm:$0xff] }
 0x37a   : > { %v5777_v44 = vsel %vm12235_vm10, %v5772_v30, %v14488_v47  ;;  %10882 = vmatprep.subr.bf16.mxu1 %v11419_v41  ;;  %v5786_v0 = vrot.slane %v5785_v34, 4  ;;  %v7903_v32 = vrot.slane %v7901_v37, 5  ;;  %v8076_v33 = vshrl.u32 %v13683_v9, 16  ;;  %v14494_v61 = vld [vmem:[#allocation25_spill] sm:$0xff]  ;;  %v14495_v30 = vld [vmem:[#allocation24_spill] sm:$0xff]  ;;  %v14497_v37 = vld [vmem:[#allocation26_spill] sm:$0xff] }
 0x37b   : > { %v9840_v39 = vcombine.low %v5763_v62, %v5777_v44  ;;  %v5800_v27 = vrot.slane %v5799_v15, 4  ;;  %v7914_v14 = vrot.slane %v7912_v35, 4  ;;  %v7917_v10 = vrot.slane %v7915_v31, 5  ;;  %v14496_v62 = vld [vmem:[#allocation64_spill] sm:$0xff]  ;;  %v13730_v34 = vld [vmem:[#allocation2 + $0x28] sm:$0xf] }
 0x37c   : > { %v8079_v12 = vshll.u32 %v13683_v9, 16  ;;  %10875 = vmatmul.mubr.msk.bf16.vlgmr.msra.gmra.mrb[32].mxu1 %vm3494_vm12, %v9988_v59  ;;  %v5791_v26 = vsel %vm12235_vm10, %v5786_v0, %v14489_v29  ;;  %v7904_v57 = vor.u32 %v7903_v32, %v7900_v48  ;;  %v8078_v2 = vrot.slane %v8076_v33, 7  ;;  %v11425_v44 = vld [vmem:[#allocation3 + $0x78] sm:$0xff]   ;;  %v14498_v32 = vld [vmem:[#allocation67_spill] sm:$0xff] }
 0x37d   : > { %v8089_v6 = vshrl.u32 %v13694_v11, 16  ;;  %10878 = vmatprep.mubr.msk.bf16.mxu1 %vm3494_vm12, %v9989_v52  ;;  %10883 = vmatpush3.bf16.msra.mxu1 %v11419_v41  ;;  %v5805_v59 = vsel %vm12235_vm10, %v5800_v27, %v14490_v53  ;;  %v7918_v21 = vor.u32 %v7917_v10, %v7914_v14  ;;  %v8092_v46 = vshll.u32 %v13694_v11, 16  ;;  %v11426_v52 = vld [vmem:[%s14330_s5 + $0xa0] sm:$0xff]   ;;  %v13736_v31 = vld [vmem:[#allocation2 + $0x34] sm:$0xf]  ;;  %v11427_v53 = vld [vmem:[#allocation3 + $0x80] sm:$0xff]  }
 0x37e   : > { %v5807_v38 = vshrl.u32 %v14491_v50, 16  ;;  %10884 = vmatprep.subr.bf16.mxu1 %v11421_v8  ;;  %10707 = vmatmul.mubr.msk.bf16.vlgmr.msra.gmra.mrb[8].mxu0 %vm5503_vm14, %v9840_v39  ;;  %v9841_v51 = vcombine.low %v5791_v26, %v5805_v59  ;;  %v7905_v40 = vrot.slane %v7904_v57, 4  ;;  %v8081_v56 = vor.u32 %v8079_v12, %v8078_v2  ;;  %v13739_v27 = vld [vmem:[#allocation2 + $0x40] sm:$0xf]  ;;  %v11428_v26 = vld [vmem:[%s14330_s5 + $0xa8] sm:$0xff]  }
 0x37f   : > { %v8091_v43 = vrot.slane %v8089_v6, 7  ;;  %10715 = vmatpush3.bf16.msra.mxu0 %v11422_v7  ;;  %v7919_v19 = vrot.slane %v7918_v21, 4  ;;  %v5810_v17 = vshll.u32 %v14491_v50, 16  ;;  %v5821_v41 = vshrl.u32 %v14492_v45, 16  ;;  %v13751_v50 = vld [vmem:[#allocation2 + $0x4c] sm:$0xf] }
 0x380   : > { %v5809_v13 = vrot.slane %v5807_v38, 4  ;;  %10710 = vmatprep.mubr.msk.bf16.mxu0 %vm5503_vm14, %v9841_v51  ;;  %v7910_v36 = vsel %vm12235_vm10, %v7905_v40, %v14493_v58  ;;  %v8082_v54 = vsel %vm11967_vm6, %v14494_v61, %v8081_v56  ;;  %10716 = vmatprep.subr.bf16.mxu0 %v11424_v18  ;;  %v5824_v5 = vshll.u32 %v14492_v45, 16  ;;  %v14499_v51 = vld [vmem:[#allocation27_spill] sm:$0xff] }
 0x381   : > { %v8094_v16 = vor.u32 %v8092_v46, %v8091_v43  ;;  %10885 = vmatpush3.bf16.msra.mxu1 %v11421_v8  ;;  %v7924_v28 = vsel %vm12235_vm10, %v7919_v19, %v14495_v30  ;;  %v5812_v42 = vrot.slane %v5810_v17, 5  ;;  %v5823_v4 = vrot.slane %v5821_v41, 4  ;;  %v11430_v30 = vld [vmem:[%s14330_s5 + $0xb0] sm:$0xff]  }
 0x382   : > { %v6001_v7 = vshrl.u32 %v14496_v62, 16  ;;  %v9990_v48 = vcombine.low %v7910_v36, %v7924_v28  ;;  %10886 = vmatprep.subr.bf16.mxu1 %v11423_v25  ;;  %v5826_v15 = vrot.slane %v5824_v5, 5  ;;  %v6004_v35 = vshll.u32 %v14496_v62, 16  ;;  %v13764_v36 = vld [vmem:[#allocation2 + $0x58] sm:$0xf] }
 0x383   : > { %v8095_v47 = vsel %vm11967_vm6, %v14497_v37, %v8094_v16  ;;  %10717 = vmatpush3.bf16.msra.mxu0 %v11424_v18  ;;  %v5813_v39 = vor.u32 %v5812_v42, %v5809_v13  ;;  %v6014_v33 = vshrl.u32 %v14498_v32, 16  ;;  %v6017_v10 = vshll.u32 %v14498_v32, 16  ;;  %v14501_v13 = vld [vmem:[#allocation28_spill] sm:$0xff] }
 0x384   : > { %v10007_v8 = vcombine.low %v8082_v54, %v8095_v47  ;;  %v6003_v0 = vrot.slane %v6001_v7, 7  ;;  %10879 = vmatmul.mubr.msk.bf16.gmra.mrb[36].mxu1 %vm3494_vm12, %v9990_v48  ;;  %v5827_v14 = vor.u32 %v5826_v15, %v5823_v4  ;;  %10718 = vmatprep.subr.bf16.mxu0 %v11426_v52  ;;  %v8102_v12 = vshrl.u32 %v13730_v34, 16  ;;  %v14502_v54 = vld [vmem:[#allocation30_spill] sm:$0xff]  ;;  %v13773_v28 = vld [vmem:[#allocation2 + $0x64] sm:$0xf]  ;;  %v14503_v4 = vld [vmem:[#allocation31_spill] sm:$0xff] }
 0x385   : > { %v8105_v29 = vshll.u32 %v13730_v34, 16  ;;  %10887 = vmatpush3.bf16.msra.mxu1 %v11423_v25  ;;  %v5814_v57 = vrot.slane %v5813_v39, 4  ;;  %v6016_v6 = vrot.slane %v6014_v33, 7  ;;  %v8115_v18 = vshrl.u32 %v13736_v31, 16  ;;  %v14500_v25 = vld [vmem:[#allocation29_spill] sm:$0xff]  ;;  %v14504_v47 = vld [vmem:[#allocation32_spill] sm:$0xff] }
 0x386   : > { %10890 = vmatprep.mubr.msk.bf16.mxu1 %vm3494_vm12, %v10007_v8  ;;  %v6006_v2 = vor.u32 %v6004_v35, %v6003_v0  ;;  %10888 = vmatprep.subr.bf16.mxu1 %v11425_v44  ;;  %v5828_v59 = vrot.slane %v5827_v14, 4  ;;  %v8104_v21 = vrot.slane %v8102_v12, 7  ;;  %v8118_v46 = vshll.u32 %v13736_v31, 16  ;;  %v14505_v0 = vld [vmem:[#allocation33_spill] sm:$0xff]  ;;  %v11429_v14 = vld [vmem:[#allocation3 + $0x88] sm:$0xff]  }
 0x387   : > { %v8128_v38 = vshrl.u32 %v13739_v27, 16  ;;  %v5819_v40 = vsel %vm12235_vm10, %v5814_v57, %v14499_v51  ;;  %10719 = vmatpush3.bf16.msra.mxu0 %v11426_v52  ;;  %v6019_v43 = vor.u32 %v6017_v10, %v6016_v6  ;;  %v8117_v19 = vrot.slane %v8115_v18, 7  ;;  %v11432_v6 = vld [vmem:[%s14330_s5 + $0xb8] sm:$0xff]  }
 0x388   : > { %v6007_v56 = vsel %vm11967_vm6, %v14500_v25, %v6006_v2  ;;  %v5833_v17 = vsel %vm12235_vm10, %v5828_v59, %v14501_v13  ;;  %v8107_v45 = vor.u32 %v8105_v29, %v8104_v21  ;;  %v8131_v58 = vshll.u32 %v13739_v27, 16  ;;  %10720 = vmatprep.subr.bf16.mxu0 %v11428_v26 }
 0x389   : > { %v8130_v41 = vrot.slane %v8128_v38, 7  ;;  %10889 = vmatpush3.bf16.msra.mxu1 %v11425_v44  ;;  %v9842_v61 = vcombine.low %v5819_v40, %v5833_v17  ;;  %v6020_v16 = vsel %vm11967_vm6, %v14502_v54, %v6019_v43  ;;  %v8120_v5 = vor.u32 %v8118_v46, %v8117_v19  ;;  %v14506_v38 = vld [vmem:[#allocation34_spill] sm:$0xff]  ;;  %v14507_v40 = vld [vmem:[#allocation80_spill] sm:$0xff]  ;;  %v11431_v19 = vld [vmem:[#allocation3 + $0x90] sm:$0xff]  }
 0x38a   : > { %v8141_v52 = vshrl.u32 %v13751_v50, 16  ;;  %v9861_v42 = vcombine.low %v6007_v56, %v6020_v16  ;;  %v8108_v7 = vsel %vm11967_vm6, %v14503_v4, %v8107_v45  ;;  %10898 = vmatprep.subr.bf16.mxu1 %v11427_v53  ;;  %v8144_v37 = vshll.u32 %v13751_v50, 16  ;;  %v14508_v45 = vld [vmem:[#allocation36_spill] sm:$0xff]  ;;  %v14509_v54 = vld [vmem:[#allocation85_spill] sm:$0xff] }
 0x38b   : > { %v8133_v48 = vor.u32 %v8131_v58, %v8130_v41  ;;  %10711 = vmatmul.mubr.msk.bf16.gmra.mrb[12].mxu0 %vm5503_vm14, %v9842_v61  ;;  %v8121_v44 = vsel %vm11967_vm6, %v14504_v47, %v8120_v5  ;;  %v8154_v35 = vshrl.u32 %v13764_v36, 16  ;;  %v8157_v8 = vshll.u32 %v13764_v36, 16  ;;  %v14510_v5 = vld [vmem:[#allocation38_spill] sm:$0xff] }
 0x38c   : > { %v8143_v15 = vrot.slane %v8141_v52, 7  ;;  %10726 = vmatprep.mubr.msk.bf16.mxu0 %vm5503_vm14, %v9861_v42  ;;  %v10008_v39 = vcombine.low %v8108_v7, %v8121_v44  ;;  %10721 = vmatpush3.bf16.msra.mxu0 %v11428_v26  ;;  %v8167_v10 = vshrl.u32 %v13773_v28, 16  ;;  %v8170_v12 = vshll.u32 %v13773_v28, 16 }
 0x38d   : > { %v8134_v33 = vsel %vm11967_vm6, %v14505_v0, %v8133_v48  ;;  %10722 = vmatprep.subr.bf16.mxu0 %v11430_v30  ;;  %v8156_v57 = vrot.slane %v8154_v35, 7  ;;  %v10019_v2 = vcombine.low %v13683_v9, %v13694_v11  ;;  %v6027_v18 = vshrl.u32 %v13367_v3, 16  ;;  %v14511_v48 = vld [vmem:[#allocation35_spill] sm:$0xff]  ;;  %v11433_v35 = vld [vmem:[#allocation3 + $0x98] sm:$0xff]  }
 0x38e   : > { %v8146_v29 = vor.u32 %v8144_v37, %v8143_v15  ;;  %10891 = vmatmul.mubr.msk.bf16.vlgmr.msra.gmra.mrb[32].mxu1 %vm3494_vm12, %v10008_v39  ;;  %v8169_v26 = vrot.slane %v8167_v10, 7  ;;  %v6030_v59 = vshll.u32 %v13367_v3, 16  ;;  %v6040_v21 = vshrl.u32 %v13417_v63, 16  ;;  %v8440_v15 = vld [vmem:[#allocation2 + $0x10] sm:$0xf] }
 0x38f   : > { %v6043_v46 = vshll.u32 %v13417_v63, 16  ;;  %10899 = vmatpush3.bf16.msra.mxu1 %v11427_v53  ;;  %v8159_v9 = vor.u32 %v8157_v8, %v8156_v57  ;;  %v6029_v11 = vrot.slane %v6027_v18, 7  ;;  %v6053_v25 = vshrl.u32 %v14507_v40, 16  ;;  %v11434_v53 = vld [vmem:[%s14330_s5 + $0xc0] sm:$0xff]   ;;  %v14512_v8 = vld [vmem:[#allocation37_spill] sm:$0xff]  ;;  %v14514_v57 = vld [vmem:[#allocation39_spill] sm:$0xff] }
 0x390   : > { %v8147_v51 = vsel %vm11967_vm6, %v14506_v38, %v8146_v29  ;;  %10900 = vmatprep.subr.bf16.mxu1 %v11429_v14  ;;  %10723 = vmatpush3.bf16.msra.mxu0 %v11430_v30  ;;  %v8172_v43 = vor.u32 %v8170_v12, %v8169_v26  ;;  %v6042_v13 = vrot.slane %v6040_v21, 7  ;;  %v6056_v17 = vshll.u32 %v14507_v40, 16  ;;  %v8442_v12 = vld [vmem:[#allocation2 + $0x1c] sm:$0xf] }
 0x391   : > { %v10009_v56 = vcombine.low %v8134_v33, %v8147_v51  ;;  %v8160_v41 = vsel %vm11967_vm6, %v14508_v45, %v8159_v9  ;;  %10724 = vmatprep.subr.bf16.mxu0 %v11432_v6  ;;  %v6032_v58 = vor.u32 %v6030_v59, %v6029_v11  ;;  %v6055_v61 = vrot.slane %v6053_v25, 7  ;;  %v14513_v33 = vld [vmem:[#allocation88_spill] sm:$0xff]  ;;  %v11436_v59 = vld [vmem:[%s14330_s5 + $0xc8] sm:$0xff]   ;;  %v14515_v11 = vld [vmem:[#allocation42_spill] sm:$0xff] }
 0x392   : > { %v6066_v16 = vshrl.u32 %v14509_v54, 16  ;;  %v8173_v52 = vsel %vm11967_vm6, %v14510_v5, %v8172_v43  ;;  %v6045_v30 = vor.u32 %v6043_v46, %v6042_v13  ;;  %v6069_v42 = vshll.u32 %v14509_v54, 16  ;;  %v8444_v9 = vld [vmem:[#allocation2 + $0x28] sm:$0xf] }
 0x393   : > { %10894 = vmatprep.mubr.msk.bf16.mxu1 %vm3494_vm12, %v10009_v56  ;;  %v10020_v4 = vcombine.low %v13730_v34, %v13736_v31  ;;  %10901 = vmatpush3.bf16.msra.mxu1 %v11429_v14  ;;  %v10010_v7 = vcombine.low %v8160_v41, %v8173_v52  ;;  %v6033_v37 = vsel %vm11967_vm6, %v14511_v48, %v6032_v58  ;;  %v6079_v14 = vshrl.u32 %v14513_v33, 16  ;;  %v11435_v41 = vld [vmem:[#allocation3 + $0xa0] sm:$0xff]  }
 0x394   : > { %v6058_v47 = vor.u32 %v6056_v17, %v6055_v61  ;;  %v6068_v44 = vrot.slane %v6066_v16, 7  ;;  %10902 = vmatprep.subr.bf16.mxu1 %v11431_v19  ;;  %10725 = vmatpush3.bf16.msra.mxu0 %v11432_v6  ;;  %v6046_v39 = vsel %vm11967_vm6, %v14512_v8, %v6045_v30  ;;  %v10021_v0 = vcombine.low %v13739_v27, %v13751_v50  ;;  %v8446_v17 = vld [vmem:[#allocation2 + $0x34] sm:$0xf]  ;;  %v14516_v30 = vld [vmem:[#allocation40_spill] sm:$0xff] }
 0x395   : > { %v6082_v10 = vshll.u32 %v14513_v33, 16  ;;  %v9862_v29 = vcombine.low %v6033_v37, %v6046_v39  ;;  %10734 = vmatprep.subr.bf16.mxu0 %v11434_v53  ;;  %v6092_v26 = vshrl.u32 %v13589_v55, 16  ;;  %v6081_v21 = vrot.slane %v6079_v14, 7 }
 0x396   : > { %v6059_v18 = vsel %vm11967_vm6, %v14514_v57, %v6058_v47  ;;  %v6071_v6 = vor.u32 %v6069_v42, %v6068_v44  ;;  %10895 = vmatmul.mubr.msk.bf16.gmra.mrb[36].mxu1 %vm3494_vm12, %v10010_v7  ;;  %v6095_v46 = vshll.u32 %v13589_v55, 16  ;;  %v10022_v38 = vcombine.low %v13764_v36, %v13773_v28  ;;  %v11438_v7 = vld [vmem:[%s14330_s5 + $0xd0] sm:$0xff]   ;;  %v8448_v44 = vld [vmem:[#allocation2 + $0x40] sm:$0xf] }
 0x397   : > { %v8457_v51 = vshrl.u32 %v8440_v15, 16  ;;  %10903 = vmatpush3.bf16.msra.mxu1 %v11431_v19  ;;  %10906 = vmatprep.mubr.msk.bf16.mxu1 %vm3494_vm12, %v10019_v2  ;;  %v6094_v56 = vrot.slane %v6092_v26, 7  ;;  %v8460_v43 = vshll.u32 %v8440_v15, 16  ;;  %v8471_v13 = vshrl.u32 %v8442_v12, 16 }
 0x398   : > { %v6072_v25 = vsel %vm11967_vm6, %v14515_v11, %v6071_v6  ;;  %10904 = vmatprep.subr.bf16.mxu1 %v11433_v35  ;;  %10727 = vmatmul.mubr.msk.bf16.vlgmr.msra.gmra.mrb[8].mxu0 %vm5503_vm14, %v9862_v29  ;;  %v6084_v58 = vor.u32 %v6082_v10, %v6081_v21  ;;  %v8474_v16 = vshll.u32 %v8442_v12, 16  ;;  %v8485_v52 = vshrl.u32 %v8444_v9, 16  ;;  %v8450_v10 = vld [vmem:[#allocation2 + $0x4c] sm:$0xf]  ;;  %v11437_v12 = vld [vmem:[#allocation3 + $0xa8] sm:$0xff]  }
 0x399   : > { %v9863_v45 = vcombine.low %v6059_v18, %v6072_v25  ;;  %v8459_v61 = vrot.slane %v8457_v51, 4  ;;  %10735 = vmatpush3.bf16.msra.mxu0 %v11434_v53  ;;  %v6097_v19 = vor.u32 %v6095_v46, %v6094_v56  ;;  %v8462_v5 = vrot.slane %v8460_v43, 5  ;;  %v14517_v53 = vld [vmem:[#allocation41_spill] sm:$0xff]  ;;  %v8452_v43 = vld [vmem:[#allocation2 + $0x58] sm:$0xf] }
 0x39a   : > { %v8473_v2 = vrot.slane %v8471_v13, 4  ;;  %10736 = vmatprep.subr.bf16.mxu0 %v11436_v59  ;;  %v6085_v42 = vsel %vm11967_vm6, %v14516_v30, %v6084_v58  ;;  %v8476_v48 = vrot.slane %v8474_v16, 5  ;;  %v8488_v37 = vshll.u32 %v8444_v9, 16  ;;  %v11441_v9 = vld [vmem:[%s14330_s5 + $0xd8] sm:$0xff]   ;;  %v14519_v58 = vld [vmem:[#allocation44_spill] sm:$0xff]  ;;  %v14521_v30 = vld [vmem:[#allocation45_spill] sm:$0xff] }
 0x39b   : > { %10730 = vmatprep.mubr.msk.bf16.mxu0 %vm5503_vm14, %v9863_v45  ;;  %v8499_v47 = vshrl.u32 %v8446_v17, 16  ;;  %10905 = vmatpush3.bf16.msra.mxu1 %v11433_v35  ;;  %v6098_v15 = vsel %vm11967_vm6, %v14517_v53, %v6097_v19  ;;  %v8463_v8 = vor.u32 %v8462_v5, %v8459_v61  ;;  %v8487_v39 = vrot.slane %v8485_v52, 4  ;;  %v11440_v45 = vld [vmem:[#allocation3 + $0xb0] sm:$0xff]   ;;  %v11443_v52 = vld [vmem:[%s14330_s5 + $0xe0] sm:$0xff]  }
 0x39c   : > { %v8502_v14 = vshll.u32 %v8446_v17, 16  ;;  %10914 = vmatprep.subr.bf16.mxu1 %v11435_v41  ;;  %v9864_v29 = vcombine.low %v6085_v42, %v6098_v15  ;;  %v8477_v57 = vor.u32 %v8476_v48, %v8473_v2  ;;  %v8490_v18 = vrot.slane %v8488_v37, 5  ;;  %v8454_v17 = vld [vmem:[#allocation2 + $0x64] sm:$0xf] }
 0x39d   : > { %v8501_v6 = vrot.slane %v8499_v47, 4  ;;  %10737 = vmatpush3.bf16.msra.mxu0 %v11436_v59  ;;  %v8464_v26 = vrot.slane %v8463_v8, 4  ;;  %v8513_v46 = vshrl.u32 %v8448_v44, 16  ;;  %v8516_v51 = vshll.u32 %v8448_v44, 16  ;;  %v14518_v59 = vld [vmem:[#allocation43_spill] sm:$0xff] }
 0x39e   : > { %v8504_v21 = vrot.slane %v8502_v14, 5  ;;  %10907 = vmatmul.mubr.msk.bf16.vlgmr.msra.gmra.mrb[32].mxu1 %vm3494_vm12, %v10020_v4  ;;  %10738 = vmatprep.subr.bf16.mxu0 %v11438_v7  ;;  %v8478_v35 = vrot.slane %v8477_v57, 4  ;;  %v8491_v11 = vor.u32 %v8490_v18, %v8487_v39  ;;  %v8527_v25 = vshrl.u32 %v8450_v10, 16  ;;  %v13884_v47 = vld [vmem:[#allocation2 + $0x1c] sm:$0xf]  ;;  %v11442_v39 = vld [vmem:[#allocation3 + $0xb8] sm:$0xff]  }
 0x39f   : > { %v8530_v56 = vshll.u32 %v8450_v10, 16  ;;  %10910 = vmatprep.mubr.msk.bf16.mxu1 %vm3494_vm12, %v10021_v0  ;;  %10915 = vmatpush3.bf16.msra.mxu1 %v11435_v41  ;;  %v8469_v34 = vsel %vm12235_vm10, %v8464_v26, %v14518_v59  ;;  %v8515_v4 = vrot.slane %v8513_v46, 4  ;;  %v8518_v13 = vrot.slane %v8516_v51, 5  ;;  %v13889_v8 = vld [vmem:[#allocation2 + $0x28] sm:$0xf]  ;;  %v14523_v18 = vld [vmem:[#allocation50_spill] sm:$0xff] }
 0x3a0   : > { %v8505_v31 = vor.u32 %v8504_v21, %v8501_v6  ;;  %10916 = vmatprep.subr.bf16.mxu1 %v11437_v12  ;;  %10731 = vmatmul.mubr.msk.bf16.gmra.mrb[12].mxu0 %vm5503_vm14, %v9864_v29  ;;  %v8483_v61 = vsel %vm12235_vm10, %v8478_v35, %v14519_v58  ;;  %v8492_v27 = vrot.slane %v8491_v11, 4  ;;  %v8529_v50 = vrot.slane %v8527_v25, 4  ;;  %v14524_v46 = vld [vmem:[#allocation51_spill] sm:$0xff]  ;;  %v11445_v35 = vld [vmem:[%s14330_s5 + $0xe8] sm:$0xff]  }
 0x3a1   : > { %v8532_v0 = vrot.slane %v8530_v56, 5  ;;  %10739 = vmatpush3.bf16.msra.mxu0 %v11438_v7  ;;  %v14520_v41 = vcombine.low %v14496_v62, %v14498_v32  ;;  %v10031_v16 = vcombine.low %v8469_v34, %v8483_v61  ;;  %v8519_v5 = vor.u32 %v8518_v13, %v8515_v4  ;;  %v14522_v62 = vld [vmem:[#allocation47_spill] sm:$0xff] }
 0x3a2   : > { %v8506_v19 = vrot.slane %v8505_v31, 4  ;;  %v8541_v2 = vshrl.u32 %v8452_v43, 16  ;;  %10740 = vmatprep.subr.bf16.mxu0 %v11441_v9  ;;  %v8497_v42 = vsel %vm12235_vm10, %v8492_v27, %v14521_v30  ;;  %v8544_v7 = vshll.u32 %v8452_v43, 16  ;;  %v11444_v43 = vld [vmem:[#allocation3 + $0xc0] sm:$0xff]   ;;  %v14525_v31 = vld [vmem:[#allocation66_spill] sm:$0xff]  ;;  %v14528_v30 = vld [vmem:[#allocation52_spill] sm:$0xff] }
 0x3a3   : > { %10746 = vmatprep.mubr.msk.bf16.mxu0 %vm5503_vm14, %v14520_v41  ;;  %v8533_v48 = vor.u32 %v8532_v0, %v8529_v50  ;;  %v8555_v37 = vshrl.u32 %v8454_v17, 16  ;;  %10917 = vmatpush3.bf16.msra.mxu1 %v11437_v12  ;;  %v8520_v44 = vrot.slane %v8519_v5, 4  ;;  %v8558_v15 = vshll.u32 %v8454_v17, 16  ;;  %v13915_v50 = vld [vmem:[#allocation2 + $0x34] sm:$0xf]  ;;  %v14527_v41 = vld [vmem:[#allocation48_spill] sm:$0xff] }
 0x3a4   : > { %v8511_v32 = vsel %vm12235_vm10, %v8506_v19, %v14522_v62  ;;  %v8543_v53 = vrot.slane %v8541_v2, 4  ;;  %10918 = vmatprep.subr.bf16.mxu1 %v11440_v45  ;;  %v8546_v29 = vrot.slane %v8544_v7, 5  ;;  %v8719_v26 = vshrl.u32 %v13884_v47, 16  ;;  %v11447_v0 = vld [vmem:[%s14330_s5 + $0xf0] sm:$0xff]  }
 0x3a5   : > { %v10032_v14 = vcombine.low %v8497_v42, %v8511_v32  ;;  %v8534_v10 = vrot.slane %v8533_v48, 4  ;;  %v8557_v57 = vrot.slane %v8555_v37, 4  ;;  %10741 = vmatpush3.bf16.msra.mxu0 %v11441_v9  ;;  %v8525_v12 = vsel %vm12235_vm10, %v8520_v44, %v14523_v18  ;;  %v14529_v48 = vld [vmem:[#allocation46_spill] sm:$0xff]  ;;  %v13931_v32 = vld [vmem:[#allocation2 + $0x4c] sm:$0xf]  ;;  %v11446_v44 = vld [vmem:[#allocation3 + $0xc8] sm:$0xff]  }
 0x3a6   : > { %v8560_v6 = vrot.slane %v8558_v15, 5  ;;  %v8722_v21 = vshll.u32 %v13884_v47, 16  ;;  %10911 = vmatmul.mubr.msk.bf16.gmra.mrb[36].mxu1 %vm3494_vm12, %v10022_v38  ;;  %10742 = vmatprep.subr.bf16.mxu0 %v11443_v52  ;;  %v8547_v9 = vor.u32 %v8546_v29, %v8543_v53  ;;  %v8732_v11 = vshrl.u32 %v13889_v8, 16  ;;  %v14530_v15 = vld [vmem:[#allocation49_spill] sm:$0xff] }
 0x3a7   : > { %v8539_v51 = vsel %vm12235_vm10, %v8534_v10, %v14524_v46  ;;  %v8735_v25 = vshll.u32 %v13889_v8, 16  ;;  %10919 = vmatpush3.bf16.msra.mxu1 %v11440_v45  ;;  %10922 = vmatprep.mubr.msk.bf16.mxu1 %vm3494_vm12, %v10031_v16  ;;  %v8721_v38 = vrot.slane %v8719_v26, 7  ;;  %v9878_v56 = vcombine.low %v14513_v33, %v13589_v55  ;;  %v14526_v45 = vld [vmem:[#allocation69_spill] sm:$0xff] }
 0x3a8   : > { %v10033_v36 = vcombine.low %v8525_v12, %v8539_v51  ;;  %v8561_v28 = vor.u32 %v8560_v6, %v8557_v57  ;;  %10920 = vmatprep.subr.bf16.mxu1 %v11442_v39  ;;  %v8548_v59 = vrot.slane %v8547_v9, 4  ;;  %v8734_v34 = vrot.slane %v8732_v11, 7  ;;  %v13937_v57 = vld [vmem:[#allocation2 + $0x58] sm:$0xf] }
 0x3a9   : > { %v6414_v4 = vshrl.u32 %v14525_v31, 16  ;;  %v6417_v13 = vshll.u32 %v14525_v31, 16  ;;  %10743 = vmatpush3.bf16.msra.mxu0 %v11443_v52  ;;  %v8724_v58 = vor.u32 %v8722_v21, %v8721_v38  ;;  %v6428_v61 = vshrl.u32 %v14526_v45, 16  ;;  %v13923_v52 = vld [vmem:[#allocation2 + $0x40] sm:$0xf]  ;;  %v11449_v12 = vld [vmem:[%s14330_s5 + $0xf8] sm:$0xff]  }
 0x3aa   : > { %v8562_v17 = vrot.slane %v8561_v28, 4  ;;  %v6431_v27 = vshll.u32 %v14526_v45, 16  ;;  %10744 = vmatprep.subr.bf16.mxu0 %v11445_v35  ;;  %v8553_v16 = vsel %vm12235_vm10, %v8548_v59, %v14527_v41  ;;  %v8737_v19 = vor.u32 %v8735_v25, %v8734_v34  ;;  %v11448_v34 = vld [vmem:[#allocation3 + $0xd0] sm:$0xff]  }
 0x3ab   : > { %v6416_v5 = vrot.slane %v6414_v4, 4  ;;  %v6419_v2 = vrot.slane %v6417_v13, 5  ;;  %10921 = vmatpush3.bf16.msra.mxu1 %v11442_v39  ;;  %v8725_v7 = vsel %vm11967_vm6, %v14529_v48, %v8724_v58  ;;  %v6430_v37 = vrot.slane %v6428_v61, 4  ;;  %v14532_v31 = vld [vmem:[#allocation53_spill] sm:$0xff]  ;;  %v14534_v58 = vld [vmem:[#allocation54_spill] sm:$0xff] }
 0x3ac   : > { %v8567_v42 = vsel %vm12235_vm10, %v8562_v17, %v14528_v30  ;;  %v6433_v62 = vrot.slane %v6431_v27, 5  ;;  %10930 = vmatprep.subr.bf16.mxu1 %v11444_v43  ;;  %v8738_v10 = vsel %vm11967_vm6, %v14530_v15, %v8737_v19  ;;  %v8745_v29 = vshrl.u32 %v13915_v50, 16  ;;  %v11451_v27 = vld [vmem:[%s14330_s5 + $0x100] sm:$0xff]   ;;  %v14536_v19 = vld [vmem:[#allocation57_spill] sm:$0xff]  ;;  %v11450_v48 = vld [vmem:[#allocation3 + $0xd8] sm:$0xff]  }
 0x3ad   : > { %v10034_v53 = vcombine.low %v8553_v16, %v8567_v42  ;;  %v6420_v39 = vor.u32 %v6419_v2, %v6416_v5  ;;  %10745 = vmatpush3.bf16.msra.mxu0 %v11445_v35  ;;  %v10051_v18 = vcombine.low %v8725_v7, %v8738_v10  ;;  %v8748_v26 = vshll.u32 %v13915_v50, 16  ;;  %v13947_v35 = vld [vmem:[#allocation2 + $0x64] sm:$0xf]  ;;  %v14535_v16 = vld [vmem:[#allocation55_spill] sm:$0xff]  ;;  %v14538_v15 = vld [vmem:[#allocation70_spill] sm:$0xff] }
 0x3ae   : > { %v6434_v6 = vor.u32 %v6433_v62, %v6430_v37  ;;  %v8758_v21 = vshrl.u32 %v13923_v52, 16  ;;  %10923 = vmatmul.mubr.msk.bf16.vlgmr.msra.gmra.mrb[32].mxu1 %vm3494_vm12, %v10032_v14  ;;  %10754 = vmatprep.subr.bf16.mxu0 %v11447_v0  ;;  %v8747_v51 = vrot.slane %v8745_v29, 7  ;;  %v8761_v9 = vshll.u32 %v13923_v52, 16  ;;  %v14537_v37 = vld [vmem:[#allocation59_spill] sm:$0xff] }
 0x3af   : > { %v6421_v46 = vrot.slane %v6420_v39, 4  ;;  %v8771_v11 = vshrl.u32 %v13931_v32, 16  ;;  %10926 = vmatprep.mubr.msk.bf16.mxu1 %vm3494_vm12, %v10033_v36  ;;  %10931 = vmatpush3.bf16.msra.mxu1 %v11444_v43  ;;  %v8774_v38 = vshll.u32 %v13931_v32, 16  ;;  %v8784_v59 = vshrl.u32 %v13937_v57, 16  ;;  %v14539_v39 = vld [vmem:[#allocation56_spill] sm:$0xff] }
 0x3b0   : > { %v6435_v25 = vrot.slane %v6434_v6, 4  ;;  %v8760_v28 = vrot.slane %v8758_v21, 7  ;;  %10932 = vmatprep.subr.bf16.mxu1 %v11446_v44  ;;  %v14531_v14 = vcombine.low %v13367_v3, %v13417_v63  ;;  %v8750_v13 = vor.u32 %v8748_v26, %v8747_v51  ;;  %v14540_v26 = vld [vmem:[#allocation75_spill] sm:$0xff] }
 0x3b1   : > { %v6426_v4 = vsel %vm12235_vm10, %v6421_v46, %v14532_v31  ;;  %v8773_v36 = vrot.slane %v8771_v11, 7  ;;  %v8787_v43 = vshll.u32 %v13937_v57, 16  ;;  %v14533_v17 = vcombine.low %v14507_v40, %v14509_v54 }
 0x3b2   : > { %10747 = vmatmul.mubr.msk.bf16.vlgmr.msra.gmra.mrb[8].mxu0 %vm5503_vm14, %v14531_v14  ;;  %v6440_v3 = vsel %vm12235_vm10, %v6435_v25, %v14534_v58  ;;  %v8763_v63 = vor.u32 %v8761_v9, %v8760_v28  ;;  %v8786_v45 = vrot.slane %v8784_v59, 7  ;;  %v8797_v61 = vshrl.u32 %v13947_v35, 16  ;;  %v11453_v9 = vld [vmem:[%s14330_s5 + $0x108] sm:$0xff]  }
 0x3b3   : > { %10750 = vmatprep.mubr.msk.bf16.mxu0 %vm5503_vm14, %v14533_v17  ;;  %10755 = vmatpush3.bf16.msra.mxu0 %v11447_v0  ;;  %v9889_v41 = vcombine.low %v6426_v4, %v6440_v3  ;;  %v8751_v40 = vsel %vm11967_vm6, %v14535_v16, %v8750_v13  ;;  %v8776_v54 = vor.u32 %v8774_v38, %v8773_v36  ;;  %v8800_v0 = vshll.u32 %v13947_v35, 16  ;;  %v14542_v38 = vld [vmem:[#allocation58_spill] sm:$0xff]  ;;  %v11452_v4 = vld [vmem:[#allocation3 + $0xe0] sm:$0xff]  }
 0x3b4   : > { %10756 = vmatprep.subr.bf16.mxu0 %v11449_v12  ;;  %10933 = vmatpush3.bf16.msra.mxu1 %v11446_v44  ;;  %v8764_v5 = vsel %vm11967_vm6, %v14536_v19, %v8763_v63  ;;  %v8789_v2 = vor.u32 %v8787_v43, %v8786_v45  ;;  %v8799_v30 = vrot.slane %v8797_v61, 7  ;;  %v10063_v42 = vcombine.low %v13884_v47, %v13889_v8  ;;  %v14544_v43 = vld [vmem:[#allocation89_spill] sm:$0xff]  ;;  %v14545_v45 = vld [vmem:[#allocation90_spill] sm:$0xff] }
 0x3b5   : > { %10934 = vmatprep.subr.bf16.mxu1 %v11448_v34  ;;  %v10052_v7 = vcombine.low %v8751_v40, %v8764_v5  ;;  %v8777_v62 = vsel %vm11967_vm6, %v14537_v37, %v8776_v54  ;;  %v6442_v10 = vshrl.u32 %v14538_v15, 16  ;;  %v6445_v44 = vshll.u32 %v14538_v15, 16  ;;  %v11454_v54 = vld [vmem:[#allocation3 + $0xe8] sm:$0xff]   ;;  %v14547_v37 = vld [vmem:[#allocation61_spill] sm:$0xff] }
 0x3b6   : > { %v8790_v29 = vsel %vm11967_vm6, %v14539_v39, %v8789_v2  ;;  %v8802_v6 = vor.u32 %v8800_v0, %v8799_v30  ;;  %v6456_v21 = vshrl.u32 %v14540_v26, 16  ;;  %v6459_v46 = vshll.u32 %v14540_v26, 16  ;;  %10927 = vmatmul.mubr.msk.bf16.gmra.mrb[36].mxu1 %vm3494_vm12, %v10034_v53  ;;  %v14546_v0 = vld [vmem:[#allocation60_spill] sm:$0xff] }
 0x3b7   : > { %10757 = vmatpush3.bf16.msra.mxu0 %v11449_v12  ;;  %v10053_v51 = vcombine.low %v8777_v62, %v8790_v29  ;;  %v6444_v11 = vrot.slane %v6442_v10, 4  ;;  %v6447_v25 = vrot.slane %v6445_v44, 5  ;;  %v14541_v12 = vld [vmem:[#allocation81_spill] sm:$0xff]  ;;  %10938 = vmatprep.mubr.msk.bf16.mxu1 %vm3494_vm12, %v10051_v18  ;;  %v14543_v18 = vsel %vm11967_vm6, %v13332_v20, %v13469_v1  ;;  %v11455_v20 = vld [vmem:[%s14330_s5 + $0x110] sm:$0xff]   ;;  %v11458_v44 = vld [vmem:[%s14330_s5 + $0x118] sm:$0xff]  }
 0x3b8   : > { %10758 = vmatprep.subr.bf16.mxu0 %v11451_v27  ;;  %v6470_v28 = vshrl.u32 %v14541_v12, 16  ;;  %10935 = vmatpush3.bf16.msra.mxu1 %v11448_v34  ;;  %v8803_v59 = vsel %vm11967_vm6, %v14542_v38, %v8802_v6  ;;  %v6458_v14 = vrot.slane %v6456_v21, 4  ;;  %v6461_v31 = vrot.slane %v6459_v46, 5  ;;  %v14550_v46 = vld [vmem:[#allocation62_spill] sm:$0xff]  ;;  %v9083_v38 = vld [vmem:[#allocation2 + $0x1c] sm:$0xf] }
 0x3b9   : > { %v6473_v53 = vshll.u32 %v14541_v12, 16  ;;  %10936 = vmatprep.subr.bf16.mxu1 %v11450_v48  ;;  %v14009_v34 = vcombine.low %v8803_v59, %v14543_v18  ;;  %v6448_v13 = vor.u32 %v6447_v25, %v6444_v11  ;;  %v6484_v17 = vshrl.u32 %v14544_v43, 16  ;;  %v14551_v25 = vld [vmem:[#allocation68_spill] sm:$0xff]  ;;  %v11456_v59 = vld [vmem:[#allocation3 + $0xf0] sm:$0xff]  }
 0x3ba   : > { %10751 = vmatmul.mubr.msk.bf16.gmra.mrb[12].mxu0 %vm5503_vm14, %v9878_v56  ;;  %v6472_v36 = vrot.slane %v6470_v28, 4  ;;  %v6462_v58 = vor.u32 %v6461_v31, %v6458_v14  ;;  %v6487_v55 = vshll.u32 %v14544_v43, 16  ;;  %v10064_v33 = vcombine.low %v13915_v50, %v13923_v52  ;;  %v14553_v31 = vld [vmem:[#allocation71_spill] sm:$0xff]  ;;  %v14556_v43 = vld [vmem:[#allocation84_spill] sm:$0xff] }
 0x3bb   : > { %10759 = vmatpush3.bf16.msra.mxu0 %v11451_v27  ;;  %10766 = vmatprep.mubr.msk.bf16.mxu0 %vm5503_vm14, %v9889_v41  ;;  %v6475_v3 = vrot.slane %v6473_v53, 5  ;;  %v6449_v1 = vrot.slane %v6448_v13, 4  ;;  %v6486_v56 = vrot.slane %v6484_v17, 4  ;;  %v10065_v63 = vcombine.low %v13931_v32, %v13937_v57  ;;  %v14554_v13 = vld [vmem:[#allocation78_spill] sm:$0xff] }
 0x3bc   : > { %10760 = vmatprep.subr.bf16.mxu0 %v11453_v9  ;;  %v6498_v61 = vshrl.u32 %v14545_v45, 16  ;;  %10937 = vmatpush3.bf16.msra.mxu1 %v11450_v48  ;;  %v6463_v27 = vrot.slane %v6462_v58, 4  ;;  %v6489_v16 = vrot.slane %v6487_v55, 5  ;;  %v6501_v40 = vshll.u32 %v14545_v45, 16  ;;  %v11460_v45 = vld [vmem:[%s14330_s5 + $0x120] sm:$0xff]  }
 0x3bd   : > { %v6476_v41 = vor.u32 %v6475_v3, %v6472_v36  ;;  %10946 = vmatprep.subr.bf16.mxu1 %v11452_v4  ;;  %v6454_v19 = vsel %vm12235_vm10, %v6449_v1, %v14546_v0  ;;  %v6512_v2 = vshrl.u32 %v13591_v23, 16  ;;  %v6515_v30 = vshll.u32 %v13591_v23, 16  ;;  %v14548_v23 = vld [vmem:[#allocation65_spill] sm:$0xff]  ;;  %v9084_v36 = vld [vmem:[#allocation2 + $0x20] sm:$0x1]  ;;  %v14558_v0 = vld [vmem:[#allocation63_spill] sm:$0xff] }
 0x3be   : > { %v6500_v5 = vrot.slane %v6498_v61, 4  ;;  %v6468_v48 = vsel %vm12235_vm10, %v6463_v27, %v14547_v37  ;;  %v6490_v15 = vor.u32 %v6489_v16, %v6486_v56  ;;  %v6503_v10 = vrot.slane %v6501_v40, 5  ;;  %v14557_v3 = vld [vmem:[#allocation72_spill] sm:$0xff]  ;;  %v9085_v56 = vld [vmem:[#allocation2 + $0x28] sm:$0xf]  ;;  %v11459_v40 = vld [vmem:[#allocation3 + $0xf8] sm:$0xff]  }
 0x3bf   : > { %10761 = vmatpush3.bf16.msra.mxu0 %v11453_v9  ;;  %v6477_v62 = vrot.slane %v6476_v41, 4  ;;  %10939 = vmatmul.mubr.msk.bf16.vlgmr.msra.gmra.mrb[32].mxu1 %vm3494_vm12, %v10052_v7  ;;  %v14035_v39 = vcombine.low %v6454_v19, %v6468_v48  ;;  %v6514_v29 = vrot.slane %v6512_v2, 4  ;;  %v6517_v6 = vrot.slane %v6515_v30, 5  ;;  %v14057_v16 = vld [vmem:[#allocation2 + $0x70] sm:$0xf] }
 0x3c0   : > { %10762 = vmatprep.subr.bf16.mxu0 %v11455_v20  ;;  %v14549_v26 = vshll.u32 %v14548_v23, 16  ;;  %10942 = vmatprep.mubr.msk.bf16.mxu1 %vm3494_vm12, %v10053_v51  ;;  %v6491_v7 = vrot.slane %v6490_v15, 4  ;;  %v6504_v11 = vor.u32 %v6503_v10, %v6500_v5  ;;  %v14552_v12 = vshrl.u32 %v14551_v25, 16  ;;  %v9089_v25 = vld [vmem:[#allocation2 + $0x40] sm:$0xf] }
 0x3c1   : > { %10947 = vmatpush3.bf16.msra.mxu1 %v11452_v4  ;;  %v6482_v9 = vsel %vm12235_vm10, %v6477_v62, %v14550_v46  ;;  %v6518_v14 = vor.u32 %v6517_v6, %v6514_v29  ;;  %v6692_v53 = vshrl.u32 %v14553_v31, 16  ;;  %v6695_v18 = vshll.u32 %v14553_v31, 16  ;;  %v9086_v62 = vld [vmem:[#allocation2 + $0x2c] sm:$0x1]  ;;  %v9087_v29 = vld [vmem:[#allocation2 + $0x34] sm:$0xf] }
 0x3c2   : > { %v6523_v21 = vrot.slane %v14549_v26, 5  ;;  %v9903_v28 = vrot.slane %v14552_v12, 11  ;;  %10948 = vmatprep.subr.bf16.mxu1 %v11454_v54  ;;  %v14555_v51 = vshrl.u32 %v14554_v13, 16  ;;  %v6496_v17 = vsel %vm12235_vm10, %v6491_v7, %v14556_v43  ;;  %v9088_v46 = vld [vmem:[#allocation2 + $0x38] sm:$0x1] }
 0x3c3   : > { %10763 = vmatpush3.bf16.msra.mxu0 %v11455_v20  ;;  %v6505_v58 = vrot.slane %v6504_v11, 4  ;;  %v6705_v55 = vshrl.u32 %v14557_v3, 16  ;;  %v6708_v1 = vshll.u32 %v14557_v3, 16  ;;  %v9891_v61 = vcombine.low %v6482_v9, %v6496_v17  ;;  %v9092_v43 = vld [vmem:[#allocation2 + $0x50] sm:$0x1] }
 0x3c4   : > { %v9904_v4 = vrot.slane %v14555_v51, 11  ;;  %10764 = vmatprep.subr.bf16.mxu0 %v11458_v44  ;;  %v6519_v27 = vrot.slane %v6518_v14, 4  ;;  %v6694_v41 = vrot.slane %v6692_v53, 7  ;;  %v10066_v20 = vcombine.low %v13947_v35, %v14057_v16  ;;  %v9090_v14 = vld [vmem:[#allocation2 + $0x44] sm:$0x1]  ;;  %v11466_v17 = vld [vmem:[%s14330_s5 + $0x130] sm:$0xff]  }
 0x3c5   : > { %10949 = vmatpush3.bf16.msra.mxu1 %v11454_v54  ;;  %v6510_v19 = vsel %vm12235_vm10, %v6505_v58, %v14558_v0  ;;  %v6707_v5 = vrot.slane %v6705_v55, 7  ;;  %v9100_v2 = vshrl.u32 %v9083_v38, 16  ;;  %v9103_v30 = vshll.u32 %v9083_v38, 16  ;;  %v11465_v0 = vld [vmem:[#allocation3 + $0x108] sm:$0xff]  }
 0x3c6   : > { %10950 = vmatprep.subr.bf16.mxu1 %v11456_v59  ;;  %v6524_v37 = vsel %vm12235_vm10, %v6519_v27, %v6523_v21  ;;  %v6697_v48 = vor.u32 %v6695_v18, %v6694_v41  ;;  %v9109_v15 = vshll.u32 %v9084_v36, 16  ;;  %v9114_v10 = vshrl.u32 %v9085_v56, 16  ;;  %v11464_v21 = vld [vmem:[%s14330_s5 + $0x128] sm:$0xff]  }
 0x3c7   : > { %10765 = vmatpush3.bf16.msra.mxu0 %v11458_v44  ;;  %v14066_v6 = vcombine.low %v6510_v19, %v6524_v37  ;;  %v6710_v54 = vor.u32 %v6708_v1, %v6707_v5  ;;  %v9102_v23 = vrot.slane %v9100_v2, 4  ;;  %v9105_v26 = vrot.slane %v9103_v30, 5  ;;  %10943 = vmatmul.mubr.msk.bf16.gmra.mrb[36].mxu1 %vm3494_vm12, %v14009_v34  ;;  %v9091_v36 = vld [vmem:[#allocation2 + $0x4c] sm:$0xf] }
 0x3c8   : > { %10774 = vmatprep.subr.bf16.mxu0 %v11460_v45  ;;  %v6698_v9 = vsel %vm11967_vm6, %v9903_v28, %v6697_v48  ;;  %v9111_v7 = vrot.slane %v9109_v15, 5  ;;  %v9116_v11 = vrot.slane %v9114_v10, 4  ;;  %v9117_v44 = vshll.u32 %v9085_v56, 16  ;;  %10954 = vmatprep.mubr.msk.bf16.mxu1 %vm3494_vm12, %v10063_v42  ;;  %v11462_v28 = vld [vmem:[#allocation3 + $0x100] sm:$0xff]  }
 0x3c9   : > { %10951 = vmatpush3.bf16.msra.mxu1 %v11456_v59  ;;  %v6711_v34 = vsel %vm11967_vm6, %v9904_v4, %v6710_v54  ;;  %v9106_v12 = vor.u32 %v9105_v26, %v9102_v23  ;;  %v9123_v38 = vshll.u32 %v9086_v62, 16  ;;  %v9128_v53 = vshrl.u32 %v9087_v29, 16  ;;  %v9093_v56 = vld [vmem:[#allocation2 + $0x58] sm:$0xf]  ;;  %v9094_v48 = vld [vmem:[#allocation2 + $0x5c] sm:$0x1] }
 0x3ca   : > { %10952 = vmatprep.subr.bf16.mxu1 %v11459_v40  ;;  %10767 = vmatmul.mubr.msk.bf16.vlgmr.msra.gmra.mrb[8].mxu0 %vm5503_vm14, %v14035_v39  ;;  %v9911_v18 = vcombine.low %v6698_v9, %v6711_v34  ;;  %v9119_v13 = vrot.slane %v9117_v44, 5  ;;  %v9131_v59 = vshll.u32 %v9087_v29, 16  ;;  %v9137_v51 = vshll.u32 %v9088_v46, 16  ;;  %v11469_v29 = vld [vmem:[%s14330_s5 + $0x138] sm:$0xff]   ;;  %v6674_v46 = vld [vmem:[#allocation2 + $0x30] sm:$0x8] }
 0x3cb   : > { %10770 = vmatprep.mubr.msk.bf16.mxu0 %vm5503_vm14, %v9891_v61  ;;  %10775 = vmatpush3.bf16.msra.mxu0 %v11460_v45  ;;  %v9107_v47 = vrot.slane %v9106_v12, 4  ;;  %v9125_v8 = vrot.slane %v9123_v38, 5  ;;  %v9130_v42 = vrot.slane %v9128_v53, 4  ;;  %v9142_v4 = vshrl.u32 %v9089_v25, 16  ;;  %v6676_v9 = vld [vmem:[#allocation2 + $0x3c] sm:$0x8] }
 0x3cc   : > { %10776 = vmatprep.subr.bf16.mxu0 %v11464_v21  ;;  %v9120_v39 = vor.u32 %v9119_v13, %v9116_v11  ;;  %v9133_v58 = vrot.slane %v9131_v59, 5  ;;  %v9139_v55 = vrot.slane %v9137_v51, 5  ;;  %v9145_v1 = vshll.u32 %v9089_v25, 16  ;;  %v6678_v59 = vld [vmem:[#allocation2 + $0x48] sm:$0x8] }
 0x3cd   : > { %10953 = vmatpush3.bf16.msra.mxu1 %v11459_v40  ;;  %v9112_v61 = vsel %vm12235_vm10, %v9107_v47, %v9111_v7  ;;  %v9144_v45 = vrot.slane %v9142_v4, 4  ;;  %v9151_v27 = vshll.u32 %v9090_v14, 16  ;;  %v9156_v41 = vshrl.u32 %v9091_v36, 16  ;;  %v11468_v7 = vld [vmem:[#allocation3 + $0x110] sm:$0xff]  }
 0x3ce   : > { %10962 = vmatprep.subr.bf16.mxu1 %v11462_v28  ;;  %v9121_v19 = vrot.slane %v9120_v39, 4  ;;  %v9134_v5 = vor.u32 %v9133_v58, %v9130_v42  ;;  %v9147_v2 = vrot.slane %v9145_v1, 5  ;;  %v9159_v30 = vshll.u32 %v9091_v36, 16  ;;  %v11470_v42 = vld [vmem:[#allocation3 + $0x118] sm:$0xff]   ;;  %v11472_v1 = vld [vmem:[%s14330_s5 + $0x148] sm:$0xff]  }
 0x3cf   : > { %10777 = vmatpush3.bf16.msra.mxu0 %v11464_v21  ;;  %v9153_v37 = vrot.slane %v9151_v27, 5  ;;  %v9158_v62 = vrot.slane %v9156_v41, 4  ;;  %v9165_v15 = vshll.u32 %v9092_v43, 16  ;;  %v9170_v10 = vshrl.u32 %v9093_v56, 16 }
 0x3d0   : > { %10955 = vmatmul.mubr.msk.bf16.vlgmr.msra.gmra.mrb[32].mxu1 %vm3494_vm12, %v10064_v33  ;;  %10778 = vmatprep.subr.bf16.mxu0 %v11466_v17  ;;  %v9126_v40 = vsel %vm12235_vm10, %v9121_v19, %v9125_v8  ;;  %v9135_v54 = vrot.slane %v9134_v5, 4  ;;  %v9148_v23 = vor.u32 %v9147_v2, %v9144_v45  ;;  %v9161_v26 = vrot.slane %v9159_v30, 5  ;;  %v6680_v8 = vld [vmem:[#allocation2 + $0x54] sm:$0x8]  ;;  %v14561_v45 = vld [vmem:[#allocation91_spill] sm:$0xff]  ;;  %v14562_v5 = vld [vmem:[#allocation92_spill] sm:$0xff] }
 0x3d1   : > { %10958 = vmatprep.mubr.msk.bf16.mxu1 %vm3494_vm12, %v10065_v63  ;;  %10963 = vmatpush3.bf16.msra.mxu1 %v11462_v28  ;;  %v10075_v50 = vcombine.low %v9112_v61, %v9126_v40  ;;  %v9167_v52 = vrot.slane %v9165_v15, 5  ;;  %v9172_v33 = vrot.slane %v9170_v10, 4  ;;  %v9173_v21 = vshll.u32 %v9093_v56, 16  ;;  %v14559_v63 = vld [vmem:[#allocation76_spill] sm:$0xff] }
 0x3d2   : > { %10964 = vmatprep.subr.bf16.mxu1 %v11465_v0  ;;  %10771 = vmatmul.mubr.msk.bf16.gmra.mrb[12].mxu0 %vm5503_vm14, %v14066_v6  ;;  %v9140_v11 = vsel %vm12235_vm10, %v9135_v54, %v9139_v55  ;;  %v9149_v44 = vrot.slane %v9148_v23, 4  ;;  %v9162_v25 = vor.u32 %v9161_v26, %v9158_v62  ;;  %v9179_v34 = vshll.u32 %v9094_v48, 16  ;;  %v11471_v6 = vld [vmem:[%s14330_s5 + $0x140] sm:$0xff]   ;;  %v9097_v62 = vld [vmem:[#allocation2 + $0x70] sm:$0xf] }
 0x3d3   : > { %10779 = vmatpush3.bf16.msra.mxu0 %v11466_v17  ;;  %10786 = vmatprep.mubr.msk.bf16.mxu0 %vm5503_vm14, %v9911_v18  ;;  %v9175_v32 = vrot.slane %v9173_v21, 5  ;;  %v6713_v57 = vshrl.u32 %v6674_v46, 16  ;;  %v6718_v12 = vshrl.u32 %v14559_v63, 16  ;;  %v6721_v38 = vshll.u32 %v14559_v63, 16  ;;  %v14560_v17 = vld [vmem:[#allocation82_spill] sm:$0xff] }
 0x3d4   : > { %10780 = vmatprep.subr.bf16.mxu0 %v11469_v29  ;;  %v9154_v14 = vsel %vm12235_vm10, %v9149_v44, %v9153_v37  ;;  %v9163_v53 = vrot.slane %v9162_v25, 4  ;;  %v9181_v28 = vrot.slane %v9179_v34, 5  ;;  %v6726_v13 = vshrl.u32 %v6676_v9, 16  ;;  %v9095_v30 = vld [vmem:[#allocation2 + $0x64] sm:$0xf] }
 0x3d5   : > { %10965 = vmatpush3.bf16.msra.mxu1 %v11465_v0  ;;  %v14114_v18 = vcombine.low %v9140_v11, %v9154_v14  ;;  %v9176_v51 = vor.u32 %v9175_v32, %v9172_v33  ;;  %v9905_v36 = vrot.slane %v6713_v57, 11  ;;  %v6720_v47 = vrot.slane %v6718_v12, 7  ;;  %v9098_v26 = vld [vmem:[#allocation2 + $0x74] sm:$0x1]  ;;  %v6682_v11 = vld [vmem:[#allocation2 + $0x60] sm:$0x8] }
 0x3d6   : > { %10966 = vmatprep.subr.bf16.mxu1 %v11468_v7  ;;  %v9168_v4 = vsel %vm12235_vm10, %v9163_v53, %v9167_v52  ;;  %v9906_v43 = vrot.slane %v6726_v13, 11  ;;  %v6731_v39 = vshrl.u32 %v14560_v17, 16  ;;  %v6734_v58 = vshll.u32 %v14560_v17, 16  ;;  %v11473_v33 = vld [vmem:[%s14330_s5 + $0x150] sm:$0xff]   ;;  %v6684_v14 = vld [vmem:[#allocation2 + $0x6c] sm:$0x8] }
 0x3d7   : > { %10781 = vmatpush3.bf16.msra.mxu0 %v11469_v29  ;;  %v9177_v55 = vrot.slane %v9176_v51, 4  ;;  %v6723_v56 = vor.u32 %v6721_v38, %v6720_v47  ;;  %v6739_v61 = vshrl.u32 %v6678_v59, 16  ;;  %v6744_v27 = vshrl.u32 %v14561_v45, 16  ;;  %v14145_v13 = vld [vmem:[#allocation2 + $0x70] sm:$0xf] }
 0x3d8   : > { %10959 = vmatmul.mubr.msk.bf16.gmra.mrb[36].mxu1 %vm3494_vm12, %v10066_v20  ;;  %10782 = vmatprep.subr.bf16.mxu0 %v11471_v6  ;;  %v6733_v41 = vrot.slane %v6731_v39, 7  ;;  %v6747_v0 = vshll.u32 %v14561_v45, 16  ;;  %v6752_v19 = vshrl.u32 %v6680_v8, 16  ;;  %v6757_v2 = vshrl.u32 %v14562_v5, 16  ;;  %v9096_v20 = vld [vmem:[#allocation2 + $0x68] sm:$0x1] }
 0x3d9   : > { %10967 = vmatpush3.bf16.msra.mxu1 %v11468_v7  ;;  %10970 = vmatprep.mubr.msk.bf16.mxu1 %vm3494_vm12, %v10075_v50  ;;  %v9182_v37 = vsel %vm12235_vm10, %v9177_v55, %v9181_v28  ;;  %v6724_v48 = vsel %vm11967_vm6, %v9905_v36, %v6723_v56  ;;  %v9907_v35 = vrot.slane %v6739_v61, 11  ;;  %v6746_v16 = vrot.slane %v6744_v27, 7 }
 0x3da   : > { %10968 = vmatprep.subr.bf16.mxu1 %v11470_v42  ;;  %v10077_v15 = vcombine.low %v9168_v4, %v9182_v37  ;;  %v6736_v10 = vor.u32 %v6734_v58, %v6733_v41  ;;  %v9908_v40 = vrot.slane %v6752_v19, 11  ;;  %v6759_v29 = vrot.slane %v6757_v2, 7 }
 0x3db   : > { %10783 = vmatpush3.bf16.msra.mxu0 %v11471_v6  ;;  %v6749_v54 = vor.u32 %v6747_v0, %v6746_v16  ;;  %v6760_v23 = vshll.u32 %v14562_v5, 16  ;;  %v9184_v46 = vshrl.u32 %v9095_v30, 16  ;;  %v9187_v50 = vshll.u32 %v9095_v30, 16  ;;  %v11475_v30 = vld [vmem:[%s14330_s5 + $0x160] sm:$0xff]  }
 0x3dc   : > { %10784 = vmatprep.subr.bf16.mxu0 %v11472_v1  ;;  %v6737_v52 = vsel %vm11967_vm6, %v9906_v43, %v6736_v10  ;;  %v9193_v21 = vshll.u32 %v9096_v20, 16  ;;  %v9198_v9 = vshrl.u32 %v9097_v62, 16  ;;  %v9201_v7 = vshll.u32 %v9097_v62, 16  ;;  %v11476_v62 = vld [vmem:[%s14330_s5 + $0x168] sm:$0xff]  }
 0x3dd   : > { %10969 = vmatpush3.bf16.msra.mxu1 %v11470_v42  ;;  %v9912_v44 = vcombine.low %v6724_v48, %v6737_v52  ;;  %v6750_v25 = vsel %vm11967_vm6, %v9907_v35, %v6749_v54  ;;  %v6762_v34 = vor.u32 %v6760_v23, %v6759_v29  ;;  %v9186_v32 = vrot.slane %v9184_v46, 4  ;;  %v11474_v42 = vld [vmem:[%s14330_s5 + $0x158] sm:$0xff]   ;;  %v14563_v10 = vld [vmem:[#allocation73_spill] sm:$0xff]  ;;  %v11479_v52 = vld [vmem:[%s14330_s5 + $0x180] sm:$0xff]  }
 0x3de   : > { %v9189_v57 = vrot.slane %v9187_v50, 5  ;;  %v9195_v12 = vrot.slane %v9193_v21, 5  ;;  %v9200_v38 = vrot.slane %v9198_v9, 4  ;;  %v9203_v6 = vrot.slane %v9201_v7, 5  ;;  %v7089_v50 = vld [vmem:[#allocation2 + $0x20] sm:$0x1] }
 0x3df   : > { %10785 = vmatpush3.bf16.msra.mxu0 %v11472_v1  ;;  %v6763_v53 = vsel %vm11967_vm6, %v9908_v40, %v6762_v34  ;;  %v9207_v28 = vshll.u32 %v9098_v26, 16  ;;  %v6765_v59 = vshrl.u32 %v6682_v11, 16  ;;  %v6770_v51 = vshrl.u32 %v13597_v24, 16  ;;  %v7091_v9 = vld [vmem:[#allocation2 + $0x2c] sm:$0x1] }
 0x3e0   : > { %10971 = vmatmul.mubr.msk.bf16.vlgmr.msra.gmra.mrb[32].mxu1 %vm3494_vm12, %v14114_v18  ;;  %10794 = vmatprep.subr.bf16.mxu0 %v11473_v33  ;;  %v9913_v36 = vcombine.low %v6750_v25, %v6763_v53  ;;  %v9190_v47 = vor.u32 %v9189_v57, %v9186_v32  ;;  %v9204_v8 = vor.u32 %v9203_v6, %v9200_v38  ;;  %v6773_v4 = vshll.u32 %v13597_v24, 16  ;;  %v11480_v25 = vld [vmem:[%s14330_s5 + $0x188] sm:$0xff]   ;;  %v14565_v6 = vld [vmem:[#allocation83_spill] sm:$0xff] }
 0x3e1   : > { %10974 = vmatprep.mubr.msk.bf16.mxu1 %vm3494_vm12, %v10077_v15  ;;  %v9209_v43 = vrot.slane %v9207_v28, 5  ;;  %v9909_v39 = vrot.slane %v6765_v59, 11  ;;  %v6772_v58 = vrot.slane %v6770_v51, 7  ;;  %v6778_v55 = vshrl.u32 %v6684_v14, 16 }
 0x3e2   : > { %10787 = vmatmul.mubr.msk.bf16.vlgmr.msra.gmra.mrb[8].mxu0 %vm5503_vm14, %v9912_v44  ;;  %v9191_v1 = vrot.slane %v9190_v47, 4  ;;  %v9205_v18 = vrot.slane %v9204_v8, 4  ;;  %v6783_v56 = vshrl.u32 %v14145_v13, 16  ;;  %v6786_v61 = vshll.u32 %v14145_v13, 16  ;;  %v14567_v47 = vld [vmem:[#allocation77_spill] sm:$0xff] }
 0x3e3   : > { %10790 = vmatprep.mubr.msk.bf16.mxu0 %vm5503_vm14, %v9913_v36  ;;  %10795 = vmatpush3.bf16.msra.mxu0 %v11473_v33  ;;  %v6775_v27 = vor.u32 %v6773_v4, %v6772_v58  ;;  %v9910_v19 = vrot.slane %v6778_v55, 11  ;;  %v9925_v15 = vcombine.low %v14553_v31, %v14557_v3  ;;  %v7105_v40 = vshrl.u32 %v14563_v10, 16  ;;  %v11478_v31 = vld [vmem:[%s14330_s5 + $0x178] sm:$0xff]   ;;  %v14564_v3 = vld [vmem:[#allocation74_spill] sm:$0xff] }
 0x3e4   : > { %v9196_v41 = vsel %vm12235_vm10, %v9191_v1, %v9195_v12  ;;  %v9210_v0 = vsel %vm12235_vm10, %v9205_v18, %v9209_v43  ;;  %10796 = vmatprep.subr.bf16.mxu0 %v11474_v42  ;;  %v6785_v2 = vrot.slane %v6783_v56, 7  ;;  %v7108_v29 = vshll.u32 %v14563_v10, 16  ;;  %v14568_v55 = vld [vmem:[#allocation94_spill] sm:$0xff] }
 0x3e5   : > { %v10078_v37 = vcombine.low %v9196_v41, %v9210_v0  ;;  %v6776_v48 = vsel %vm11967_vm6, %v9909_v39, %v6775_v27  ;;  %v7119_v54 = vshrl.u32 %v14564_v3, 16  ;;  %v7122_v23 = vshll.u32 %v14564_v3, 16  ;;  %v11482_v39 = vld [vmem:[%s14330_s5 + $0x198] sm:$0xff]   ;;  %v7102_v27 = vld [vmem:[#allocation2 + $0x70] sm:$0xf] }
 0x3e6   : > { %v6788_v35 = vor.u32 %v6786_v61, %v6785_v2  ;;  %v7107_v26 = vrot.slane %v7105_v40, 4  ;;  %v7110_v46 = vrot.slane %v7108_v29, 5  ;;  %v7114_v11 = vshll.u32 %v7089_v50, 16  ;;  %v11483_v2 = vld [vmem:[%s14330_s5 + $0x1a0] sm:$0xff]  }
 0x3e7   : > { %10797 = vmatpush3.bf16.msra.mxu0 %v11474_v42  ;;  %v7121_v33 = vrot.slane %v7119_v54, 4  ;;  %v7124_v21 = vrot.slane %v7122_v23, 5  ;;  %v9926_v44 = vcombine.low %v14559_v63, %v14560_v17  ;;  %v7128_v32 = vshll.u32 %v7091_v9, 16  ;;  %v11481_v63 = vld [vmem:[%s14330_s5 + $0x190] sm:$0xff]   ;;  %v11484_v54 = vld [vmem:[%s14330_s5 + $0x1a8] sm:$0xff]  }
 0x3e8   : > { %10975 = vmatmul.mubr.msk.bf16.gmra.mrb[36].mxu1 %vm3494_vm12, %v10078_v37  ;;  %v6789_v16 = vsel %vm11967_vm6, %v9910_v19, %v6788_v35  ;;  %10798 = vmatprep.subr.bf16.mxu0 %v11475_v30  ;;  %v7111_v7 = vor.u32 %v7110_v46, %v7107_v26  ;;  %v9927_v57 = vcombine.low %v14561_v45, %v14562_v5  ;;  %v7116_v38 = vrot.slane %v7114_v11, 5  ;;  %v14566_v5 = vld [vmem:[#allocation93_spill] sm:$0xff]  ;;  %v7097_v19 = vld [vmem:[#allocation2 + $0x50] sm:$0x1] }
 0x3e9   : > { %v9914_v20 = vcombine.low %v6776_v48, %v6789_v16  ;;  %v7125_v34 = vor.u32 %v7124_v21, %v7121_v33  ;;  %v7147_v14 = vshrl.u32 %v14565_v6, 16  ;;  %v7130_v53 = vrot.slane %v7128_v32, 5 }
 0x3ea   : > { %v7112_v12 = vrot.slane %v7111_v7, 4  ;;  %v7150_v28 = vshll.u32 %v14565_v6, 16  ;;  %v7161_v59 = vshrl.u32 %v14566_v5, 16  ;;  %v7164_v51 = vshll.u32 %v14566_v5, 16 }
 0x3eb   : > { %10791 = vmatmul.mubr.msk.bf16.gmra.mrb[12].mxu0 %vm5503_vm14, %v9914_v20  ;;  %v7126_v17 = vrot.slane %v7125_v34, 4  ;;  %v9928_v36 = vcombine.low %v13597_v24, %v14145_v13  ;;  %v7133_v8 = vshrl.u32 %v14567_v47, 16  ;;  %v7136_v42 = vshll.u32 %v14567_v47, 16  ;;  %v7095_v24 = vld [vmem:[#allocation2 + $0x44] sm:$0x1] }
 0x3ec   : > { %10799 = vmatpush3.bf16.msra.mxu0 %v11475_v30  ;;  %10806 = vmatprep.mubr.msk.bf16.mxu0 %vm5503_vm14, %v9925_v15  ;;  %v7117_v45 = vsel %vm12235_vm10, %v7112_v12, %v7116_v38  ;;  %v7149_v4 = vrot.slane %v7147_v14, 4  ;;  %v7152_v58 = vrot.slane %v7150_v28, 5  ;;  %v7175_v1 = vshrl.u32 %v14568_v55, 16  ;;  %v7093_v30 = vld [vmem:[#allocation2 + $0x38] sm:$0x1] }
 0x3ed   : > { %10800 = vmatprep.subr.bf16.mxu0 %v11476_v62  ;;  %v7131_v43 = vsel %vm12235_vm10, %v7126_v17, %v7130_v53  ;;  %v7178_v18 = vshll.u32 %v14568_v55, 16  ;;  %v7163_v13 = vrot.slane %v7161_v59, 4  ;;  %v7166_v61 = vrot.slane %v7164_v51, 5  ;;  %v7099_v20 = vld [vmem:[#allocation2 + $0x5c] sm:$0x1] }
 0x3ee   : > { %v9939_v56 = vcombine.low %v7117_v45, %v7131_v43  ;;  %v7135_v41 = vrot.slane %v7133_v8, 4  ;;  %v7138_v0 = vrot.slane %v7136_v42, 5  ;;  %v7153_v37 = vor.u32 %v7152_v58, %v7149_v4  ;;  %v10087_v43 = vld [vmem:[%s14333_s8] ss:$0 sm:$0xff]  ;;  %v10088_v58 = vld [vmem:[%s14333_s8 + $0x1] ss:$0 sm:$0xff] }
 0x3ef   : > { %v7156_v48 = vshll.u32 %v7095_v24, 16  ;;  %v7177_v35 = vrot.slane %v7175_v1, 4  ;;  %v7180_v16 = vrot.slane %v7178_v18, 5  ;;  %v7192_v15 = vshll.u32 %v13604_v22, 16 }
 0x3f0   : > { %10801 = vmatpush3.bf16.msra.mxu0 %v11476_v62  ;;  %v7189_v62 = vshrl.u32 %v13604_v22, 16  ;;  %v7206_v10 = vshll.u32 %v7102_v27, 16  ;;  %v7167_v40 = vor.u32 %v7166_v61, %v7163_v13  ;;  %v7170_v29 = vshll.u32 %v7097_v19, 16 }
 0x3f1   : > { %10802 = vmatprep.subr.bf16.mxu0 %v11477_v49  ;;  %v7142_v3 = vshll.u32 %v7093_v30, 16  ;;  %v7154_v23 = vrot.slane %v7153_v37, 4  ;;  %v7158_v26 = vrot.slane %v7156_v48, 5  ;;  %v7181_v46 = vor.u32 %v7180_v16, %v7177_v35 }
 0x3f2   : > { %v7184_v50 = vshll.u32 %v7099_v20, 16  ;;  %v7191_v33 = vrot.slane %v7189_v62, 4  ;;  %v7194_v21 = vrot.slane %v7192_v15, 5  ;;  %v7208_v9 = vrot.slane %v7206_v10, 5 }
 0x3f3   : > { %v7168_v7 = vrot.slane %v7167_v40, 4  ;;  %v7172_v11 = vrot.slane %v7170_v29, 5  ;;  %v7144_v34 = vrot.slane %v7142_v3, 5  ;;  %v7182_v32 = vrot.slane %v7181_v46, 4 }
 0x3f4   : > { %10803 = vmatpush3.bf16.msra.mxu0 %v11477_v49  ;;  %v7203_v49 = vshrl.u32 %v7102_v27, 16  ;;  %v7159_v38 = vsel %vm12235_vm10, %v7154_v23, %v7158_v26  ;;  %v7195_v6 = vor.u32 %v7194_v21, %v7191_v33  ;;  %v9954_v33 = vld [vmem:[%s14331_s6 + $0x1] ss:$0 sm:$0xff] }
 0x3f5   : > { %10804 = vmatprep.subr.bf16.mxu0 %v11478_v31  ;;  %v7173_v17 = vsel %vm12235_vm10, %v7168_v7, %v7172_v11 }
 0x3f6   : > { %v7205_v22 = vrot.slane %v7203_v49, 4  ;;  %v7196_v51 = vrot.slane %v7195_v6, 4 }
 0x3f8   : > { %10805 = vmatpush3.bf16.msra.mxu0 %v11478_v31  ;;  %v7139_v31 = vor.u32 %v7138_v0, %v7135_v41  ;;  %v7209_v14 = vor.u32 %v7208_v9, %v7205_v22 }
 0x3f9   : > { %10814 = vmatprep.subr.bf16.mxu0 %v11479_v52 }
 0x3fb   : > { %10807 = vmatmul.mubr.msk.bf16.vlgmr.msra.gmra.mrb[8].mxu0 %vm5503_vm14, %v9926_v44  ;;  %v7103_v44 = vld [vmem:[#allocation2 + $0x74] sm:$0x1] }
 0x3fc   : > { %10810 = vmatprep.mubr.msk.bf16.mxu0 %vm5503_vm14, %v9927_v57  ;;  %10815 = vmatpush3.bf16.msra.mxu0 %v11479_v52  ;;  %v7101_v52 = vld [vmem:[#allocation2 + $0x68] sm:$0x1]  ;;  %v7186_v57 = vrot.slane %v7184_v50, 5  ;;  %v9953_v50 = vld [vmem:[%s14331_s6] ss:$0 sm:$0xff] }
 0x3fd   : > { %10816 = vmatprep.subr.bf16.mxu0 %v11480_v25  ;;  %v7198_v12 = vshll.u32 %v7101_v52, 16 }
 0x3fe   : > { %v7187_v45 = vsel %vm12235_vm10, %v7182_v32, %v7186_v57 }
 0x3ff   : > { %v7200_v5 = vrot.slane %v7198_v12, 5  ;;  %v9941_v59 = vcombine.low %v7173_v17, %v7187_v45 }
 0x400   : > { %10817 = vmatpush3.bf16.msra.mxu0 %v11480_v25  ;;  %v7140_v25 = vrot.slane %v7139_v31, 4 }
 0x401   : > { %10818 = vmatprep.subr.bf16.mxu0 %v11481_v63  ;;  %v7201_v8 = vsel %vm12235_vm10, %v7196_v51, %v7200_v5 }
 0x402   : > { %v7145_v53 = vsel %vm12235_vm10, %v7140_v25, %v7144_v34 }
 0x403   : > { %10811 = vmatmul.mubr.msk.bf16.gmra.mrb[12].mxu0 %vm5503_vm14, %v9928_v36  ;;  %v9940_v28 = vcombine.low %v7145_v53, %v7159_v38  ;;  %v7210_v36 = vrot.slane %v7209_v14, 4 }
 0x404   : > { %10819 = vmatpush3.bf16.msra.mxu0 %v11481_v63  ;;  %10826 = vmatprep.mubr.msk.bf16.mxu0 %vm5503_vm14, %v9939_v56  ;;  %v7212_v63 = vshll.u32 %v7103_v44, 16 }
 0x405   : > { %10820 = vmatprep.subr.bf16.mxu0 %v11482_v39 }
 0x406   : > { %v7214_v47 = vrot.slane %v7212_v63, 5 }
 0x408   : > { %10821 = vmatpush3.bf16.msra.mxu0 %v11482_v39  ;;  %v7215_v42 = vsel %vm12235_vm10, %v7210_v36, %v7214_v47 }
 0x409   : > { %10822 = vmatprep.subr.bf16.mxu0 %v11483_v2  ;;  %v9942_v4 = vcombine.low %v7201_v8, %v7215_v42 }
 0x40c   : > { %10823 = vmatpush3.bf16.msra.mxu0 %v11483_v2 }
 0x40d   : > { %10824 = vmatprep.subr.bf16.mxu0 %v11484_v54 }
 0x410   : > { %10825 = vmatpush3.bf16.msra.mxu0 %v11484_v54 }
 0x413   : > { %10827 = vmatmul.mubr.msk.bf16.vlgmr.msra.gmra.mrb[8].mxu0 %vm5503_vm14, %v9940_v28 }
 0x414   : > { %10830 = vmatprep.mubr.msk.bf16.mxu0 %vm5503_vm14, %v9941_v59 }
 0x41b   : > { %10831 = vmatmul.mubr.msk.bf16.gmra.mrb[12].mxu0 %vm5503_vm14, %v9942_v4 }
 0x4b3   : > { %v10972_v39 = vpop.f32.mrb[32].mxu1 }
 0x4b4   : > { %v9347_v55 = vmul.f32 %v10972_v39, %v10087_v43  ;;  %v9301_v1 = vpop.f32.mrb[33].mxu1 }
 0x4b5   : > { %v9345_v18 = vmul.f32 %v10087_v43, %v9301_v1  ;;  %v10973_v60 = vpop.f32.mrb[34].mxu1 }
 0x4b6   : > { %v9360_v56 = vadd.f32 %v10088_v58, %v9347_v55  ;;  %v9348_v24 = vmul.f32 %v10973_v60, %v10087_v43  ;;  %v9304_v13 = vpop.f32.mrb[35].mxu1 }
 0x4b7   : > { %v9358_v61 = vadd.f32 %v10088_v58, %v9345_v18  ;;  %v9346_v27 = vmul.f32 %v10087_v43, %v9304_v13 }
 0x4b8   : > { %v9368_v41 = vmax.f32 %v9360_v56, 0.0  ;;  %v9361_v0 = vadd.f32 %v10088_v58, %v9348_v24 }
 0x4b9   : > { %v9366_v19 = vmax.f32 %v9358_v61, 0.0  ;;  %v9359_v2 = vadd.f32 %v10088_v58, %v9346_v27 }
 0x4ba   : > { %9384 = vst [vmem:[%s12654_s23 + $0x48] sm:$0xff] %v9368_v41  ;;  %v9369_v30 = vmax.f32 %v9361_v0, 0.0 }
 0x4bb   : > { %9382 = vst [vmem:[%s12654_s23 + $0x8] sm:$0xff] %v9366_v19  ;;  %v9367_v37 = vmax.f32 %v9359_v2, 0.0  ;;  %v10976_v48 = vpop.f32.mrb[36].mxu1 }
 0x4bc   : > { %9385 = vst [vmem:[%s12654_s23 + $0x68] sm:$0xff] %v9369_v30  ;;  %v9351_v35 = vmul.f32 %v10976_v48, %v10087_v43  ;;  %v9317_v16 = vpop.f32.mrb[37].mxu1 }
 0x4bd   : > { %9383 = vst [vmem:[%s12654_s23 + $0x28] sm:$0xff] %v9367_v37  ;;  %v9349_v20 = vmul.f32 %v10087_v43, %v9317_v16  ;;  %v10977_v62 = vpop.f32.mrb[38].mxu1 }
 0x4be   : > { %v9364_v15 = vadd.f32 %v10088_v58, %v9351_v35  ;;  %v9352_v49 = vmul.f32 %v10977_v62, %v10087_v43  ;;  %v9320_v10 = vpop.f32.mrb[39].mxu1 }
 0x4bf   : > { %v9362_v40 = vadd.f32 %v10088_v58, %v9349_v20  ;;  %v9350_v29 = vmul.f32 %v10087_v43, %v9320_v10 }
 0x4c0   : > { %v9372_v31 = vmax.f32 %v9364_v15, 0.0  ;;  %v9365_v3 = vadd.f32 %v10088_v58, %v9352_v49 }
 0x4c1   : > { %v9370_v54 = vmax.f32 %v9362_v40, 0.0  ;;  %v9363_v23 = vadd.f32 %v10088_v58, %v9350_v29 }
 0x4c2   : > { %9388 = vst [vmem:[%s12654_s23 + $0xc8] sm:$0xff] %v9372_v31  ;;  %v9373_v26 = vmax.f32 %v9365_v3, 0.0 }
 0x4c3   : > { %9386 = vst [vmem:[%s12654_s23 + $0x88] sm:$0xff] %v9370_v54  ;;  %v9371_v46 = vmax.f32 %v9363_v23, 0.0 }
 0x4c4   : > { %9389 = vst [vmem:[%s12654_s23 + $0xe8] sm:$0xff] %v9373_v26 }
 0x4c5   : > { %9387 = vst [vmem:[%s12654_s23 + $0xa8] sm:$0xff] %v9371_v46 }
 0x4e6   : > { %v10828_v52 = vpop.f32.mrb[8].mxu0 }
 0x4e7   : > { %v7368_v21 = vmul.f32 %v10828_v52, %v9953_v50  ;;  %v7322_v22 = vpop.f32.mrb[9].mxu0 }
 0x4e8   : > { %v7366_v9 = vmul.f32 %v9953_v50, %v7322_v22  ;;  %v10829_v7 = vpop.f32.mrb[10].mxu0 }
 0x4e9   : > { %v7381_v11 = vadd.f32 %v9954_v33, %v7368_v21  ;;  %v7369_v44 = vmul.f32 %v10829_v7, %v9953_v50  ;;  %v7325_v25 = vpop.f32.mrb[11].mxu0 }
 0x4ea   : > { %v7379_v34 = vadd.f32 %v9954_v33, %v7366_v9  ;;  %v7367_v32 = vmul.f32 %v9953_v50, %v7325_v25 }
 0x4eb   : > { %v7389_v57 = vmax.f32 %v7381_v11, 0.0  ;;  %v7382_v12 = vadd.f32 %v9954_v33, %v7369_v44 }
 0x4ec   : > { %v7387_v38 = vmax.f32 %v7379_v34, 0.0  ;;  %v7380_v6 = vadd.f32 %v9954_v33, %v7367_v32 }
 0x4ed   : > { %9376 = vst [vmem:[%s12654_s23 + $0x40] sm:$0xff] %v7389_v57  ;;  %v7390_v14 = vmax.f32 %v7382_v12, 0.0 }
 0x4ee   : > { %9374 = vst [vmem:[%s12654_s23] sm:$0xff] %v7387_v38  ;;  %v7388_v63 = vmax.f32 %v7380_v6, 0.0  ;;  %v10832_v17 = vpop.f32.mrb[12].mxu0 }
 0x4ef   : > { %9377 = vst [vmem:[%s12654_s23 + $0x60] sm:$0xff] %v7390_v14  ;;  %v7372_v53 = vmul.f32 %v10832_v17, %v9953_v50  ;;  %v7338_v28 = vpop.f32.mrb[13].mxu0 }
 0x4f0   : > { %9375 = vst [vmem:[%s12654_s23 + $0x20] sm:$0xff] %v7388_v63  ;;  %v7370_v45 = vmul.f32 %v9953_v50, %v7338_v28  ;;  %v10833_v5 = vpop.f32.mrb[14].mxu0 }
 0x4f1   : > { %v7385_v59 = vadd.f32 %v9954_v33, %v7372_v53  ;;  %v7373_v51 = vmul.f32 %v10833_v5, %v9953_v50  ;;  %v7341_v36 = vpop.f32.mrb[15].mxu0 }
 0x4f2   : > { %v7383_v47 = vadd.f32 %v9954_v33, %v7370_v45  ;;  %v7371_v8 = vmul.f32 %v9953_v50, %v7341_v36 }
 0x4f3   : > { %v7393_v42 = vmax.f32 %v7385_v59, 0.0  ;;  %v7386_v4 = vadd.f32 %v9954_v33, %v7373_v51 }
 0x4f4   : > { %v7391_v43 = vmax.f32 %v7383_v47, 0.0  ;;  %v7384_v39 = vadd.f32 %v9954_v33, %v7371_v8 }
 0x4f5   : > { %9380 = vst [vmem:[%s12654_s23 + $0xc0] sm:$0xff] %v7393_v42  ;;  %v7394_v58 = vmax.f32 %v7386_v4, 0.0 }
 0x4f6   : > { %9378 = vst [vmem:[%s12654_s23 + $0x80] sm:$0xff] %v7391_v43  ;;  %v7392_v55 = vmax.f32 %v7384_v39, 0.0 }
 0x4f7   : > { %9381 = vst [vmem:[%s12654_s23 + $0xe0] sm:$0xff] %v7394_v58 }
 0x4f8   : > { %9379 = vst [vmem:[%s12654_s23 + $0xa0] sm:$0xff] %v7392_v55 }
 0x4f9   : > { %11555 = shalt.err (!%p11552_p11)
}
 0x4fa   : > { %s11556_s12 = scalar_lea.hbm %s14275_s25, 4096  ;;  %s11560_s13 = scalar_lea.hbm %s14336_s11, 8192 }
 0x4fb   : > { %p11557_p13 = scmp.ne.s32.totalorder %s14275_s25, %s11556_s12  ;;  %p11561_p6 = scmp.lt.u32.totalorder %s14275_s25, %s14336_s11 }
 0x4fc   : > { %p11562_p9 = scmp.lt.u32.totalorder %s11560_s13, %s11556_s12  ;;  %p11564_p12 = scmp.lt.u32.totalorder %s11556_s12, %s14275_s25 }
 0x4fd   : > { %p11558_p5 = pnand %p11557_p13, %p14569_p1 }
 0x4fe   : > { %p11563_p10 = por %p11562_p9, %p11561_p6 }
 0x4ff   : > { %p11559_p0 = pneg %p11558_p5 }
 0x500   : > { %p11565_p2 = por %p11564_p12, %p11563_p10 }
 0x502   : > { %p11566_p3 = pnand %p11565_p2, %p11559_p0 }
 0x504   : > { %11569 = shalt.err (!%p11566_p3)
}
 0x505   : > { %s11622_s22 = smov 512   ;;  %s11623_s26 = smov 32  }
 0x506   : > { %11242 = dma.vmem_to_hbm [thread:$0]  (%p14569_p1), %s14277_s19, 4096, %s14275_s25, %s14284_s21, %s11622_s22, %s11622_s22, %s11623_s26  }
 0x507 PF: > { %s14570_s24 = sld [smem:[#allocation12_spill]]  ;;  %s14571_s30 = sld [smem:[#allocation16_spill]] }
 0x508   : > { %p11259_p4 = scmp.ge.s32.totalorder %s11612_s20, 2 }
 0x50d   : > { %s9436_s14 = sand.u32 1, %s14570_s24   ;;  %p14572_p7 = scmp.ne.s32.totalorder %s14571_s30, 0 }
 0x50e   : > { %s9437_s17 = scalar_lea.sflag [#allocation5], %s9436_s14 }
 0x50f   : > { %p11252_p8 = pnand %p11259_p4, %p14572_p7 }
 0x511   : > { %11595 = dma.done.wait (!%p11252_p8), %s9437_s17, 4096  }
 0x512   : > { %11597 = vsyncadd (!%p11252_p8), %s9437_s17, 4294963200  ;;  %s14573_s20 = sld [smem:[#allocation14_spill]]  ;;  %s14574_s28 = sld [smem:[#allocation13_spill]] }
 0x513   : > { %s14575_s19 = sld [smem:[#allocation15_spill]]  ;;  %s14576_s17 = smov %s11604_s18 }
 0x518   : > { %p23_p11 = scmp.ge.s32.totalorder %s14573_s20, 4   ;;  %s14577_s18 = smov %s14574_s28 }
 0x51a   :  { %25 = sbr.rel (!%p23_p11) target bundleno = 5 (0x5), region = 112 }
 0x521   :  { %9442 = vsyncpa [#allocation4], 1 }
 0x522   :  { %9444 = vsyncpa [#allocation4 + $0x1], 1 }
 0x523   :  { %9445 = vsyncpa [#allocation7], 1 }
 0x524   :  { %9446 = vsyncpa [#allocation5], 1 }
 0x525   :  { %9448 = vsyncpa [#allocation5 + $0x1], 1 }

</bundles_post_ra>
